<compile_context>
chip_gen: v7x
topology: tpu7x:2x2x1
jax: 0.10.0
libtpu: 0.0.40
codegen_flags: <defaults>
</compile_context>

<pallas_src>
import functools
from math import sqrt

import jax
import jax.numpy as jnp
from jax import lax
from jax.experimental import pallas as pl
from jax.experimental.pallas import tpu as pltpu

LN_EPS = 1e-5   # nn.LayerNorm default
BN_EPS = 1e-5   # nn.BatchNorm2d default
BF16 = jnp.bfloat16
F32 = jnp.float32


# ----------------------------------------------------------------------------
# in-kernel helpers
# ----------------------------------------------------------------------------
def _layernorm(x, gamma, beta):
    mu = jnp.mean(x, axis=-1, keepdims=True)
    var = jnp.mean((x - mu) ** 2, axis=-1, keepdims=True)      # biased, like torch
    return (x - mu) * lax.rsqrt(var + LN_EPS) * gamma + beta


def _gelu_exact(x):
    # nn.GELU() default == exact erf GELU
    # TODO(synk): on v5e (weak VALU) tanh-approx GELU would move this to the EUP.
    return 0.5 * x * (1.0 + lax.erf(x / sqrt(2.0)))


# ----------------------------------------------------------------------------
# Pallas kernels
# ----------------------------------------------------------------------------
def transformer_kernel(x_ref, ln1g_ref, ln1b_ref, wq_ref, wk_ref, wv_ref,
                       wo_ref, bo_ref, ln2g_ref, ln2b_ref,
                       w1_ref, b1_ref, w2_ref, b2_ref, o_ref,
                       *, depth, heads, dim_head, batch, seq_len):
    """All `depth` layers: x = x + Attn(LN(x)); x = x + FF(LN(x)).
    Batch folded into the rows (x is (B*N, D)); attention done per (head,batch)
    block via 3-D batched einsums (no 16-lane head slices / concats)."""
    M = batch * seq_len
    D = x_ref.shape[-1]
    x = x_ref[...]                                        # (B*N, D) f32 residual
    # TODO(synk): for depth >~ 4 or ViT-scale D, make depth a grid axis
    # ("arbitrary") with per-layer weight BlockSpecs and explicit
    # vmem_limit_bytes (v7x has only 64 MiB VMEM) instead of this static unroll.
    for l in range(depth):
        # ---- PreNorm + multi-head self-attention ----
        h = _layernorm(x, ln1g_ref[l], ln1b_ref[l]).astype(BF16)
        hh = jnp.broadcast_to(h[None], (heads, M, D))            # (H, B*N, D)
        q = jnp.einsum('hmd,hdk->hmk', hh, wq_ref[l], preferred_element_type=F32)
        k = jnp.einsum('hmd,hdk->hmk', hh, wk_ref[l], preferred_element_type=F32)
        v = jnp.einsum('hmd,hdk->hmk', hh, wv_ref[l], preferred_element_type=F32)
        # (H, B*N, dh) -> (H*B, N, dh): per-(head,batch) attention blocks
        q3 = q.reshape(heads * batch, seq_len, dim_head).astype(BF16)
        k3 = k.reshape(heads * batch, seq_len, dim_head).astype(BF16)
        v3 = v.reshape(heads * batch, seq_len, dim_head).astype(BF16)
        dots = jnp.einsum('gnd,gmd->gnm', q3, k3, preferred_element_type=F32)
        mx = jnp.max(dots, axis=-1, keepdims=True)
        p = jnp.exp(dots - mx)
        attn = (p * pl.reciprocal(jnp.sum(p, axis=-1, keepdims=True),
                                  approx=True)).astype(BF16)
        outh = jnp.einsum('gnm,gmd->gnd', attn, v3, preferred_element_type=F32)
        # output projection with head-major wo: (heads, dh, D) -> sum over heads
        wo_g = jnp.broadcast_to(wo_ref[l][:, None], (heads, batch, dim_head, D))
        wo_g = wo_g.reshape(heads * batch, dim_head, D)
        projg = jnp.einsum('gnd,gdo->gno', outh.astype(BF16), wo_g,
                           preferred_element_type=F32)           # (H*B, N, D)
        proj = jnp.sum(projg.reshape(heads, M, D), axis=0)
        x = x + proj + bo_ref[l]

        # ---- PreNorm + FeedForward ----
        h2 = _layernorm(x, ln2g_ref[l], ln2b_ref[l]).astype(BF16)
        f = jnp.dot(h2, w1_ref[l], preferred_element_type=F32) + b1_ref[l]
        f = _gelu_exact(f).astype(BF16)
        x = x + jnp.dot(f, w2_ref[l], preferred_element_type=F32) + b2_ref[l]
    o_ref[...] = x


def deconv_fused_kernel(feat_ref, w1t_ref, s1_ref, t1_ref,
                        w2_ref, s2_ref, t2_ref, o_ref, *, H, W):
    """Channel-major fused decoder head over the full (C1, B*H*W) slab:
       Deconv1 (1x1 convT + BN + SiLU) -> to_img (3x3 s=2 convT + BN + SiLU).
       The 3x3/s2 transposed conv uses sub-pixel phase decomposition with a
       single fused (16, 4*C0) @ (4*C0, B*H*W) matmul."""
    total = feat_ref.shape[-1]
    HW = H * W
    # Deconv1: 1x1 ConvTranspose == channel matmul; lanes = spatial positions.
    y = jnp.dot(w1t_ref[...], feat_ref[...], preferred_element_type=F32)  # (C0, T)
    y = y * s1_ref[...] + t1_ref[...]
    y = y * jax.nn.sigmoid(y)                                             # SiLU (f32)

    # shifted neighbour copies (y[i,j+1], y[i+1,j], y[i+1,j+1]) via XLU lane
    # rolls, masked per image (mod H*W) so nothing leaks across batch boundaries.
    col = lax.broadcasted_iota(jnp.int32, (1, total), 1)
    has_right = (col % W) < (W - 1)
    has_down = (col % HW) < (H - 1) * W
    y_r = jnp.where(has_right, pltpu.roll(y, total - 1, 1), 0.0)
    y_d = jnp.where(has_down, pltpu.roll(y, total - W, 1), 0.0)
    y_rd = jnp.where(jnp.logical_and(has_right, has_down),
                     pltpu.roll(y, total - W - 1, 1), 0.0)

    # single fused sub-pixel phase matmul (output rows padded 12 -> 16).
    y_cat = jnp.concatenate([y, y_r, y_d, y_rd], axis=0).astype(BF16)     # (4*C0, T)
    o = jnp.dot(w2_ref[...], y_cat, preferred_element_type=F32)           # (16, T)
    o = o * s2_ref[...] + t2_ref[...]
    o_ref[...] = o * jax.nn.sigmoid(o)


# ----------------------------------------------------------------------------
# pallas_call wrappers
# ----------------------------------------------------------------------------
def transformer_fused(seq, p, depth, heads, dim_head):
    B, N, D = seq.shape
    x2 = seq.reshape(B * N, D)
    names = ("ln1_g", "ln1_b", "wq", "wk", "wv", "wo", "bo",
             "ln2_g", "ln2_b", "w1", "b1", "w2", "b2")
    args = [p[n] for n in names]

    def full(a):
        nd = a.ndim
        return pl.BlockSpec(a.shape, lambda i: (0,) * nd)

    kernel = functools.partial(transformer_kernel, depth=depth, heads=heads,
                               dim_head=dim_head, batch=B, seq_len=N)
    out = pl.pallas_call(
        kernel,
        out_shape=jax.ShapeDtypeStruct((B * N, D), jnp.float32),
        grid=(1,),   # TODO(synk): 2-way batch split only on v7x (2 TensorCores)
        in_specs=[pl.BlockSpec((B * N, D), lambda i: (0, 0))] + [full(a) for a in args],
        out_specs=pl.BlockSpec((B * N, D), lambda i: (0, 0)),
        compiler_params=pltpu.CompilerParams(dimension_semantics=("arbitrary",)),
    )(x2, *args)
    return out.reshape(B, N, D)


def deconv_fused(feat_cm, p, H, W):
    """feat_cm: (C1, B*H*W) channel-major bf16 -> (12, B*H*W) f32 phase output."""
    C1, total = feat_cm.shape
    args = [p["d1_wT"], p["d1_scale"], p["d1_shift"],
            p["ti_w"], p["ti_scale"], p["ti_shift"]]
    kernel = functools.partial(deconv_fused_kernel, H=H, W=W)
    out = pl.pallas_call(
        kernel,
        out_shape=jax.ShapeDtypeStruct((16, total), jnp.float32),
        grid=(1,),   # TODO(synk): split over batch on v7x so both TCs get work
        in_specs=[pl.BlockSpec((C1, total), lambda i: (0, 0))]
                 + [pl.BlockSpec(a.shape, lambda i: (0, 0)) for a in args],
        out_specs=pl.BlockSpec((16, total), lambda i: (0, 0)),
        compiler_params=pltpu.CompilerParams(dimension_semantics=("arbitrary",)),
    )(feat_cm, *args)
    return out[:12]


# ----------------------------------------------------------------------------
# parameter setup (BN folded, head-major transformer weights, fused phase matrix)
# ----------------------------------------------------------------------------
def bn_scale_shift(gamma, beta, mean, var):
    scale = gamma / jnp.sqrt(var + BN_EPS)
    shift = beta - mean * scale
    return scale, shift


def init_params(key, cfg):
    C0, C1 = cfg["channels"]
    ph, pw = cfg["patch_size"]
    D = ph * pw * C1                                  # patch_dim == transformer width
    heads, dim_head = cfg["heads"], cfg["dim_head"]
    ff = cfg["ff_dim"]
    depth = cfg["depth"]
    k = cfg["kernel_size"]
    assert k == 3, "to_img sub-pixel decomposition implemented for kernel_size=3"

    keys = iter(jax.random.split(key, 64))

    def rnd(shape, s=0.05):
        # round to bf16 once so kernel (bf16) and pure-JAX reference share values
        return (s * jax.random.normal(next(keys), shape)).astype(BF16).astype(F32)

    # ---- transformer, head-major layouts, stacked over depth ----
    p = dict(
        ln1_g=jnp.ones((depth, 1, D), F32),
        ln1_b=jnp.zeros((depth, 1, D), F32),
        # softmax scale folded into W_q (per-head weights (depth, heads, D, dh))
        wq=(rnd((depth, heads, D, dim_head)) * dim_head ** (-0.5)).astype(BF16),
        wk=rnd((depth, heads, D, dim_head)).astype(BF16),
        wv=rnd((depth, heads, D, dim_head)).astype(BF16),
        wo=rnd((depth, heads, dim_head, D)).astype(BF16),
        bo=rnd((depth, 1, D)),
        ln2_g=jnp.ones((depth, 1, D), F32),
        ln2_b=jnp.zeros((depth, 1, D), F32),
        w1=rnd((depth, D, ff)).astype(BF16),
        b1=rnd((depth, 1, ff)),
        w2=rnd((depth, ff, D)).astype(BF16),
        b2=rnd((depth, 1, D)),
    )

    # ---- Deconv1: ConvTranspose2d(C1, C0, 1, 1, 0, bias=False) + BN + SiLU ----
    w_t1 = rnd((C1, C0, 1, 1))                        # torch convT layout (Cin, Cout, 1, 1)
    g1 = 1.0 + rnd((C0,), 0.1)
    be1 = rnd((C0,), 0.1)
    d1_s, d1_t = bn_scale_shift(g1, be1, jnp.zeros((C0,)), jnp.ones((C0,)))
    p["d1_wT"] = w_t1[:, :, 0, 0].T.astype(BF16)      # (C0, C1) for channel-major matmul
    p["d1_scale"] = d1_s.reshape(C0, 1)
    p["d1_shift"] = d1_t.reshape(C0, 1)

    # ---- to_img: ConvTranspose2d(C0, 3, 3, 2, 1, output_padding=1) + BN + SiLU ----
    w_t2 = rnd((C0, 3, k, k))                         # torch convT layout (Cin, Cout, kh, kw)
    wt = lambda kh, kw: w_t2[:, :, kh, kw].T          # (3, C0) tap matrix
    z3 = jnp.zeros((3, C0), F32)
    # rows = 4 sub-pixel phases [ee, eo, oe, oo] x 3 RGB channels
    # cols = taps on [y | y(.,j+1) | y(i+1,.) | y(i+1,j+1)] x C0  (fused at init)
    blk_y  = jnp.concatenate([wt(1, 1), wt(1, 2), wt(2, 1), wt(2, 2)], 0)
    blk_r  = jnp.concatenate([z3,       wt(1, 0), z3,       wt(2, 0)], 0)
    blk_d  = jnp.concatenate([z3,       z3,       wt(0, 1), wt(0, 2)], 0)
    blk_rd = jnp.concatenate([z3,       z3,       z3,       wt(0, 0)], 0)
    ti_w12 = jnp.concatenate([blk_y, blk_r, blk_d, blk_rd], 1)        # (12, 4*C0)
    p["ti_w"] = jnp.zeros((16, 4 * C0), F32).at[:12].set(ti_w12).astype(BF16)
    g2 = 1.0 + rnd((3,), 0.1)
    be2 = rnd((3,), 0.1)
    ti_s, ti_t = bn_scale_shift(g2, be2, jnp.zeros((3,)), jnp.ones((3,)))
    p["ti_scale"] = jnp.ones((16, 1), F32).at[:12, 0].set(jnp.tile(ti_s, 4))
    p["ti_shift"] = jnp.zeros((16, 1), F32).at[:12, 0].set(jnp.tile(ti_t, 4))

    # raw copies for the pure-JAX reference (same bf16-rounded values)
    p["ti_w_raw"] = w_t2
    p["ti_bn_scale"] = ti_s
    p["ti_bn_shift"] = ti_t

    # pos_embedding exists in __init__ but is only used in the undefined part of
    # forward(); created for shape fidelity, unused below.
    ih = cfg["image_size"]
    num_patches = max(ih // (ph * 4), 1) * max(ih // (pw * 4), 1)
    p["pos_embedding"] = rnd((1, num_patches + 1, cfg["dim"]), 1.0)
    return p


# ----------------------------------------------------------------------------
# forward
# ----------------------------------------------------------------------------
def conv_base_decoder_forward(x, params, cfg):
    B, C1, H, W = x.shape
    ph, pw = cfg["patch_size"]
    heads, dim_head, depth = cfg["heads"], cfg["dim_head"], cfg["depth"]

    # to_patch_embedding: 'b d (h ph) (w pw) -> b (ph pw) (h w) d'; the (ph pw d)
    # axes are folded into the transformer feature dim (= patch_dim).
    h_, w_ = H // ph, W // pw
    t = x.reshape(B, C1, h_, ph, w_, pw).transpose(0, 2, 4, 3, 5, 1)   # b h w ph pw d
    seq = t.reshape(B, h_ * w_, ph * pw * C1)

    # TODO(synk): forward()'s conv1/mv2/mvit/conv2/fc/pool and cls_token/
    # pos_embedding/dropout/to_latent path uses attributes never defined in
    # Conv_base_decoder.__init__; that path is not faked here.

    seq = transformer_fused(seq, params, depth, heads, dim_head)

    # inverse patch rearrange straight to channel-major (C1, B*H*W) bf16 for the
    # fused deconv kernel — lanes = spatial positions, no NHWC<->NCHW hops.
    t = seq.astype(BF16).reshape(B, h_, w_, ph, pw, C1)
    feat_cm = t.transpose(5, 0, 1, 3, 2, 4).reshape(C1, B * H * W)

    out_cm = deconv_fused(feat_cm, params, H, W)          # (12, B*H*W) f32

    # interleave the 4 sub-pixel phases -> NCHW (B, 3, 2H, 2W)
    o = out_cm.reshape(2, 2, 3, B, H, W)                  # [pr, pc, c, b, i, j]
    img = o.transpose(3, 2, 4, 0, 5, 1).reshape(B, 3, 2 * H, 2 * W)
    return img


# ----------------------------------------------------------------------------
# pure-JAX f32 reference (no Pallas) — used for tolerance validation in __main__
# ----------------------------------------------------------------------------
def reference_forward(x, p, cfg):
    B, C1, H, W = x.shape
    ph, pw = cfg["patch_size"]
    depth = cfg["depth"]
    f32 = lambda a: a.astype(F32)

    h_, w_ = H // ph, W // pw
    t = x.reshape(B, C1, h_, ph, w_, pw).transpose(0, 2, 4, 3, 5, 1)
    xx = t.reshape(B, h_ * w_, ph * pw * C1)
    for l in range(depth):
        hn = _layernorm(xx, p["ln1_g"][l], p["ln1_b"][l])
        q = jnp.einsum('bnd,hdk->bhnk', hn, f32(p["wq"][l]))
        k = jnp.einsum('bnd,hdk->bhnk', hn, f32(p["wk"][l]))
        v = jnp.einsum('bnd,hdk->bhnk', hn, f32(p["wv"][l]))
        attn = jax.nn.softmax(jnp.einsum('bhnk,bhmk->bhnm', q, k), axis=-1)
        out = jnp.einsum('bhnm,bhmk->bhnk', attn, v)
        xx = xx + jnp.einsum('bhnk,hkd->bnd', out, f32(p["wo"][l])) + p["bo"][l]
        h2 = _layernorm(xx, p["ln2_g"][l], p["ln2_b"][l])
        f = jax.nn.gelu(jnp.einsum('bnd,df->bnf', h2, f32(p["w1"][l])) + p["b1"][l],
                        approximate=False)
        xx = xx + jnp.einsum('bnf,fd->bnd', f, f32(p["w2"][l])) + p["b2"][l]

    feat = xx.reshape(B, h_, w_, ph, pw, C1).transpose(0, 5, 1, 3, 2, 4).reshape(B, C1, H, W)

    # Deconv1 (1x1 convT + BN + SiLU)
    y = jnp.einsum('oi,bihw->bohw', f32(p["d1_wT"]), feat)
    y = y * p["d1_scale"].reshape(1, -1, 1, 1) + p["d1_shift"].reshape(1, -1, 1, 1)
    y = y * jax.nn.sigmoid(y)

    # to_img: ConvTranspose2d(C0,3,3,stride=2,pad=1,output_padding=1) via dilated conv
    w = p["ti_w_raw"]                                      # (C0, 3, 3, 3)
    w_flip = jnp.flip(w, axis=(2, 3)).transpose(1, 0, 2, 3)
    o = lax.conv_general_dilated(y, w_flip, window_strides=(1, 1),
                                 padding=((1, 2), (1, 2)), lhs_dilation=(2, 2),
                                 dimension_numbers=('NCHW', 'OIHW', 'NCHW'))
    o = o * p["ti_bn_scale"].reshape(1, 3, 1, 1) + p["ti_bn_shift"].reshape(1, 3, 1, 1)
    return o * jax.nn.sigmoid(o)


if __name__ == "__main__":
    cfg = dict(image_size=16, dim=64, channels=(8, 16), depth=2, heads=2,
               dim_head=16, ff_dim=32, kernel_size=3, patch_size=(2, 2))
    key = jax.random.PRNGKey(0)
    kx, kp = jax.random.split(key)

    B = 2
    C1 = cfg["channels"][1]
    H = W = cfg["image_size"]
    x = jax.random.normal(kx, (B, C1, H, W), jnp.float32)      # NCHW input

    params = init_params(kp, cfg)
    fwd = jax.jit(lambda xx, pp: conv_base_decoder_forward(xx, pp, cfg))
    out = jax.block_until_ready(fwd(x, params))
    assert out.shape == (B, 3, 2 * H, 2 * W), out.shape
    assert bool(jnp.all(jnp.isfinite(out)))

    # tolerance check vs pure-JAX f32 reference (validates attention math, BN
    # fold and the 3x3/s2 sub-pixel transposed-conv decomposition).
    ref = reference_forward(x, params, cfg)
    err = float(jnp.max(jnp.abs(out - ref.astype(jnp.float32))))
    assert err < 5e-2, f"max abs error vs reference: {err}"
    print("KERNEL_OK")
</pallas_src>

<mosaic_0001>
module attributes {stable_mosaic.version = 11 : i64} {
  func.func @transformer_kernel(%arg0: i32, %arg1: memref<128x64xf32, #tpu.memory_space<vmem>>, %arg2: memref<2x1x64xf32, #tpu.memory_space<vmem>>, %arg3: memref<2x1x64xf32, #tpu.memory_space<vmem>>, %arg4: memref<2x2x64x16xbf16, #tpu.memory_space<vmem>>, %arg5: memref<2x2x64x16xbf16, #tpu.memory_space<vmem>>, %arg6: memref<2x2x64x16xbf16, #tpu.memory_space<vmem>>, %arg7: memref<2x2x16x64xbf16, #tpu.memory_space<vmem>>, %arg8: memref<2x1x64xf32, #tpu.memory_space<vmem>>, %arg9: memref<2x1x64xf32, #tpu.memory_space<vmem>>, %arg10: memref<2x1x64xf32, #tpu.memory_space<vmem>>, %arg11: memref<2x64x32xbf16, #tpu.memory_space<vmem>>, %arg12: memref<2x1x32xf32, #tpu.memory_space<vmem>>, %arg13: memref<2x32x64xbf16, #tpu.memory_space<vmem>>, %arg14: memref<2x1x64xf32, #tpu.memory_space<vmem>>, %arg15: memref<128x64xf32, #tpu.memory_space<vmem>>) attributes {dimension_semantics = [#tpu.dimension_semantics<arbitrary>], iteration_bounds = array<i64: 1>, scalar_prefetch = 0 : i64, scratch_operands = 0 : i64, tpu.core_type = #tpu.core_type<tc>, window_params = [{pipeline_mode = #tpu.pipeline_mode<synchronous>, transform_indices = @transform_0, window_bounds = array<i64: 128, 64>}, {pipeline_mode = #tpu.pipeline_mode<synchronous>, transform_indices = @transform_1, window_bounds = array<i64: 2, 1, 64>}, {pipeline_mode = #tpu.pipeline_mode<synchronous>, transform_indices = @transform_2, window_bounds = array<i64: 2, 1, 64>}, {pipeline_mode = #tpu.pipeline_mode<synchronous>, transform_indices = @transform_3, window_bounds = array<i64: 2, 2, 64, 16>}, {pipeline_mode = #tpu.pipeline_mode<synchronous>, transform_indices = @transform_4, window_bounds = array<i64: 2, 2, 64, 16>}, {pipeline_mode = #tpu.pipeline_mode<synchronous>, transform_indices = @transform_5, window_bounds = array<i64: 2, 2, 64, 16>}, {pipeline_mode = #tpu.pipeline_mode<synchronous>, transform_indices = @transform_6, window_bounds = array<i64: 2, 2, 16, 64>}, {pipeline_mode = #tpu.pipeline_mode<synchronous>, transform_indices = @transform_7, window_bounds = array<i64: 2, 1, 64>}, {pipeline_mode = #tpu.pipeline_mode<synchronous>, transform_indices = @transform_8, window_bounds = array<i64: 2, 1, 64>}, {pipeline_mode = #tpu.pipeline_mode<synchronous>, transform_indices = @transform_9, window_bounds = array<i64: 2, 1, 64>}, {pipeline_mode = #tpu.pipeline_mode<synchronous>, transform_indices = @transform_10, window_bounds = array<i64: 2, 64, 32>}, {pipeline_mode = #tpu.pipeline_mode<synchronous>, transform_indices = @transform_11, window_bounds = array<i64: 2, 1, 32>}, {pipeline_mode = #tpu.pipeline_mode<synchronous>, transform_indices = @transform_12, window_bounds = array<i64: 2, 32, 64>}, {pipeline_mode = #tpu.pipeline_mode<synchronous>, transform_indices = @transform_13, window_bounds = array<i64: 2, 1, 64>}, {pipeline_mode = #tpu.pipeline_mode<synchronous>, transform_indices = @transform_14, window_bounds = array<i64: 128, 64>}]} {
    %c0 = arith.constant 0 : index
    %c0_0 = arith.constant 0 : index
    %0 = vector.load %arg1[%c0, %c0_0] : memref<128x64xf32, #tpu.memory_space<vmem>>, vector<128x64xf32>
    %c0_1 = arith.constant 0 : index
    %c0_2 = arith.constant 0 : index
    %c0_3 = arith.constant 0 : index
    %1 = vector.load %arg2[%c0_1, %c0_2, %c0_3] : memref<2x1x64xf32, #tpu.memory_space<vmem>>, vector<1x1x64xf32>
    %2 = vector.shape_cast %1 : vector<1x1x64xf32> to vector<1x64xf32>
    %c0_4 = arith.constant 0 : index
    %c0_5 = arith.constant 0 : index
    %c0_6 = arith.constant 0 : index
    %3 = vector.load %arg3[%c0_4, %c0_5, %c0_6] : memref<2x1x64xf32, #tpu.memory_space<vmem>>, vector<1x1x64xf32>
    %4 = vector.shape_cast %3 : vector<1x1x64xf32> to vector<1x64xf32>
    %cst = arith.constant dense<0.000000e+00> : vector<128xf32>
    %5 = vector.multi_reduction <add>, %0, %cst [1] : vector<128x64xf32> to vector<128xf32>
    %6 = vector.shape_cast %5 : vector<128xf32> to vector<128x1xf32>
    %cst_7 = arith.constant 6.400000e+01 : f32
    %7 = vector.broadcast %cst_7 : f32 to vector<128x1xf32>
    %8 = arith.divf %6, %7 : vector<128x1xf32>
    %9 = vector.broadcast %8 : vector<128x1xf32> to vector<128x64xf32>
    %10 = arith.subf %0, %9 : vector<128x64xf32>
    %11 = arith.mulf %10, %10 : vector<128x64xf32>
    %cst_8 = arith.constant dense<0.000000e+00> : vector<128xf32>
    %12 = vector.multi_reduction <add>, %11, %cst_8 [1] : vector<128x64xf32> to vector<128xf32>
    %13 = vector.shape_cast %12 : vector<128xf32> to vector<128x1xf32>
    %cst_9 = arith.constant 6.400000e+01 : f32
    %14 = vector.broadcast %cst_9 : f32 to vector<128x1xf32>
    %15 = arith.divf %13, %14 : vector<128x1xf32>
    %16 = vector.broadcast %8 : vector<128x1xf32> to vector<128x64xf32>
    %17 = arith.subf %0, %16 : vector<128x64xf32>
    %cst_10 = arith.constant 9.99999974E-6 : f32
    %18 = vector.broadcast %cst_10 : f32 to vector<128x1xf32>
    %19 = arith.addf %15, %18 : vector<128x1xf32>
    %20 = math.rsqrt %19 : vector<128x1xf32>
    %21 = vector.broadcast %20 : vector<128x1xf32> to vector<128x64xf32>
    %22 = arith.mulf %17, %21 : vector<128x64xf32>
    %23 = vector.broadcast %2 : vector<1x64xf32> to vector<128x64xf32>
    %24 = arith.mulf %22, %23 : vector<128x64xf32>
    %25 = vector.broadcast %4 : vector<1x64xf32> to vector<128x64xf32>
    %26 = arith.addf %24, %25 : vector<128x64xf32>
    %27 = arith.truncf %26 : vector<128x64xf32> to vector<128x64xbf16>
    %28 = vector.shape_cast %27 : vector<128x64xbf16> to vector<1x128x64xbf16>
    %29 = vector.shape_cast %28 : vector<1x128x64xbf16> to vector<1x128x64xbf16>
    %30 = vector.broadcast %29 : vector<1x128x64xbf16> to vector<2x128x64xbf16>
    %c0_11 = arith.constant 0 : index
    %c0_12 = arith.constant 0 : index
    %c0_13 = arith.constant 0 : index
    %c0_14 = arith.constant 0 : index
    %31 = vector.load %arg4[%c0_11, %c0_12, %c0_13, %c0_14] : memref<2x2x64x16xbf16, #tpu.memory_space<vmem>>, vector<1x2x64x16xbf16>
    %32 = vector.shape_cast %31 : vector<1x2x64x16xbf16> to vector<2x64x16xbf16>
    "tpu.trace_start"() <{level = 10 : i32, message = "hmd,hdk->hmk"}> : () -> ()
    %cst_15 = arith.constant dense<0.000000e+00> : vector<2x128x16xf32>
    %33 = tpu.matmul %30, %32, %cst_15 {dimension_numbers = #tpu.dot_dimension_numbers<[2], [1], [1], [2], [0, 0, 0, 1, 1, 2], [0], [0]>} : vector<2x128x64xbf16>, vector<2x64x16xbf16>, vector<2x128x16xf32> -> vector<2x128x16xf32>
    "tpu.trace_stop"() : () -> ()
    %c0_16 = arith.constant 0 : index
    %c0_17 = arith.constant 0 : index
    %c0_18 = arith.constant 0 : index
    %c0_19 = arith.constant 0 : index
    %34 = vector.load %arg5[%c0_16, %c0_17, %c0_18, %c0_19] : memref<2x2x64x16xbf16, #tpu.memory_space<vmem>>, vector<1x2x64x16xbf16>
    %35 = vector.shape_cast %34 : vector<1x2x64x16xbf16> to vector<2x64x16xbf16>
    "tpu.trace_start"() <{level = 10 : i32, message = "hmd,hdk->hmk"}> : () -> ()
    %cst_20 = arith.constant dense<0.000000e+00> : vector<2x128x16xf32>
    %36 = tpu.matmul %30, %35, %cst_20 {dimension_numbers = #tpu.dot_dimension_numbers<[2], [1], [1], [2], [0, 0, 0, 1, 1, 2], [0], [0]>} : vector<2x128x64xbf16>, vector<2x64x16xbf16>, vector<2x128x16xf32> -> vector<2x128x16xf32>
    "tpu.trace_stop"() : () -> ()
    %c0_21 = arith.constant 0 : index
    %c0_22 = arith.constant 0 : index
    %c0_23 = arith.constant 0 : index
    %c0_24 = arith.constant 0 : index
    %37 = vector.load %arg6[%c0_21, %c0_22, %c0_23, %c0_24] : memref<2x2x64x16xbf16, #tpu.memory_space<vmem>>, vector<1x2x64x16xbf16>
    %38 = vector.shape_cast %37 : vector<1x2x64x16xbf16> to vector<2x64x16xbf16>
    "tpu.trace_start"() <{level = 10 : i32, message = "hmd,hdk->hmk"}> : () -> ()
    %cst_25 = arith.constant dense<0.000000e+00> : vector<2x128x16xf32>
    %39 = tpu.matmul %30, %38, %cst_25 {dimension_numbers = #tpu.dot_dimension_numbers<[2], [1], [1], [2], [0, 0, 0, 1, 1, 2], [0], [0]>} : vector<2x128x64xbf16>, vector<2x64x16xbf16>, vector<2x128x16xf32> -> vector<2x128x16xf32>
    "tpu.trace_stop"() : () -> ()
    %40 = vector.shape_cast %33 : vector<2x128x16xf32> to vector<4x64x16xf32>
    %41 = arith.truncf %40 : vector<4x64x16xf32> to vector<4x64x16xbf16>
    %42 = vector.shape_cast %36 : vector<2x128x16xf32> to vector<4x64x16xf32>
    %43 = arith.truncf %42 : vector<4x64x16xf32> to vector<4x64x16xbf16>
    %44 = vector.shape_cast %39 : vector<2x128x16xf32> to vector<4x64x16xf32>
    %45 = arith.truncf %44 : vector<4x64x16xf32> to vector<4x64x16xbf16>
    "tpu.trace_start"() <{level = 10 : i32, message = "gnd,gmd->gnm"}> : () -> ()
    %cst_26 = arith.constant dense<0.000000e+00> : vector<4x64x64xf32>
    %46 = tpu.matmul %41, %43, %cst_26 {dimension_numbers = #tpu.dot_dimension_numbers<[2], [2], [1], [1], [0, 0, 0, 1, 1, 1], [0], [0]>} : vector<4x64x16xbf16>, vector<4x64x16xbf16>, vector<4x64x64xf32> -> vector<4x64x64xf32>
    "tpu.trace_stop"() : () -> ()
    %cst_27 = arith.constant dense<0xFF800000> : vector<4x64xf32>
    %47 = vector.multi_reduction <maximumf>, %46, %cst_27 [2] : vector<4x64x64xf32> to vector<4x64xf32>
    %48 = vector.shape_cast %47 : vector<4x64xf32> to vector<4x64x1xf32>
    %49 = vector.broadcast %48 : vector<4x64x1xf32> to vector<4x64x64xf32>
    %50 = arith.subf %46, %49 : vector<4x64x64xf32>
    %51 = math.exp %50 : vector<4x64x64xf32>
    %cst_28 = arith.constant dense<0.000000e+00> : vector<4x64xf32>
    %52 = vector.multi_reduction <add>, %51, %cst_28 [2] : vector<4x64x64xf32> to vector<4x64xf32>
    %53 = vector.shape_cast %52 : vector<4x64xf32> to vector<4x64x1xf32>
    %54 = tpu.reciprocal %53 {approx = true} : vector<4x64x1xf32> -> vector<4x64x1xf32>
    %55 = vector.broadcast %54 : vector<4x64x1xf32> to vector<4x64x64xf32>
    %56 = arith.mulf %51, %55 : vector<4x64x64xf32>
    %57 = arith.truncf %56 : vector<4x64x64xf32> to vector<4x64x64xbf16>
    "tpu.trace_start"() <{level = 10 : i32, message = "gnm,gmd->gnd"}> : () -> ()
    %cst_29 = arith.constant dense<0.000000e+00> : vector<4x64x16xf32>
    %58 = tpu.matmul %57, %45, %cst_29 {dimension_numbers = #tpu.dot_dimension_numbers<[2], [1], [1], [2], [0, 0, 0, 1, 1, 2], [0], [0]>} : vector<4x64x64xbf16>, vector<4x64x16xbf16>, vector<4x64x16xf32> -> vector<4x64x16xf32>
    "tpu.trace_stop"() : () -> ()
    %c0_30 = arith.constant 0 : index
    %c0_31 = arith.constant 0 : index
    %c0_32 = arith.constant 0 : index
    %c0_33 = arith.constant 0 : index
    %59 = vector.load %arg7[%c0_30, %c0_31, %c0_32, %c0_33] : memref<2x2x16x64xbf16, #tpu.memory_space<vmem>>, vector<1x2x16x64xbf16>
    %60 = vector.shape_cast %59 : vector<1x2x16x64xbf16> to vector<2x16x64xbf16>
    %61 = vector.shape_cast %60 : vector<2x16x64xbf16> to vector<2x1x16x64xbf16>
    %62 = vector.shape_cast %61 : vector<2x1x16x64xbf16> to vector<2x1x16x64xbf16>
    %63 = vector.broadcast %62 : vector<2x1x16x64xbf16> to vector<2x2x16x64xbf16>
    %64 = vector.shape_cast %63 : vector<2x2x16x64xbf16> to vector<4x16x64xbf16>
    %65 = arith.truncf %58 : vector<4x64x16xf32> to vector<4x64x16xbf16>
    "tpu.trace_start"() <{level = 10 : i32, message = "gnd,gdo->gno"}> : () -> ()
    %cst_34 = arith.constant dense<0.000000e+00> : vector<4x64x64xf32>
    %66 = tpu.matmul %65, %64, %cst_34 {dimension_numbers = #tpu.dot_dimension_numbers<[2], [1], [1], [2], [0, 0, 0, 1, 1, 2], [0], [0]>} : vector<4x64x16xbf16>, vector<4x16x64xbf16>, vector<4x64x64xf32> -> vector<4x64x64xf32>
    "tpu.trace_stop"() : () -> ()
    %67 = vector.shape_cast %66 : vector<4x64x64xf32> to vector<2x128x64xf32>
    %cst_35 = arith.constant dense<0.000000e+00> : vector<128x64xf32>
    %68 = vector.multi_reduction <add>, %67, %cst_35 [0] : vector<2x128x64xf32> to vector<128x64xf32>
    %69 = arith.addf %0, %68 : vector<128x64xf32>
    %c0_36 = arith.constant 0 : index
    %c0_37 = arith.constant 0 : index
    %c0_38 = arith.constant 0 : index
    %70 = vector.load %arg8[%c0_36, %c0_37, %c0_38] : memref<2x1x64xf32, #tpu.memory_space<vmem>>, vector<1x1x64xf32>
    %71 = vector.shape_cast %70 : vector<1x1x64xf32> to vector<1x64xf32>
    %72 = vector.broadcast %71 : vector<1x64xf32> to vector<128x64xf32>
    %73 = arith.addf %69, %72 : vector<128x64xf32>
    %c0_39 = arith.constant 0 : index
    %c0_40 = arith.constant 0 : index
    %c0_41 = arith.constant 0 : index
    %74 = vector.load %arg9[%c0_39, %c0_40, %c0_41] : memref<2x1x64xf32, #tpu.memory_space<vmem>>, vector<1x1x64xf32>
    %75 = vector.shape_cast %74 : vector<1x1x64xf32> to vector<1x64xf32>
    %c0_42 = arith.constant 0 : index
    %c0_43 = arith.constant 0 : index
    %c0_44 = arith.constant 0 : index
    %76 = vector.load %arg10[%c0_42, %c0_43, %c0_44] : memref<2x1x64xf32, #tpu.memory_space<vmem>>, vector<1x1x64xf32>
    %77 = vector.shape_cast %76 : vector<1x1x64xf32> to vector<1x64xf32>
    %cst_45 = arith.constant dense<0.000000e+00> : vector<128xf32>
    %78 = vector.multi_reduction <add>, %73, %cst_45 [1] : vector<128x64xf32> to vector<128xf32>
    %79 = vector.shape_cast %78 : vector<128xf32> to vector<128x1xf32>
    %cst_46 = arith.constant 6.400000e+01 : f32
    %80 = vector.broadcast %cst_46 : f32 to vector<128x1xf32>
    %81 = arith.divf %79, %80 : vector<128x1xf32>
    %82 = vector.broadcast %81 : vector<128x1xf32> to vector<128x64xf32>
    %83 = arith.subf %73, %82 : vector<128x64xf32>
    %84 = arith.mulf %83, %83 : vector<128x64xf32>
    %cst_47 = arith.constant dense<0.000000e+00> : vector<128xf32>
    %85 = vector.multi_reduction <add>, %84, %cst_47 [1] : vector<128x64xf32> to vector<128xf32>
    %86 = vector.shape_cast %85 : vector<128xf32> to vector<128x1xf32>
    %cst_48 = arith.constant 6.400000e+01 : f32
    %87 = vector.broadcast %cst_48 : f32 to vector<128x1xf32>
    %88 = arith.divf %86, %87 : vector<128x1xf32>
    %89 = vector.broadcast %81 : vector<128x1xf32> to vector<128x64xf32>
    %90 = arith.subf %73, %89 : vector<128x64xf32>
    %cst_49 = arith.constant 9.99999974E-6 : f32
    %91 = vector.broadcast %cst_49 : f32 to vector<128x1xf32>
    %92 = arith.addf %88, %91 : vector<128x1xf32>
    %93 = math.rsqrt %92 : vector<128x1xf32>
    %94 = vector.broadcast %93 : vector<128x1xf32> to vector<128x64xf32>
    %95 = arith.mulf %90, %94 : vector<128x64xf32>
    %96 = vector.broadcast %75 : vector<1x64xf32> to vector<128x64xf32>
    %97 = arith.mulf %95, %96 : vector<128x64xf32>
    %98 = vector.broadcast %77 : vector<1x64xf32> to vector<128x64xf32>
    %99 = arith.addf %97, %98 : vector<128x64xf32>
    %100 = arith.truncf %99 : vector<128x64xf32> to vector<128x64xbf16>
    %c0_50 = arith.constant 0 : index
    %c0_51 = arith.constant 0 : index
    %c0_52 = arith.constant 0 : index
    %101 = vector.load %arg11[%c0_50, %c0_51, %c0_52] : memref<2x64x32xbf16, #tpu.memory_space<vmem>>, vector<1x64x32xbf16>
    %102 = vector.shape_cast %101 : vector<1x64x32xbf16> to vector<64x32xbf16>
    %cst_53 = arith.constant dense<0.000000e+00> : vector<128x32xf32>
    %103 = tpu.matmul %100, %102, %cst_53 {dimension_numbers = #tpu.dot_dimension_numbers<[1], [0], [0], [1], [0, 0, 1, 1], [], []>} : vector<128x64xbf16>, vector<64x32xbf16>, vector<128x32xf32> -> vector<128x32xf32>
    %c0_54 = arith.constant 0 : index
    %c0_55 = arith.constant 0 : index
    %c0_56 = arith.constant 0 : index
    %104 = vector.load %arg12[%c0_54, %c0_55, %c0_56] : memref<2x1x32xf32, #tpu.memory_space<vmem>>, vector<1x1x32xf32>
    %105 = vector.shape_cast %104 : vector<1x1x32xf32> to vector<1x32xf32>
    %106 = vector.broadcast %105 : vector<1x32xf32> to vector<128x32xf32>
    %107 = arith.addf %103, %106 : vector<128x32xf32>
    %cst_57 = arith.constant 5.000000e-01 : f32
    %108 = vector.broadcast %cst_57 : f32 to vector<128x32xf32>
    %109 = arith.mulf %108, %107 : vector<128x32xf32>
    %cst_58 = arith.constant 1.41421354 : f32
    %110 = vector.broadcast %cst_58 : f32 to vector<128x32xf32>
    %111 = arith.divf %107, %110 : vector<128x32xf32>
    %112 = math.erf %111 : vector<128x32xf32>
    %cst_59 = arith.constant 1.000000e+00 : f32
    %113 = vector.broadcast %cst_59 : f32 to vector<128x32xf32>
    %114 = arith.addf %113, %112 : vector<128x32xf32>
    %115 = arith.mulf %109, %114 : vector<128x32xf32>
    %116 = arith.truncf %115 : vector<128x32xf32> to vector<128x32xbf16>
    %c0_60 = arith.constant 0 : index
    %c0_61 = arith.constant 0 : index
    %c0_62 = arith.constant 0 : index
    %117 = vector.load %arg13[%c0_60, %c0_61, %c0_62] : memref<2x32x64xbf16, #tpu.memory_space<vmem>>, vector<1x32x64xbf16>
    %118 = vector.shape_cast %117 : vector<1x32x64xbf16> to vector<32x64xbf16>
    %cst_63 = arith.constant dense<0.000000e+00> : vector<128x64xf32>
    %119 = tpu.matmul %116, %118, %cst_63 {dimension_numbers = #tpu.dot_dimension_numbers<[1], [0], [0], [1], [0, 0, 1, 1], [], []>} : vector<128x32xbf16>, vector<32x64xbf16>, vector<128x64xf32> -> vector<128x64xf32>
    %120 = arith.addf %73, %119 : vector<128x64xf32>
    %c0_64 = arith.constant 0 : index
    %c0_65 = arith.constant 0 : index
    %c0_66 = arith.constant 0 : index
    %121 = vector.load %arg14[%c0_64, %c0_65, %c0_66] : memref<2x1x64xf32, #tpu.memory_space<vmem>>, vector<1x1x64xf32>
    %122 = vector.shape_cast %121 : vector<1x1x64xf32> to vector<1x64xf32>
    %123 = vector.broadcast %122 : vector<1x64xf32> to vector<128x64xf32>
    %124 = arith.addf %120, %123 : vector<128x64xf32>
    %c1 = arith.constant 1 : index
    %c0_67 = arith.constant 0 : index
    %c0_68 = arith.constant 0 : index
    %125 = vector.load %arg2[%c1, %c0_67, %c0_68] : memref<2x1x64xf32, #tpu.memory_space<vmem>>, vector<1x1x64xf32>
    %126 = vector.shape_cast %125 : vector<1x1x64xf32> to vector<1x64xf32>
    %c1_69 = arith.constant 1 : index
    %c0_70 = arith.constant 0 : index
    %c0_71 = arith.constant 0 : index
    %127 = vector.load %arg3[%c1_69, %c0_70, %c0_71] : memref<2x1x64xf32, #tpu.memory_space<vmem>>, vector<1x1x64xf32>
    %128 = vector.shape_cast %127 : vector<1x1x64xf32> to vector<1x64xf32>
    %cst_72 = arith.constant dense<0.000000e+00> : vector<128xf32>
    %129 = vector.multi_reduction <add>, %124, %cst_72 [1] : vector<128x64xf32> to vector<128xf32>
    %130 = vector.shape_cast %129 : vector<128xf32> to vector<128x1xf32>
    %cst_73 = arith.constant 6.400000e+01 : f32
    %131 = vector.broadcast %cst_73 : f32 to vector<128x1xf32>
    %132 = arith.divf %130, %131 : vector<128x1xf32>
    %133 = vector.broadcast %132 : vector<128x1xf32> to vector<128x64xf32>
    %134 = arith.subf %124, %133 : vector<128x64xf32>
    %135 = arith.mulf %134, %134 : vector<128x64xf32>
    %cst_74 = arith.constant dense<0.000000e+00> : vector<128xf32>
    %136 = vector.multi_reduction <add>, %135, %cst_74 [1] : vector<128x64xf32> to vector<128xf32>
    %137 = vector.shape_cast %136 : vector<128xf32> to vector<128x1xf32>
    %cst_75 = arith.constant 6.400000e+01 : f32
    %138 = vector.broadcast %cst_75 : f32 to vector<128x1xf32>
    %139 = arith.divf %137, %138 : vector<128x1xf32>
    %140 = vector.broadcast %132 : vector<128x1xf32> to vector<128x64xf32>
    %141 = arith.subf %124, %140 : vector<128x64xf32>
    %cst_76 = arith.constant 9.99999974E-6 : f32
    %142 = vector.broadcast %cst_76 : f32 to vector<128x1xf32>
    %143 = arith.addf %139, %142 : vector<128x1xf32>
    %144 = math.rsqrt %143 : vector<128x1xf32>
    %145 = vector.broadcast %144 : vector<128x1xf32> to vector<128x64xf32>
    %146 = arith.mulf %141, %145 : vector<128x64xf32>
    %147 = vector.broadcast %126 : vector<1x64xf32> to vector<128x64xf32>
    %148 = arith.mulf %146, %147 : vector<128x64xf32>
    %149 = vector.broadcast %128 : vector<1x64xf32> to vector<128x64xf32>
    %150 = arith.addf %148, %149 : vector<128x64xf32>
    %151 = arith.truncf %150 : vector<128x64xf32> to vector<128x64xbf16>
    %152 = vector.shape_cast %151 : vector<128x64xbf16> to vector<1x128x64xbf16>
    %153 = vector.shape_cast %152 : vector<1x128x64xbf16> to vector<1x128x64xbf16>
    %154 = vector.broadcast %153 : vector<1x128x64xbf16> to vector<2x128x64xbf16>
    %c1_77 = arith.constant 1 : index
    %c0_78 = arith.constant 0 : index
    %c0_79 = arith.constant 0 : index
    %c0_80 = arith.constant 0 : index
    %155 = vector.load %arg4[%c1_77, %c0_78, %c0_79, %c0_80] : memref<2x2x64x16xbf16, #tpu.memory_space<vmem>>, vector<1x2x64x16xbf16>
    %156 = vector.shape_cast %155 : vector<1x2x64x16xbf16> to vector<2x64x16xbf16>
    "tpu.trace_start"() <{level = 10 : i32, message = "hmd,hdk->hmk"}> : () -> ()
    %cst_81 = arith.constant dense<0.000000e+00> : vector<2x128x16xf32>
    %157 = tpu.matmul %154, %156, %cst_81 {dimension_numbers = #tpu.dot_dimension_numbers<[2], [1], [1], [2], [0, 0, 0, 1, 1, 2], [0], [0]>} : vector<2x128x64xbf16>, vector<2x64x16xbf16>, vector<2x128x16xf32> -> vector<2x128x16xf32>
    "tpu.trace_stop"() : () -> ()
    %c1_82 = arith.constant 1 : index
    %c0_83 = arith.constant 0 : index
    %c0_84 = arith.constant 0 : index
    %c0_85 = arith.constant 0 : index
    %158 = vector.load %arg5[%c1_82, %c0_83, %c0_84, %c0_85] : memref<2x2x64x16xbf16, #tpu.memory_space<vmem>>, vector<1x2x64x16xbf16>
    %159 = vector.shape_cast %158 : vector<1x2x64x16xbf16> to vector<2x64x16xbf16>
    "tpu.trace_start"() <{level = 10 : i32, message = "hmd,hdk->hmk"}> : () -> ()
    %cst_86 = arith.constant dense<0.000000e+00> : vector<2x128x16xf32>
    %160 = tpu.matmul %154, %159, %cst_86 {dimension_numbers = #tpu.dot_dimension_numbers<[2], [1], [1], [2], [0, 0, 0, 1, 1, 2], [0], [0]>} : vector<2x128x64xbf16>, vector<2x64x16xbf16>, vector<2x128x16xf32> -> vector<2x128x16xf32>
    "tpu.trace_stop"() : () -> ()
    %c1_87 = arith.constant 1 : index
    %c0_88 = arith.constant 0 : index
    %c0_89 = arith.constant 0 : index
    %c0_90 = arith.constant 0 : index
    %161 = vector.load %arg6[%c1_87, %c0_88, %c0_89, %c0_90] : memref<2x2x64x16xbf16, #tpu.memory_space<vmem>>, vector<1x2x64x16xbf16>
    %162 = vector.shape_cast %161 : vector<1x2x64x16xbf16> to vector<2x64x16xbf16>
    "tpu.trace_start"() <{level = 10 : i32, message = "hmd,hdk->hmk"}> : () -> ()
    %cst_91 = arith.constant dense<0.000000e+00> : vector<2x128x16xf32>
    %163 = tpu.matmul %154, %162, %cst_91 {dimension_numbers = #tpu.dot_dimension_numbers<[2], [1], [1], [2], [0, 0, 0, 1, 1, 2], [0], [0]>} : vector<2x128x64xbf16>, vector<2x64x16xbf16>, vector<2x128x16xf32> -> vector<2x128x16xf32>
    "tpu.trace_stop"() : () -> ()
    %164 = vector.shape_cast %157 : vector<2x128x16xf32> to vector<4x64x16xf32>
    %165 = arith.truncf %164 : vector<4x64x16xf32> to vector<4x64x16xbf16>
    %166 = vector.shape_cast %160 : vector<2x128x16xf32> to vector<4x64x16xf32>
    %167 = arith.truncf %166 : vector<4x64x16xf32> to vector<4x64x16xbf16>
    %168 = vector.shape_cast %163 : vector<2x128x16xf32> to vector<4x64x16xf32>
    %169 = arith.truncf %168 : vector<4x64x16xf32> to vector<4x64x16xbf16>
    "tpu.trace_start"() <{level = 10 : i32, message = "gnd,gmd->gnm"}> : () -> ()
    %cst_92 = arith.constant dense<0.000000e+00> : vector<4x64x64xf32>
    %170 = tpu.matmul %165, %167, %cst_92 {dimension_numbers = #tpu.dot_dimension_numbers<[2], [2], [1], [1], [0, 0, 0, 1, 1, 1], [0], [0]>} : vector<4x64x16xbf16>, vector<4x64x16xbf16>, vector<4x64x64xf32> -> vector<4x64x64xf32>
    "tpu.trace_stop"() : () -> ()
    %cst_93 = arith.constant dense<0xFF800000> : vector<4x64xf32>
    %171 = vector.multi_reduction <maximumf>, %170, %cst_93 [2] : vector<4x64x64xf32> to vector<4x64xf32>
    %172 = vector.shape_cast %171 : vector<4x64xf32> to vector<4x64x1xf32>
    %173 = vector.broadcast %172 : vector<4x64x1xf32> to vector<4x64x64xf32>
    %174 = arith.subf %170, %173 : vector<4x64x64xf32>
    %175 = math.exp %174 : vector<4x64x64xf32>
    %cst_94 = arith.constant dense<0.000000e+00> : vector<4x64xf32>
    %176 = vector.multi_reduction <add>, %175, %cst_94 [2] : vector<4x64x64xf32> to vector<4x64xf32>
    %177 = vector.shape_cast %176 : vector<4x64xf32> to vector<4x64x1xf32>
    %178 = tpu.reciprocal %177 {approx = true} : vector<4x64x1xf32> -> vector<4x64x1xf32>
    %179 = vector.broadcast %178 : vector<4x64x1xf32> to vector<4x64x64xf32>
    %180 = arith.mulf %175, %179 : vector<4x64x64xf32>
    %181 = arith.truncf %180 : vector<4x64x64xf32> to vector<4x64x64xbf16>
    "tpu.trace_start"() <{level = 10 : i32, message = "gnm,gmd->gnd"}> : () -> ()
    %cst_95 = arith.constant dense<0.000000e+00> : vector<4x64x16xf32>
    %182 = tpu.matmul %181, %169, %cst_95 {dimension_numbers = #tpu.dot_dimension_numbers<[2], [1], [1], [2], [0, 0, 0, 1, 1, 2], [0], [0]>} : vector<4x64x64xbf16>, vector<4x64x16xbf16>, vector<4x64x16xf32> -> vector<4x64x16xf32>
    "tpu.trace_stop"() : () -> ()
    %c1_96 = arith.constant 1 : index
    %c0_97 = arith.constant 0 : index
    %c0_98 = arith.constant 0 : index
    %c0_99 = arith.constant 0 : index
    %183 = vector.load %arg7[%c1_96, %c0_97, %c0_98, %c0_99] : memref<2x2x16x64xbf16, #tpu.memory_space<vmem>>, vector<1x2x16x64xbf16>
    %184 = vector.shape_cast %183 : vector<1x2x16x64xbf16> to vector<2x16x64xbf16>
    %185 = vector.shape_cast %184 : vector<2x16x64xbf16> to vector<2x1x16x64xbf16>
    %186 = vector.shape_cast %185 : vector<2x1x16x64xbf16> to vector<2x1x16x64xbf16>
    %187 = vector.broadcast %186 : vector<2x1x16x64xbf16> to vector<2x2x16x64xbf16>
    %188 = vector.shape_cast %187 : vector<2x2x16x64xbf16> to vector<4x16x64xbf16>
    %189 = arith.truncf %182 : vector<4x64x16xf32> to vector<4x64x16xbf16>
    "tpu.trace_start"() <{level = 10 : i32, message = "gnd,gdo->gno"}> : () -> ()
    %cst_100 = arith.constant dense<0.000000e+00> : vector<4x64x64xf32>
    %190 = tpu.matmul %189, %188, %cst_100 {dimension_numbers = #tpu.dot_dimension_numbers<[2], [1], [1], [2], [0, 0, 0, 1, 1, 2], [0], [0]>} : vector<4x64x16xbf16>, vector<4x16x64xbf16>, vector<4x64x64xf32> -> vector<4x64x64xf32>
    "tpu.trace_stop"() : () -> ()
    %191 = vector.shape_cast %190 : vector<4x64x64xf32> to vector<2x128x64xf32>
    %cst_101 = arith.constant dense<0.000000e+00> : vector<128x64xf32>
    %192 = vector.multi_reduction <add>, %191, %cst_101 [0] : vector<2x128x64xf32> to vector<128x64xf32>
    %193 = arith.addf %124, %192 : vector<128x64xf32>
    %c1_102 = arith.constant 1 : index
    %c0_103 = arith.constant 0 : index
    %c0_104 = arith.constant 0 : index
    %194 = vector.load %arg8[%c1_102, %c0_103, %c0_104] : memref<2x1x64xf32, #tpu.memory_space<vmem>>, vector<1x1x64xf32>
    %195 = vector.shape_cast %194 : vector<1x1x64xf32> to vector<1x64xf32>
    %196 = vector.broadcast %195 : vector<1x64xf32> to vector<128x64xf32>
    %197 = arith.addf %193, %196 : vector<128x64xf32>
    %c1_105 = arith.constant 1 : index
    %c0_106 = arith.constant 0 : index
    %c0_107 = arith.constant 0 : index
    %198 = vector.load %arg9[%c1_105, %c0_106, %c0_107] : memref<2x1x64xf32, #tpu.memory_space<vmem>>, vector<1x1x64xf32>
    %199 = vector.shape_cast %198 : vector<1x1x64xf32> to vector<1x64xf32>
    %c1_108 = arith.constant 1 : index
    %c0_109 = arith.constant 0 : index
    %c0_110 = arith.constant 0 : index
    %200 = vector.load %arg10[%c1_108, %c0_109, %c0_110] : memref<2x1x64xf32, #tpu.memory_space<vmem>>, vector<1x1x64xf32>
    %201 = vector.shape_cast %200 : vector<1x1x64xf32> to vector<1x64xf32>
    %cst_111 = arith.constant dense<0.000000e+00> : vector<128xf32>
    %202 = vector.multi_reduction <add>, %197, %cst_111 [1] : vector<128x64xf32> to vector<128xf32>
    %203 = vector.shape_cast %202 : vector<128xf32> to vector<128x1xf32>
    %cst_112 = arith.constant 6.400000e+01 : f32
    %204 = vector.broadcast %cst_112 : f32 to vector<128x1xf32>
    %205 = arith.divf %203, %204 : vector<128x1xf32>
    %206 = vector.broadcast %205 : vector<128x1xf32> to vector<128x64xf32>
    %207 = arith.subf %197, %206 : vector<128x64xf32>
    %208 = arith.mulf %207, %207 : vector<128x64xf32>
    %cst_113 = arith.constant dense<0.000000e+00> : vector<128xf32>
    %209 = vector.multi_reduction <add>, %208, %cst_113 [1] : vector<128x64xf32> to vector<128xf32>
    %210 = vector.shape_cast %209 : vector<128xf32> to vector<128x1xf32>
    %cst_114 = arith.constant 6.400000e+01 : f32
    %211 = vector.broadcast %cst_114 : f32 to vector<128x1xf32>
    %212 = arith.divf %210, %211 : vector<128x1xf32>
    %213 = vector.broadcast %205 : vector<128x1xf32> to vector<128x64xf32>
    %214 = arith.subf %197, %213 : vector<128x64xf32>
    %cst_115 = arith.constant 9.99999974E-6 : f32
    %215 = vector.broadcast %cst_115 : f32 to vector<128x1xf32>
    %216 = arith.addf %212, %215 : vector<128x1xf32>
    %217 = math.rsqrt %216 : vector<128x1xf32>
    %218 = vector.broadcast %217 : vector<128x1xf32> to vector<128x64xf32>
    %219 = arith.mulf %214, %218 : vector<128x64xf32>
    %220 = vector.broadcast %199 : vector<1x64xf32> to vector<128x64xf32>
    %221 = arith.mulf %219, %220 : vector<128x64xf32>
    %222 = vector.broadcast %201 : vector<1x64xf32> to vector<128x64xf32>
    %223 = arith.addf %221, %222 : vector<128x64xf32>
    %224 = arith.truncf %223 : vector<128x64xf32> to vector<128x64xbf16>
    %c1_116 = arith.constant 1 : index
    %c0_117 = arith.constant 0 : index
    %c0_118 = arith.constant 0 : index
    %225 = vector.load %arg11[%c1_116, %c0_117, %c0_118] : memref<2x64x32xbf16, #tpu.memory_space<vmem>>, vector<1x64x32xbf16>
    %226 = vector.shape_cast %225 : vector<1x64x32xbf16> to vector<64x32xbf16>
    %cst_119 = arith.constant dense<0.000000e+00> : vector<128x32xf32>
    %227 = tpu.matmul %224, %226, %cst_119 {dimension_numbers = #tpu.dot_dimension_numbers<[1], [0], [0], [1], [0, 0, 1, 1], [], []>} : vector<128x64xbf16>, vector<64x32xbf16>, vector<128x32xf32> -> vector<128x32xf32>
    %c1_120 = arith.constant 1 : index
    %c0_121 = arith.constant 0 : index
    %c0_122 = arith.constant 0 : index
    %228 = vector.load %arg12[%c1_120, %c0_121, %c0_122] : memref<2x1x32xf32, #tpu.memory_space<vmem>>, vector<1x1x32xf32>
    %229 = vector.shape_cast %228 : vector<1x1x32xf32> to vector<1x32xf32>
    %230 = vector.broadcast %229 : vector<1x32xf32> to vector<128x32xf32>
    %231 = arith.addf %227, %230 : vector<128x32xf32>
    %cst_123 = arith.constant 5.000000e-01 : f32
    %232 = vector.broadcast %cst_123 : f32 to vector<128x32xf32>
    %233 = arith.mulf %232, %231 : vector<128x32xf32>
    %cst_124 = arith.constant 1.41421354 : f32
    %234 = vector.broadcast %cst_124 : f32 to vector<128x32xf32>
    %235 = arith.divf %231, %234 : vector<128x32xf32>
    %236 = math.erf %235 : vector<128x32xf32>
    %cst_125 = arith.constant 1.000000e+00 : f32
    %237 = vector.broadcast %cst_125 : f32 to vector<128x32xf32>
    %238 = arith.addf %237, %236 : vector<128x32xf32>
    %239 = arith.mulf %233, %238 : vector<128x32xf32>
    %240 = arith.truncf %239 : vector<128x32xf32> to vector<128x32xbf16>
    %c1_126 = arith.constant 1 : index
    %c0_127 = arith.constant 0 : index
    %c0_128 = arith.constant 0 : index
    %241 = vector.load %arg13[%c1_126, %c0_127, %c0_128] : memref<2x32x64xbf16, #tpu.memory_space<vmem>>, vector<1x32x64xbf16>
    %242 = vector.shape_cast %241 : vector<1x32x64xbf16> to vector<32x64xbf16>
    %cst_129 = arith.constant dense<0.000000e+00> : vector<128x64xf32>
    %243 = tpu.matmul %240, %242, %cst_129 {dimension_numbers = #tpu.dot_dimension_numbers<[1], [0], [0], [1], [0, 0, 1, 1], [], []>} : vector<128x32xbf16>, vector<32x64xbf16>, vector<128x64xf32> -> vector<128x64xf32>
    %244 = arith.addf %197, %243 : vector<128x64xf32>
    %c1_130 = arith.constant 1 : index
    %c0_131 = arith.constant 0 : index
    %c0_132 = arith.constant 0 : index
    %245 = vector.load %arg14[%c1_130, %c0_131, %c0_132] : memref<2x1x64xf32, #tpu.memory_space<vmem>>, vector<1x1x64xf32>
    %246 = vector.shape_cast %245 : vector<1x1x64xf32> to vector<1x64xf32>
    %247 = vector.broadcast %246 : vector<1x64xf32> to vector<128x64xf32>
    %248 = arith.addf %244, %247 : vector<128x64xf32>
    %c0_133 = arith.constant 0 : index
    %c0_134 = arith.constant 0 : index
    %249 = vector.load %arg15[%c0_133, %c0_134] : memref<128x64xf32, #tpu.memory_space<vmem>>, vector<128x64xf32>
    tpu.vector_store %arg15[%c0_133, %c0_134], %248 {strides = array<i32>} : memref<128x64xf32, #tpu.memory_space<vmem>>, vector<128x64xf32>,
    return
  }
  func.func @transform_0(%arg0: i32) -> (i32, i32) {
    %c0_i32 = arith.constant 0 : i32
    %c0_i32_0 = arith.constant 0 : i32
    %c0_i32_1 = arith.constant 0 : i32
    return %c0_i32, %c0_i32_0 : i32, i32
  }
  func.func @transform_1(%arg0: i32) -> (i32, i32, i32) {
    %c0_i32 = arith.constant 0 : i32
    %c0_i32_0 = arith.constant 0 : i32
    %c0_i32_1 = arith.constant 0 : i32
    %c0_i32_2 = arith.constant 0 : i32
    return %c0_i32, %c0_i32_0, %c0_i32_1 : i32, i32, i32
  }
  func.func @transform_2(%arg0: i32) -> (i32, i32, i32) {
    %c0_i32 = arith.constant 0 : i32
    %c0_i32_0 = arith.constant 0 : i32
    %c0_i32_1 = arith.constant 0 : i32
    %c0_i32_2 = arith.constant 0 : i32
    return %c0_i32, %c0_i32_0, %c0_i32_1 : i32, i32, i32
  }
  func.func @transform_3(%arg0: i32) -> (i32, i32, i32, i32) {
    %c0_i32 = arith.constant 0 : i32
    %c0_i32_0 = arith.constant 0 : i32
    %c0_i32_1 = arith.constant 0 : i32
    %c0_i32_2 = arith.constant 0 : i32
    %c0_i32_3 = arith.constant 0 : i32
    return %c0_i32, %c0_i32_0, %c0_i32_1, %c0_i32_2 : i32, i32, i32, i32
  }
  func.func @transform_4(%arg0: i32) -> (i32, i32, i32, i32) {
    %c0_i32 = arith.constant 0 : i32
    %c0_i32_0 = arith.constant 0 : i32
    %c0_i32_1 = arith.constant 0 : i32
    %c0_i32_2 = arith.constant 0 : i32
    %c0_i32_3 = arith.constant 0 : i32
    return %c0_i32, %c0_i32_0, %c0_i32_1, %c0_i32_2 : i32, i32, i32, i32
  }
  func.func @transform_5(%arg0: i32) -> (i32, i32, i32, i32) {
    %c0_i32 = arith.constant 0 : i32
    %c0_i32_0 = arith.constant 0 : i32
    %c0_i32_1 = arith.constant 0 : i32
    %c0_i32_2 = arith.constant 0 : i32
    %c0_i32_3 = arith.constant 0 : i32
    return %c0_i32, %c0_i32_0, %c0_i32_1, %c0_i32_2 : i32, i32, i32, i32
  }
  func.func @transform_6(%arg0: i32) -> (i32, i32, i32, i32) {
    %c0_i32 = arith.constant 0 : i32
    %c0_i32_0 = arith.constant 0 : i32
    %c0_i32_1 = arith.constant 0 : i32
    %c0_i32_2 = arith.constant 0 : i32
    %c0_i32_3 = arith.constant 0 : i32
    return %c0_i32, %c0_i32_0, %c0_i32_1, %c0_i32_2 : i32, i32, i32, i32
  }
  func.func @transform_7(%arg0: i32) -> (i32, i32, i32) {
    %c0_i32 = arith.constant 0 : i32
    %c0_i32_0 = arith.constant 0 : i32
    %c0_i32_1 = arith.constant 0 : i32
    %c0_i32_2 = arith.constant 0 : i32
    return %c0_i32, %c0_i32_0, %c0_i32_1 : i32, i32, i32
  }
  func.func @transform_8(%arg0: i32) -> (i32, i32, i32) {
    %c0_i32 = arith.constant 0 : i32
    %c0_i32_0 = arith.constant 0 : i32
    %c0_i32_1 = arith.constant 0 : i32
    %c0_i32_2 = arith.constant 0 : i32
    return %c0_i32, %c0_i32_0, %c0_i32_1 : i32, i32, i32
  }
  func.func @transform_9(%arg0: i32) -> (i32, i32, i32) {
    %c0_i32 = arith.constant 0 : i32
    %c0_i32_0 = arith.constant 0 : i32
    %c0_i32_1 = arith.constant 0 : i32
    %c0_i32_2 = arith.constant 0 : i32
    return %c0_i32, %c0_i32_0, %c0_i32_1 : i32, i32, i32
  }
  func.func @transform_10(%arg0: i32) -> (i32, i32, i32) {
    %c0_i32 = arith.constant 0 : i32
    %c0_i32_0 = arith.constant 0 : i32
    %c0_i32_1 = arith.constant 0 : i32
    %c0_i32_2 = arith.constant 0 : i32
    return %c0_i32, %c0_i32_0, %c0_i32_1 : i32, i32, i32
  }
  func.func @transform_11(%arg0: i32) -> (i32, i32, i32) {
    %c0_i32 = arith.constant 0 : i32
    %c0_i32_0 = arith.constant 0 : i32
    %c0_i32_1 = arith.constant 0 : i32
    %c0_i32_2 = arith.constant 0 : i32
    return %c0_i32, %c0_i32_0, %c0_i32_1 : i32, i32, i32
  }
  func.func @transform_12(%arg0: i32) -> (i32, i32, i32) {
    %c0_i32 = arith.constant 0 : i32
    %c0_i32_0 = arith.constant 0 : i32
    %c0_i32_1 = arith.constant 0 : i32
    %c0_i32_2 = arith.constant 0 : i32
    return %c0_i32, %c0_i32_0, %c0_i32_1 : i32, i32, i32
  }
  func.func @transform_13(%arg0: i32) -> (i32, i32, i32) {
    %c0_i32 = arith.constant 0 : i32
    %c0_i32_0 = arith.constant 0 : i32
    %c0_i32_1 = arith.constant 0 : i32
    %c0_i32_2 = arith.constant 0 : i32
    return %c0_i32, %c0_i32_0, %c0_i32_1 : i32, i32, i32
  }
  func.func @transform_14(%arg0: i32) -> (i32, i32) {
    %c0_i32 = arith.constant 0 : i32
    %c0_i32_0 = arith.constant 0 : i32
    %c0_i32_1 = arith.constant 0 : i32
    return %c0_i32, %c0_i32_0 : i32, i32
  }
}

module attributes {stable_mosaic.version = 11 : i64} {
  func.func @deconv_fused_kernel(%arg0: i32, %arg1: memref<16x512xbf16, #tpu.memory_space<vmem>>, %arg2: memref<8x16xbf16, #tpu.memory_space<vmem>>, %arg3: memref<8x1xf32, #tpu.memory_space<vmem>>, %arg4: memref<8x1xf32, #tpu.memory_space<vmem>>, %arg5: memref<16x32xbf16, #tpu.memory_space<vmem>>, %arg6: memref<16x1xf32, #tpu.memory_space<vmem>>, %arg7: memref<16x1xf32, #tpu.memory_space<vmem>>, %arg8: memref<16x512xf32, #tpu.memory_space<vmem>>) attributes {dimension_semantics = [#tpu.dimension_semantics<arbitrary>], iteration_bounds = array<i64: 1>, scalar_prefetch = 0 : i64, scratch_operands = 0 : i64, tpu.core_type = #tpu.core_type<tc>, window_params = [{pipeline_mode = #tpu.pipeline_mode<synchronous>, transform_indices = @transform_0, window_bounds = array<i64: 16, 512>}, {pipeline_mode = #tpu.pipeline_mode<synchronous>, transform_indices = @transform_1, window_bounds = array<i64: 8, 16>}, {pipeline_mode = #tpu.pipeline_mode<synchronous>, transform_indices = @transform_2, window_bounds = array<i64: 8, 1>}, {pipeline_mode = #tpu.pipeline_mode<synchronous>, transform_indices = @transform_3, window_bounds = array<i64: 8, 1>}, {pipeline_mode = #tpu.pipeline_mode<synchronous>, transform_indices = @transform_4, window_bounds = array<i64: 16, 32>}, {pipeline_mode = #tpu.pipeline_mode<synchronous>, transform_indices = @transform_5, window_bounds = array<i64: 16, 1>}, {pipeline_mode = #tpu.pipeline_mode<synchronous>, transform_indices = @transform_6, window_bounds = array<i64: 16, 1>}, {pipeline_mode = #tpu.pipeline_mode<synchronous>, transform_indices = @transform_7, window_bounds = array<i64: 16, 512>}]} {
    %c0 = arith.constant 0 : index
    %c0_0 = arith.constant 0 : index
    %0 = vector.load %arg2[%c0, %c0_0] : memref<8x16xbf16, #tpu.memory_space<vmem>>, vector<8x16xbf16>
    %c0_1 = arith.constant 0 : index
    %c0_2 = arith.constant 0 : index
    %1 = vector.load %arg1[%c0_1, %c0_2] : memref<16x512xbf16, #tpu.memory_space<vmem>>, vector<16x512xbf16>
    %cst = arith.constant dense<0.000000e+00> : vector<8x512xf32>
    %2 = tpu.matmul %0, %1, %cst {dimension_numbers = #tpu.dot_dimension_numbers<[1], [0], [0], [1], [0, 0, 1, 1], [], []>} : vector<8x16xbf16>, vector<16x512xbf16>, vector<8x512xf32> -> vector<8x512xf32>
    %c0_3 = arith.constant 0 : index
    %c0_4 = arith.constant 0 : index
    %3 = vector.load %arg3[%c0_3, %c0_4] : memref<8x1xf32, #tpu.memory_space<vmem>>, vector<8x1xf32>
    %4 = vector.broadcast %3 : vector<8x1xf32> to vector<8x512xf32>
    %5 = arith.mulf %2, %4 : vector<8x512xf32>
    %c0_5 = arith.constant 0 : index
    %c0_6 = arith.constant 0 : index
    %6 = vector.load %arg4[%c0_5, %c0_6] : memref<8x1xf32, #tpu.memory_space<vmem>>, vector<8x1xf32>
    %7 = vector.broadcast %6 : vector<8x1xf32> to vector<8x512xf32>
    %8 = arith.addf %5, %7 : vector<8x512xf32>
    %9 = arith.negf %8 : vector<8x512xf32>
    %10 = math.exp %9 : vector<8x512xf32>
    %cst_7 = arith.constant 1.000000e+00 : f32
    %11 = vector.broadcast %cst_7 : f32 to vector<8x512xf32>
    %12 = arith.addf %11, %10 : vector<8x512xf32>
    %13 = arith.divf %11, %12 : vector<8x512xf32>
    %14 = arith.mulf %8, %13 : vector<8x512xf32>
    %15 = tpu.iota {dimensions = array<i32: 1>} : vector<1x512xi32>
    %c16_i32 = arith.constant 16 : i32
    %c0_i32 = arith.constant 0 : i32
    %16 = arith.cmpi eq, %c16_i32, %c0_i32 : i32
    %c1_i32 = arith.constant 1 : i32
    %17 = arith.select %16, %c1_i32, %c16_i32 : i32
    %18 = vector.broadcast %17 : i32 to vector<1x512xi32>
    %19 = arith.remsi %15, %18 : vector<1x512xi32>
    %c0_i32_8 = arith.constant 0 : i32
    %20 = vector.broadcast %c0_i32_8 : i32 to vector<1x512xi32>
    %21 = arith.cmpi ne, %19, %20 : vector<1x512xi32>
    %c0_i32_9 = arith.constant 0 : i32
    %22 = vector.broadcast %c0_i32_9 : i32 to vector<1x512xi32>
    %23 = arith.cmpi slt, %19, %22 : vector<1x512xi32>
    %c0_i32_10 = arith.constant 0 : i32
    %24 = arith.cmpi slt, %17, %c0_i32_10 : i32
    %25 = vector.broadcast %24 : i1 to vector<1x512xi1>
    %26 = vector.broadcast %25 : vector<1x512xi1> to vector<1x512xi1>
    %27 = arith.xori %23, %26 : vector<1x512xi1>
    %28 = arith.andi %27, %21 : vector<1x512xi1>
    %29 = vector.broadcast %17 : i32 to vector<1x512xi32>
    %30 = arith.addi %19, %29 : vector<1x512xi32>
    %31 = arith.select %28, %30, %19 : vector<1x512xi1>, vector<1x512xi32>
    %c15_i32 = arith.constant 15 : i32
    %32 = vector.broadcast %c15_i32 : i32 to vector<1x512xi32>
    %33 = arith.cmpi slt, %31, %32 : vector<1x512xi32>
    %c256_i32 = arith.constant 256 : i32
    %c0_i32_11 = arith.constant 0 : i32
    %34 = arith.cmpi eq, %c256_i32, %c0_i32_11 : i32
    %c1_i32_12 = arith.constant 1 : i32
    %35 = arith.select %34, %c1_i32_12, %c256_i32 : i32
    %36 = vector.broadcast %35 : i32 to vector<1x512xi32>
    %37 = arith.remsi %15, %36 : vector<1x512xi32>
    %c0_i32_13 = arith.constant 0 : i32
    %38 = vector.broadcast %c0_i32_13 : i32 to vector<1x512xi32>
    %39 = arith.cmpi ne, %37, %38 : vector<1x512xi32>
    %c0_i32_14 = arith.constant 0 : i32
    %40 = vector.broadcast %c0_i32_14 : i32 to vector<1x512xi32>
    %41 = arith.cmpi slt, %37, %40 : vector<1x512xi32>
    %c0_i32_15 = arith.constant 0 : i32
    %42 = arith.cmpi slt, %35, %c0_i32_15 : i32
    %43 = vector.broadcast %42 : i1 to vector<1x512xi1>
    %44 = vector.broadcast %43 : vector<1x512xi1> to vector<1x512xi1>
    %45 = arith.xori %41, %44 : vector<1x512xi1>
    %46 = arith.andi %45, %39 : vector<1x512xi1>
    %47 = vector.broadcast %35 : i32 to vector<1x512xi32>
    %48 = arith.addi %37, %47 : vector<1x512xi32>
    %49 = arith.select %46, %48, %37 : vector<1x512xi1>, vector<1x512xi32>
    %c240_i32 = arith.constant 240 : i32
    %50 = vector.broadcast %c240_i32 : i32 to vector<1x512xi32>
    %51 = arith.cmpi slt, %49, %50 : vector<1x512xi32>
    %c511_i32 = arith.constant 511 : i32
    %52 = tpu.dynamic_rotate %14 by %c511_i32 dim 1 : vector<8x512xf32>, i32 -> vector<8x512xf32>
    %cst_16 = arith.constant 0.000000e+00 : f32
    %53 = vector.shape_cast %33 : vector<1x512xi1> to vector<1x512xi1>
    %54 = vector.broadcast %53 : vector<1x512xi1> to vector<8x512xi1>
    %55 = vector.broadcast %cst_16 : f32 to vector<8x512xf32>
    %56 = arith.select %54, %52, %55 : vector<8x512xi1>, vector<8x512xf32>
    %c496_i32 = arith.constant 496 : i32
    %57 = tpu.dynamic_rotate %14 by %c496_i32 dim 1 : vector<8x512xf32>, i32 -> vector<8x512xf32>
    %cst_17 = arith.constant 0.000000e+00 : f32
    %58 = vector.shape_cast %51 : vector<1x512xi1> to vector<1x512xi1>
    %59 = vector.broadcast %58 : vector<1x512xi1> to vector<8x512xi1>
    %60 = vector.broadcast %cst_17 : f32 to vector<8x512xf32>
    %61 = arith.select %59, %57, %60 : vector<8x512xi1>, vector<8x512xf32>
    %62 = arith.andi %33, %51 : vector<1x512xi1>
    %c495_i32 = arith.constant 495 : i32
    %63 = tpu.dynamic_rotate %14 by %c495_i32 dim 1 : vector<8x512xf32>, i32 -> vector<8x512xf32>
    %cst_18 = arith.constant 0.000000e+00 : f32
    %64 = vector.shape_cast %62 : vector<1x512xi1> to vector<1x512xi1>
    %65 = vector.broadcast %64 : vector<1x512xi1> to vector<8x512xi1>
    %66 = vector.broadcast %cst_18 : f32 to vector<8x512xf32>
    %67 = arith.select %65, %63, %66 : vector<8x512xi1>, vector<8x512xf32>
    %68 = tpu.concatenate %14, %56, %61, %67 in 0 : vector<8x512xf32>, vector<8x512xf32>, vector<8x512xf32>, vector<8x512xf32> -> vector<32x512xf32>
    %69 = arith.truncf %68 : vector<32x512xf32> to vector<32x512xbf16>
    %c0_19 = arith.constant 0 : index
    %c0_20 = arith.constant 0 : index
    %70 = vector.load %arg5[%c0_19, %c0_20] : memref<16x32xbf16, #tpu.memory_space<vmem>>, vector<16x32xbf16>
    %cst_21 = arith.constant dense<0.000000e+00> : vector<16x512xf32>
    %71 = tpu.matmul %70, %69, %cst_21 {dimension_numbers = #tpu.dot_dimension_numbers<[1], [0], [0], [1], [0, 0, 1, 1], [], []>} : vector<16x32xbf16>, vector<32x512xbf16>, vector<16x512xf32> -> vector<16x512xf32>
    %c0_22 = arith.constant 0 : index
    %c0_23 = arith.constant 0 : index
    %72 = vector.load %arg6[%c0_22, %c0_23] : memref<16x1xf32, #tpu.memory_space<vmem>>, vector<16x1xf32>
    %73 = vector.broadcast %72 : vector<16x1xf32> to vector<16x512xf32>
    %74 = arith.mulf %71, %73 : vector<16x512xf32>
    %c0_24 = arith.constant 0 : index
    %c0_25 = arith.constant 0 : index
    %75 = vector.load %arg7[%c0_24, %c0_25] : memref<16x1xf32, #tpu.memory_space<vmem>>, vector<16x1xf32>
    %76 = vector.broadcast %75 : vector<16x1xf32> to vector<16x512xf32>
    %77 = arith.addf %74, %76 : vector<16x512xf32>
    %78 = arith.negf %77 : vector<16x512xf32>
    %79 = math.exp %78 : vector<16x512xf32>
    %cst_26 = arith.constant 1.000000e+00 : f32
    %80 = vector.broadcast %cst_26 : f32 to vector<16x512xf32>
    %81 = arith.addf %80, %79 : vector<16x512xf32>
    %82 = arith.divf %80, %81 : vector<16x512xf32>
    %83 = arith.mulf %77, %82 : vector<16x512xf32>
    %c0_27 = arith.constant 0 : index
    %c0_28 = arith.constant 0 : index
    %84 = vector.load %arg8[%c0_27, %c0_28] : memref<16x512xf32, #tpu.memory_space<vmem>>, vector<16x512xf32>
    tpu.vector_store %arg8[%c0_27, %c0_28], %83 {strides = array<i32>} : memref<16x512xf32, #tpu.memory_space<vmem>>, vector<16x512xf32>,
    return
  }
  func.func @transform_0(%arg0: i32) -> (i32, i32) {
    %c0_i32 = arith.constant 0 : i32
    %c0_i32_0 = arith.constant 0 : i32
    %c0_i32_1 = arith.constant 0 : i32
    return %c0_i32, %c0_i32_0 : i32, i32
  }
  func.func @transform_1(%arg0: i32) -> (i32, i32) {
    %c0_i32 = arith.constant 0 : i32
    %c0_i32_0 = arith.constant 0 : i32
    %c0_i32_1 = arith.constant 0 : i32
    return %c0_i32, %c0_i32_0 : i32, i32
  }
  func.func @transform_2(%arg0: i32) -> (i32, i32) {
    %c0_i32 = arith.constant 0 : i32
    %c0_i32_0 = arith.constant 0 : i32
    %c0_i32_1 = arith.constant 0 : i32
    return %c0_i32, %c0_i32_0 : i32, i32
  }
  func.func @transform_3(%arg0: i32) -> (i32, i32) {
    %c0_i32 = arith.constant 0 : i32
    %c0_i32_0 = arith.constant 0 : i32
    %c0_i32_1 = arith.constant 0 : i32
    return %c0_i32, %c0_i32_0 : i32, i32
  }
  func.func @transform_4(%arg0: i32) -> (i32, i32) {
    %c0_i32 = arith.constant 0 : i32
    %c0_i32_0 = arith.constant 0 : i32
    %c0_i32_1 = arith.constant 0 : i32
    return %c0_i32, %c0_i32_0 : i32, i32
  }
  func.func @transform_5(%arg0: i32) -> (i32, i32) {
    %c0_i32 = arith.constant 0 : i32
    %c0_i32_0 = arith.constant 0 : i32
    %c0_i32_1 = arith.constant 0 : i32
    return %c0_i32, %c0_i32_0 : i32, i32
  }
  func.func @transform_6(%arg0: i32) -> (i32, i32) {
    %c0_i32 = arith.constant 0 : i32
    %c0_i32_0 = arith.constant 0 : i32
    %c0_i32_1 = arith.constant 0 : i32
    return %c0_i32, %c0_i32_0 : i32, i32
  }
  func.func @transform_7(%arg0: i32) -> (i32, i32) {
    %c0_i32 = arith.constant 0 : i32
    %c0_i32_0 = arith.constant 0 : i32
    %c0_i32_1 = arith.constant 0 : i32
    return %c0_i32, %c0_i32_0 : i32, i32
  }
}

</mosaic_0001>

<bundles_post_ra>
// kernel: _lambda_.3
= control target key start
LH: loop header
LB: loop body
LE: loop exit
PB: predicated region body
PF: predicated region fallthrough
CT: control target
= control target key end

     0   :  { %v724_v1 = vmov 0   ;;  %vm52_vm0 = vcmask 130048   ;;  %v186_v52 = vlaneseq  ;;  %vm728_vm5 = vmmov 1   ;;  %s934_s0 = inlined_call_operand.vmem [shape: bf16[16,512], index: 0, kind: input, shape index: {}]   ;;  %s935_s2 = inlined_call_operand.vmem [shape: f32[8,1], index: 2, kind: input, shape index: {}]   ;;  %s936_s1 = inlined_call_operand.vmem [shape: bf16[8,16], index: 1, kind: input, shape index: {}]   ;;  %s937_s3 = inlined_call_operand.vmem [shape: f32[8,1], index: 3, kind: input, shape index: {}]   ;;  %s938_s5 = inlined_call_operand.vmem [shape: f32[16,1], index: 5, kind: input, shape index: {}]   ;;  %s939_s6 = inlined_call_operand.vmem [shape: f32[16,1], index: 6, kind: input, shape index: {}]   ;;  %s940_s4 = inlined_call_operand.vmem [shape: bf16[16,32], index: 4, kind: input, shape index: {}]   ;;  %s941_s7 = inlined_call_operand.vmem [shape: f32[16,512], index: 7, kind: output, shape index: {}]  }
   0x1   :  { %v669_v0 = vld [vmem:[%s934_s0 + $0x4] ss:$16 sps:$4 sm:$0xff]   ;;  %88 = vmatprep.mubr.bf16.mxu0 %v724_v1  ;;  %129 = vmatprep.mubr.bf16.mxu1 %v724_v1  ;;  %v671_v2 = vld [vmem:[%s934_s0 + $0xc] ss:$16 sps:$4 sm:$0xff]   ;;  %v673_v3 = vld [vmem:[%s934_s0] ss:$16 sps:$4 sm:$0xff]  }
   0x2   :  { %637 = vset.pattern.permute.xlu0 %v724_v1  ;;  %668 = vset.pattern.permute.xlu1 %v724_v1  ;;  %v674_v4 = vld [vmem:[%s934_s0 + $0x8] ss:$16 sps:$4 sm:$0xff]   ;;  %v138_v5 = vld [vmem:[%s935_s2] sm:$0xff]  ;;  %s725_s0 = smov 112   ;;  %s727_s2 = smov 111   ;;  %v814_v53 = vand.u32 127, %v186_v52 }
   0x3   :  { %56 = vmatprep.subr.bf16.mxu0 %v669_v0  ;;  %97 = vmatprep.subr.bf16.mxu1 %v671_v2  ;;  %v27_v6 = vld [vmem:[%s936_s1] sm:$0xf]  ;;  %s726_s1 = smov 127   ;;  %v480_v50 = vld [vmem:[%s938_s5 + $0x8] sm:$0xff] }
   0x4   :  { %57 = vmatpush1.bf16.msra.mxu0 %v673_v3  ;;  %98 = vmatpush1.bf16.msra.mxu1 %v674_v4  ;;  %v148_v7 = vld [vmem:[%s937_s3] sm:$0xff]  ;;  %v500_v51 = vld [vmem:[%s939_s6 + $0x8] sm:$0xff]  ;;  %v188_v54 = vadd.s32 128, %v814_v53  ;;  %v190_v55 = vadd.s32 384, %v814_v53  ;;  %v189_v56 = vadd.s32 256, %v814_v53  ;;  %v195_v60 = vand.u32 15, %v814_v53 }
   0x5   :  { %141 = vperm.xlu0 %637, %v138_v5   ;;  %v479_v48 = vld [vmem:[%s938_s5] sm:$0xff]  ;;  %vm303_vm2 = vcmp.lt.s32.totalorder %v814_v53, 127  ;;  %vm357_vm13 = vcmp.lt.s32.totalorder %v814_v53, 111 }
   0x6   :  { %v499_v49 = vld [vmem:[%s939_s6] sm:$0xff]  ;;  %v202_v57 = vand.u32 15, %v188_v54  ;;  %v216_v58 = vand.u32 15, %v190_v55  ;;  %v209_v62 = vand.u32 15, %v189_v56  ;;  %vm239_vm4 = vcmp.lt.s32.totalorder %v195_v60, 15 }
   0x7   :  { %591 = vmatmul.mubr.msk.bf16.vlgmr.msra.gmra.mrb[0].mxu0 %vm52_vm0, %v27_v6  ;;  %592 = vmatmul.mubr.msk.bf16.vlgmr.msra.gmra.mrb[0].mxu1 %vm52_vm0, %v27_v6  ;;  %v254_v4 = vand.u32 255, %v188_v54  ;;  %vm852_vm9 = vmpackc.low %vm239_vm4, %vm728_vm5  ;;  %vm328_vm0 = vcmp.lt.s32.totalorder %v814_v53, 112 }
   0x8   :  { %425 = vmatprep.mubr.bf16.mxu0 %v724_v1  ;;  %468 = vmatprep.mubr.bf16.mxu1 %v724_v1  ;;  %vm820_vm1 = vcmp.lt.s32.totalorder %v202_v57, 15  ;;  %vm825_vm3 = vcmp.lt.s32.totalorder %v216_v58, 15  ;;  %vm241_vm7 = vcmp.lt.s32.totalorder %v209_v62, 15 }
   0x9   :  { %151 = vperm.xlu0 %637, %v148_v7   ;;  %vm832_vm6 = vmpackc.low %vm820_vm1, %vm728_vm5  ;;  %vm864_vm11 = vcmp.lt.s32.totalorder %v254_v4, 240 }
   0xa   :  { %vm841_vm8 = vmpackc.low %vm825_vm3, %vm728_vm5 }
   0xb   :  { %vm860_vm10 = vmpackc.low %vm241_vm7, %vm728_vm5 }
   0xc   :  { %vm346_vm14 = vmand %vm820_vm1, %vm864_vm11 }
   0xd   :  { %vm604_vm1 = vmpackc.low %vm346_vm14, %vm864_vm11 }
  0x84   :  { %v142_v8 = vpop.permute.xlu0 %141 }
  0x88   :  { %v152_v9 = vpop.permute.xlu0 %151 }
  0xda   :  { %v90_v10 = vpop.f32.mrb[0].mxu0  ;;  %v131_v11 = vpop.f32.mrb[0].mxu1 }
  0xdb   :  { %v144_v12 = vmul.f32 %v142_v8, %v90_v10  ;;  %v146_v13 = vmul.f32 %v142_v8, %v131_v11  ;;  %v92_v14 = vpop.f32.mrb[1].mxu0  ;;  %v133_v15 = vpop.f32.mrb[1].mxu1 }
  0xdc   :  { %v145_v16 = vmul.f32 %v142_v8, %v92_v14  ;;  %v147_v17 = vmul.f32 %v142_v8, %v133_v15  ;;  %v94_v18 = vpop.f32.mrb[2].mxu0  ;;  %v135_v19 = vpop.f32.mrb[2].mxu1  ;;  %v268_v8 = vand.u32 255, %v190_v55 }
  0xdd   :  { %v154_v20 = vadd.f32 %v152_v9, %v144_v12  ;;  %v156_v21 = vadd.f32 %v152_v9, %v146_v13  ;;  %v95_v22 = vpop.f32.mrb[3].mxu0  ;;  %v136_v23 = vpop.f32.mrb[3].mxu1 }
  0xde   :  { %v155_v24 = vadd.f32 %v152_v9, %v145_v16  ;;  %v157_v25 = vadd.f32 %v152_v9, %v147_v17  ;;  %vm869_vm12 = vcmp.lt.s32.totalorder %v268_v8, 240 }
  0xdf   :  { %v593_v26 = vmul.f32 -1.442695, %v154_v20  ;;  %v595_v27 = vmul.f32 -1.442695, %v156_v21  ;;  %vm348_vm15 = vmand %vm825_vm3, %vm869_vm12  ;;  %vm389_vm3 = vcmask 261120  }
  0xe0   :  { %v594_v28 = vmul.f32 -1.442695, %v155_v24  ;;  %v596_v29 = vmul.f32 -1.442695, %v157_v25 }
  0xe1   :  { %676 = vpow2.f32 %v593_v26 }
  0xe2   :  { %678 = vpow2.f32 %v595_v27 }
  0xe3   :  { %680 = vpow2.f32 %v594_v28 }
  0xe4   :  { %682 = vpow2.f32 %v596_v29 }
  0xeb   :  { %v677_v30 = vpop.eup %676 }
  0xec   :  { %v679_v31 = vpop.eup %678  ;;  %v170_v32 = vadd.f32 1.0, %v677_v30 }
  0xed   :  { %v681_v33 = vpop.eup %680  ;;  %v172_v34 = vadd.f32 1.0, %v679_v31 }
  0xee   :  { %v683_v35 = vpop.eup %682  ;;  %684 = vrcp.f32 %v170_v32  ;;  %v171_v36 = vadd.f32 1.0, %v681_v33 }
  0xef   :  { %686 = vrcp.f32 %v172_v34  ;;  %v173_v37 = vadd.f32 1.0, %v683_v35 }
  0xf0   :  { %688 = vrcp.f32 %v171_v36 }
  0xf1   :  { %690 = vrcp.f32 %v173_v37 }
  0xf8   :  { %v685_v38 = vpop.eup %684 }
  0xf9   :  { %v687_v39 = vpop.eup %686  ;;  %v790_v40 = vmul.f32 %v685_v38, %v154_v20 }
  0xfa   :  { %v689_v41 = vpop.eup %688  ;;  %v794_v44 = vmul.f32 %v687_v39, %v156_v21 }
  0xfb   :  { %v691_v42 = vpop.eup %690  ;;  %v792_v43 = vmul.f32 %v689_v41, %v155_v24 }
  0xfc   :  { %v796_v45 = vmul.f32 %v691_v42, %v157_v25 }
  0xfd   :  { %v648_v46 = vpack.i.bf16 %v792_v43, %v790_v40 }
  0xfe   :  { %v643_v47 = vpack.i.bf16 %v796_v45, %v794_v44 }
  0xff   :  { %649 = vrot.lane.b32.xlu0 %v648_v46, %s725_s0  ;;  %639 = vrot.lane.b32.xlu1 %v648_v46, %s726_s1 }
 0x103   :  { %659 = vrot.lane.b32.xlu0 %v648_v46, %s727_s2  ;;  %644 = vrot.lane.b32.xlu1 %v643_v47, %s726_s1 }
 0x107   :  { %483 = vperm.xlu0 %637, %v479_v48   ;;  %654 = vrot.lane.b32.xlu1 %v643_v47, %s725_s0 }
 0x10b   :  { %503 = vperm.xlu0 %637, %v499_v49   ;;  %664 = vrot.lane.b32.xlu1 %v643_v47, %s727_s2 }
 0x10f   :  { %488 = vperm.xlu1 %668, %v480_v50  }
 0x113   :  { %508 = vperm.xlu1 %668, %v500_v51  }
 0x171   :  { %v640_v59 = vpop.permute.xlu1 %639  ;;  %v650_v61 = vpop.permute.xlu0 %649 }
 0x172   :  { %v642_v63 = vunpack.i.h.bf16 %v640_v59  ;;  %v641_v0 = vunpack.i.l.bf16 %v640_v59  ;;  %v652_v28 = vunpack.i.h.bf16 %v650_v61  ;;  %v651_v29 = vunpack.i.l.bf16 %v650_v61 }
 0x174   :  { %v306_v9 = vsel %vm303_vm2, %v641_v0, %v642_v63 }
 0x175   :  { %v645_v3 = vpop.permute.xlu1 %644  ;;  %v660_v11 = vpop.permute.xlu0 %659  ;;  %v602_v22 = vpack.c.bf16 %v306_v9, %v790_v40  ;;  %v331_v40 = vsel %vm328_vm0, %v651_v29, %v652_v28 }
 0x176   :  { %v647_v5 = vunpack.i.h.bf16 %v645_v3  ;;  %v646_v6 = vunpack.i.l.bf16 %v645_v3  ;;  %v662_v24 = vunpack.i.h.bf16 %v660_v11  ;;  %v661_v25 = vunpack.i.l.bf16 %v660_v11 }
 0x178   :  { %v304_v12 = vsel %vm303_vm2, %v646_v6, %v647_v5  ;;  %v305_v13 = vsel %vm303_vm2, %v642_v63, %v646_v6  ;;  %v307_v14 = vsel %vm303_vm2, %v647_v5, %v641_v0  ;;  %v360_v33 = vsel %vm357_vm13, %v661_v25, %v662_v24  ;;  %vm617_vm2 = vmpackc.low %vm348_vm15, %vm869_vm12 }
 0x179   :  { %v599_v16 = vpack.c.bf16 %v305_v13, %v792_v43  ;;  %v612_v17 = vpack.c.bf16 %v307_v14, %v796_v45  ;;  %v615_v18 = vpack.c.bf16 %v304_v12, %v794_v44  ;;  %v655_v19 = vpop.permute.xlu1 %654  ;;  %v608_v44 = vpack.c.bf16 %v360_v33, %v331_v40  ;;  %v675_v45 = vld [vmem:[%s940_s4] sm:$0xff]  }
 0x17a   :  { %v657_v26 = vunpack.i.h.bf16 %v655_v19  ;;  %v656_v27 = vunpack.i.l.bf16 %v655_v19 }
 0x17b   :  { %600 = vmatprep.subr.msk.bf16.mxu0 %vm832_vm6, %v599_v16  ;;  %613 = vmatprep.subr.msk.bf16.mxu1 %vm841_vm8, %v612_v17 }
 0x17c   :  { %603 = vmatpush1.bf16.msk.msra.mxu0 %vm852_vm9, %v602_v22  ;;  %616 = vmatpush1.bf16.msk.msra.mxu1 %vm860_vm10, %v615_v18  ;;  %v332_v34 = vsel %vm328_vm0, %v657_v26, %v651_v29  ;;  %v329_v35 = vsel %vm328_vm0, %v656_v27, %v657_v26  ;;  %v330_v36 = vsel %vm328_vm0, %v652_v28, %v656_v27 }
 0x17d   :  { %v665_v30 = vpop.permute.xlu1 %664 }
 0x17e   :  { %v667_v31 = vunpack.i.h.bf16 %v665_v30  ;;  %v666_v32 = vunpack.i.l.bf16 %v665_v30 }
 0x180   :  { %v361_v37 = vsel %vm357_vm13, %v667_v31, %v661_v25  ;;  %v358_v38 = vsel %vm357_vm13, %v666_v32, %v667_v31  ;;  %v359_v39 = vsel %vm357_vm13, %v662_v24, %v666_v32 }
 0x181   :  { %v605_v41 = vpack.c.bf16 %v359_v39, %v330_v36  ;;  %v618_v42 = vpack.c.bf16 %v361_v37, %v332_v34  ;;  %v621_v43 = vpack.c.bf16 %v358_v38, %v329_v35 }
 0x183   :  { %606 = vmatprep.subr.msk.bf16.mxu0 %vm604_vm1, %v605_v41  ;;  %619 = vmatprep.subr.msk.bf16.mxu1 %vm617_vm2, %v618_v42 }
 0x184   :  { %609 = vmatpush1.bf16.msk.msra.mxu0 %vm852_vm9, %v608_v44  ;;  %622 = vmatpush1.bf16.msk.msra.mxu1 %vm860_vm10, %v621_v43 }
 0x186   :  { %v484_v46 = vpop.permute.xlu0 %483 }
 0x187   :  { %610 = vmatmul.mubr.msk.bf16.vlgmr.msra.gmra.mrb[4].mxu0 %vm389_vm3, %v675_v45  ;;  %623 = vmatmul.mubr.msk.bf16.vlgmr.msra.gmra.mrb[4].mxu1 %vm389_vm3, %v675_v45 }
 0x18a   :  { %v504_v48 = vpop.permute.xlu0 %503 }
 0x18e   :  { %v489_v47 = vpop.permute.xlu1 %488 }
 0x192   :  { %v509_v3 = vpop.permute.xlu1 %508 }
 0x25a   :  { %v427_v49 = vpop.f32.mrb[4].mxu0  ;;  %v470_v50 = vpop.f32.mrb[4].mxu1 }
 0x25b   :  { %v491_v51 = vmul.f32 %v484_v46, %v427_v49  ;;  %v493_v52 = vmul.f32 %v484_v46, %v470_v50  ;;  %v429_v53 = vpop.f32.mrb[5].mxu0  ;;  %v472_v54 = vpop.f32.mrb[5].mxu1 }
 0x25c   :  { %v492_v55 = vmul.f32 %v484_v46, %v429_v53  ;;  %v494_v56 = vmul.f32 %v484_v46, %v472_v54  ;;  %v431_v57 = vpop.f32.mrb[6].mxu0  ;;  %v474_v58 = vpop.f32.mrb[6].mxu1 }
 0x25d   :  { %v511_v59 = vadd.f32 %v504_v48, %v491_v51  ;;  %v513_v60 = vadd.f32 %v504_v48, %v493_v52  ;;  %v495_v61 = vmul.f32 %v489_v47, %v431_v57  ;;  %v497_v62 = vmul.f32 %v489_v47, %v474_v58  ;;  %v433_v63 = vpop.f32.mrb[7].mxu0  ;;  %v476_v0 = vpop.f32.mrb[7].mxu1 }
 0x25e   :  { %v512_v1 = vadd.f32 %v504_v48, %v492_v55  ;;  %v514_v2 = vadd.f32 %v504_v48, %v494_v56  ;;  %v496_v4 = vmul.f32 %v489_v47, %v433_v63  ;;  %v498_v5 = vmul.f32 %v489_v47, %v476_v0 }
 0x25f   :  { %v624_v6 = vmul.f32 -1.442695, %v511_v59  ;;  %v626_v7 = vmul.f32 -1.442695, %v513_v60  ;;  %v515_v8 = vadd.f32 %v509_v3, %v495_v61  ;;  %v517_v9 = vadd.f32 %v509_v3, %v497_v62 }
 0x260   :  { %v625_v10 = vmul.f32 -1.442695, %v512_v1  ;;  %v627_v11 = vmul.f32 -1.442695, %v514_v2  ;;  %v516_v12 = vadd.f32 %v509_v3, %v496_v4  ;;  %v518_v13 = vadd.f32 %v509_v3, %v498_v5 }
 0x261   :  { %692 = vpow2.f32 %v624_v6  ;;  %v628_v14 = vmul.f32 -1.442695, %v515_v8  ;;  %v630_v15 = vmul.f32 -1.442695, %v517_v9 }
 0x262   :  { %694 = vpow2.f32 %v626_v7  ;;  %v629_v16 = vmul.f32 -1.442695, %v516_v12  ;;  %v631_v17 = vmul.f32 -1.442695, %v518_v13 }
 0x263   :  { %696 = vpow2.f32 %v625_v10 }
 0x264   :  { %698 = vpow2.f32 %v627_v11 }
 0x265   :  { %700 = vpow2.f32 %v628_v14 }
 0x266   :  { %702 = vpow2.f32 %v630_v15 }
 0x267   :  { %704 = vpow2.f32 %v629_v16 }
 0x268   :  { %706 = vpow2.f32 %v631_v17 }
 0x26b   :  { %v693_v18 = vpop.eup %692 }
 0x26c   :  { %v695_v19 = vpop.eup %694  ;;  %v543_v20 = vadd.f32 1.0, %v693_v18 }
 0x26d   :  { %v697_v21 = vpop.eup %696  ;;  %v545_v22 = vadd.f32 1.0, %v695_v19 }
 0x26e   :  { %v699_v23 = vpop.eup %698  ;;  %708 = vrcp.f32 %v543_v20  ;;  %v544_v24 = vadd.f32 1.0, %v697_v21 }
 0x26f   :  { %v701_v25 = vpop.eup %700  ;;  %710 = vrcp.f32 %v545_v22  ;;  %v546_v26 = vadd.f32 1.0, %v699_v23 }
 0x270   :  { %v703_v27 = vpop.eup %702  ;;  %712 = vrcp.f32 %v544_v24  ;;  %v547_v28 = vadd.f32 1.0, %v701_v25 }
 0x271   :  { %v705_v29 = vpop.eup %704  ;;  %714 = vrcp.f32 %v546_v26  ;;  %v549_v30 = vadd.f32 1.0, %v703_v27 }
 0x272   :  { %v707_v31 = vpop.eup %706  ;;  %716 = vrcp.f32 %v547_v28  ;;  %v548_v32 = vadd.f32 1.0, %v705_v29 }
 0x273   :  { %718 = vrcp.f32 %v549_v30  ;;  %v550_v33 = vadd.f32 1.0, %v707_v31 }
 0x274   :  { %720 = vrcp.f32 %v548_v32 }
 0x275   :  { %722 = vrcp.f32 %v550_v33 }
 0x278   :  { %v709_v34 = vpop.eup %708 }
 0x279   :  { %v711_v35 = vpop.eup %710  ;;  %v567_v36 = vmul.f32 %v709_v34, %v511_v59 }
 0x27a   :  { %v713_v37 = vpop.eup %712  ;;  %v569_v38 = vmul.f32 %v711_v35, %v513_v60 }
 0x27b   :  { %v715_v39 = vpop.eup %714  ;;  %575 = vst [vmem:[%s941_s7] sm:$0xff] %v567_v36  ;;  %v568_v40 = vmul.f32 %v713_v37, %v512_v1 }
 0x27c   :  { %v717_v41 = vpop.eup %716  ;;  %577 = vst [vmem:[%s941_s7 + $0x10] sm:$0xff] %v569_v38  ;;  %v570_v42 = vmul.f32 %v715_v39, %v514_v2 }
 0x27d   :  { %v719_v43 = vpop.eup %718  ;;  %576 = vst [vmem:[%s941_s7 + $0x8] sm:$0xff] %v568_v40  ;;  %v571_v44 = vmul.f32 %v717_v41, %v515_v8 }
 0x27e   :  { %v721_v45 = vpop.eup %720  ;;  %578 = vst [vmem:[%s941_s7 + $0x18] sm:$0xff] %v570_v42  ;;  %v573_v46 = vmul.f32 %v719_v43, %v517_v9 }
 0x27f   :  { %v723_v47 = vpop.eup %722  ;;  %579 = vst [vmem:[%s941_s7 + $0x20] sm:$0xff] %v571_v44  ;;  %v572_v48 = vmul.f32 %v721_v45, %v516_v12 }
 0x280   :  { %581 = vst [vmem:[%s941_s7 + $0x30] sm:$0xff] %v573_v46  ;;  %v574_v49 = vmul.f32 %v723_v47, %v518_v13 }
 0x281   :  { %580 = vst [vmem:[%s941_s7 + $0x28] sm:$0xff] %v572_v48 }
 0x282   :  { %582 = vst [vmem:[%s941_s7 + $0x38] sm:$0xff] %v574_v49 }

// kernel: _lambda_.2
= control target key start
LH: loop header
LB: loop body
LE: loop exit
PB: predicated region body
PF: predicated region fallthrough
CT: control target
= control target key end

     0   :  { %vm66_vm0 = vcmask 523264   ;;  %vm1174_vm1 = vcmask 130048   ;;  %vm3161_vm2 = vcmask 261120   ;;  %s11601_s0 = inlined_call_operand.vmem [shape: f32[128,64], index: 0, kind: input, shape index: {}]   ;;  %s11602_s3 = inlined_call_operand.vmem [shape: bf16[2,2,64,16], index: 3, kind: input, shape index: {}]   ;;  %s11603_s4 = inlined_call_operand.vmem [shape: bf16[2,2,64,16], index: 4, kind: input, shape index: {}]   ;;  %s11604_s5 = inlined_call_operand.vmem [shape: bf16[2,2,64,16], index: 5, kind: input, shape index: {}]   ;;  %s11605_s1 = inlined_call_operand.vmem [shape: f32[2,1,64], index: 1, kind: input, shape index: {}]   ;;  %s11606_s2 = inlined_call_operand.vmem [shape: f32[2,1,64], index: 2, kind: input, shape index: {}]   ;;  %s11607_s6 = inlined_call_operand.vmem [shape: bf16[2,2,16,64], index: 6, kind: input, shape index: {}]   ;;  %s11608_s7 = inlined_call_operand.vmem [shape: f32[2,1,64], index: 7, kind: input, shape index: {}]   ;;  %s11609_s10 = inlined_call_operand.vmem [shape: bf16[2,64,32], index: 10, kind: input, shape index: {}]   ;;  %s11610_s8 = inlined_call_operand.vmem [shape: f32[2,1,64], index: 8, kind: input, shape index: {}]   ;;  %s11611_s9 = inlined_call_operand.vmem [shape: f32[2,1,64], index: 9, kind: input, shape index: {}]   ;;  %s11612_s12 = inlined_call_operand.vmem [shape: bf16[2,32,64], index: 12, kind: input, shape index: {}]   ;;  %s11613_s11 = inlined_call_operand.vmem [shape: f32[2,1,32], index: 11, kind: input, shape index: {}]   ;;  %s11614_s13 = inlined_call_operand.vmem [shape: f32[2,1,64], index: 13, kind: input, shape index: {}]   ;;  %s11615_s14 = inlined_call_operand.vmem [shape: f32[128,64], index: 14, kind: output, shape index: {}]  }
   0x1   :  { %v48_v0 = vld [vmem:[%s11601_s0] sm:$0xff]  ;;  %v50_v1 = vld [vmem:[%s11601_s0 + $0x10] sm:$0xff]  ;;  %v49_v2 = vld [vmem:[%s11601_s0 + $0x8] sm:$0xff] }
   0x2   :  { %v67_v3 = vsel %vm66_vm0, %v48_v0, 0.0  ;;  %v73_v4 = vsel %vm66_vm0, %v50_v1, 0.0  ;;  %v51_v5 = vld [vmem:[%s11601_s0 + $0x18] sm:$0xff]  ;;  %v70_v6 = vsel %vm66_vm0, %v49_v2, 0.0  ;;  %v52_v8 = vld [vmem:[%s11601_s0 + $0x20] sm:$0xff]  ;;  %v53_v9 = vld [vmem:[%s11601_s0 + $0x28] sm:$0xff] }
   0x3   :  { %68 = vadd.xlane.f32.xlu0 %v67_v3  ;;  %74 = vadd.xlane.f32.xlu1 %v73_v4  ;;  %v76_v7 = vsel %vm66_vm0, %v51_v5, 0.0  ;;  %v79_v10 = vsel %vm66_vm0, %v52_v8, 0.0  ;;  %v82_v11 = vsel %vm66_vm0, %v53_v9, 0.0  ;;  %v8711_v12 = vld [vmem:[%s11601_s0 + $0x30] sm:$0xff]  ;;  %v8716_v13 = vld [vmem:[%s11601_s0 + $0x38] sm:$0xff]  ;;  %v8725_v16 = vld [vmem:[%s11601_s0 + $0x40] sm:$0xff] }
   0x4   :  { %v85_v14 = vsel %vm66_vm0, %v8711_v12, 0.0  ;;  %v88_v15 = vsel %vm66_vm0, %v8716_v13, 0.0  ;;  %v8730_v17 = vld [vmem:[%s11601_s0 + $0x48] sm:$0xff]  ;;  %v91_v18 = vsel %vm66_vm0, %v8725_v16, 0.0  ;;  %v8739_v20 = vld [vmem:[%s11601_s0 + $0x50] sm:$0xff]  ;;  %v8744_v21 = vld [vmem:[%s11601_s0 + $0x58] sm:$0xff] }
   0x5   :  { %v94_v19 = vsel %vm66_vm0, %v8730_v17, 0.0  ;;  %v97_v22 = vsel %vm66_vm0, %v8739_v20, 0.0  ;;  %v100_v23 = vsel %vm66_vm0, %v8744_v21, 0.0  ;;  %v8753_v24 = vld [vmem:[%s11601_s0 + $0x60] sm:$0xff]  ;;  %v8758_v25 = vld [vmem:[%s11601_s0 + $0x68] sm:$0xff]  ;;  %v8767_v28 = vld [vmem:[%s11601_s0 + $0x70] sm:$0xff] }
   0x6   :  { %v103_v26 = vsel %vm66_vm0, %v8753_v24, 0.0  ;;  %v106_v27 = vsel %vm66_vm0, %v8758_v25, 0.0  ;;  %v8772_v29 = vld [vmem:[%s11601_s0 + $0x78] sm:$0xff]  ;;  %v109_v30 = vsel %vm66_vm0, %v8767_v28, 0.0 }
   0x7   :  { %71 = vadd.xlane.f32.xlu0 %v70_v6  ;;  %77 = vadd.xlane.f32.xlu1 %v76_v7  ;;  %v112_v31 = vsel %vm66_vm0, %v8772_v29, 0.0 }
   0xb   :  { %80 = vadd.xlane.f32.xlu0 %v79_v10  ;;  %83 = vadd.xlane.f32.xlu1 %v82_v11 }
   0xf   :  { %86 = vadd.xlane.f32.xlu0 %v85_v14  ;;  %89 = vadd.xlane.f32.xlu1 %v88_v15 }
  0x13   :  { %92 = vadd.xlane.f32.xlu0 %v91_v18  ;;  %95 = vadd.xlane.f32.xlu1 %v94_v19 }
  0x17   :  { %98 = vadd.xlane.f32.xlu0 %v97_v22  ;;  %101 = vadd.xlane.f32.xlu1 %v100_v23 }
  0x1b   :  { %104 = vadd.xlane.f32.xlu0 %v103_v26  ;;  %107 = vadd.xlane.f32.xlu1 %v106_v27 }
  0x1f   :  { %110 = vadd.xlane.f32.xlu0 %v109_v30  ;;  %113 = vadd.xlane.f32.xlu1 %v112_v31 }
  0x90   :  { %v69_v32 = vpop.xlane.xlu0 %68  ;;  %v75_v33 = vpop.xlane.xlu1 %74 }
  0x91   :  { %v116_v34 = vmul.f32 0.015625, %v69_v32  ;;  %v118_v35 = vmul.f32 0.015625, %v75_v33 }
  0x93   :  { %v8778_v36 = vsub.f32 %v48_v0, %v116_v34  ;;  %v8780_v37 = vsub.f32 %v50_v1, %v118_v35 }
  0x94   :  { %v72_v38 = vpop.xlane.xlu0 %71  ;;  %v78_v39 = vpop.xlane.xlu1 %77 }
  0x95   :  { %v117_v40 = vmul.f32 0.015625, %v72_v38  ;;  %v119_v41 = vmul.f32 0.015625, %v78_v39  ;;  %v148_v42 = vmul.f32 %v8778_v36, %v8778_v36  ;;  %v150_v43 = vmul.f32 %v8780_v37, %v8780_v37 }
  0x97   :  { %v8786_v44 = vsub.f32 %v49_v2, %v117_v40  ;;  %v8788_v45 = vsub.f32 %v51_v5, %v119_v41  ;;  %v164_v46 = vsel %vm66_vm0, %v148_v42, 0.0  ;;  %v170_v49 = vsel %vm66_vm0, %v150_v43, 0.0 }
  0x98   :  { %165 = vadd.xlane.f32.xlu0 %v164_v46  ;;  %v81_v47 = vpop.xlane.xlu0 %80  ;;  %v84_v48 = vpop.xlane.xlu1 %83 }
  0x99   :  { %v120_v50 = vmul.f32 0.015625, %v81_v47  ;;  %v121_v51 = vmul.f32 0.015625, %v84_v48  ;;  %v149_v52 = vmul.f32 %v8786_v44, %v8786_v44  ;;  %v151_v53 = vmul.f32 %v8788_v45, %v8788_v45 }
  0x9b   :  { %v8796_v54 = vsub.f32 %v52_v8, %v120_v50  ;;  %v8798_v55 = vsub.f32 %v53_v9, %v121_v51  ;;  %v167_v56 = vsel %vm66_vm0, %v149_v52, 0.0  ;;  %v173_v59 = vsel %vm66_vm0, %v151_v53, 0.0  ;;  %v8082_v53 = vld [vmem:[%s11602_s3 + $0x20] sm:$0xff]  }
  0x9c   :  { %171 = vadd.xlane.f32.xlu0 %v170_v49  ;;  %168 = vadd.xlane.f32.xlu1 %v167_v56  ;;  %v87_v57 = vpop.xlane.xlu0 %86  ;;  %v90_v58 = vpop.xlane.xlu1 %89  ;;  %v8083_v56 = vld [vmem:[%s11602_s3 + $0x8] sm:$0xff]  }
  0x9d   :  { %v122_v60 = vmul.f32 0.015625, %v87_v57  ;;  %v123_v61 = vmul.f32 0.015625, %v90_v58  ;;  %v152_v62 = vmul.f32 %v8796_v54, %v8796_v54  ;;  %v153_v63 = vmul.f32 %v8798_v55, %v8798_v55  ;;  %7361 = vmatprep.subr.bf16.mxu1 %v8082_v53  ;;  %v8084_v57 = vld [vmem:[%s11602_s3 + $0x28] sm:$0xff]   ;;  %v8085_v58 = vld [vmem:[%s11602_s3 + $0x10] sm:$0xff]  }
  0x9e   :  { %7362 = vmatpush3.bf16.msra.mxu1 %v8082_v53 }
  0x9f   :  { %v8807_v0 = vsub.f32 %v8711_v12, %v122_v60  ;;  %v8810_v1 = vsub.f32 %v8716_v13, %v123_v61  ;;  %v176_v2 = vsel %vm66_vm0, %v152_v62, 0.0  ;;  %v179_v5 = vsel %vm66_vm0, %v153_v63, 0.0  ;;  %7363 = vmatprep.subr.bf16.mxu1 %v8084_v57  ;;  %v8087_v60 = vld [vmem:[%s11602_s3 + $0x18] sm:$0xff]   ;;  %v8895_v62 = vld [vmem:[%s11603_s4] sm:$0xff]  }
  0xa0   :  { %174 = vadd.xlane.f32.xlu1 %v173_v59  ;;  %177 = vadd.xlane.f32.xlu0 %v176_v2  ;;  %v93_v3 = vpop.xlane.xlu0 %92  ;;  %v96_v4 = vpop.xlane.xlu1 %95  ;;  %v8086_v59 = vld [vmem:[%s11602_s3 + $0x30] sm:$0xff]   ;;  %v8088_v61 = vld [vmem:[%s11602_s3 + $0x38] sm:$0xff]   ;;  %v8901_v63 = vld [vmem:[%s11603_s4 + $0x20] sm:$0xff]  }
  0xa1   :  { %v124_v6 = vmul.f32 0.015625, %v93_v3  ;;  %v125_v7 = vmul.f32 0.015625, %v96_v4  ;;  %v154_v8 = vmul.f32 %v8807_v0, %v8807_v0  ;;  %v155_v9 = vmul.f32 %v8810_v1, %v8810_v1 }
  0xa2   :  { %7364 = vmatpush3.bf16.msra.mxu1 %v8084_v57 }
  0xa3   :  { %v8819_v10 = vsub.f32 %v8725_v16, %v124_v6  ;;  %v8822_v11 = vsub.f32 %v8730_v17, %v125_v7  ;;  %v182_v12 = vsel %vm66_vm0, %v154_v8, 0.0  ;;  %v185_v15 = vsel %vm66_vm0, %v155_v9, 0.0  ;;  %7365 = vmatprep.subr.bf16.mxu1 %v8086_v59 }
  0xa4   :  { %180 = vadd.xlane.f32.xlu1 %v179_v5  ;;  %183 = vadd.xlane.f32.xlu0 %v182_v12  ;;  %v99_v13 = vpop.xlane.xlu0 %98  ;;  %v102_v14 = vpop.xlane.xlu1 %101 }
  0xa5   :  { %v126_v18 = vmul.f32 0.015625, %v99_v13  ;;  %v127_v19 = vmul.f32 0.015625, %v102_v14  ;;  %v156_v22 = vmul.f32 %v8819_v10, %v8819_v10  ;;  %v157_v16 = vmul.f32 %v8822_v11, %v8822_v11 }
  0xa6   :  { %7366 = vmatpush3.bf16.msra.mxu1 %v8086_v59 }
  0xa7   :  { %v8831_v23 = vsub.f32 %v8739_v20, %v126_v18  ;;  %v8834_v17 = vsub.f32 %v8744_v21, %v127_v19  ;;  %v188_v26 = vsel %vm66_vm0, %v156_v22, 0.0  ;;  %v191_v31 = vsel %vm66_vm0, %v157_v16, 0.0  ;;  %7367 = vmatprep.subr.bf16.mxu1 %v8088_v61 }
  0xa8   :  { %186 = vadd.xlane.f32.xlu1 %v185_v15  ;;  %189 = vadd.xlane.f32.xlu0 %v188_v26  ;;  %v105_v27 = vpop.xlane.xlu0 %104  ;;  %v108_v30 = vpop.xlane.xlu1 %107 }
  0xa9   :  { %v128_v32 = vmul.f32 0.015625, %v105_v27  ;;  %v129_v33 = vmul.f32 0.015625, %v108_v30  ;;  %v158_v34 = vmul.f32 %v8831_v23, %v8831_v23  ;;  %v159_v20 = vmul.f32 %v8834_v17, %v8834_v17 }
  0xaa   :  { %7368 = vmatpush3.bf16.msra.mxu1 %v8088_v61 }
  0xab   :  { %v8843_v35 = vsub.f32 %v8753_v24, %v128_v32  ;;  %v8846_v21 = vsub.f32 %v8758_v25, %v129_v33  ;;  %v194_v38 = vsel %vm66_vm0, %v158_v34, 0.0  ;;  %v197_v41 = vsel %vm66_vm0, %v159_v20, 0.0  ;;  %7409 = vmatprep.subr.bf16.mxu1 %v8901_v63 }
  0xac   :  { %192 = vadd.xlane.f32.xlu1 %v191_v31  ;;  %195 = vadd.xlane.f32.xlu0 %v194_v38  ;;  %v111_v39 = vpop.xlane.xlu0 %110  ;;  %v114_v40 = vpop.xlane.xlu1 %113 }
  0xad   :  { %v130_v42 = vmul.f32 0.015625, %v111_v39  ;;  %v131_v43 = vmul.f32 0.015625, %v114_v40  ;;  %v160_v46 = vmul.f32 %v8843_v35, %v8843_v35  ;;  %v161_v24 = vmul.f32 %v8846_v21, %v8846_v21  ;;  %v8908_v39 = vld [vmem:[%s11605_s1] ss:$0 sm:$0xff] }
  0xaf   :  { %v8855_v47 = vsub.f32 %v8767_v28, %v130_v42  ;;  %v8858_v25 = vsub.f32 %v8772_v29, %v131_v43  ;;  %v200_v48 = vsel %vm66_vm0, %v160_v46, 0.0  ;;  %v203_v49 = vsel %vm66_vm0, %v161_v24, 0.0  ;;  %v8081_v28 = vld [vmem:[%s11602_s3] sm:$0xff]  }
  0xb0   :  { %198 = vadd.xlane.f32.xlu1 %v197_v41  ;;  %201 = vadd.xlane.f32.xlu0 %v200_v48 }
  0xb1   :  { %v162_v50 = vmul.f32 %v8855_v47, %v8855_v47  ;;  %v163_v51 = vmul.f32 %v8858_v25, %v8858_v25  ;;  %7337 = vmatprep.subr.bf16.mxu0 %v8081_v28 }
  0xb2   :  { %7338 = vmatpush3.bf16.msra.mxu0 %v8081_v28 }
  0xb3   :  { %v206_v52 = vsel %vm66_vm0, %v162_v50, 0.0  ;;  %v209_v29 = vsel %vm66_vm0, %v163_v51, 0.0  ;;  %7339 = vmatprep.subr.bf16.mxu0 %v8083_v56  ;;  %v8915_v51 = vld [vmem:[%s11606_s2] ss:$0 sm:$0xff] }
  0xb4   :  { %204 = vadd.xlane.f32.xlu1 %v203_v49  ;;  %207 = vadd.xlane.f32.xlu0 %v206_v52 }
  0xb6   :  { %7340 = vmatpush3.bf16.msra.mxu0 %v8083_v56 }
  0xb7   :  { %7341 = vmatprep.subr.bf16.mxu0 %v8085_v58 }
  0xb8   :  { %210 = vadd.xlane.f32.xlu1 %v209_v29 }
  0xba   :  { %7342 = vmatpush3.bf16.msra.mxu0 %v8085_v58 }
  0xbb   :  { %7343 = vmatprep.subr.bf16.mxu0 %v8087_v60 }
  0xbe   :  { %7344 = vmatpush3.bf16.msra.mxu0 %v8087_v60 }
  0xbf   :  { %7385 = vmatprep.subr.bf16.mxu0 %v8895_v62 }
 0x125   :  { %v166_v2 = vpop.xlane.xlu0 %165 }
 0x126   :  { %v212_v3 = vmul.f32 0.015625, %v166_v2 }
 0x128   :  { %v228_v4 = vadd.f32 1e-05, %v212_v3 }
 0x129   :  { %v169_v5 = vpop.xlane.xlu1 %168  ;;  %v172_v6 = vpop.xlane.xlu0 %171 }
 0x12a   :  { %8145 = vrsqrt.f32 %v228_v4  ;;  %v213_v7 = vmul.f32 0.015625, %v169_v5  ;;  %v214_v8 = vmul.f32 0.015625, %v172_v6 }
 0x12c   :  { %v229_v9 = vadd.f32 1e-05, %v213_v7  ;;  %v230_v12 = vadd.f32 1e-05, %v214_v8 }
 0x12d   :  { %v175_v13 = vpop.xlane.xlu1 %174  ;;  %v178_v14 = vpop.xlane.xlu0 %177 }
 0x12e   :  { %8147 = vrsqrt.f32 %v229_v9  ;;  %v215_v15 = vmul.f32 0.015625, %v175_v13  ;;  %v216_v18 = vmul.f32 0.015625, %v178_v14 }
 0x12f   :  { %8149 = vrsqrt.f32 %v230_v12 }
 0x130   :  { %v231_v19 = vadd.f32 1e-05, %v215_v15  ;;  %v232_v22 = vadd.f32 1e-05, %v216_v18 }
 0x131   :  { %v181_v16 = vpop.xlane.xlu1 %180  ;;  %v184_v26 = vpop.xlane.xlu0 %183 }
 0x132   :  { %8151 = vrsqrt.f32 %v231_v19  ;;  %v217_v27 = vmul.f32 0.015625, %v181_v16  ;;  %v218_v30 = vmul.f32 0.015625, %v184_v26 }
 0x133   :  { %8153 = vrsqrt.f32 %v232_v22 }
 0x134   :  { %v8146_v31 = vpop.eup %8145  ;;  %v233_v32 = vadd.f32 1e-05, %v217_v27  ;;  %v234_v33 = vadd.f32 1e-05, %v218_v30 }
 0x135   :  { %v260_v34 = vmul.f32 %v8146_v31, %v8778_v36  ;;  %v187_v20 = vpop.xlane.xlu1 %186  ;;  %v190_v38 = vpop.xlane.xlu0 %189 }
 0x136   :  { %8155 = vrsqrt.f32 %v233_v32  ;;  %v219_v40 = vmul.f32 0.015625, %v187_v20  ;;  %v220_v41 = vmul.f32 0.015625, %v190_v38  ;;  %v8093_v32 = vld [vmem:[%s11603_s4 + $0x28] sm:$0xff]  }
 0x137   :  { %8157 = vrsqrt.f32 %v234_v33  ;;  %v282_v48 = vmul.f32 %v8908_v39, %v260_v34 }
 0x138   :  { %v8148_v42 = vpop.eup %8147  ;;  %v235_v43 = vadd.f32 1e-05, %v219_v40  ;;  %v236_v46 = vadd.f32 1e-05, %v220_v41 }
 0x139   :  { %v8150_v24 = vpop.eup %8149  ;;  %v261_v49 = vmul.f32 %v8148_v42, %v8786_v44  ;;  %v193_v36 = vpop.xlane.xlu1 %192  ;;  %v304_v44 = vadd.f32 %v8915_v51, %v282_v48 }
 0x13a   :  { %v196_v50 = vpop.xlane.xlu0 %195  ;;  %v262_v52 = vmul.f32 %v8150_v24, %v8780_v37  ;;  %8159 = vrsqrt.f32 %v235_v43  ;;  %v221_v28 = vmul.f32 0.015625, %v193_v36 }
 0x13b   :  { %v222_v29 = vmul.f32 0.015625, %v196_v50  ;;  %v283_v53 = vmul.f32 %v8908_v39, %v261_v49  ;;  %8161 = vrsqrt.f32 %v236_v46  ;;  %v8091_v49 = vld [vmem:[%s11603_s4 + $0x10] sm:$0xff]  }
 0x13c   :  { %v8152_v56 = vpop.eup %8151  ;;  %v237_v57 = vadd.f32 1e-05, %v221_v28  ;;  %v284_v61 = vmul.f32 %v8908_v39, %v262_v52 }
 0x13d   :  { %v238_v58 = vadd.f32 1e-05, %v222_v29  ;;  %v8154_v59 = vpop.eup %8153  ;;  %v305_v60 = vadd.f32 %v8915_v51, %v283_v53  ;;  %v263_v2 = vmul.f32 %v8152_v56, %v8788_v45  ;;  %v199_v3 = vpop.xlane.xlu1 %198 }
 0x13e   :  { %v202_v37 = vpop.xlane.xlu0 %201  ;;  %v264_v4 = vmul.f32 %v8154_v59, %v8796_v54  ;;  %8163 = vrsqrt.f32 %v237_v57  ;;  %v223_v5 = vmul.f32 0.015625, %v199_v3  ;;  %v306_v15 = vadd.f32 %v8915_v51, %v284_v61 }
 0x13f   :  { %v285_v6 = vmul.f32 %v8908_v39, %v263_v2  ;;  %8165 = vrsqrt.f32 %v238_v58  ;;  %v224_v7 = vmul.f32 0.015625, %v202_v37  ;;  %v8925_v8 = vpack.c.bf16 %v305_v60, %v304_v44  ;;  %v8096_v58 = vld [vmem:[%s11603_s4 + $0x38] sm:$0xff]  }
 0x140   :  { %v8156_v9 = vpop.eup %8155  ;;  %v286_v12 = vmul.f32 %v8908_v39, %v264_v4  ;;  %v239_v13 = vadd.f32 1e-05, %v223_v5  ;;  %v8098_v5 = vld [vmem:[%s11604_s5 + $0x20] sm:$0xff]  }
 0x141   :  { %v8158_v14 = vpop.eup %8157  ;;  %v307_v45 = vadd.f32 %v8915_v51, %v285_v6  ;;  %v265_v18 = vmul.f32 %v8156_v9, %v8798_v55  ;;  %v240_v54 = vadd.f32 1e-05, %v224_v7  ;;  %v205_v19 = vpop.xlane.xlu1 %204  ;;  %7345 = vmatprep.mubr.msk.bf16.mxu0 %vm66_vm0, %v8925_v8  ;;  %7369 = vmatprep.mubr.msk.bf16.mxu1 %vm66_vm0, %v8925_v8  ;;  %v8090_v55 = vld [vmem:[%s11603_s4 + $0x8] sm:$0xff]  }
 0x142   :  { %v208_v22 = vpop.xlane.xlu0 %207  ;;  %v266_v16 = vmul.f32 %v8158_v14, %v8807_v0  ;;  %8167 = vrsqrt.f32 %v239_v13  ;;  %v225_v26 = vmul.f32 0.015625, %v205_v19  ;;  %v308_v34 = vadd.f32 %v8915_v51, %v286_v12 }
 0x143   :  { %v287_v27 = vmul.f32 %v8908_v39, %v265_v18  ;;  %8169 = vrsqrt.f32 %v240_v54  ;;  %v226_v30 = vmul.f32 0.015625, %v208_v22  ;;  %v8937_v31 = vpack.c.bf16 %v307_v45, %v306_v15 }
 0x144   :  { %v8160_v33 = vpop.eup %8159  ;;  %v241_v0 = vadd.f32 1e-05, %v225_v26  ;;  %v288_v40 = vmul.f32 %v8908_v39, %v266_v16 }
 0x145   :  { %v8162_v20 = vpop.eup %8161  ;;  %v309_v38 = vadd.f32 %v8915_v51, %v287_v27  ;;  %v267_v41 = vmul.f32 %v8160_v33, %v8810_v1  ;;  %v242_v42 = vadd.f32 1e-05, %v226_v30  ;;  %v211_v43 = vpop.xlane.xlu1 %210  ;;  %7346 = vmatmul.mubr.msk.bf16.vlgmr.msra.gmra.mrb[0].mxu0 %vm66_vm0, %v8937_v31  ;;  %7370 = vmatmul.mubr.msk.bf16.vlgmr.msra.gmra.mrb[0].mxu1 %vm66_vm0, %v8937_v31  ;;  %v8104_v33 = vld [vmem:[%s11604_s5 + $0x38] sm:$0xff]  }
 0x146   :  { %v268_v46 = vmul.f32 %v8162_v20, %v8819_v10  ;;  %8171 = vrsqrt.f32 %v241_v0  ;;  %v227_v24 = vmul.f32 0.015625, %v211_v43  ;;  %7386 = vmatpush3.bf16.msra.mxu0 %v8895_v62  ;;  %7410 = vmatpush3.bf16.msra.mxu1 %v8901_v63  ;;  %v8095_v10 = vld [vmem:[%s11603_s4 + $0x30] sm:$0xff]   ;;  %v310_v52 = vadd.f32 %v8915_v51, %v288_v40 }
 0x147   :  { %v289_v48 = vmul.f32 %v8908_v39, %v267_v41  ;;  %8173 = vrsqrt.f32 %v242_v42  ;;  %v8957_v1 = vpack.c.bf16 %v309_v38, %v308_v34  ;;  %7387 = vmatprep.subr.bf16.mxu0 %v8090_v55  ;;  %7411 = vmatprep.subr.bf16.mxu1 %v8093_v32 }
 0x148   :  { %v8164_v36 = vpop.eup %8163  ;;  %v290_v62 = vmul.f32 %v8908_v39, %v268_v46  ;;  %v243_v50 = vadd.f32 1e-05, %v227_v24 }
 0x149   :  { %v8166_v63 = vpop.eup %8165  ;;  %v311_v28 = vadd.f32 %v8915_v51, %v289_v48  ;;  %v269_v29 = vmul.f32 %v8164_v36, %v8822_v11  ;;  %7349 = vmatprep.mubr.msk.bf16.mxu0 %vm66_vm0, %v8957_v1  ;;  %7373 = vmatprep.mubr.msk.bf16.mxu1 %vm66_vm0, %v8957_v1  ;;  %v8094_v11 = vld [vmem:[%s11603_s4 + $0x18] sm:$0xff]  }
 0x14a   :  { %v270_v53 = vmul.f32 %v8166_v63, %v8831_v23  ;;  %8175 = vrsqrt.f32 %v243_v50  ;;  %7388 = vmatpush3.bf16.msra.mxu0 %v8090_v55  ;;  %7412 = vmatpush3.bf16.msra.mxu1 %v8093_v32  ;;  %v312_v23 = vadd.f32 %v8915_v51, %v290_v62  ;;  %v8102_v55 = vld [vmem:[%s11604_s5 + $0x30] sm:$0xff]   ;;  %v8103_v32 = vld [vmem:[%s11604_s5 + $0x18] sm:$0xff]  }
 0x14b   :  { %v291_v56 = vmul.f32 %v8908_v39, %v269_v29  ;;  %v8975_v57 = vpack.c.bf16 %v311_v28, %v310_v52  ;;  %7389 = vmatprep.subr.bf16.mxu0 %v8091_v49  ;;  %7413 = vmatprep.subr.bf16.mxu1 %v8095_v10 }
 0x14c   :  { %v8168_v59 = vpop.eup %8167  ;;  %v292_v61 = vmul.f32 %v8908_v39, %v270_v53 }
 0x14d   :  { %v8170_v44 = vpop.eup %8169  ;;  %v313_v60 = vadd.f32 %v8915_v51, %v291_v56  ;;  %v271_v2 = vmul.f32 %v8168_v59, %v8834_v17  ;;  %7350 = vmatmul.mubr.msk.bf16.gmra.mrb[4].mxu0 %vm66_vm0, %v8975_v57  ;;  %7374 = vmatmul.mubr.msk.bf16.gmra.mrb[4].mxu1 %vm66_vm0, %v8975_v57  ;;  %v8097_v17 = vld [vmem:[%s11604_s5] sm:$0xff]  }
 0x14e   :  { %v272_v3 = vmul.f32 %v8170_v44, %v8843_v35  ;;  %7390 = vmatpush3.bf16.msra.mxu0 %v8091_v49  ;;  %7414 = vmatpush3.bf16.msra.mxu1 %v8095_v10  ;;  %v314_v9 = vadd.f32 %v8915_v51, %v292_v61 }
 0x14f   :  { %v293_v37 = vmul.f32 %v8908_v39, %v271_v2  ;;  %v8993_v4 = vpack.c.bf16 %v313_v60, %v312_v23  ;;  %7391 = vmatprep.subr.bf16.mxu0 %v8094_v11  ;;  %7415 = vmatprep.subr.bf16.mxu1 %v8096_v58 }
 0x150   :  { %v8172_v6 = vpop.eup %8171  ;;  %v294_v7 = vmul.f32 %v8908_v39, %v272_v3 }
 0x151   :  { %v8174_v35 = vpop.eup %8173  ;;  %v315_v12 = vadd.f32 %v8915_v51, %v293_v37  ;;  %v273_v13 = vmul.f32 %v8172_v6, %v8846_v21  ;;  %7353 = vmatprep.mubr.msk.bf16.mxu0 %vm66_vm0, %v8993_v4  ;;  %7377 = vmatprep.mubr.msk.bf16.mxu1 %vm66_vm0, %v8993_v4 }
 0x152   :  { %v274_v14 = vmul.f32 %v8174_v35, %v8855_v47  ;;  %7392 = vmatpush3.bf16.msra.mxu0 %v8094_v11  ;;  %7416 = vmatpush3.bf16.msra.mxu1 %v8096_v58  ;;  %v316_v54 = vadd.f32 %v8915_v51, %v294_v7 }
 0x153   :  { %v295_v15 = vmul.f32 %v8908_v39, %v273_v13  ;;  %v9011_v45 = vpack.c.bf16 %v315_v12, %v314_v9  ;;  %7433 = vmatprep.subr.bf16.mxu0 %v8097_v17  ;;  %7457 = vmatprep.subr.bf16.mxu1 %v8098_v5 }
 0x154   :  { %v8176_v18 = vpop.eup %8175  ;;  %v296_v19 = vmul.f32 %v8908_v39, %v274_v14 }
 0x155   :  { %v317_v21 = vadd.f32 %v8915_v51, %v295_v15  ;;  %v275_v22 = vmul.f32 %v8176_v18, %v8858_v25  ;;  %7354 = vmatmul.mubr.msk.bf16.gmra.mrb[8].mxu0 %vm66_vm0, %v9011_v45  ;;  %7378 = vmatmul.mubr.msk.bf16.gmra.mrb[8].mxu1 %vm66_vm0, %v9011_v45  ;;  %v8099_v25 = vld [vmem:[%s11604_s5 + $0x8] sm:$0xff]  }
 0x156   :  { %v318_v26 = vadd.f32 %v8915_v51, %v296_v19 }
 0x157   :  { %v297_v47 = vmul.f32 %v8908_v39, %v275_v22  ;;  %v326_v16 = vpack.c.bf16 %v317_v21, %v316_v54  ;;  %v8100_v39 = vld [vmem:[%s11604_s5 + $0x28] sm:$0xff]  }
 0x159   :  { %v319_v27 = vadd.f32 %v8915_v51, %v297_v47  ;;  %7357 = vmatprep.mubr.msk.bf16.mxu0 %vm66_vm0, %v326_v16  ;;  %7381 = vmatprep.mubr.msk.bf16.mxu1 %vm66_vm0, %v326_v16  ;;  %v8101_v51 = vld [vmem:[%s11604_s5 + $0x10] sm:$0xff]  }
 0x15b   :  { %v327_v30 = vpack.c.bf16 %v319_v27, %v318_v26 }
 0x15d   :  { %7358 = vmatmul.mubr.msk.bf16.gmra.mrb[12].mxu0 %vm66_vm0, %v327_v30  ;;  %7382 = vmatmul.mubr.msk.bf16.gmra.mrb[12].mxu1 %vm66_vm0, %v327_v30 }
 0x15e   :  { %7393 = vmatprep.mubr.msk.bf16.mxu0 %vm66_vm0, %v8925_v8  ;;  %7417 = vmatprep.mubr.msk.bf16.mxu1 %vm66_vm0, %v8925_v8 }
 0x165   :  { %7394 = vmatmul.mubr.msk.bf16.vlgmr.msra.gmra.mrb[16].mxu0 %vm66_vm0, %v8937_v31  ;;  %7418 = vmatmul.mubr.msk.bf16.vlgmr.msra.gmra.mrb[16].mxu1 %vm66_vm0, %v8937_v31 }
 0x166   :  { %7397 = vmatprep.mubr.msk.bf16.mxu0 %vm66_vm0, %v8957_v1  ;;  %7421 = vmatprep.mubr.msk.bf16.mxu1 %vm66_vm0, %v8957_v1 }
 0x167   :  { %7434 = vmatpush3.bf16.msra.mxu0 %v8097_v17  ;;  %7458 = vmatpush3.bf16.msra.mxu1 %v8098_v5 }
 0x168   :  { %7435 = vmatprep.subr.bf16.mxu0 %v8099_v25  ;;  %7459 = vmatprep.subr.bf16.mxu1 %v8100_v39 }
 0x16b   :  { %7436 = vmatpush3.bf16.msra.mxu0 %v8099_v25  ;;  %7460 = vmatpush3.bf16.msra.mxu1 %v8100_v39 }
 0x16c   :  { %7437 = vmatprep.subr.bf16.mxu0 %v8101_v51  ;;  %7461 = vmatprep.subr.bf16.mxu1 %v8102_v55 }
 0x16d   :  { %7398 = vmatmul.mubr.msk.bf16.gmra.mrb[20].mxu0 %vm66_vm0, %v8975_v57  ;;  %7422 = vmatmul.mubr.msk.bf16.gmra.mrb[20].mxu1 %vm66_vm0, %v8975_v57 }
 0x16e   :  { %7401 = vmatprep.mubr.msk.bf16.mxu0 %vm66_vm0, %v8993_v4  ;;  %7425 = vmatprep.mubr.msk.bf16.mxu1 %vm66_vm0, %v8993_v4 }
 0x16f   :  { %7438 = vmatpush3.bf16.msra.mxu0 %v8101_v51  ;;  %7462 = vmatpush3.bf16.msra.mxu1 %v8102_v55 }
 0x170   :  { %7439 = vmatprep.subr.bf16.mxu0 %v8103_v32  ;;  %7463 = vmatprep.subr.bf16.mxu1 %v8104_v33 }
 0x173   :  { %7440 = vmatpush3.bf16.msra.mxu0 %v8103_v32  ;;  %7464 = vmatpush3.bf16.msra.mxu1 %v8104_v33 }
 0x175   :  { %7402 = vmatmul.mubr.msk.bf16.gmra.mrb[24].mxu0 %vm66_vm0, %v9011_v45  ;;  %7426 = vmatmul.mubr.msk.bf16.gmra.mrb[24].mxu1 %vm66_vm0, %v9011_v45 }
 0x176   :  { %7405 = vmatprep.mubr.msk.bf16.mxu0 %vm66_vm0, %v326_v16  ;;  %7429 = vmatprep.mubr.msk.bf16.mxu1 %vm66_vm0, %v326_v16 }
 0x17d   :  { %7406 = vmatmul.mubr.msk.bf16.gmra.mrb[28].mxu0 %vm66_vm0, %v327_v30  ;;  %7430 = vmatmul.mubr.msk.bf16.gmra.mrb[28].mxu1 %vm66_vm0, %v327_v30 }
 0x17e   :  { %7441 = vmatprep.mubr.msk.bf16.mxu0 %vm66_vm0, %v8925_v8  ;;  %7465 = vmatprep.mubr.msk.bf16.mxu1 %vm66_vm0, %v8925_v8 }
 0x185   :  { %7442 = vmatmul.mubr.msk.bf16.vlgmr.msra.gmra.mrb[32].mxu0 %vm66_vm0, %v8937_v31  ;;  %7466 = vmatmul.mubr.msk.bf16.vlgmr.msra.gmra.mrb[32].mxu1 %vm66_vm0, %v8937_v31 }
 0x186   :  { %7445 = vmatprep.mubr.msk.bf16.mxu0 %vm66_vm0, %v8957_v1  ;;  %7469 = vmatprep.mubr.msk.bf16.mxu1 %vm66_vm0, %v8957_v1 }
 0x18d   :  { %7446 = vmatmul.mubr.msk.bf16.gmra.mrb[36].mxu0 %vm66_vm0, %v8975_v57  ;;  %7470 = vmatmul.mubr.msk.bf16.gmra.mrb[36].mxu1 %vm66_vm0, %v8975_v57 }
 0x18e   :  { %7449 = vmatprep.mubr.msk.bf16.mxu0 %vm66_vm0, %v8993_v4  ;;  %7473 = vmatprep.mubr.msk.bf16.mxu1 %vm66_vm0, %v8993_v4 }
 0x195   :  { %7450 = vmatmul.mubr.msk.bf16.gmra.mrb[40].mxu0 %vm66_vm0, %v9011_v45  ;;  %7474 = vmatmul.mubr.msk.bf16.gmra.mrb[40].mxu1 %vm66_vm0, %v9011_v45 }
 0x196   :  { %7453 = vmatprep.mubr.msk.bf16.mxu0 %vm66_vm0, %v326_v16  ;;  %7477 = vmatprep.mubr.msk.bf16.mxu1 %vm66_vm0, %v326_v16 }
 0x19d   :  { %7454 = vmatmul.mubr.msk.bf16.gmra.mrb[44].mxu0 %vm66_vm0, %v327_v30  ;;  %7478 = vmatmul.mubr.msk.bf16.gmra.mrb[44].mxu1 %vm66_vm0, %v327_v30 }
 0x218   :  { %v9102_v8 = vpop.f32.mrb[0].mxu0  ;;  %v9104_v31 = vpop.f32.mrb[0].mxu1 }
 0x219   :  { %v426_v34 = vpop.f32.mrb[1].mxu0  ;;  %v9106_v0 = vpop.f32.mrb[1].mxu1 }
 0x21a   :  { %v9108_v20 = vpop.f32.mrb[2].mxu0  ;;  %v9110_v38 = vpop.f32.mrb[2].mxu1 }
 0x21b   :  { %v1127_v40 = vpack.c.bf16 %v9108_v20, %v9102_v8  ;;  %v1135_v41 = vpack.c.bf16 %v9110_v38, %v9104_v31  ;;  %v429_v42 = vpop.f32.mrb[3].mxu0  ;;  %v9116_v43 = vpop.f32.mrb[3].mxu1 }
 0x21c   :  { %v1126_v46 = vpack.c.bf16 %v429_v42, %v426_v34  ;;  %v1134_v24 = vpack.c.bf16 %v9116_v43, %v9106_v0 }
 0x21e   :  { %7489 = vmatprep.mubr.msk.bf16.mxu0 %vm1174_vm1, %v1126_v46 }
 0x220   :  { %v9121_v48 = vpop.f32.mrb[4].mxu0  ;;  %v9123_v1 = vpop.f32.mrb[4].mxu1 }
 0x221   :  { %v9125_v49 = vpop.f32.mrb[5].mxu0  ;;  %v9127_v10 = vpop.f32.mrb[5].mxu1 }
 0x222   :  { %v9129_v36 = vpop.f32.mrb[6].mxu0  ;;  %v9131_v62 = vpop.f32.mrb[6].mxu1 }
 0x223   :  { %v1129_v50 = vpack.c.bf16 %v9129_v36, %v9121_v48  ;;  %v1137_v63 = vpack.c.bf16 %v9131_v62, %v9123_v1  ;;  %v9137_v52 = vpop.f32.mrb[7].mxu0  ;;  %v9139_v28 = vpop.f32.mrb[7].mxu1 }
 0x224   :  { %v1128_v29 = vpack.c.bf16 %v9137_v52, %v9125_v49  ;;  %v1136_v53 = vpack.c.bf16 %v9139_v28, %v9127_v10 }
 0x228   :  { %v9145_v56 = vpop.f32.mrb[8].mxu0  ;;  %v9147_v57 = vpop.f32.mrb[8].mxu1 }
 0x229   :  { %v458_v11 = vpop.f32.mrb[9].mxu0  ;;  %v9149_v58 = vpop.f32.mrb[9].mxu1 }
 0x22a   :  { %v9151_v59 = vpop.f32.mrb[10].mxu0  ;;  %v9153_v23 = vpop.f32.mrb[10].mxu1 }
 0x22b   :  { %v1131_v44 = vpack.c.bf16 %v9151_v59, %v9145_v56  ;;  %v1139_v60 = vpack.c.bf16 %v9153_v23, %v9147_v57  ;;  %v461_v61 = vpop.f32.mrb[11].mxu0  ;;  %v9159_v2 = vpop.f32.mrb[11].mxu1 }
 0x22c   :  { %v1130_v3 = vpack.c.bf16 %v461_v61, %v458_v11  ;;  %v1138_v37 = vpack.c.bf16 %v9159_v2, %v9149_v58 }
 0x22e   :  { %7505 = vmatprep.mubr.msk.bf16.mxu1 %vm1174_vm1, %v1130_v3 }
 0x230   :  { %v9164_v4 = vpop.f32.mrb[12].mxu0  ;;  %v9166_v17 = vpop.f32.mrb[12].mxu1 }
 0x231   :  { %v9168_v5 = vpop.f32.mrb[13].mxu0  ;;  %v9170_v6 = vpop.f32.mrb[13].mxu1 }
 0x232   :  { %v9172_v7 = vpop.f32.mrb[14].mxu0  ;;  %v9174_v35 = vpop.f32.mrb[14].mxu1 }
 0x233   :  { %v1133_v9 = vpack.c.bf16 %v9172_v7, %v9164_v4  ;;  %v9180_v13 = vpop.f32.mrb[15].mxu0  ;;  %v9182_v14 = vpop.f32.mrb[15].mxu1 }
 0x234   :  { %v1132_v15 = vpack.c.bf16 %v9180_v13, %v9168_v5  ;;  %v11624_v38 = vpack.c.bf16 %v9182_v14, %v9170_v6 }
 0x238   :  { %v7395_v18 = vpop.f32.mrb[16].mxu0  ;;  %v7419_v54 = vpop.f32.mrb[16].mxu1 }
 0x239   :  { %v684_v21 = vpop.f32.mrb[17].mxu0  ;;  %v805_v19 = vpop.f32.mrb[17].mxu1 }
 0x23a   :  { %v7396_v22 = vpop.f32.mrb[18].mxu0  ;;  %v7420_v47 = vpop.f32.mrb[18].mxu1 }
 0x23b   :  { %v1143_v16 = vpack.c.bf16 %v7396_v22, %v7395_v18  ;;  %v9188_v26 = vpack.c.bf16 %v7420_v47, %v7419_v54  ;;  %v687_v27 = vpop.f32.mrb[19].mxu0  ;;  %v808_v30 = vpop.f32.mrb[19].mxu1 }
 0x23c   :  { %v1142_v25 = vpack.c.bf16 %v687_v27, %v684_v21  ;;  %v9190_v39 = vpack.c.bf16 %v808_v30, %v805_v19 }
 0x23d   :  { %v1191_v19 = vsel %vm1174_vm1, %v1143_v16, 0 }
 0x23e   :  { %v1188_v51 = vsel %vm1174_vm1, %v1142_v25, 0  ;;  %8049 = vmatprep.subr.msk.bf16.mxu0 %vm1174_vm1, %v1142_v25 }
 0x23f   :  { %7482 = vmatpush3.bf16.xpose.msra.mxu0 %v1188_v51 }
 0x240   :  { %v7399_v55 = vpop.f32.mrb[20].mxu0  ;;  %v7423_v32 = vpop.f32.mrb[20].mxu1  ;;  %8050 = vmatprep.subr.msk.bf16.mxu0 %vm1174_vm1, %v1143_v16 }
 0x241   :  { %v700_v33 = vpop.f32.mrb[21].mxu0  ;;  %v821_v34 = vpop.f32.mrb[21].mxu1 }
 0x242   :  { %v7400_v42 = vpop.f32.mrb[22].mxu0  ;;  %v7424_v46 = vpop.f32.mrb[22].mxu1 }
 0x243   :  { %v1145_v11 = vpack.c.bf16 %v7400_v42, %v7399_v55  ;;  %v9195_v61 = vpack.c.bf16 %v7424_v46, %v7423_v32  ;;  %v703_v3 = vpop.f32.mrb[23].mxu0  ;;  %v824_v18 = vpop.f32.mrb[23].mxu1 }
 0x244   :  { %v1144_v54 = vpack.c.bf16 %v703_v3, %v700_v33  ;;  %v9197_v21 = vpack.c.bf16 %v824_v18, %v821_v34 }
 0x246   :  { %v1194_v34 = vsel %vm1174_vm1, %v1144_v54, 0 }
 0x247   :  { %7484 = vmatpush3.bf16.xpose.msra.mxu0 %v1191_v19 }
 0x248   :  { %v7403_v22 = vpop.f32.mrb[24].mxu0  ;;  %v7427_v47 = vpop.f32.mrb[24].mxu1  ;;  %8051 = vmatprep.subr.msk.bf16.mxu0 %vm1174_vm1, %v1144_v54 }
 0x249   :  { %v716_v27 = vpop.f32.mrb[25].mxu0  ;;  %v837_v30 = vpop.f32.mrb[25].mxu1 }
 0x24a   :  { %v7404_v25 = vpop.f32.mrb[26].mxu0  ;;  %v7428_v51 = vpop.f32.mrb[26].mxu1 }
 0x24b   :  { %v1147_v12 = vpack.c.bf16 %v7404_v25, %v7403_v22  ;;  %v9201_v55 = vpack.c.bf16 %v7428_v51, %v7427_v47  ;;  %v719_v32 = vpop.f32.mrb[27].mxu0  ;;  %v840_v42 = vpop.f32.mrb[27].mxu1 }
 0x24c   :  { %v1146_v46 = vpack.c.bf16 %v719_v32, %v716_v27  ;;  %v9203_v33 = vpack.c.bf16 %v840_v42, %v837_v30 }
 0x24e   :  { %v1277_v16 = vsel %vm1174_vm1, %v1146_v46, 0  ;;  %8053 = vmatprep.subr.msk.bf16.mxu1 %vm1174_vm1, %v1146_v46  ;;  %v1197_v46 = vsel %vm1174_vm1, %v1145_v11, 0 }
 0x24f   :  { %7486 = vmatpush3.bf16.xpose.msra.mxu0 %v1194_v34  ;;  %7498 = vmatpush3.bf16.xpose.msra.mxu1 %v1277_v16  ;;  %v1280_v34 = vsel %vm1174_vm1, %v1147_v12, 0 }
 0x250   :  { %v7407_v3 = vpop.f32.mrb[28].mxu0  ;;  %v7431_v18 = vpop.f32.mrb[28].mxu1  ;;  %8052 = vmatprep.subr.msk.bf16.mxu0 %vm1174_vm1, %v1145_v11  ;;  %8054 = vmatprep.subr.msk.bf16.mxu1 %vm1174_vm1, %v1147_v12 }
 0x251   :  { %v732_v19 = vpop.f32.mrb[29].mxu0  ;;  %v853_v22 = vpop.f32.mrb[29].mxu1 }
 0x252   :  { %v7408_v47 = vpop.f32.mrb[30].mxu0  ;;  %v7432_v27 = vpop.f32.mrb[30].mxu1 }
 0x253   :  { %v1149_v30 = vpack.c.bf16 %v7408_v47, %v7407_v3  ;;  %v9210_v25 = vpack.c.bf16 %v7432_v27, %v7431_v18  ;;  %v735_v54 = vpop.f32.mrb[31].mxu0  ;;  %v856_v51 = vpop.f32.mrb[31].mxu1 }
 0x254   :  { %v1148_v32 = vpack.c.bf16 %v735_v54, %v732_v19  ;;  %v9212_v42 = vpack.c.bf16 %v856_v51, %v853_v22 }
 0x255   :  { %v1464_v31 = vsel %vm1174_vm1, %v9210_v25, 0 }
 0x256   :  { %v1461_v4 = vsel %vm1174_vm1, %v9212_v42, 0 }
 0x257   :  { %7488 = vmatpush3.bf16.xpose.msra.mxu0 %v1197_v46  ;;  %7500 = vmatpush3.bf16.xpose.msra.mxu1 %v1280_v34  ;;  %v1283_v46 = vsel %vm1174_vm1, %v1148_v32, 0  ;;  %v1366_v34 = vsel %vm1174_vm1, %v9190_v39, 0 }
 0x258   :  { %v7443_v16 = vpop.f32.mrb[32].mxu0  ;;  %v7467_v45 = vpop.f32.mrb[32].mxu1  ;;  %8055 = vmatprep.subr.msk.bf16.mxu1 %vm1174_vm1, %v1148_v32  ;;  %8057 = vmatprep.subr.msk.bf16.mxu0 %vm1174_vm1, %v9190_v39 }
 0x259   :  { %v942_v3 = vpop.f32.mrb[33].mxu0  ;;  %v1063_v18 = vpop.f32.mrb[33].mxu1 }
 0x25a   :  { %v7444_v47 = vpop.f32.mrb[34].mxu0  ;;  %v7468_v27 = vpop.f32.mrb[34].mxu1 }
 0x25b   :  { %v9219_v19 = vpack.c.bf16 %v7444_v47, %v7443_v16  ;;  %v9221_v22 = vpack.c.bf16 %v7468_v27, %v7467_v45  ;;  %v945_v11 = vpop.f32.mrb[35].mxu0  ;;  %v1066_v54 = vpop.f32.mrb[35].mxu1  ;;  %v1286_v47 = vsel %vm1174_vm1, %v1149_v30, 0  ;;  %v1369_v27 = vsel %vm1174_vm1, %v9188_v26, 0 }
 0x25c   :  { %v9223_v12 = vpack.c.bf16 %v945_v11, %v942_v3  ;;  %v9225_v51 = vpack.c.bf16 %v1066_v54, %v1063_v18 }
 0x25e   :  { %7490 = vmatmul.mubr.msk.bf16.vlgmr.msra.gmra.mrb[48].mxu0 %vm1174_vm1, %v1127_v40 }
 0x25f   :  { %7493 = vmatprep.mubr.msk.bf16.mxu0 %vm1174_vm1, %v1128_v29  ;;  %7502 = vmatpush3.bf16.xpose.msra.mxu1 %v1283_v46 }
 0x260   :  { %7514 = vmatpush3.bf16.xpose.msra.mxu0 %v1366_v34  ;;  %v7447_v45 = vpop.f32.mrb[36].mxu0  ;;  %v7471_v16 = vpop.f32.mrb[36].mxu1  ;;  %8056 = vmatprep.subr.msk.bf16.mxu1 %vm1174_vm1, %v1149_v30 }
 0x261   :  { %8058 = vmatprep.subr.msk.bf16.mxu0 %vm1174_vm1, %v9188_v26  ;;  %v958_v8 = vpop.f32.mrb[37].mxu0  ;;  %v1079_v20 = vpop.f32.mrb[37].mxu1 }
 0x262   :  { %v7448_v40 = vpop.f32.mrb[38].mxu0  ;;  %v7472_v32 = vpop.f32.mrb[38].mxu1 }
 0x263   :  { %v9241_v3 = vpack.c.bf16 %v7448_v40, %v7447_v45  ;;  %v9243_v39 = vpack.c.bf16 %v7472_v32, %v7471_v16  ;;  %v961_v49 = vpop.f32.mrb[39].mxu0  ;;  %v1082_v52 = vpop.f32.mrb[39].mxu1  ;;  %v1455_v45 = vsel %vm1174_vm1, %v9203_v33, 0  ;;  %v1372_v16 = vsel %vm1174_vm1, %v9197_v21, 0 }
 0x264   :  { %v1160_v29 = vpack.c.bf16 %v961_v49, %v958_v8  ;;  %v9245_v18 = vpack.c.bf16 %v1082_v52, %v1079_v20  ;;  %v1458_v49 = vsel %vm1174_vm1, %v9201_v55, 0  ;;  %v1375_v52 = vsel %vm1174_vm1, %v9195_v61, 0 }
 0x266   :  { %7494 = vmatmul.mubr.msk.bf16.gmra.mrb[52].mxu0 %vm1174_vm1, %v1129_v50 }
 0x267   :  { %7504 = vmatpush3.bf16.xpose.msra.mxu1 %v1286_v47  ;;  %7521 = vmatprep.mubr.msk.bf16.mxu0 %vm1174_vm1, %v1134_v24 }
 0x268   :  { %7516 = vmatpush3.bf16.xpose.msra.mxu0 %v1369_v27  ;;  %v7451_v11 = vpop.f32.mrb[40].mxu0  ;;  %v7475_v54 = vpop.f32.mrb[40].mxu1  ;;  %8061 = vmatprep.subr.msk.bf16.mxu1 %vm1174_vm1, %v9203_v33 }
 0x269   :  { %8059 = vmatprep.subr.msk.bf16.mxu0 %vm1174_vm1, %v9197_v21  ;;  %v974_v48 = vpop.f32.mrb[41].mxu0  ;;  %v1095_v36 = vpop.f32.mrb[41].mxu1 }
 0x26a   :  { %v7452_v50 = vpop.f32.mrb[42].mxu0  ;;  %v7476_v30 = vpop.f32.mrb[42].mxu1 }
 0x26b   :  { %v1163_v26 = vpack.c.bf16 %v7452_v50, %v7451_v11  ;;  %v9262_v46 = vpack.c.bf16 %v7476_v30, %v7475_v54  ;;  %v977_v34 = vpop.f32.mrb[43].mxu0  ;;  %v1098_v0 = vpop.f32.mrb[43].mxu1 }
 0x26c   :  { %v1162_v43 = vpack.c.bf16 %v977_v34, %v974_v48  ;;  %v9264_v24 = vpack.c.bf16 %v1098_v0, %v1095_v36 }
 0x26e   :  { %7506 = vmatmul.mubr.msk.bf16.vlgmr.msra.gmra.mrb[48].mxu1 %vm1174_vm1, %v1131_v44 }
 0x26f   :  { %7509 = vmatprep.mubr.msk.bf16.mxu1 %vm1174_vm1, %v1132_v15  ;;  %7530 = vmatpush3.bf16.xpose.msra.mxu1 %v1455_v45 }
 0x270   :  { %7518 = vmatpush3.bf16.xpose.msra.mxu0 %v1372_v16  ;;  %v7455_v8 = vpop.f32.mrb[44].mxu0  ;;  %v7479_v20 = vpop.f32.mrb[44].mxu1  ;;  %8062 = vmatprep.subr.msk.bf16.mxu1 %vm1174_vm1, %v9201_v55 }
 0x271   :  { %8060 = vmatprep.subr.msk.bf16.mxu0 %vm1174_vm1, %v9195_v61  ;;  %v990_v56 = vpop.f32.mrb[45].mxu0  ;;  %v1111_v59 = vpop.f32.mrb[45].mxu1 }
 0x272   :  { %v7456_v44 = vpop.f32.mrb[46].mxu0  ;;  %v7480_v33 = vpop.f32.mrb[46].mxu1 }
 0x273   :  { %v1165_v21 = vpack.c.bf16 %v7456_v44, %v7455_v8  ;;  %v9282_v40 = vpack.c.bf16 %v7480_v33, %v7479_v20  ;;  %v993_v5 = vpop.f32.mrb[47].mxu0  ;;  %v1114_v13 = vpop.f32.mrb[47].mxu1 }
 0x274   :  { %v1164_v15 = vpack.c.bf16 %v993_v5, %v990_v56  ;;  %v9284_v32 = vpack.c.bf16 %v1114_v13, %v1111_v59 }
 0x276   :  { %7510 = vmatmul.mubr.msk.bf16.gmra.mrb[52].mxu1 %vm1174_vm1, %v1133_v9 }
 0x277   :  { %7532 = vmatpush3.bf16.xpose.msra.mxu1 %v1458_v49  ;;  %7537 = vmatprep.mubr.msk.bf16.mxu1 %vm1174_vm1, %v1138_v37 }
 0x278   :  { %7520 = vmatpush3.bf16.xpose.msra.mxu0 %v1375_v52  ;;  %8063 = vmatprep.subr.msk.bf16.mxu1 %vm1174_vm1, %v9212_v42 }
 0x279   :  { %7545 = vmatprep.subr.bf16.mxu0 %v9223_v12 }
 0x27f   :  { %7522 = vmatmul.mubr.msk.bf16.vlgmr.msra.gmra.mrb[56].mxu0 %vm1174_vm1, %v1135_v41  ;;  %7534 = vmatpush3.bf16.xpose.msra.mxu1 %v1461_v4  ;;  %v11625_v41 = vpack.c.bf16 %v9174_v35, %v9166_v17 }
 0x280   :  { %7525 = vmatprep.mubr.msk.bf16.mxu0 %vm1174_vm1, %v1136_v53  ;;  %7546 = vmatpush3.bf16.msra.mxu0 %v9223_v12 }
 0x281   :  { %8064 = vmatprep.subr.msk.bf16.mxu1 %vm1174_vm1, %v9210_v25  ;;  %7547 = vmatprep.subr.bf16.mxu0 %v9219_v19 }
 0x284   :  { %7548 = vmatpush3.bf16.msra.mxu0 %v9219_v19 }
 0x285   :  { %7549 = vmatprep.subr.bf16.mxu0 %v1160_v29 }
 0x287   :  { %7526 = vmatmul.mubr.msk.bf16.gmra.mrb[60].mxu0 %vm1174_vm1, %v1137_v63  ;;  %7536 = vmatpush3.bf16.xpose.msra.mxu1 %v1464_v31 }
 0x288   :  { %7550 = vmatpush3.bf16.msra.mxu0 %v1160_v29  ;;  %7561 = vmatprep.subr.bf16.mxu1 %v1162_v43 }
 0x289   :  { %7551 = vmatprep.subr.bf16.mxu0 %v9241_v3 }
 0x28c   :  { %7552 = vmatpush3.bf16.msra.mxu0 %v9241_v3 }
 0x28d   :  { %7577 = vmatprep.subr.bf16.mxu0 %v9225_v51 }
 0x28e   :  { %7538 = vmatmul.mubr.msk.bf16.vlgmr.msra.gmra.mrb[56].mxu1 %vm1174_vm1, %v1139_v60 }
 0x28f   :  { %7541 = vmatprep.mubr.msk.bf16.mxu1 %vm1174_vm1, %v11624_v38  ;;  %7562 = vmatpush3.bf16.msra.mxu1 %v1162_v43 }
 0x290   :  { %7563 = vmatprep.subr.bf16.mxu1 %v1163_v26 }
 0x293   :  { %7564 = vmatpush3.bf16.msra.mxu1 %v1163_v26 }
 0x294   :  { %7565 = vmatprep.subr.bf16.mxu1 %v1164_v15 }
 0x296   :  { %7542 = vmatmul.mubr.msk.bf16.gmra.mrb[60].mxu1 %vm1174_vm1, %v11625_v41 }
 0x297   :  { %7566 = vmatpush3.bf16.msra.mxu1 %v1164_v15 }
 0x298   :  { %7567 = vmatprep.subr.bf16.mxu1 %v1165_v21 }
 0x29b   :  { %7568 = vmatpush3.bf16.msra.mxu1 %v1165_v21 }
 0x29c   :  { %7593 = vmatprep.subr.bf16.mxu1 %v9264_v24 }
 0x331   :  { %v9338_v1 = vpop.f32.mrb[48].mxu0 }
 0x332   :  { %v9340_v10 = vpop.f32.mrb[49].mxu0  ;;  %v1537_v62 = vsel %vm66_vm0, %v9338_v1, -inf }
 0x333   :  { %1538 = vmax.xlane.f32.xlu0 %v1537_v62  ;;  %v9344_v63 = vpop.f32.mrb[50].mxu0  ;;  %v1531_v57 = vsel %vm66_vm0, %v9340_v10, -inf }
 0x334   :  { %v9346_v28 = vpop.f32.mrb[51].mxu0  ;;  %v1540_v53 = vsel %vm66_vm0, %v9344_v63, -inf }
 0x335   :  { %1541 = vmax.xlane.f32.xlu1 %v1540_v53  ;;  %v1534_v58 = vsel %vm66_vm0, %v9346_v28, -inf }
 0x337   :  { %1532 = vmax.xlane.f32.xlu0 %v1531_v57 }
 0x339   :  { %1535 = vmax.xlane.f32.xlu1 %v1534_v58  ;;  %v9354_v23 = vpop.f32.mrb[52].mxu0 }
 0x33a   :  { %v9356_v60 = vpop.f32.mrb[53].mxu0  ;;  %v1549_v2 = vsel %vm66_vm0, %v9354_v23, -inf }
 0x33b   :  { %1550 = vmax.xlane.f32.xlu0 %v1549_v2  ;;  %v9360_v37 = vpop.f32.mrb[54].mxu0  ;;  %v1543_v7 = vsel %vm66_vm0, %v9356_v60, -inf }
 0x33c   :  { %v9362_v17 = vpop.f32.mrb[55].mxu0  ;;  %v1552_v6 = vsel %vm66_vm0, %v9360_v37, -inf }
 0x33d   :  { %1553 = vmax.xlane.f32.xlu1 %v1552_v6  ;;  %v1546_v35 = vsel %vm66_vm0, %v9362_v17, -inf }
 0x33f   :  { %1544 = vmax.xlane.f32.xlu0 %v1543_v7 }
 0x341   :  { %v9370_v9 = vpop.f32.mrb[48].mxu1  ;;  %1547 = vmax.xlane.f32.xlu1 %v1546_v35 }
 0x342   :  { %v9372_v14 = vpop.f32.mrb[49].mxu1  ;;  %v1561_v61 = vsel %vm66_vm0, %v9370_v9, -inf }
 0x343   :  { %v9376_v55 = vpop.f32.mrb[50].mxu1  ;;  %1562 = vmax.xlane.f32.xlu0 %v1561_v61  ;;  %v1555_v19 = vsel %vm66_vm0, %v9372_v14, -inf }
 0x344   :  { %v9378_v25 = vpop.f32.mrb[51].mxu1  ;;  %v1564_v42 = vsel %vm66_vm0, %v9376_v55, -inf }
 0x345   :  { %1565 = vmax.xlane.f32.xlu1 %v1564_v42  ;;  %v1558_v12 = vsel %vm66_vm0, %v9378_v25, -inf }
 0x347   :  { %1556 = vmax.xlane.f32.xlu0 %v1555_v19 }
 0x349   :  { %v9386_v3 = vpop.f32.mrb[52].mxu1  ;;  %1559 = vmax.xlane.f32.xlu1 %v1558_v12 }
 0x34a   :  { %v9388_v29 = vpop.f32.mrb[53].mxu1  ;;  %v1573_v8 = vsel %vm66_vm0, %v9386_v3, -inf }
 0x34b   :  { %v9390_v47 = vpop.f32.mrb[54].mxu1  ;;  %v1567_v27 = vsel %vm66_vm0, %v9388_v29, -inf }
 0x34c   :  { %v9394_v11 = vpop.f32.mrb[55].mxu1  ;;  %1568 = vmax.xlane.f32.xlu0 %v1567_v27  ;;  %v1576_v59 = vsel %vm66_vm0, %v9390_v47, -inf }
 0x34d   :  { %v1570_v54 = vsel %vm66_vm0, %v9394_v11, -inf }
 0x34e   :  { %1571 = vmax.xlane.f32.xlu1 %v1570_v54 }
 0x352   :  { %v9398_v48 = vpop.f32.mrb[56].mxu0 }
 0x353   :  { %v9400_v36 = vpop.f32.mrb[57].mxu0  ;;  %v1585_v50 = vsel %vm66_vm0, %v9398_v48, -inf }
 0x354   :  { %1586 = vmax.xlane.f32.xlu0 %v1585_v50  ;;  %v9404_v30 = vpop.f32.mrb[58].mxu0  ;;  %v1579_v0 = vsel %vm66_vm0, %v9400_v36, -inf }
 0x355   :  { %v9406_v26 = vpop.f32.mrb[59].mxu0  ;;  %v1588_v34 = vsel %vm66_vm0, %v9404_v30, -inf }
 0x356   :  { %1589 = vmax.xlane.f32.xlu1 %v1588_v34  ;;  %v1582_v43 = vsel %vm66_vm0, %v9406_v26, -inf }
 0x358   :  { %1580 = vmax.xlane.f32.xlu0 %v1579_v0 }
 0x35a   :  { %1583 = vmax.xlane.f32.xlu1 %v1582_v43  ;;  %v9414_v45 = vpop.f32.mrb[60].mxu0 }
 0x35b   :  { %v9416_v16 = vpop.f32.mrb[61].mxu0  ;;  %v1597_v15 = vsel %vm66_vm0, %v9414_v45, -inf }
 0x35c   :  { %1574 = vmax.xlane.f32.xlu0 %v1573_v8  ;;  %v9420_v20 = vpop.f32.mrb[62].mxu0  ;;  %v1591_v44 = vsel %vm66_vm0, %v9416_v16, -inf }
 0x35d   :  { %v9422_v56 = vpop.f32.mrb[63].mxu0  ;;  %v1600_v52 = vsel %vm66_vm0, %v9420_v20, -inf }
 0x35e   :  { %1577 = vmax.xlane.f32.xlu1 %v1576_v59  ;;  %v1594_v21 = vsel %vm66_vm0, %v9422_v56, -inf }
 0x360   :  { %1592 = vmax.xlane.f32.xlu0 %v1591_v44 }
 0x361   :  { %v9428_v33 = vpop.f32.mrb[56].mxu1 }
 0x362   :  { %1595 = vmax.xlane.f32.xlu1 %v1594_v21  ;;  %v9432_v5 = vpop.f32.mrb[57].mxu1  ;;  %v1609_v53 = vsel %vm66_vm0, %v9428_v33, -inf }
 0x363   :  { %v9434_v13 = vpop.f32.mrb[58].mxu1  ;;  %v1603_v4 = vsel %vm66_vm0, %v9432_v5, -inf }
 0x364   :  { %1598 = vmax.xlane.f32.xlu0 %v1597_v15  ;;  %v9438_v49 = vpop.f32.mrb[59].mxu1  ;;  %v1612_v58 = vsel %vm66_vm0, %v9434_v13, -inf }
 0x365   :  { %v1606_v38 = vsel %vm66_vm0, %v9438_v49, -inf }
 0x366   :  { %1601 = vmax.xlane.f32.xlu1 %v1600_v52 }
 0x368   :  { %1604 = vmax.xlane.f32.xlu0 %v1603_v4 }
 0x369   :  { %v9444_v31 = vpop.f32.mrb[60].mxu1 }
 0x36a   :  { %1607 = vmax.xlane.f32.xlu1 %v1606_v38  ;;  %v9448_v41 = vpop.f32.mrb[61].mxu1  ;;  %v1621_v7 = vsel %vm66_vm0, %v9444_v31, -inf }
 0x36b   :  { %v9450_v62 = vpop.f32.mrb[62].mxu1  ;;  %v1615_v2 = vsel %vm66_vm0, %v9448_v41, -inf }
 0x36c   :  { %1610 = vmax.xlane.f32.xlu0 %v1609_v53  ;;  %v9454_v57 = vpop.f32.mrb[63].mxu1  ;;  %v1624_v35 = vsel %vm66_vm0, %v9450_v62, -inf }
 0x36d   :  { %v1618_v6 = vsel %vm66_vm0, %v9454_v57, -inf }
 0x36e   :  { %1613 = vmax.xlane.f32.xlu1 %v1612_v58 }
 0x370   :  { %1616 = vmax.xlane.f32.xlu0 %v1615_v2 }
 0x372   :  { %1619 = vmax.xlane.f32.xlu1 %v1618_v6 }
 0x374   :  { %1622 = vmax.xlane.f32.xlu0 %v1621_v7 }
 0x376   :  { %1625 = vmax.xlane.f32.xlu1 %v1624_v35 }
 0x3c0   :  { %v1539_v61 = vpop.xlane.xlu0 %1538 }
 0x3c1   :  { %v1629_v42 = vsub.f32 %v9338_v1, %v1539_v61 }
 0x3c2   :  { %v1542_v19 = vpop.xlane.xlu1 %1541 }
 0x3c3   :  { %v1663_v12 = vmul.f32 1.442695, %v1629_v42  ;;  %v1630_v27 = vsub.f32 %v9344_v63, %v1542_v19 }
 0x3c4   :  { %v1533_v54 = vpop.xlane.xlu0 %1532 }
 0x3c5   :  { %8177 = vpow2.f32 %v1663_v12  ;;  %v1665_v50 = vmul.f32 1.442695, %v1630_v27  ;;  %v1627_v34 = vsub.f32 %v9340_v10, %v1533_v54 }
 0x3c6   :  { %v1536_v0 = vpop.xlane.xlu1 %1535 }
 0x3c7   :  { %8179 = vpow2.f32 %v1665_v50  ;;  %v1659_v43 = vmul.f32 1.442695, %v1627_v34  ;;  %v1628_v8 = vsub.f32 %v9346_v28, %v1536_v0 }
 0x3c8   :  { %v1551_v59 = vpop.xlane.xlu0 %1550 }
 0x3c9   :  { %8181 = vpow2.f32 %v1659_v43  ;;  %v1661_v44 = vmul.f32 1.442695, %v1628_v8  ;;  %v1633_v21 = vsub.f32 %v9354_v23, %v1551_v59 }
 0x3ca   :  { %v1554_v1 = vpop.xlane.xlu1 %1553 }
 0x3cb   :  { %8183 = vpow2.f32 %v1661_v44  ;;  %v1671_v15 = vmul.f32 1.442695, %v1633_v21  ;;  %v1634_v63 = vsub.f32 %v9360_v37, %v1554_v1 }
 0x3cc   :  { %v1545_v52 = vpop.xlane.xlu0 %1544 }
 0x3cd   :  { %8185 = vpow2.f32 %v1671_v15  ;;  %v1673_v4 = vmul.f32 1.442695, %v1634_v63  ;;  %v1631_v10 = vsub.f32 %v9356_v60, %v1545_v52 }
 0x3ce   :  { %v1548_v38 = vpop.xlane.xlu1 %1547 }
 0x3cf   :  { %v9473_v53 = vpop.eup %8177  ;;  %8187 = vpow2.f32 %v1673_v4  ;;  %v1667_v28 = vmul.f32 1.442695, %v1631_v10  ;;  %v1632_v58 = vsub.f32 %v9362_v17, %v1548_v38 }
 0x3d0   :  { %v1563_v2 = vpop.xlane.xlu0 %1562  ;;  %v1729_v23 = vsel %vm66_vm0, %v9473_v53, 0.0 }
 0x3d1   :  { %v9478_v6 = vpop.eup %8179  ;;  %8189 = vpow2.f32 %v1667_v28  ;;  %v1669_v37 = vmul.f32 1.442695, %v1632_v58  ;;  %v1637_v7 = vsub.f32 %v9370_v9, %v1563_v2  ;;  %1730 = vadd.xlane.f32.xlu0 %v1729_v23 }
 0x3d2   :  { %v1566_v35 = vpop.xlane.xlu1 %1565  ;;  %v1732_v60 = vsel %vm66_vm0, %v9478_v6, 0.0 }
 0x3d3   :  { %v9483_v61 = vpop.eup %8181  ;;  %8191 = vpow2.f32 %v1669_v37  ;;  %v1679_v42 = vmul.f32 1.442695, %v1637_v7  ;;  %v1638_v17 = vsub.f32 %v9376_v55, %v1566_v35  ;;  %1733 = vadd.xlane.f32.xlu1 %v1732_v60 }
 0x3d4   :  { %v1557_v19 = vpop.xlane.xlu0 %1556  ;;  %v1723_v12 = vsel %vm66_vm0, %v9483_v61, 0.0 }
 0x3d5   :  { %v9488_v27 = vpop.eup %8183  ;;  %8193 = vpow2.f32 %v1679_v42  ;;  %v1681_v9 = vmul.f32 1.442695, %v1638_v17  ;;  %v1635_v54 = vsub.f32 %v9372_v14, %v1557_v19  ;;  %1724 = vadd.xlane.f32.xlu0 %v1723_v12 }
 0x3d6   :  { %v1560_v50 = vpop.xlane.xlu1 %1559  ;;  %v1726_v34 = vsel %vm66_vm0, %v9488_v27, 0.0 }
 0x3d7   :  { %v9493_v0 = vpop.eup %8185  ;;  %8195 = vpow2.f32 %v1681_v9  ;;  %v1675_v55 = vmul.f32 1.442695, %v1635_v54  ;;  %v1636_v43 = vsub.f32 %v9378_v25, %v1560_v50  ;;  %1727 = vadd.xlane.f32.xlu1 %v1726_v34 }
 0x3d8   :  { %v1741_v8 = vsel %vm66_vm0, %v9493_v0, 0.0 }
 0x3d9   :  { %v9498_v59 = vpop.eup %8187  ;;  %8197 = vpow2.f32 %v1675_v55  ;;  %v1677_v44 = vmul.f32 1.442695, %v1636_v43  ;;  %v1569_v14 = vpop.xlane.xlu0 %1568  ;;  %1742 = vadd.xlane.f32.xlu0 %v1741_v8 }
 0x3da   :  { %v1639_v21 = vsub.f32 %v9388_v29, %v1569_v14  ;;  %v1744_v1 = vsel %vm66_vm0, %v9498_v59, 0.0 }
 0x3db   :  { %v9503_v15 = vpop.eup %8189  ;;  %8199 = vpow2.f32 %v1677_v44  ;;  %v1572_v63 = vpop.xlane.xlu1 %1571  ;;  %1745 = vadd.xlane.f32.xlu1 %v1744_v1 }
 0x3dc   :  { %v1683_v25 = vmul.f32 1.442695, %v1639_v21  ;;  %v1640_v52 = vsub.f32 %v9394_v11, %v1572_v63  ;;  %v1735_v4 = vsel %vm66_vm0, %v9503_v15, 0.0 }
 0x3dd   :  { %v9508_v10 = vpop.eup %8191  ;;  %1736 = vadd.xlane.f32.xlu0 %v1735_v4 }
 0x3de   :  { %8201 = vpow2.f32 %v1683_v25  ;;  %v1685_v38 = vmul.f32 1.442695, %v1640_v52  ;;  %v1738_v29 = vsel %vm66_vm0, %v9508_v10, 0.0 }
 0x3df   :  { %v9512_v28 = vpop.eup %8193  ;;  %1739 = vadd.xlane.f32.xlu1 %v1738_v29 }
 0x3e0   :  { %8203 = vpow2.f32 %v1685_v38  ;;  %v1753_v58 = vsel %vm66_vm0, %v9512_v28, 0.0 }
 0x3e1   :  { %v9516_v2 = vpop.eup %8195  ;;  %v1587_v11 = vpop.xlane.xlu0 %1586  ;;  %1754 = vadd.xlane.f32.xlu0 %v1753_v58 }
 0x3e2   :  { %v1645_v23 = vsub.f32 %v9398_v48, %v1587_v11  ;;  %v1756_v37 = vsel %vm66_vm0, %v9516_v2, 0.0 }
 0x3e3   :  { %v9521_v7 = vpop.eup %8197  ;;  %v1590_v35 = vpop.xlane.xlu1 %1589  ;;  %1757 = vadd.xlane.f32.xlu1 %v1756_v37 }
 0x3e4   :  { %v1695_v60 = vmul.f32 1.442695, %v1645_v23  ;;  %v1646_v42 = vsub.f32 %v9404_v30, %v1590_v35  ;;  %v1747_v17 = vsel %vm66_vm0, %v9521_v7, 0.0 }
 0x3e5   :  { %v9526_v19 = vpop.eup %8199  ;;  %v1581_v12 = vpop.xlane.xlu0 %1580  ;;  %1748 = vadd.xlane.f32.xlu0 %v1747_v17 }
 0x3e6   :  { %8205 = vpow2.f32 %v1695_v60  ;;  %v1697_v9 = vmul.f32 1.442695, %v1646_v42  ;;  %v1643_v48 = vsub.f32 %v9400_v36, %v1581_v12  ;;  %v1750_v54 = vsel %vm66_vm0, %v9526_v19, 0.0 }
 0x3e7   :  { %v1584_v50 = vpop.xlane.xlu1 %1583  ;;  %1751 = vadd.xlane.f32.xlu1 %v1750_v54 }
 0x3e8   :  { %v9531_v34 = vpop.eup %8201  ;;  %8207 = vpow2.f32 %v1697_v9  ;;  %v1691_v30 = vmul.f32 1.442695, %v1643_v48  ;;  %v1644_v55 = vsub.f32 %v9406_v26, %v1584_v50 }
 0x3e9   :  { %v1575_v43 = vpop.xlane.xlu0 %1574  ;;  %v1759_v8 = vsel %vm66_vm0, %v9531_v34, 0.0 }
 0x3ea   :  { %v9536_v44 = vpop.eup %8203  ;;  %8209 = vpow2.f32 %v1691_v30  ;;  %v1693_v14 = vmul.f32 1.442695, %v1644_v55  ;;  %v1641_v36 = vsub.f32 %v9386_v3, %v1575_v43  ;;  %1760 = vadd.xlane.f32.xlu0 %v1759_v8 }
 0x3eb   :  { %v1578_v21 = vpop.xlane.xlu1 %1577  ;;  %v1762_v1 = vsel %vm66_vm0, %v9536_v44, 0.0 }
 0x3ec   :  { %8211 = vpow2.f32 %v1693_v14  ;;  %v1687_v63 = vmul.f32 1.442695, %v1641_v36  ;;  %v1642_v25 = vsub.f32 %v9390_v47, %v1578_v21  ;;  %1763 = vadd.xlane.f32.xlu1 %v1762_v1 }
 0x3ed   :  { %v1593_v26 = vpop.xlane.xlu0 %1592 }
 0x3ee   :  { %8213 = vpow2.f32 %v1687_v63  ;;  %v1689_v52 = vmul.f32 1.442695, %v1642_v25  ;;  %v1647_v4 = vsub.f32 %v9416_v16, %v1593_v26 }
 0x3ef   :  { %v1596_v38 = vpop.xlane.xlu1 %1595 }
 0x3f0   :  { %v9543_v29 = vpop.eup %8205  ;;  %8215 = vpow2.f32 %v1689_v52  ;;  %v1699_v3 = vmul.f32 1.442695, %v1647_v4  ;;  %v1648_v58 = vsub.f32 %v9422_v56, %v1596_v38 }
 0x3f1   :  { %v1599_v11 = vpop.xlane.xlu0 %1598  ;;  %v1777_v23 = vsel %vm66_vm0, %v9543_v29, 0.0 }
 0x3f2   :  { %v9548_v37 = vpop.eup %8207  ;;  %8217 = vpow2.f32 %v1699_v3  ;;  %v1701_v47 = vmul.f32 1.442695, %v1648_v58  ;;  %v1649_v35 = vsub.f32 %v9414_v45, %v1599_v11  ;;  %1778 = vadd.xlane.f32.xlu0 %v1777_v23 }
 0x3f3   :  { %v1602_v60 = vpop.xlane.xlu1 %1601  ;;  %v1780_v16 = vsel %vm66_vm0, %v9548_v37, 0.0 }
 0x3f4   :  { %v9553_v42 = vpop.eup %8209  ;;  %8219 = vpow2.f32 %v1701_v47  ;;  %v1703_v17 = vmul.f32 1.442695, %v1649_v35  ;;  %v1650_v56 = vsub.f32 %v9420_v20, %v1602_v60  ;;  %1781 = vadd.xlane.f32.xlu1 %v1780_v16 }
 0x3f5   :  { %v1605_v12 = vpop.xlane.xlu0 %1604  ;;  %v1771_v9 = vsel %vm66_vm0, %v9553_v42, 0.0 }
 0x3f6   :  { %v9558_v48 = vpop.eup %8211  ;;  %8221 = vpow2.f32 %v1703_v17  ;;  %v1705_v45 = vmul.f32 1.442695, %v1650_v56  ;;  %v1651_v54 = vsub.f32 %v9432_v5, %v1605_v12  ;;  %1772 = vadd.xlane.f32.xlu0 %v1771_v9 }
 0x3f7   :  { %v1608_v50 = vpop.xlane.xlu1 %1607  ;;  %v1774_v30 = vsel %vm66_vm0, %v9558_v48, 0.0 }
 0x3f8   :  { %v9563_v55 = vpop.eup %8213  ;;  %8223 = vpow2.f32 %v1705_v45  ;;  %v1707_v20 = vmul.f32 1.442695, %v1651_v54  ;;  %v1652_v43 = vsub.f32 %v9438_v49, %v1608_v50  ;;  %1775 = vadd.xlane.f32.xlu1 %v1774_v30 }
 0x3f9   :  { %v1611_v8 = vpop.xlane.xlu0 %1610  ;;  %v1765_v14 = vsel %vm66_vm0, %v9563_v55, 0.0 }
 0x3fa   :  { %v9568_v36 = vpop.eup %8215  ;;  %8225 = vpow2.f32 %v1707_v20  ;;  %v1709_v5 = vmul.f32 1.442695, %v1652_v43  ;;  %v1653_v21 = vsub.f32 %v9428_v33, %v1611_v8  ;;  %1766 = vadd.xlane.f32.xlu0 %v1765_v14 }
 0x3fb   :  { %v1614_v1 = vpop.xlane.xlu1 %1613  ;;  %v1768_v63 = vsel %vm66_vm0, %v9568_v36, 0.0 }
 0x3fc   :  { %v9573_v25 = vpop.eup %8217  ;;  %8227 = vpow2.f32 %v1709_v5  ;;  %v1711_v49 = vmul.f32 1.442695, %v1653_v21  ;;  %v1654_v26 = vsub.f32 %v9434_v13, %v1614_v1  ;;  %1769 = vadd.xlane.f32.xlu1 %v1768_v63 }
 0x3fd   :  { %v1617_v52 = vpop.xlane.xlu0 %1616  ;;  %v1783_v4 = vsel %vm66_vm0, %v9573_v25, 0.0 }
 0x3fe   :  { %v9578_v38 = vpop.eup %8219  ;;  %8229 = vpow2.f32 %v1711_v49  ;;  %v1713_v33 = vmul.f32 1.442695, %v1654_v26  ;;  %v1655_v3 = vsub.f32 %v9448_v41, %v1617_v52  ;;  %1784 = vadd.xlane.f32.xlu0 %v1783_v4 }
 0x3ff   :  { %v1620_v58 = vpop.xlane.xlu1 %1619  ;;  %v1786_v11 = vsel %vm66_vm0, %v9578_v38, 0.0 }
 0x400   :  { %v9583_v23 = vpop.eup %8221  ;;  %8231 = vpow2.f32 %v1713_v33  ;;  %v1715_v13 = vmul.f32 1.442695, %v1655_v3  ;;  %v1656_v47 = vsub.f32 %v9454_v57, %v1620_v58  ;;  %1787 = vadd.xlane.f32.xlu1 %v1786_v11 }
 0x401   :  { %v1623_v35 = vpop.xlane.xlu0 %1622  ;;  %v1789_v60 = vsel %vm66_vm0, %v9583_v23, 0.0 }
 0x402   :  { %v9588_v16 = vpop.eup %8223  ;;  %8233 = vpow2.f32 %v1715_v13  ;;  %v1717_v41 = vmul.f32 1.442695, %v1656_v47  ;;  %v1657_v17 = vsub.f32 %v9444_v31, %v1623_v35  ;;  %1790 = vadd.xlane.f32.xlu0 %v1789_v60 }
 0x403   :  { %v1626_v56 = vpop.xlane.xlu1 %1625  ;;  %v1792_v12 = vsel %vm66_vm0, %v9588_v16, 0.0 }
 0x404   :  { %v9593_v9 = vpop.eup %8225  ;;  %8235 = vpow2.f32 %v1717_v41  ;;  %v1719_v57 = vmul.f32 1.442695, %v1657_v17  ;;  %v1658_v45 = vsub.f32 %v9450_v62, %v1626_v56  ;;  %1793 = vadd.xlane.f32.xlu1 %v1792_v12 }
 0x405   :  { %v1795_v54 = vsel %vm66_vm0, %v9593_v9, 0.0 }
 0x406   :  { %v9598_v50 = vpop.eup %8227  ;;  %8237 = vpow2.f32 %v1719_v57  ;;  %v1721_v30 = vmul.f32 1.442695, %v1658_v45  ;;  %1796 = vadd.xlane.f32.xlu0 %v1795_v54 }
 0x407   :  { %v1798_v31 = vsel %vm66_vm0, %v9598_v50, 0.0 }
 0x408   :  { %v9602_v20 = vpop.eup %8229  ;;  %8239 = vpow2.f32 %v1721_v30  ;;  %1799 = vadd.xlane.f32.xlu1 %v1798_v31 }
 0x409   :  { %v1801_v43 = vsel %vm66_vm0, %v9602_v20, 0.0 }
 0x40a   :  { %v9606_v62 = vpop.eup %8231  ;;  %1802 = vadd.xlane.f32.xlu0 %v1801_v43 }
 0x40b   :  { %v1804_v8 = vsel %vm66_vm0, %v9606_v62, 0.0 }
 0x40c   :  { %v9610_v14 = vpop.eup %8233  ;;  %1805 = vadd.xlane.f32.xlu1 %v1804_v8 }
 0x40d   :  { %v1807_v5 = vsel %vm66_vm0, %v9610_v14, 0.0 }
 0x40e   :  { %v9614_v21 = vpop.eup %8235  ;;  %1808 = vadd.xlane.f32.xlu0 %v1807_v5 }
 0x40f   :  { %v1810_v1 = vsel %vm66_vm0, %v9614_v21, 0.0 }
 0x410   :  { %v9618_v63 = vpop.eup %8237  ;;  %1811 = vadd.xlane.f32.xlu1 %v1810_v1 }
 0x411   :  { %v1813_v49 = vsel %vm66_vm0, %v9618_v63, 0.0 }
 0x412   :  { %v9622_v26 = vpop.eup %8239  ;;  %1814 = vadd.xlane.f32.xlu0 %v1813_v49 }
 0x413   :  { %v1816_v52 = vsel %vm66_vm0, %v9622_v26, 0.0 }
 0x414   :  { %1817 = vadd.xlane.f32.xlu1 %v1816_v52 }
 0x45e   :  { %v1731_v4 = vpop.xlane.xlu0 %1730 }
 0x460   :  { %v1734_v33 = vpop.xlane.xlu1 %1733 }
 0x461   :  { %8241 = vrcp.f32 %v1734_v33 }
 0x462   :  { %v1725_v3 = vpop.xlane.xlu0 %1724 }
 0x463   :  { %8243 = vrcp.f32 %v1725_v3 }
 0x464   :  { %8245 = vrcp.f32 %v1731_v4  ;;  %v1728_v58 = vpop.xlane.xlu1 %1727 }
 0x465   :  { %8247 = vrcp.f32 %v1728_v58 }
 0x466   :  { %v1743_v11 = vpop.xlane.xlu0 %1742 }
 0x468   :  { %v1746_v13 = vpop.xlane.xlu1 %1745 }
 0x469   :  { %8249 = vrcp.f32 %v1746_v13 }
 0x46a   :  { %v1737_v47 = vpop.xlane.xlu0 %1736 }
 0x46b   :  { %8251 = vrcp.f32 %v1737_v47  ;;  %v8242_v35 = vpop.eup %8241 }
 0x46c   :  { %8253 = vrcp.f32 %v1743_v11  ;;  %v1740_v60 = vpop.xlane.xlu1 %1739  ;;  %v1854_v57 = vmul.f32 %v8242_v35, %v9478_v6 }
 0x46d   :  { %v8244_v41 = vpop.eup %8243  ;;  %8255 = vrcp.f32 %v1740_v60 }
 0x46e   :  { %v8246_v17 = vpop.eup %8245  ;;  %v1755_v56 = vpop.xlane.xlu0 %1754  ;;  %v1851_v54 = vmul.f32 %v8244_v41, %v9483_v61 }
 0x46f   :  { %v8248_v12 = vpop.eup %8247  ;;  %v1853_v31 = vmul.f32 %v8246_v17, %v9473_v53 }
 0x470   :  { %v1758_v45 = vpop.xlane.xlu1 %1757  ;;  %v1852_v30 = vmul.f32 %v8248_v12, %v9488_v27 }
 0x471   :  { %8257 = vrcp.f32 %v1758_v45  ;;  %v1884_v5 = vpack.c.bf16 %v1854_v57, %v1853_v31 }
 0x472   :  { %v1749_v43 = vpop.xlane.xlu0 %1748  ;;  %v1883_v8 = vpack.c.bf16 %v1852_v30, %v1851_v54 }
 0x473   :  { %8259 = vrcp.f32 %v1749_v43  ;;  %v8250_v1 = vpop.eup %8249 }
 0x474   :  { %8261 = vrcp.f32 %v1755_v56  ;;  %7553 = vmatprep.mubr.msk.bf16.mxu0 %vm66_vm0, %v1883_v8  ;;  %v1752_v49 = vpop.xlane.xlu1 %1751  ;;  %v1858_v27 = vmul.f32 %v8250_v1, %v9498_v59 }
 0x475   :  { %v8252_v52 = vpop.eup %8251  ;;  %8263 = vrcp.f32 %v1752_v49  ;;  %7554 = vmatmul.mubr.msk.bf16.vlgmr.msra.gmra.mrb[64].mxu0 %vm66_vm0, %v1884_v5 }
 0x476   :  { %v8254_v6 = vpop.eup %8253  ;;  %7578 = vmatpush3.bf16.msra.mxu0 %v9225_v51  ;;  %v1855_v4 = vmul.f32 %v8252_v52, %v9503_v15 }
 0x477   :  { %v8256_v61 = vpop.eup %8255  ;;  %7579 = vmatprep.subr.bf16.mxu0 %v9221_v22  ;;  %v1761_v53 = vpop.xlane.xlu0 %1760  ;;  %v1857_v58 = vmul.f32 %v8254_v6, %v9493_v0 }
 0x478   :  { %8265 = vrcp.f32 %v1761_v53  ;;  %v1856_v33 = vmul.f32 %v8256_v61, %v9508_v10 }
 0x479   :  { %v1764_v3 = vpop.xlane.xlu1 %1763  ;;  %v1886_v51 = vpack.c.bf16 %v1858_v27, %v1857_v58 }
 0x47a   :  { %7580 = vmatpush3.bf16.msra.mxu0 %v9221_v22  ;;  %8267 = vrcp.f32 %v1764_v3  ;;  %v1885_v11 = vpack.c.bf16 %v1856_v33, %v1855_v4 }
 0x47b   :  { %7581 = vmatprep.subr.bf16.mxu0 %v9245_v18  ;;  %v8258_v13 = vpop.eup %8257 }
 0x47c   :  { %7557 = vmatprep.mubr.msk.bf16.mxu0 %vm66_vm0, %v1885_v11  ;;  %v1862_v10 = vmul.f32 %v8258_v13, %v9516_v2 }
 0x47d   :  { %v8260_v47 = vpop.eup %8259  ;;  %7558 = vmatmul.mubr.msk.bf16.gmra.mrb[68].mxu0 %vm66_vm0, %v1886_v51 }
 0x47e   :  { %v8262_v59 = vpop.eup %8261  ;;  %7582 = vmatpush3.bf16.msra.mxu0 %v9245_v18  ;;  %v1859_v22 = vmul.f32 %v8260_v47, %v9521_v7 }
 0x47f   :  { %v8264_v15 = vpop.eup %8263  ;;  %v1779_v0 = vpop.xlane.xlu0 %1778  ;;  %7583 = vmatprep.subr.bf16.mxu0 %v9243_v39  ;;  %v1861_v60 = vmul.f32 %v8262_v59, %v9512_v28 }
 0x480   :  { %v1860_v35 = vmul.f32 %v8264_v15, %v9526_v19 }
 0x481   :  { %v1782_v41 = vpop.xlane.xlu1 %1781  ;;  %v1888_v12 = vpack.c.bf16 %v1862_v10, %v1861_v60 }
 0x482   :  { %v8266_v17 = vpop.eup %8265  ;;  %7584 = vmatpush3.bf16.msra.mxu0 %v9243_v39  ;;  %v1887_v56 = vpack.c.bf16 %v1860_v35, %v1859_v22  ;;  %8269 = vrcp.f32 %v1782_v41 }
 0x483   :  { %v1773_v18 = vpop.xlane.xlu0 %1772  ;;  %v1863_v7 = vmul.f32 %v8266_v17, %v9531_v34 }
 0x484   :  { %v8268_v57 = vpop.eup %8267  ;;  %8271 = vrcp.f32 %v1773_v18  ;;  %7569 = vmatprep.mubr.msk.bf16.mxu1 %vm66_vm0, %v1887_v56 }
 0x485   :  { %8273 = vrcp.f32 %v1779_v0  ;;  %v1776_v2 = vpop.xlane.xlu1 %1775  ;;  %7570 = vmatmul.mubr.msk.bf16.vlgmr.msra.gmra.mrb[64].mxu1 %vm66_vm0, %v1888_v12  ;;  %v1864_v28 = vmul.f32 %v8268_v57, %v9536_v44 }
 0x486   :  { %8275 = vrcp.f32 %v1776_v2  ;;  %7594 = vmatpush3.bf16.msra.mxu1 %v9264_v24 }
 0x487   :  { %v1767_v39 = vpop.xlane.xlu0 %1766  ;;  %7595 = vmatprep.subr.bf16.mxu1 %v9262_v46  ;;  %v1889_v19 = vpack.c.bf16 %v1864_v28, %v1863_v7 }
 0x488   :  { %8277 = vrcp.f32 %v1767_v39  ;;  %v8105_v39 = vld [vmem:[%s11607_s6] sm:$0xff]  }
 0x489   :  { %v1770_v45 = vpop.xlane.xlu1 %1769  ;;  %7573 = vmatprep.mubr.msk.bf16.mxu1 %vm66_vm0, %v1889_v19  ;;  %7609 = vmatprep.subr.bf16.mxu0 %v8105_v39 }
 0x48a   :  { %8279 = vrcp.f32 %v1770_v45  ;;  %7596 = vmatpush3.bf16.msra.mxu1 %v9262_v46 }
 0x48b   :  { %v1785_v54 = vpop.xlane.xlu0 %1784  ;;  %7597 = vmatprep.subr.bf16.mxu1 %v9284_v32 }
 0x48c   :  { %8281 = vrcp.f32 %v1785_v54  ;;  %v8270_v34 = vpop.eup %8269 }
 0x48d   :  { %v1788_v44 = vpop.xlane.xlu1 %1787  ;;  %v1870_v8 = vmul.f32 %v8270_v34, %v9548_v37 }
 0x48e   :  { %v8272_v30 = vpop.eup %8271  ;;  %8283 = vrcp.f32 %v1788_v44  ;;  %7598 = vmatpush3.bf16.msra.mxu1 %v9284_v32 }
 0x48f   :  { %v8274_v24 = vpop.eup %8273  ;;  %v1791_v31 = vpop.xlane.xlu0 %1790  ;;  %7599 = vmatprep.subr.bf16.mxu1 %v9282_v40  ;;  %v1867_v46 = vmul.f32 %v8272_v30, %v9553_v42 }
 0x490   :  { %v8276_v43 = vpop.eup %8275  ;;  %8285 = vrcp.f32 %v1791_v31  ;;  %v1869_v52 = vmul.f32 %v8274_v24, %v9543_v29 }
 0x491   :  { %v1794_v5 = vpop.xlane.xlu1 %1793  ;;  %v1868_v1 = vmul.f32 %v8276_v43, %v9558_v48 }
 0x492   :  { %v8278_v49 = vpop.eup %8277  ;;  %8287 = vrcp.f32 %v1794_v5  ;;  %7600 = vmatpush3.bf16.msra.mxu1 %v9282_v40  ;;  %v1892_v53 = vpack.c.bf16 %v1870_v8, %v1869_v52 }
 0x493   :  { %v1797_v32 = vpop.xlane.xlu0 %1796  ;;  %v1891_v6 = vpack.c.bf16 %v1868_v1, %v1867_v46  ;;  %v1865_v27 = vmul.f32 %v8278_v49, %v9563_v55  ;;  %7619 = vmatprep.subr.bf16.mxu1 %v8105_v39 }
 0x494   :  { %v8280_v61 = vpop.eup %8279  ;;  %8289 = vrcp.f32 %v1797_v32 }
 0x495   :  { %7585 = vmatprep.mubr.msk.bf16.mxu0 %vm66_vm0, %v1891_v6  ;;  %v1800_v37 = vpop.xlane.xlu1 %1799  ;;  %v1866_v42 = vmul.f32 %v8280_v61, %v9568_v36 }
 0x496   :  { %v8282_v4 = vpop.eup %8281  ;;  %8291 = vrcp.f32 %v1800_v37  ;;  %7586 = vmatmul.mubr.msk.bf16.vlgmr.msra.gmra.mrb[72].mxu0 %vm66_vm0, %v1892_v53 }
 0x497   :  { %v1803_v29 = vpop.xlane.xlu0 %1802  ;;  %v1890_v48 = vpack.c.bf16 %v1866_v42, %v1865_v27  ;;  %v1871_v3 = vmul.f32 %v8282_v4, %v9573_v25  ;;  %7610 = vmatpush3.bf16.msra.mxu0 %v8105_v39 }
 0x498   :  { %v8284_v33 = vpop.eup %8283  ;;  %8293 = vrcp.f32 %v1803_v29 }
 0x499   :  { %v1806_v40 = vpop.xlane.xlu1 %1805  ;;  %7574 = vmatmul.mubr.msk.bf16.gmra.mrb[68].mxu1 %vm66_vm0, %v1890_v48  ;;  %v1872_v58 = vmul.f32 %v8284_v33, %v9578_v38 }
 0x49a   :  { %v8286_v11 = vpop.eup %8285  ;;  %8295 = vrcp.f32 %v1806_v40 }
 0x49b   :  { %v1809_v55 = vpop.xlane.xlu0 %1808  ;;  %v1893_v51 = vpack.c.bf16 %v1872_v58, %v1871_v3  ;;  %v1873_v47 = vmul.f32 %v8286_v11, %v9583_v23 }
 0x49c   :  { %v8288_v36 = vpop.eup %8287  ;;  %8297 = vrcp.f32 %v1809_v55 }
 0x49d   :  { %7589 = vmatprep.mubr.msk.bf16.mxu0 %vm66_vm0, %v1893_v51  ;;  %v1812_v13 = vpop.xlane.xlu1 %1811  ;;  %v1874_v59 = vmul.f32 %v8288_v36, %v9588_v16 }
 0x49e   :  { %v8290_v15 = vpop.eup %8289  ;;  %8299 = vrcp.f32 %v1812_v13 }
 0x49f   :  { %v1815_v10 = vpop.xlane.xlu0 %1814  ;;  %v1894_v0 = vpack.c.bf16 %v1874_v59, %v1873_v47  ;;  %v1875_v22 = vmul.f32 %v8290_v15, %v9593_v9 }
 0x4a0   :  { %v8292_v25 = vpop.eup %8291  ;;  %8301 = vrcp.f32 %v1815_v10 }
 0x4a1   :  { %7590 = vmatmul.mubr.msk.bf16.gmra.mrb[76].mxu0 %vm66_vm0, %v1894_v0  ;;  %v1818_v38 = vpop.xlane.xlu1 %1817  ;;  %v1876_v35 = vmul.f32 %v8292_v25, %v9598_v50 }
 0x4a2   :  { %v8294_v60 = vpop.eup %8293  ;;  %8303 = vrcp.f32 %v1818_v38 }
 0x4a3   :  { %v1895_v41 = vpack.c.bf16 %v1876_v35, %v1875_v22  ;;  %v1877_v23 = vmul.f32 %v8294_v60, %v9602_v20 }
 0x4a4   :  { %v8296_v17 = vpop.eup %8295 }
 0x4a5   :  { %v1878_v16 = vmul.f32 %v8296_v17, %v9606_v62  ;;  %7601 = vmatprep.mubr.msk.bf16.mxu1 %vm66_vm0, %v1895_v41 }
 0x4a6   :  { %v8298_v56 = vpop.eup %8297 }
 0x4a7   :  { %v1896_v12 = vpack.c.bf16 %v1878_v16, %v1877_v23  ;;  %v1879_v57 = vmul.f32 %v8298_v56, %v9610_v14  ;;  %v8106_v14 = vld [vmem:[%s11607_s6 + $0x8] sm:$0xff]  }
 0x4a8   :  { %v8300_v18 = vpop.eup %8299  ;;  %7629 = vmatprep.subr.bf16.mxu0 %v8106_v14 }
 0x4a9   :  { %7602 = vmatmul.mubr.msk.bf16.vlgmr.msra.gmra.mrb[72].mxu1 %vm66_vm0, %v1896_v12  ;;  %v1880_v9 = vmul.f32 %v8300_v18, %v9614_v21 }
 0x4aa   :  { %v8302_v50 = vpop.eup %8301  ;;  %7620 = vmatpush3.bf16.msra.mxu1 %v8105_v39 }
 0x4ab   :  { %v1897_v2 = vpack.c.bf16 %v1880_v9, %v1879_v57  ;;  %v1881_v20 = vmul.f32 %v8302_v50, %v9618_v63  ;;  %7639 = vmatprep.subr.bf16.mxu1 %v8106_v14 }
 0x4ac   :  { %v8304_v7 = vpop.eup %8303 }
 0x4ad   :  { %7605 = vmatprep.mubr.msk.bf16.mxu1 %vm66_vm0, %v1897_v2  ;;  %v1882_v62 = vmul.f32 %v8304_v7, %v9622_v26 }
 0x4af   :  { %v1898_v28 = vpack.c.bf16 %v1882_v62, %v1881_v20 }
 0x4b1   :  { %7606 = vmatmul.mubr.msk.bf16.gmra.mrb[76].mxu1 %vm66_vm0, %v1898_v28 }
 0x548   :  { %v7555_v21 = vpop.f32.mrb[64].mxu0 }
 0x549   :  { %v1945_v63 = vpop.f32.mrb[65].mxu0 }
 0x54a   :  { %v7556_v26 = vpop.f32.mrb[66].mxu0 }
 0x54b   :  { %v2212_v19 = vpack.c.bf16 %v7556_v26, %v7555_v21  ;;  %v1948_v45 = vpop.f32.mrb[67].mxu0 }
 0x54c   :  { %v2211_v54 = vpack.c.bf16 %v1948_v45, %v1945_v63 }
 0x54e   :  { %7611 = vmatprep.mubr.msk.bf16.mxu0 %vm1174_vm1, %v2211_v54 }
 0x54f   :  { %7612 = vmatmul.mubr.msk.bf16.vlgmr.msra.gmra.mrb[80].mxu0 %vm1174_vm1, %v2212_v19 }
 0x550   :  { %v7559_v34 = vpop.f32.mrb[68].mxu0  ;;  %7630 = vmatpush3.bf16.msra.mxu0 %v8106_v14 }
 0x551   :  { %v1961_v44 = vpop.f32.mrb[69].mxu0 }
 0x552   :  { %v7560_v30 = vpop.f32.mrb[70].mxu0 }
 0x553   :  { %v2214_v24 = vpack.c.bf16 %v7560_v30, %v7559_v34  ;;  %v1964_v31 = vpop.f32.mrb[71].mxu0 }
 0x554   :  { %v2213_v43 = vpack.c.bf16 %v1964_v31, %v1961_v44  ;;  %v9730_v31 = vld [vmem:[%s11608_s7] ss:$0 sm:$0xff] }
 0x556   :  { %7615 = vmatprep.mubr.msk.bf16.mxu0 %vm1174_vm1, %v2213_v43 }
 0x557   :  { %7616 = vmatmul.mubr.msk.bf16.gmra.mrb[84].mxu0 %vm1174_vm1, %v2214_v24 }
 0x558   :  { %v7571_v8 = vpop.f32.mrb[64].mxu1 }
 0x559   :  { %v2022_v5 = vpop.f32.mrb[65].mxu1 }
 0x55a   :  { %v7572_v46 = vpop.f32.mrb[66].mxu1 }
 0x55b   :  { %v2216_v1 = vpack.c.bf16 %v7572_v46, %v7571_v8  ;;  %v2025_v49 = vpop.f32.mrb[67].mxu1  ;;  %v8593_v46 = vld [vmem:[%s11601_s0 + $0x10] sm:$0xff] }
 0x55c   :  { %v2215_v52 = vpack.c.bf16 %v2025_v49, %v2022_v5  ;;  %v8594_v49 = vld [vmem:[%s11601_s0] sm:$0xff] }
 0x55e   :  { %7621 = vmatprep.mubr.msk.bf16.mxu1 %vm1174_vm1, %v2215_v52 }
 0x55f   :  { %7622 = vmatmul.mubr.msk.bf16.vlgmr.msra.gmra.mrb[80].mxu1 %vm1174_vm1, %v2216_v1 }
 0x560   :  { %7640 = vmatpush3.bf16.msra.mxu1 %v8106_v14 }
 0x569   :  { %v7587_v32 = vpop.f32.mrb[72].mxu0 }
 0x56a   :  { %v2099_v6 = vpop.f32.mrb[73].mxu0 }
 0x56b   :  { %v7588_v61 = vpop.f32.mrb[74].mxu0 }
 0x56c   :  { %v2220_v53 = vpack.c.bf16 %v7588_v61, %v7587_v32  ;;  %v7575_v37 = vpop.f32.mrb[68].mxu1  ;;  %v2102_v27 = vpop.f32.mrb[75].mxu0 }
 0x56d   :  { %v2219_v42 = vpack.c.bf16 %v2102_v27, %v2099_v6  ;;  %v2038_v4 = vpop.f32.mrb[69].mxu1  ;;  %v8596_v27 = vld [vmem:[%s11601_s0 + $0x8] sm:$0xff] }
 0x56e   :  { %v7576_v29 = vpop.f32.mrb[70].mxu1 }
 0x56f   :  { %v2218_v48 = vpack.c.bf16 %v7576_v29, %v7575_v37  ;;  %v2041_v33 = vpop.f32.mrb[71].mxu1  ;;  %7631 = vmatprep.mubr.msk.bf16.mxu0 %vm1174_vm1, %v2219_v42 }
 0x570   :  { %v2217_v40 = vpack.c.bf16 %v2041_v33, %v2038_v4  ;;  %7632 = vmatmul.mubr.msk.bf16.vlgmr.msra.gmra.mrb[88].mxu0 %vm1174_vm1, %v2220_v53  ;;  %v8595_v53 = vld [vmem:[%s11601_s0 + $0x18] sm:$0xff] }
 0x572   :  { %7625 = vmatprep.mubr.msk.bf16.mxu1 %vm1174_vm1, %v2217_v40 }
 0x573   :  { %7626 = vmatmul.mubr.msk.bf16.gmra.mrb[84].mxu1 %vm1174_vm1, %v2218_v48 }
 0x574   :  { %v7591_v3 = vpop.f32.mrb[76].mxu0 }
 0x575   :  { %v2115_v58 = vpop.f32.mrb[77].mxu0 }
 0x576   :  { %v7592_v11 = vpop.f32.mrb[78].mxu0 }
 0x577   :  { %v2222_v55 = vpack.c.bf16 %v7592_v11, %v7591_v3  ;;  %v2118_v51 = vpop.f32.mrb[79].mxu0 }
 0x578   :  { %v2221_v36 = vpack.c.bf16 %v2118_v51, %v2115_v58 }
 0x57a   :  { %7635 = vmatprep.mubr.msk.bf16.mxu0 %vm1174_vm1, %v2221_v36 }
 0x57b   :  { %7636 = vmatmul.mubr.msk.bf16.gmra.mrb[92].mxu0 %vm1174_vm1, %v2222_v55 }
 0x57c   :  { %v7603_v13 = vpop.f32.mrb[72].mxu1 }
 0x57d   :  { %v2176_v47 = vpop.f32.mrb[73].mxu1 }
 0x57e   :  { %v7604_v59 = vpop.f32.mrb[74].mxu1 }
 0x57f   :  { %v2224_v15 = vpack.c.bf16 %v7604_v59, %v7603_v13  ;;  %v2179_v10 = vpop.f32.mrb[75].mxu1 }
 0x580   :  { %v2223_v0 = vpack.c.bf16 %v2179_v10, %v2176_v47 }
 0x582   :  { %7641 = vmatprep.mubr.msk.bf16.mxu1 %vm1174_vm1, %v2223_v0 }
 0x583   :  { %7642 = vmatmul.mubr.msk.bf16.vlgmr.msra.gmra.mrb[88].mxu1 %vm1174_vm1, %v2224_v15 }
 0x584   :  { %v7607_v25 = vpop.f32.mrb[76].mxu1 }
 0x585   :  { %v2192_v38 = vpop.f32.mrb[77].mxu1 }
 0x586   :  { %v7608_v22 = vpop.f32.mrb[78].mxu1 }
 0x587   :  { %v2226_v35 = vpack.c.bf16 %v7608_v22, %v7607_v25  ;;  %v2195_v60 = vpop.f32.mrb[79].mxu1 }
 0x588   :  { %v2225_v41 = vpack.c.bf16 %v2195_v60, %v2192_v38 }
 0x58a   :  { %7645 = vmatprep.mubr.msk.bf16.mxu1 %vm1174_vm1, %v2225_v41 }
 0x58b   :  { %7646 = vmatmul.mubr.msk.bf16.gmra.mrb[92].mxu1 %vm1174_vm1, %v2226_v35 }
 0x622   :  { %v7613_v17 = vpop.f32.mrb[80].mxu0 }
 0x623   :  { %v2279_v23 = vpop.f32.mrb[81].mxu0  ;;  %v2553_v28 = vsel %vm66_vm0, %v7613_v17, 0.0  ;;  %v8597_v17 = vld [vmem:[%s11601_s0 + $0x30] sm:$0xff] }
 0x624   :  { %v7614_v16 = vpop.f32.mrb[82].mxu0  ;;  %v2547_v21 = vsel %vm66_vm0, %v2279_v23, 0.0 }
 0x625   :  { %v2282_v56 = vpop.f32.mrb[83].mxu0  ;;  %v2556_v45 = vsel %vm66_vm0, %v7614_v16, 0.0  ;;  %v8598_v16 = vld [vmem:[%s11601_s0 + $0x20] sm:$0xff] }
 0x626   :  { %v2550_v24 = vsel %vm66_vm0, %v2282_v56, 0.0 }
 0x62a   :  { %v7617_v12 = vpop.f32.mrb[84].mxu0 }
 0x62b   :  { %v2295_v18 = vpop.f32.mrb[85].mxu0  ;;  %v2565_v11 = vsel %vm66_vm0, %v7617_v12, 0.0 }
 0x62c   :  { %v7618_v57 = vpop.f32.mrb[86].mxu0  ;;  %v2559_v36 = vsel %vm66_vm0, %v2295_v18, 0.0 }
 0x62d   :  { %v2298_v9 = vpop.f32.mrb[87].mxu0  ;;  %v2568_v10 = vsel %vm66_vm0, %v7618_v57, 0.0  ;;  %v8599_v57 = vld [vmem:[%s11601_s0 + $0x38] sm:$0xff] }
 0x62e   :  { %v2562_v22 = vsel %vm66_vm0, %v2298_v9, 0.0 }
 0x632   :  { %v9710_v50 = vpop.f32.mrb[80].mxu1 }
 0x633   :  { %v9712_v2 = vpop.f32.mrb[81].mxu1 }
 0x634   :  { %v9714_v7 = vpop.f32.mrb[82].mxu1 }
 0x635   :  { %v9716_v20 = vpop.f32.mrb[83].mxu1 }
 0x643   :  { %v7633_v62 = vpop.f32.mrb[88].mxu0 }
 0x644   :  { %v2554_v39 = vsel %vm66_vm0, %v7633_v62, 0.0  ;;  %v2439_v14 = vpop.f32.mrb[89].mxu0  ;;  %v8600_v62 = vld [vmem:[%s11601_s0 + $0x28] sm:$0xff] }
 0x645   :  { %v2555_v63 = vadd.f32 %v2554_v39, %v2553_v28  ;;  %v2548_v26 = vsel %vm66_vm0, %v2439_v14, 0.0  ;;  %v7634_v19 = vpop.f32.mrb[90].mxu0  ;;  %v2577_v39 = vsel %vm66_vm0, %v9710_v50, 0.0 }
 0x646   :  { %v2549_v54 = vadd.f32 %v2548_v26, %v2547_v21  ;;  %v2557_v34 = vsel %vm66_vm0, %v7634_v19, 0.0  ;;  %v9724_v44 = vpop.f32.mrb[84].mxu1  ;;  %v2442_v30 = vpop.f32.mrb[91].mxu0 }
 0x647   :  { %v2558_v43 = vadd.f32 %v2557_v34, %v2556_v45  ;;  %v2551_v8 = vsel %vm66_vm0, %v2442_v30, 0.0  ;;  %v9733_v5 = vpop.f32.mrb[85].mxu1  ;;  %v2597_v1 = vadd.f32 %v8593_v46, %v2555_v63  ;;  %v2580_v34 = vsel %vm66_vm0, %v9714_v7, 0.0 }
 0x648   :  { %v2595_v52 = vadd.f32 %v8594_v49, %v2549_v54  ;;  %v2552_v32 = vadd.f32 %v2551_v8, %v2550_v24  ;;  %v9741_v6 = vpop.f32.mrb[86].mxu1  ;;  %v2571_v54 = vsel %vm66_vm0, %v9712_v2, 0.0  ;;  %v2574_v2 = vsel %vm66_vm0, %v9716_v20, 0.0 }
 0x649   :  { %v9743_v61 = vpop.f32.mrb[87].mxu1  ;;  %v2598_v37 = vadd.f32 %v8595_v53, %v2558_v43  ;;  %v9755_v29 = vadd.f32 %v9730_v31, %v2597_v1 }
 0x64a   :  { %v2596_v42 = vadd.f32 %v8596_v27, %v2552_v32  ;;  %v9752_v4 = vadd.f32 %v9730_v31, %v2595_v52  ;;  %v8601_v32 = vld [vmem:[%s11601_s0 + $0x50] sm:$0xff] }
 0x64b   :  { %v9763_v40 = vadd.f32 %v9730_v31, %v2598_v37  ;;  %v2642_v15 = vsel %vm66_vm0, %v9755_v29, 0.0  ;;  %v8602_v37 = vld [vmem:[%s11601_s0 + $0x40] sm:$0xff] }
 0x64c   :  { %v2636_v48 = vsel %vm66_vm0, %v9752_v4, 0.0  ;;  %v9760_v33 = vadd.f32 %v9730_v31, %v2596_v42 }
 0x64d   :  { %2637 = vadd.xlane.f32.xlu0 %v2636_v48  ;;  %v2645_v41 = vsel %vm66_vm0, %v9763_v40, 0.0 }
 0x64e   :  { %v7637_v3 = vpop.f32.mrb[92].mxu0  ;;  %v2639_v58 = vsel %vm66_vm0, %v9760_v33, 0.0 }
 0x64f   :  { %v2566_v55 = vsel %vm66_vm0, %v7637_v3, 0.0  ;;  %2640 = vadd.xlane.f32.xlu1 %v2639_v58  ;;  %v2455_v51 = vpop.f32.mrb[93].mxu0  ;;  %v8603_v3 = vld [vmem:[%s11601_s0 + $0x58] sm:$0xff] }
 0x650   :  { %v2567_v13 = vadd.f32 %v2566_v55, %v2565_v11  ;;  %v2560_v47 = vsel %vm66_vm0, %v2455_v51, 0.0  ;;  %v7638_v59 = vpop.f32.mrb[94].mxu0  ;;  %v8604_v11 = vld [vmem:[%s11601_s0 + $0x48] sm:$0xff] }
 0x651   :  { %v2561_v0 = vadd.f32 %v2560_v47, %v2559_v36  ;;  %v2569_v25 = vsel %vm66_vm0, %v7638_v59, 0.0  ;;  %2643 = vadd.xlane.f32.xlu0 %v2642_v15  ;;  %v2458_v38 = vpop.f32.mrb[95].mxu0  ;;  %v2589_v36 = vsel %vm66_vm0, %v9724_v44, 0.0  ;;  %v2592_v44 = vsel %vm66_vm0, %v9741_v6, 0.0 }
 0x652   :  { %v2570_v35 = vadd.f32 %v2569_v25, %v2568_v10  ;;  %v2563_v60 = vsel %vm66_vm0, %v2458_v38, 0.0  ;;  %v2601_v23 = vadd.f32 %v8597_v17, %v2567_v13  ;;  %v2583_v25 = vsel %vm66_vm0, %v9733_v5, 0.0 }
 0x653   :  { %v2599_v56 = vadd.f32 %v8598_v16, %v2561_v0  ;;  %v2564_v12 = vadd.f32 %v2563_v60, %v2562_v22  ;;  %2646 = vadd.xlane.f32.xlu1 %v2645_v41  ;;  %v2586_v5 = vsel %vm66_vm0, %v9743_v61, 0.0 }
 0x654   :  { %v2602_v9 = vadd.f32 %v8599_v57, %v2570_v35  ;;  %v9797_v21 = vadd.f32 %v9730_v31, %v2601_v23 }
 0x655   :  { %v9786_v18 = vadd.f32 %v9730_v31, %v2599_v56  ;;  %v2600_v28 = vadd.f32 %v8600_v62, %v2564_v12  ;;  %v8605_v12 = vld [vmem:[%s11601_s0 + $0x70] sm:$0xff] }
 0x656   :  { %v7643_v14 = vpop.f32.mrb[88].mxu1  ;;  %v9811_v43 = vadd.f32 %v9730_v31, %v2602_v9  ;;  %v2654_v48 = vsel %vm66_vm0, %v9797_v21, 0.0  ;;  %v8606_v9 = vld [vmem:[%s11601_s0 + $0x60] sm:$0xff] }
 0x657   :  { %v9800_v63 = vadd.f32 %v9730_v31, %v2600_v28  ;;  %v2578_v26 = vsel %vm66_vm0, %v7643_v14, 0.0  ;;  %v2516_v19 = vpop.f32.mrb[89].mxu1  ;;  %v2648_v45 = vsel %vm66_vm0, %v9786_v18, 0.0  ;;  %v8607_v14 = vld [vmem:[%s11601_s0 + $0x78] sm:$0xff] }
 0x658   :  { %v2579_v50 = vadd.f32 %v2578_v26, %v2577_v39  ;;  %v2572_v30 = vsel %vm66_vm0, %v2516_v19, 0.0  ;;  %2649 = vadd.xlane.f32.xlu0 %v2648_v45  ;;  %v7644_v24 = vpop.f32.mrb[90].mxu1  ;;  %v2657_v51 = vsel %vm66_vm0, %v9811_v43, 0.0  ;;  %v8608_v19 = vld [vmem:[%s11601_s0 + $0x68] sm:$0xff] }
 0x659   :  { %v2573_v8 = vadd.f32 %v2572_v30, %v2571_v54  ;;  %v2581_v46 = vsel %vm66_vm0, %v7644_v24, 0.0  ;;  %v2519_v1 = vpop.f32.mrb[91].mxu1  ;;  %v2651_v49 = vsel %vm66_vm0, %v9800_v63, 0.0 }
 0x65a   :  { %v2582_v52 = vadd.f32 %v2581_v46, %v2580_v34  ;;  %v2575_v7 = vsel %vm66_vm0, %v2519_v1, 0.0  ;;  %2652 = vadd.xlane.f32.xlu1 %v2651_v49  ;;  %v2605_v53 = vadd.f32 %v8601_v32, %v2579_v50 }
 0x65b   :  { %v2603_v27 = vadd.f32 %v8602_v37, %v2573_v8  ;;  %v2576_v42 = vadd.f32 %v2575_v7, %v2574_v2 }
 0x65c   :  { %2655 = vadd.xlane.f32.xlu0 %v2654_v48  ;;  %v2606_v58 = vadd.f32 %v8603_v3, %v2582_v52  ;;  %v9841_v47 = vadd.f32 %v9730_v31, %v2605_v53 }
 0x65d   :  { %v9828_v20 = vadd.f32 %v9730_v31, %v2603_v27  ;;  %v2604_v55 = vadd.f32 %v8604_v11, %v2576_v42 }
 0x65e   :  { %2658 = vadd.xlane.f32.xlu1 %v2657_v51  ;;  %v7647_v13 = vpop.f32.mrb[92].mxu1  ;;  %v9855_v60 = vadd.f32 %v9730_v31, %v2606_v58  ;;  %v2666_v39 = vsel %vm66_vm0, %v9841_v47, 0.0 }
 0x65f   :  { %v9844_v59 = vadd.f32 %v9730_v31, %v2604_v55  ;;  %v2590_v15 = vsel %vm66_vm0, %v7647_v13, 0.0  ;;  %v2532_v10 = vpop.f32.mrb[93].mxu1  ;;  %v2660_v0 = vsel %vm66_vm0, %v9828_v20, 0.0 }
 0x660   :  { %v2591_v38 = vadd.f32 %v2590_v15, %v2589_v36  ;;  %v2584_v22 = vsel %vm66_vm0, %v2532_v10, 0.0  ;;  %2661 = vadd.xlane.f32.xlu0 %v2660_v0  ;;  %v7648_v35 = vpop.f32.mrb[94].mxu1  ;;  %v2669_v54 = vsel %vm66_vm0, %v9855_v60, 0.0 }
 0x661   :  { %v2585_v41 = vadd.f32 %v2584_v22, %v2583_v25  ;;  %v2593_v17 = vsel %vm66_vm0, %v7648_v35, 0.0  ;;  %v2535_v23 = vpop.f32.mrb[95].mxu1  ;;  %v2663_v16 = vsel %vm66_vm0, %v9844_v59, 0.0 }
 0x662   :  { %v2594_v56 = vadd.f32 %v2593_v17, %v2592_v44  ;;  %v2587_v6 = vsel %vm66_vm0, %v2535_v23, 0.0  ;;  %2664 = vadd.xlane.f32.xlu1 %v2663_v16  ;;  %v2609_v57 = vadd.f32 %v8605_v12, %v2591_v38 }
 0x663   :  { %v2607_v62 = vadd.f32 %v8606_v9, %v2585_v41  ;;  %v2588_v28 = vadd.f32 %v2587_v6, %v2586_v5 }
 0x664   :  { %2667 = vadd.xlane.f32.xlu0 %v2666_v39  ;;  %v2610_v26 = vadd.f32 %v8607_v14, %v2594_v56  ;;  %v9883_v34 = vadd.f32 %v9730_v31, %v2609_v57 }
 0x665   :  { %v9872_v61 = vadd.f32 %v9730_v31, %v2607_v62  ;;  %v2608_v45 = vadd.f32 %v8608_v19, %v2588_v28 }
 0x666   :  { %2670 = vadd.xlane.f32.xlu1 %v2669_v54  ;;  %v9891_v24 = vadd.f32 %v9730_v31, %v2610_v26  ;;  %v2678_v46 = vsel %vm66_vm0, %v9883_v34, 0.0 }
 0x667   :  { %v9886_v50 = vadd.f32 %v9730_v31, %v2608_v45  ;;  %v2672_v30 = vsel %vm66_vm0, %v9872_v61, 0.0 }
 0x668   :  { %2673 = vadd.xlane.f32.xlu0 %v2672_v30  ;;  %v2681_v1 = vsel %vm66_vm0, %v9891_v24, 0.0 }
 0x669   :  { %v2675_v8 = vsel %vm66_vm0, %v9886_v50, 0.0 }
 0x66a   :  { %2676 = vadd.xlane.f32.xlu1 %v2675_v8 }
 0x66c   :  { %2679 = vadd.xlane.f32.xlu0 %v2678_v46 }
 0x66e   :  { %2682 = vadd.xlane.f32.xlu1 %v2681_v1 }
 0x6da   :  { %v2638_v49 = vpop.xlane.xlu0 %2637 }
 0x6db   :  { %v2684_v2 = vmul.f32 0.015625, %v2638_v49 }
 0x6dc   :  { %v2641_v52 = vpop.xlane.xlu1 %2640 }
 0x6dd   :  { %v9900_v7 = vsub.f32 %v9752_v4, %v2684_v2  ;;  %v2685_v31 = vmul.f32 0.015625, %v2641_v52 }
 0x6de   :  { %v2644_v32 = vpop.xlane.xlu0 %2643 }
 0x6df   :  { %v9903_v53 = vsub.f32 %v9760_v33, %v2685_v31  ;;  %v2686_v37 = vmul.f32 0.015625, %v2644_v32  ;;  %v2716_v27 = vmul.f32 %v9900_v7, %v9900_v7 }
 0x6e0   :  { %v2647_v42 = vpop.xlane.xlu1 %2646 }
 0x6e1   :  { %v9908_v48 = vsub.f32 %v9755_v29, %v2686_v37  ;;  %v2687_v3 = vmul.f32 0.015625, %v2647_v42  ;;  %v2732_v58 = vsel %vm66_vm0, %v2716_v27, 0.0  ;;  %v2717_v11 = vmul.f32 %v9903_v53, %v9903_v53 }
 0x6e2   :  { %2733 = vadd.xlane.f32.xlu0 %v2732_v58 }
 0x6e3   :  { %v9914_v55 = vsub.f32 %v9763_v40, %v2687_v3  ;;  %v2735_v51 = vsel %vm66_vm0, %v2717_v11, 0.0  ;;  %v2718_v36 = vmul.f32 %v9908_v48, %v9908_v48 }
 0x6e4   :  { %2736 = vadd.xlane.f32.xlu1 %v2735_v51 }
 0x6e5   :  { %v2650_v13 = vpop.xlane.xlu0 %2649  ;;  %v2738_v15 = vsel %vm66_vm0, %v2718_v36, 0.0  ;;  %v2719_v10 = vmul.f32 %v9914_v55, %v9914_v55 }
 0x6e6   :  { %v2688_v0 = vmul.f32 0.015625, %v2650_v13  ;;  %2739 = vadd.xlane.f32.xlu0 %v2738_v15 }
 0x6e7   :  { %v2653_v25 = vpop.xlane.xlu1 %2652  ;;  %v2741_v44 = vsel %vm66_vm0, %v2719_v10, 0.0 }
 0x6e8   :  { %v9924_v38 = vsub.f32 %v9786_v18, %v2688_v0  ;;  %v2689_v22 = vmul.f32 0.015625, %v2653_v25  ;;  %2742 = vadd.xlane.f32.xlu1 %v2741_v44 }
 0x6e9   :  { %v2656_v35 = vpop.xlane.xlu0 %2655 }
 0x6ea   :  { %v9927_v41 = vsub.f32 %v9800_v63, %v2689_v22  ;;  %v2690_v17 = vmul.f32 0.015625, %v2656_v35  ;;  %v2720_v23 = vmul.f32 %v9924_v38, %v9924_v38 }
 0x6eb   :  { %v2659_v16 = vpop.xlane.xlu1 %2658 }
 0x6ec   :  { %v9932_v5 = vsub.f32 %v9797_v21, %v2690_v17  ;;  %v2691_v56 = vmul.f32 0.015625, %v2659_v16  ;;  %v2744_v6 = vsel %vm66_vm0, %v2720_v23, 0.0  ;;  %v2721_v12 = vmul.f32 %v9927_v41, %v9927_v41  ;;  %v8107_v23 = vld [vmem:[%s11609_s10] sm:$0xff]  }
 0x6ed   :  { %v2662_v57 = vpop.xlane.xlu0 %2661  ;;  %2745 = vadd.xlane.f32.xlu0 %v2744_v6  ;;  %7649 = vmatprep.subr.bf16.mxu0 %v8107_v23 }
 0x6ee   :  { %v9938_v9 = vsub.f32 %v9811_v43, %v2691_v56  ;;  %v2692_v62 = vmul.f32 0.015625, %v2662_v57  ;;  %v2747_v28 = vsel %vm66_vm0, %v2721_v12, 0.0  ;;  %v2722_v39 = vmul.f32 %v9932_v5, %v9932_v5  ;;  %7650 = vmatpush3.bf16.msra.mxu0 %v8107_v23 }
 0x6ef   :  { %v2665_v14 = vpop.xlane.xlu1 %2664  ;;  %2748 = vadd.xlane.f32.xlu1 %v2747_v28 }
 0x6f0   :  { %v9944_v26 = vsub.f32 %v9828_v20, %v2692_v62  ;;  %v2693_v19 = vmul.f32 0.015625, %v2665_v14  ;;  %v2750_v45 = vsel %vm66_vm0, %v2722_v39, 0.0  ;;  %v2723_v54 = vmul.f32 %v9938_v9, %v9938_v9  ;;  %v8108_v39 = vld [vmem:[%s11609_s10 + $0x8] sm:$0xff]  }
 0x6f1   :  { %v2668_v30 = vpop.xlane.xlu0 %2667  ;;  %2751 = vadd.xlane.f32.xlu0 %v2750_v45  ;;  %7651 = vmatprep.subr.bf16.mxu0 %v8108_v39 }
 0x6f2   :  { %v9950_v8 = vsub.f32 %v9844_v59, %v2693_v19  ;;  %v2694_v46 = vmul.f32 0.015625, %v2668_v30  ;;  %v2753_v1 = vsel %vm66_vm0, %v2723_v54, 0.0  ;;  %v2724_v49 = vmul.f32 %v9944_v26, %v9944_v26  ;;  %7652 = vmatpush3.bf16.msra.mxu0 %v8108_v39  ;;  %v8109_v54 = vld [vmem:[%s11609_s10 + $0x10] sm:$0xff]   ;;  %v8110_v30 = vld [vmem:[%s11609_s10 + $0x18] sm:$0xff]  }
 0x6f3   :  { %v2671_v2 = vpop.xlane.xlu1 %2670  ;;  %2754 = vadd.xlane.f32.xlu1 %v2753_v1  ;;  %7653 = vmatprep.subr.bf16.mxu0 %v8109_v54 }
 0x6f4   :  { %v9956_v52 = vsub.f32 %v9841_v47, %v2694_v46  ;;  %v2695_v31 = vmul.f32 0.015625, %v2671_v2  ;;  %v2756_v32 = vsel %vm66_vm0, %v2724_v49, 0.0  ;;  %v2725_v37 = vmul.f32 %v9950_v8, %v9950_v8 }
 0x6f5   :  { %2757 = vadd.xlane.f32.xlu0 %v2756_v32  ;;  %v2674_v27 = vpop.xlane.xlu0 %2673 }
 0x6f6   :  { %v9962_v42 = vsub.f32 %v9855_v60, %v2695_v31  ;;  %v2696_v3 = vmul.f32 0.015625, %v2674_v27  ;;  %v2759_v58 = vsel %vm66_vm0, %v2725_v37, 0.0  ;;  %v2726_v11 = vmul.f32 %v9956_v52, %v9956_v52  ;;  %7654 = vmatpush3.bf16.msra.mxu0 %v8109_v54 }
 0x6f7   :  { %2760 = vadd.xlane.f32.xlu1 %v2759_v58  ;;  %v2677_v51 = vpop.xlane.xlu1 %2676  ;;  %7655 = vmatprep.subr.bf16.mxu0 %v8110_v30 }
 0x6f8   :  { %v9968_v36 = vsub.f32 %v9872_v61, %v2696_v3  ;;  %v2697_v13 = vmul.f32 0.015625, %v2677_v51  ;;  %v2762_v15 = vsel %vm66_vm0, %v2726_v11, 0.0  ;;  %v2727_v10 = vmul.f32 %v9962_v42, %v9962_v42 }
 0x6f9   :  { %2763 = vadd.xlane.f32.xlu0 %v2762_v15  ;;  %v2680_v0 = vpop.xlane.xlu0 %2679 }
 0x6fa   :  { %v9974_v25 = vsub.f32 %v9886_v50, %v2697_v13  ;;  %v2698_v44 = vmul.f32 0.015625, %v2680_v0  ;;  %v2765_v22 = vsel %vm66_vm0, %v2727_v10, 0.0  ;;  %v2728_v35 = vmul.f32 %v9968_v36, %v9968_v36  ;;  %7656 = vmatpush3.bf16.msra.mxu0 %v8110_v30  ;;  %v10018_v30 = vld [vmem:[%s11611_s9] ss:$0 sm:$0xff] }
 0x6fb   :  { %2766 = vadd.xlane.f32.xlu1 %v2765_v22  ;;  %v2683_v17 = vpop.xlane.xlu1 %2682 }
 0x6fc   :  { %v9983_v16 = vsub.f32 %v9883_v34, %v2698_v44  ;;  %v2699_v56 = vmul.f32 0.015625, %v2683_v17  ;;  %v2768_v6 = vsel %vm66_vm0, %v2728_v35, 0.0  ;;  %v2729_v12 = vmul.f32 %v9974_v25, %v9974_v25  ;;  %v10010_v17 = vld [vmem:[%s11610_s8] ss:$0 sm:$0xff] }
 0x6fd   :  { %2769 = vadd.xlane.f32.xlu0 %v2768_v6 }
 0x6fe   :  { %v9989_v57 = vsub.f32 %v9891_v24, %v2699_v56  ;;  %v2771_v62 = vsel %vm66_vm0, %v2729_v12, 0.0  ;;  %v2730_v28 = vmul.f32 %v9983_v16, %v9983_v16 }
 0x6ff   :  { %2772 = vadd.xlane.f32.xlu1 %v2771_v62 }
 0x700   :  { %v2774_v14 = vsel %vm66_vm0, %v2730_v28, 0.0  ;;  %v2731_v19 = vmul.f32 %v9989_v57, %v9989_v57 }
 0x701   :  { %2775 = vadd.xlane.f32.xlu0 %v2774_v14 }
 0x702   :  { %v2777_v45 = vsel %vm66_vm0, %v2731_v19, 0.0 }
 0x703   :  { %2778 = vadd.xlane.f32.xlu1 %v2777_v45 }
 0x76f   :  { %v2734_v46 = vpop.xlane.xlu0 %2733 }
 0x770   :  { %v2780_v1 = vmul.f32 0.015625, %v2734_v46 }
 0x771   :  { %v2737_v49 = vpop.xlane.xlu1 %2736 }
 0x772   :  { %v2796_v2 = vadd.f32 1e-05, %v2780_v1  ;;  %v2781_v31 = vmul.f32 0.015625, %v2737_v49 }
 0x773   :  { %v2740_v32 = vpop.xlane.xlu0 %2739 }
 0x774   :  { %8305 = vrsqrt.f32 %v2796_v2  ;;  %v2797_v37 = vadd.f32 1e-05, %v2781_v31  ;;  %v2782_v27 = vmul.f32 0.015625, %v2740_v32 }
 0x775   :  { %v2743_v3 = vpop.xlane.xlu1 %2742 }
 0x776   :  { %8307 = vrsqrt.f32 %v2797_v37  ;;  %v2798_v58 = vadd.f32 1e-05, %v2782_v27  ;;  %v2783_v11 = vmul.f32 0.015625, %v2743_v3 }
 0x778   :  { %8309 = vrsqrt.f32 %v2798_v58  ;;  %v2799_v51 = vadd.f32 1e-05, %v2783_v11 }
 0x77a   :  { %8311 = vrsqrt.f32 %v2799_v51  ;;  %v2746_v13 = vpop.xlane.xlu0 %2745 }
 0x77b   :  { %v2784_v15 = vmul.f32 0.015625, %v2746_v13 }
 0x77c   :  { %v2749_v10 = vpop.xlane.xlu1 %2748 }
 0x77d   :  { %v2800_v0 = vadd.f32 1e-05, %v2784_v15  ;;  %v2785_v44 = vmul.f32 0.015625, %v2749_v10 }
 0x77e   :  { %v8306_v22 = vpop.eup %8305  ;;  %v2752_v35 = vpop.xlane.xlu0 %2751 }
 0x77f   :  { %8313 = vrsqrt.f32 %v2800_v0  ;;  %v2801_v23 = vadd.f32 1e-05, %v2785_v44  ;;  %v2786_v56 = vmul.f32 0.015625, %v2752_v35  ;;  %v2828_v6 = vmul.f32 %v8306_v22, %v9900_v7 }
 0x780   :  { %v8308_v12 = vpop.eup %8307  ;;  %v2755_v62 = vpop.xlane.xlu1 %2754 }
 0x781   :  { %8315 = vrsqrt.f32 %v2801_v23  ;;  %v2802_v28 = vadd.f32 1e-05, %v2786_v56  ;;  %v2787_v39 = vmul.f32 0.015625, %v2755_v62  ;;  %v2829_v14 = vmul.f32 %v8308_v12, %v9903_v53 }
 0x782   :  { %v8310_v19 = vpop.eup %8309  ;;  %v2758_v45 = vpop.xlane.xlu0 %2757  ;;  %v2850_v54 = vmul.f32 %v10010_v17, %v2828_v6 }
 0x783   :  { %v2830_v46 = vmul.f32 %v8310_v19, %v9908_v48  ;;  %8317 = vrsqrt.f32 %v2802_v28  ;;  %v2803_v7 = vadd.f32 1e-05, %v2787_v39  ;;  %v2788_v1 = vmul.f32 0.015625, %v2758_v45 }
 0x784   :  { %v8312_v49 = vpop.eup %8311  ;;  %v2761_v2 = vpop.xlane.xlu1 %2760  ;;  %v2851_v31 = vmul.f32 %v10010_v17, %v2829_v14  ;;  %v2872_v58 = vadd.f32 %v10018_v30, %v2850_v54 }
 0x785   :  { %v2852_v53 = vmul.f32 %v10010_v17, %v2830_v46  ;;  %v2831_v32 = vmul.f32 %v8312_v49, %v9914_v55  ;;  %8319 = vrsqrt.f32 %v2803_v7  ;;  %v2804_v37 = vadd.f32 1e-05, %v2788_v1 }
 0x786   :  { %v2789_v27 = vmul.f32 0.015625, %v2761_v2  ;;  %v2764_v3 = vpop.xlane.xlu0 %2763  ;;  %v2873_v11 = vadd.f32 %v10018_v30, %v2851_v31 }
 0x787   :  { %v2853_v48 = vmul.f32 %v10010_v17, %v2831_v32  ;;  %8321 = vrsqrt.f32 %v2804_v37  ;;  %v2790_v51 = vmul.f32 0.015625, %v2764_v3  ;;  %v2874_v44 = vadd.f32 %v10018_v30, %v2852_v53 }
 0x788   :  { %v2805_v13 = vadd.f32 1e-05, %v2789_v27  ;;  %v2767_v15 = vpop.xlane.xlu1 %2766  ;;  %v2888_v10 = vpack.c.bf16 %v2873_v11, %v2872_v58 }
 0x789   :  { %v8314_v0 = vpop.eup %8313  ;;  %v2875_v55 = vadd.f32 %v10018_v30, %v2853_v48  ;;  %v2806_v22 = vadd.f32 1e-05, %v2790_v51  ;;  %v2791_v35 = vmul.f32 0.015625, %v2767_v15 }
 0x78a   :  { %8323 = vrsqrt.f32 %v2805_v13  ;;  %7657 = vmatprep.mubr.msk.bf16.mxu0 %vm66_vm0, %v2888_v10  ;;  %v2770_v23 = vpop.xlane.xlu0 %2769  ;;  %v2832_v56 = vmul.f32 %v8314_v0, %v9924_v38 }
 0x78b   :  { %v8316_v6 = vpop.eup %8315  ;;  %8325 = vrsqrt.f32 %v2806_v22  ;;  %v2807_v12 = vadd.f32 1e-05, %v2791_v35  ;;  %v2792_v62 = vmul.f32 0.015625, %v2770_v23  ;;  %v2889_v28 = vpack.c.bf16 %v2875_v55, %v2874_v44 }
 0x78c   :  { %v2773_v39 = vpop.xlane.xlu1 %2772  ;;  %v2833_v14 = vmul.f32 %v8316_v6, %v9927_v41  ;;  %v2854_v19 = vmul.f32 %v10010_v17, %v2832_v56 }
 0x78d   :  { %v8318_v45 = vpop.eup %8317  ;;  %8327 = vrsqrt.f32 %v2807_v12  ;;  %v2808_v54 = vadd.f32 1e-05, %v2792_v62  ;;  %v2793_v46 = vmul.f32 0.015625, %v2773_v39  ;;  %7658 = vmatmul.mubr.msk.bf16.vlgmr.msra.gmra.mrb[96].mxu0 %vm66_vm0, %v2889_v28 }
 0x78e   :  { %v2776_v7 = vpop.xlane.xlu0 %2775  ;;  %v2855_v1 = vmul.f32 %v10010_v17, %v2833_v14  ;;  %v2834_v38 = vmul.f32 %v8318_v45, %v9932_v5  ;;  %v2876_v41 = vadd.f32 %v10018_v30, %v2854_v19 }
 0x78f   :  { %v8320_v49 = vpop.eup %8319  ;;  %8329 = vrsqrt.f32 %v2808_v54  ;;  %v2809_v2 = vadd.f32 1e-05, %v2793_v46  ;;  %v2794_v31 = vmul.f32 0.015625, %v2776_v7 }
 0x790   :  { %v2779_v53 = vpop.xlane.xlu1 %2778  ;;  %v2877_v32 = vadd.f32 %v10018_v30, %v2855_v1  ;;  %v2835_v37 = vmul.f32 %v8320_v49, %v9938_v9  ;;  %v2856_v27 = vmul.f32 %v10010_v17, %v2834_v38 }
 0x791   :  { %v8322_v3 = vpop.eup %8321  ;;  %8331 = vrsqrt.f32 %v2809_v2  ;;  %v2810_v58 = vadd.f32 1e-05, %v2794_v31  ;;  %v2795_v11 = vmul.f32 0.015625, %v2779_v53 }
 0x792   :  { %v2890_v48 = vpack.c.bf16 %v2877_v32, %v2876_v41  ;;  %v2857_v5 = vmul.f32 %v10010_v17, %v2835_v37  ;;  %v2836_v51 = vmul.f32 %v8322_v3, %v9944_v26  ;;  %v2878_v10 = vadd.f32 %v10018_v30, %v2856_v27  ;;  %v8111_v27 = vld [vmem:[%s11612_s12] sm:$0xff]  }
 0x793   :  { %8333 = vrsqrt.f32 %v2810_v58  ;;  %v2811_v13 = vadd.f32 1e-05, %v2795_v11  ;;  %7673 = vmatprep.subr.bf16.mxu1 %v8111_v27 }
 0x794   :  { %v8324_v15 = vpop.eup %8323  ;;  %7661 = vmatprep.mubr.msk.bf16.mxu0 %vm66_vm0, %v2890_v48  ;;  %v2879_v9 = vadd.f32 %v10018_v30, %v2857_v5  ;;  %v2858_v55 = vmul.f32 %v10010_v17, %v2836_v51  ;;  %7674 = vmatpush3.bf16.msra.mxu1 %v8111_v27 }
 0x795   :  { %v8326_v0 = vpop.eup %8325  ;;  %8335 = vrsqrt.f32 %v2811_v13  ;;  %v2837_v44 = vmul.f32 %v8324_v15, %v9950_v8 }
 0x796   :  { %v2891_v22 = vpack.c.bf16 %v2879_v9, %v2878_v10  ;;  %v2838_v35 = vmul.f32 %v8326_v0, %v9956_v52  ;;  %v2880_v62 = vadd.f32 %v10018_v30, %v2858_v55 }
 0x797   :  { %v8328_v23 = vpop.eup %8327  ;;  %v2859_v26 = vmul.f32 %v10010_v17, %v2837_v44 }
 0x798   :  { %7662 = vmatmul.mubr.msk.bf16.gmra.mrb[100].mxu0 %vm66_vm0, %v2891_v22  ;;  %v2839_v56 = vmul.f32 %v8328_v23, %v9962_v42  ;;  %v2860_v6 = vmul.f32 %v10010_v17, %v2838_v35 }
 0x799   :  { %v8330_v12 = vpop.eup %8329  ;;  %v2881_v28 = vadd.f32 %v10018_v30, %v2859_v26 }
 0x79a   :  { %v2861_v8 = vmul.f32 %v10010_v17, %v2839_v56  ;;  %v2840_v39 = vmul.f32 %v8330_v12, %v9968_v36  ;;  %v2882_v19 = vadd.f32 %v10018_v30, %v2860_v6 }
 0x79b   :  { %v8332_v14 = vpop.eup %8331  ;;  %v2892_v52 = vpack.c.bf16 %v2881_v28, %v2880_v62 }
 0x79c   :  { %v2883_v45 = vadd.f32 %v10018_v30, %v2861_v8  ;;  %v2841_v54 = vmul.f32 %v8332_v14, %v9974_v25  ;;  %v2862_v42 = vmul.f32 %v10010_v17, %v2840_v39 }
 0x79d   :  { %v8334_v46 = vpop.eup %8333  ;;  %7665 = vmatprep.mubr.msk.bf16.mxu0 %vm66_vm0, %v2892_v52 }
 0x79e   :  { %v2893_v7 = vpack.c.bf16 %v2883_v45, %v2882_v19  ;;  %v2863_v1 = vmul.f32 %v10010_v17, %v2841_v54  ;;  %v2842_v38 = vmul.f32 %v8334_v46, %v9983_v16  ;;  %v2884_v36 = vadd.f32 %v10018_v30, %v2862_v42 }
 0x79f   :  { %v8336_v49 = vpop.eup %8335 }
 0x7a0   :  { %7666 = vmatmul.mubr.msk.bf16.gmra.mrb[104].mxu0 %vm66_vm0, %v2893_v7  ;;  %v2885_v2 = vadd.f32 %v10018_v30, %v2863_v1  ;;  %v2843_v31 = vmul.f32 %v8336_v49, %v9989_v57  ;;  %v2864_v25 = vmul.f32 %v10010_v17, %v2842_v38  ;;  %v8112_v57 = vld [vmem:[%s11612_s12 + $0x8] sm:$0xff]  }
 0x7a1   :  { %7675 = vmatprep.subr.bf16.mxu1 %v8112_v57 }
 0x7a2   :  { %v2894_v53 = vpack.c.bf16 %v2885_v2, %v2884_v36  ;;  %v2865_v41 = vmul.f32 %v10010_v17, %v2843_v31  ;;  %v2886_v32 = vadd.f32 %v10018_v30, %v2864_v25  ;;  %7676 = vmatpush3.bf16.msra.mxu1 %v8112_v57  ;;  %v10082_v17 = vld [vmem:[%s11613_s11] ss:$0 sm:$0xff] }
 0x7a4   :  { %7669 = vmatprep.mubr.msk.bf16.mxu0 %vm66_vm0, %v2894_v53  ;;  %v2887_v16 = vadd.f32 %v10018_v30, %v2865_v41 }
 0x7a6   :  { %v2895_v37 = vpack.c.bf16 %v2887_v16, %v2886_v32 }
 0x7a8   :  { %7670 = vmatmul.mubr.msk.bf16.gmra.mrb[108].mxu0 %vm66_vm0, %v2895_v37 }
 0x860   :  { %v7659_v30 = vpop.f32.mrb[96].mxu0 }
 0x861   :  { %v3002_v3 = vadd.f32 %v7659_v30, %v10082_v17  ;;  %v2993_v58 = vpop.f32.mrb[97].mxu0 }
 0x862   :  { %v2994_v11 = vadd.f32 %v10082_v17, %v2993_v58  ;;  %v7660_v48 = vpop.f32.mrb[98].mxu0 }
 0x863   :  { %v3075_v5 = vmul.f32 0.70710677, %v3002_v3  ;;  %v3005_v51 = vadd.f32 %v7660_v48, %v10082_v17  ;;  %v2996_v13 = vpop.f32.mrb[99].mxu0  ;;  %v3058_v42 = vmul.f32 0.5, %v3002_v3 }
 0x864   :  { %v3073_v15 = vmul.f32 0.70710677, %v2994_v11  ;;  %v2997_v10 = vadd.f32 %v10082_v17, %v2996_v13  ;;  %v3056_v1 = vmul.f32 0.5, %v2994_v11 }
 0x865   :  { %8337 = verf.f32 %v3075_v5  ;;  %v3076_v9 = vmul.f32 0.70710677, %v3005_v51  ;;  %v3059_v46 = vmul.f32 0.5, %v3005_v51 }
 0x866   :  { %8339 = verf.f32 %v3073_v15  ;;  %v3074_v0 = vmul.f32 0.70710677, %v2997_v10  ;;  %v3057_v38 = vmul.f32 0.5, %v2997_v10 }
 0x867   :  { %8341 = verf.f32 %v3076_v9 }
 0x868   :  { %8343 = verf.f32 %v3074_v0 }
 0x86b   :  { %v7663_v44 = vpop.f32.mrb[100].mxu0 }
 0x86c   :  { %v3018_v55 = vadd.f32 %v7663_v44, %v10082_v17  ;;  %v3009_v22 = vpop.f32.mrb[101].mxu0 }
 0x86d   :  { %v10090_v35 = vadd.f32 %v10082_v17, %v3009_v22  ;;  %v7664_v23 = vpop.f32.mrb[102].mxu0 }
 0x86e   :  { %v3079_v26 = vmul.f32 0.70710677, %v3018_v55  ;;  %v3021_v56 = vadd.f32 %v7664_v23, %v10082_v17  ;;  %v3012_v6 = vpop.f32.mrb[103].mxu0 }
 0x86f   :  { %v8338_v12 = vpop.eup %8337  ;;  %v3077_v62 = vmul.f32 0.70710677, %v10090_v35  ;;  %v3013_v28 = vadd.f32 %v10082_v17, %v3012_v6  ;;  %v3062_v6 = vmul.f32 0.5, %v3018_v55 }
 0x870   :  { %v8340_v8 = vpop.eup %8339  ;;  %v3107_v39 = vadd.f32 1.0, %v8338_v12  ;;  %8345 = verf.f32 %v3079_v26  ;;  %v3080_v14 = vmul.f32 0.70710677, %v3021_v56  ;;  %v3063_v12 = vmul.f32 0.5, %v3021_v56 }
 0x871   :  { %v8342_v52 = vpop.eup %8341  ;;  %v3105_v19 = vadd.f32 1.0, %v8340_v8  ;;  %8347 = verf.f32 %v3077_v62  ;;  %v3078_v45 = vmul.f32 0.70710677, %v3013_v28 }
 0x872   :  { %v8344_v54 = vpop.eup %8343  ;;  %v3108_v7 = vadd.f32 1.0, %v8342_v52  ;;  %8349 = verf.f32 %v3080_v14  ;;  %v3123_v2 = vmul.f32 %v3107_v39, %v3058_v42  ;;  %v3060_v14 = vmul.f32 0.5, %v10090_v35 }
 0x873   :  { %v3106_v49 = vadd.f32 1.0, %v8344_v54  ;;  %8351 = verf.f32 %v3078_v45  ;;  %v7667_v36 = vpop.f32.mrb[104].mxu0  ;;  %v3121_v41 = vmul.f32 %v3105_v19, %v3056_v1  ;;  %v3061_v52 = vmul.f32 0.5, %v3013_v28 }
 0x874   :  { %v3124_v31 = vmul.f32 %v3108_v7, %v3059_v46  ;;  %v3034_v25 = vadd.f32 %v7667_v36, %v10082_v17  ;;  %v3025_v53 = vpop.f32.mrb[105].mxu0 }
 0x875   :  { %v3122_v32 = vmul.f32 %v3106_v49, %v3057_v38  ;;  %v10097_v16 = vadd.f32 %v10082_v17, %v3025_v53  ;;  %v7668_v37 = vpop.f32.mrb[106].mxu0 }
 0x876   :  { %v3138_v27 = vpack.c.bf16 %v3124_v31, %v3123_v2  ;;  %v3083_v57 = vmul.f32 0.70710677, %v3034_v25  ;;  %v3037_v30 = vadd.f32 %v7668_v37, %v10082_v17  ;;  %v3028_v3 = vpop.f32.mrb[107].mxu0 }
 0x877   :  { %v3137_v58 = vpack.c.bf16 %v3122_v32, %v3121_v41  ;;  %v3081_v11 = vmul.f32 0.70710677, %v10097_v16  ;;  %v3029_v48 = vadd.f32 %v10082_v17, %v3028_v3 }
 0x878   :  { %8353 = verf.f32 %v3083_v57  ;;  %v3084_v5 = vmul.f32 0.70710677, %v3037_v30  ;;  %v3067_v57 = vmul.f32 0.5, %v3037_v30 }
 0x879   :  { %8355 = verf.f32 %v3081_v11  ;;  %v3082_v51 = vmul.f32 0.70710677, %v3029_v48  ;;  %7677 = vmatprep.mubr.msk.bf16.mxu1 %vm3161_vm2, %v3137_v58  ;;  %v3065_v58 = vmul.f32 0.5, %v3029_v48 }
 0x87a   :  { %v8346_v13 = vpop.eup %8345  ;;  %8357 = verf.f32 %v3084_v5  ;;  %7678 = vmatmul.mubr.msk.bf16.vlgmr.msra.gmra.mrb[96].mxu1 %vm3161_vm2, %v3138_v27  ;;  %v3066_v27 = vmul.f32 0.5, %v3034_v25 }
 0x87b   :  { %v8348_v15 = vpop.eup %8347  ;;  %v3111_v10 = vadd.f32 1.0, %v8346_v13  ;;  %8359 = verf.f32 %v3082_v51  ;;  %v7671_v9 = vpop.f32.mrb[108].mxu0 }
 0x87c   :  { %v8350_v0 = vpop.eup %8349  ;;  %v3109_v44 = vadd.f32 1.0, %v8348_v15  ;;  %v3050_v22 = vadd.f32 %v7671_v9, %v10082_v17  ;;  %v3041_v23 = vpop.f32.mrb[109].mxu0 }
 0x87d   :  { %v8352_v26 = vpop.eup %8351  ;;  %v3112_v62 = vadd.f32 1.0, %v8350_v0  ;;  %v3042_v8 = vadd.f32 %v10082_v17, %v3041_v23  ;;  %v7672_v39 = vpop.f32.mrb[110].mxu0  ;;  %v3127_v42 = vmul.f32 %v3111_v10, %v3062_v6 }
 0x87e   :  { %v3110_v19 = vadd.f32 1.0, %v8352_v26  ;;  %v3087_v45 = vmul.f32 0.70710677, %v3050_v22  ;;  %v3044_v54 = vpop.f32.mrb[111].mxu0  ;;  %v3053_v1 = vadd.f32 %v7672_v39, %v10082_v17  ;;  %v3125_v38 = vmul.f32 %v3109_v44, %v3060_v14 }
 0x87f   :  { %v3128_v46 = vmul.f32 %v3112_v62, %v3063_v12  ;;  %v3085_v7 = vmul.f32 0.70710677, %v3042_v8  ;;  %v3045_v55 = vadd.f32 %v10082_v17, %v3044_v54  ;;  %v3064_v17 = vmul.f32 0.5, %v10097_v16 }
 0x880   :  { %v3126_v49 = vmul.f32 %v3110_v19, %v3061_v52  ;;  %8361 = verf.f32 %v3087_v45  ;;  %v3088_v36 = vmul.f32 0.70710677, %v3053_v1  ;;  %v3070_v6 = vmul.f32 0.5, %v3050_v22  ;;  %v10119_v22 = vld [vmem:[%s11614_s13] ss:$0 sm:$0xff] }
 0x881   :  { %v3140_v56 = vpack.c.bf16 %v3128_v46, %v3127_v42  ;;  %8363 = verf.f32 %v3085_v7  ;;  %v3086_v35 = vmul.f32 0.70710677, %v3045_v55  ;;  %v3071_v16 = vmul.f32 0.5, %v3053_v1 }
 0x882   :  { %v8354_v2 = vpop.eup %8353  ;;  %v3139_v31 = vpack.c.bf16 %v3126_v49, %v3125_v38  ;;  %8365 = verf.f32 %v3088_v36  ;;  %v3068_v12 = vmul.f32 0.5, %v3042_v8  ;;  %v3069_v62 = vmul.f32 0.5, %v3045_v55 }
 0x883   :  { %v8356_v28 = vpop.eup %8355  ;;  %v3115_v53 = vadd.f32 1.0, %v8354_v2  ;;  %8367 = verf.f32 %v3086_v35 }
 0x884   :  { %v8358_v41 = vpop.eup %8357  ;;  %v3113_v32 = vadd.f32 1.0, %v8356_v28  ;;  %7681 = vmatprep.mubr.msk.bf16.mxu1 %vm3161_vm2, %v3139_v31 }
 0x885   :  { %v8360_v37 = vpop.eup %8359  ;;  %v3116_v3 = vadd.f32 1.0, %v8358_v41  ;;  %7682 = vmatmul.mubr.msk.bf16.gmra.mrb[100].mxu1 %vm3161_vm2, %v3140_v56  ;;  %v3131_v5 = vmul.f32 %v3115_v53, %v3066_v27 }
 0x886   :  { %v3114_v11 = vadd.f32 1.0, %v8360_v37  ;;  %v3129_v13 = vmul.f32 %v3113_v32, %v3064_v17 }
 0x887   :  { %v3132_v51 = vmul.f32 %v3116_v3, %v3067_v57 }
 0x888   :  { %v3130_v15 = vmul.f32 %v3114_v11, %v3065_v58 }
 0x889   :  { %v3142_v10 = vpack.c.bf16 %v3132_v51, %v3131_v5 }
 0x88a   :  { %v8362_v9 = vpop.eup %8361  ;;  %v3141_v0 = vpack.c.bf16 %v3130_v15, %v3129_v13 }
 0x88b   :  { %v8364_v44 = vpop.eup %8363  ;;  %v3119_v23 = vadd.f32 1.0, %v8362_v9 }
 0x88c   :  { %7685 = vmatprep.mubr.msk.bf16.mxu1 %vm3161_vm2, %v3141_v0  ;;  %v8366_v25 = vpop.eup %8365  ;;  %v3117_v30 = vadd.f32 1.0, %v8364_v44 }
 0x88d   :  { %7686 = vmatmul.mubr.msk.bf16.gmra.mrb[104].mxu1 %vm3161_vm2, %v3142_v10  ;;  %v8368_v26 = vpop.eup %8367  ;;  %v3120_v48 = vadd.f32 1.0, %v8366_v25  ;;  %v3135_v14 = vmul.f32 %v3119_v23, %v3070_v6 }
 0x88e   :  { %v3118_v39 = vadd.f32 1.0, %v8368_v26  ;;  %v3133_v19 = vmul.f32 %v3117_v30, %v3068_v12 }
 0x88f   :  { %v3136_v52 = vmul.f32 %v3120_v48, %v3071_v16 }
 0x890   :  { %v3134_v45 = vmul.f32 %v3118_v39, %v3069_v62 }
 0x891   :  { %v3144_v54 = vpack.c.bf16 %v3136_v52, %v3135_v14 }
 0x892   :  { %v3143_v42 = vpack.c.bf16 %v3134_v45, %v3133_v19 }
 0x894   :  { %7689 = vmatprep.mubr.msk.bf16.mxu1 %vm3161_vm2, %v3143_v42 }
 0x895   :  { %7690 = vmatmul.mubr.msk.bf16.gmra.mrb[108].mxu1 %vm3161_vm2, %v3144_v54 }
 0x94d   :  { %v7679_v46 = vpop.f32.mrb[96].mxu1 }
 0x94e   :  { %v3220_v7 = vpop.f32.mrb[97].mxu1  ;;  %v3285_v8 = vadd.f32 %v7679_v46, %v9755_v29 }
 0x94f   :  { %v3283_v1 = vadd.f32 %v3220_v7, %v9752_v4  ;;  %v7680_v38 = vpop.f32.mrb[98].mxu1  ;;  %v8113_v7 = vld [vmem:[%s11602_s3 + $0x40] sm:$0xff]  }
 0x950   :  { %v3223_v49 = vpop.f32.mrb[99].mxu1  ;;  %v3286_v56 = vadd.f32 %v7680_v38, %v9763_v40  ;;  %v10129_v2 = vadd.f32 %v10119_v22, %v3285_v8  ;;  %7693 = vmatprep.subr.bf16.mxu0 %v8113_v7 }
 0x951   :  { %v10124_v55 = vadd.f32 %v10119_v22, %v3283_v1  ;;  %v3284_v36 = vadd.f32 %v3223_v49, %v9760_v33  ;;  %7694 = vmatpush3.bf16.msra.mxu0 %v8113_v7 }
 0x952   :  { %v10137_v4 = vadd.f32 %v10119_v22, %v3286_v56  ;;  %v3332_v33 = vsel %vm66_vm0, %v10129_v2, 0.0 }
 0x953   :  { %v10132_v31 = vadd.f32 %v10119_v22, %v3284_v36  ;;  %v3326_v29 = vsel %vm66_vm0, %v10124_v55, 0.0 }
 0x954   :  { %3327 = vadd.xlane.f32.xlu0 %v3326_v29  ;;  %v3335_v53 = vsel %vm66_vm0, %v10137_v4, 0.0 }
 0x955   :  { %v3329_v35 = vsel %vm66_vm0, %v10132_v31, 0.0 }
 0x956   :  { %3330 = vadd.xlane.f32.xlu1 %v3329_v35 }
 0x958   :  { %3333 = vadd.xlane.f32.xlu0 %v3332_v33  ;;  %v7683_v40 = vpop.f32.mrb[100].mxu1 }
 0x959   :  { %v3236_v28 = vpop.f32.mrb[101].mxu1  ;;  %v3289_v41 = vadd.f32 %v7683_v40, %v9797_v21 }
 0x95a   :  { %v3287_v32 = vadd.f32 %v3236_v28, %v9786_v18  ;;  %3336 = vadd.xlane.f32.xlu1 %v3335_v53  ;;  %v7684_v37 = vpop.f32.mrb[102].mxu1 }
 0x95b   :  { %v3239_v27 = vpop.f32.mrb[103].mxu1  ;;  %v3290_v3 = vadd.f32 %v7684_v37, %v9811_v43  ;;  %v10153_v58 = vadd.f32 %v10119_v22, %v3289_v41 }
 0x95c   :  { %v10148_v57 = vadd.f32 %v10119_v22, %v3287_v32  ;;  %v3288_v17 = vadd.f32 %v3239_v27, %v9800_v63 }
 0x95d   :  { %v10161_v18 = vadd.f32 %v10119_v22, %v3290_v3  ;;  %v3344_v10 = vsel %vm66_vm0, %v10153_v58, 0.0 }
 0x95e   :  { %v10156_v11 = vadd.f32 %v10119_v22, %v3288_v17  ;;  %v3338_v21 = vsel %vm66_vm0, %v10148_v57, 0.0 }
 0x95f   :  { %3339 = vadd.xlane.f32.xlu0 %v3338_v21  ;;  %v3347_v25 = vsel %vm66_vm0, %v10161_v18, 0.0 }
 0x960   :  { %v7687_v5 = vpop.f32.mrb[104].mxu1  ;;  %v3341_v51 = vsel %vm66_vm0, %v10156_v11, 0.0 }
 0x961   :  { %3342 = vadd.xlane.f32.xlu1 %v3341_v51  ;;  %v3252_v43 = vpop.f32.mrb[105].mxu1  ;;  %v3293_v63 = vadd.f32 %v7687_v5, %v9841_v47 }
 0x962   :  { %v3291_v13 = vadd.f32 %v3252_v43, %v9828_v20  ;;  %v7688_v15 = vpop.f32.mrb[106].mxu1 }
 0x963   :  { %3345 = vadd.xlane.f32.xlu0 %v3344_v10  ;;  %v3255_v9 = vpop.f32.mrb[107].mxu1  ;;  %v3294_v44 = vadd.f32 %v7688_v15, %v9855_v60  ;;  %v10177_v47 = vadd.f32 %v10119_v22, %v3293_v63 }
 0x964   :  { %v10170_v0 = vadd.f32 %v10119_v22, %v3291_v13  ;;  %v3292_v23 = vadd.f32 %v3255_v9, %v9844_v59 }
 0x965   :  { %3348 = vadd.xlane.f32.xlu1 %v3347_v25  ;;  %11627 = vst [vmem:[#allocation3_spill] sm:$0xff] %v10177_v47  ;;  %v10185_v26 = vadd.f32 %v10119_v22, %v3294_v44  ;;  %v3356_v16 = vsel %vm66_vm0, %v10177_v47, 0.0 }
 0x966   :  { %11626 = vst [vmem:[#allocation2_spill] sm:$0xff] %v10170_v0  ;;  %v10180_v20 = vadd.f32 %v10119_v22, %v3292_v23  ;;  %v3350_v30 = vsel %vm66_vm0, %v10170_v0, 0.0 }
 0x967   :  { %3351 = vadd.xlane.f32.xlu0 %v3350_v30  ;;  %11629 = vst [vmem:[#allocation5_spill] sm:$0xff] %v10185_v26  ;;  %v3359_v14 = vsel %vm66_vm0, %v10185_v26, 0.0 }
 0x968   :  { %11628 = vst [vmem:[#allocation4_spill] sm:$0xff] %v10180_v20  ;;  %v3353_v59 = vsel %vm66_vm0, %v10180_v20, 0.0  ;;  %v7691_v60 = vpop.f32.mrb[108].mxu1 }
 0x969   :  { %3354 = vadd.xlane.f32.xlu1 %v3353_v59  ;;  %v3268_v6 = vpop.f32.mrb[109].mxu1  ;;  %v3297_v48 = vadd.f32 %v7691_v60, %v9883_v34 }
 0x96a   :  { %v3295_v12 = vadd.f32 %v3268_v6, %v9872_v61  ;;  %v7692_v62 = vpop.f32.mrb[110].mxu1 }
 0x96b   :  { %3357 = vadd.xlane.f32.xlu0 %v3356_v16  ;;  %v3271_v39 = vpop.f32.mrb[111].mxu1  ;;  %v3298_v19 = vadd.f32 %v7692_v62, %v9891_v24  ;;  %v10201_v54 = vadd.f32 %v10119_v22, %v3297_v48 }
 0x96c   :  { %v10196_v52 = vadd.f32 %v10119_v22, %v3295_v12  ;;  %v3296_v45 = vadd.f32 %v3271_v39, %v9886_v50 }
 0x96d   :  { %3360 = vadd.xlane.f32.xlu1 %v3359_v14  ;;  %11631 = vst [vmem:[#allocation7_spill] sm:$0xff] %v10201_v54  ;;  %v10209_v42 = vadd.f32 %v10119_v22, %v3298_v19  ;;  %v3368_v50 = vsel %vm66_vm0, %v10201_v54, 0.0 }
 0x96e   :  { %11630 = vst [vmem:[#allocation6_spill] sm:$0xff] %v10196_v52  ;;  %v10204_v34 = vadd.f32 %v10119_v22, %v3296_v45  ;;  %v3362_v61 = vsel %vm66_vm0, %v10196_v52, 0.0 }
 0x96f   :  { %3363 = vadd.xlane.f32.xlu0 %v3362_v61  ;;  %11633 = vst [vmem:[#allocation9_spill] sm:$0xff] %v10209_v42  ;;  %v3371_v24 = vsel %vm66_vm0, %v10209_v42, 0.0 }
 0x970   :  { %11632 = vst [vmem:[#allocation8_spill] sm:$0xff] %v10204_v34  ;;  %v3365_v46 = vsel %vm66_vm0, %v10204_v34, 0.0 }
 0x971   :  { %3366 = vadd.xlane.f32.xlu1 %v3365_v46 }
 0x973   :  { %3369 = vadd.xlane.f32.xlu0 %v3368_v50 }
 0x975   :  { %3372 = vadd.xlane.f32.xlu1 %v3371_v24 }
 0x9e1   :  { %v3328_v22 = vpop.xlane.xlu0 %3327 }
 0x9e2   :  { %v3374_v8 = vmul.f32 0.015625, %v3328_v22 }
 0x9e3   :  { %v3331_v1 = vpop.xlane.xlu1 %3330 }
 0x9e4   :  { %v10221_v38 = vsub.f32 %v10124_v55, %v3374_v8  ;;  %v3375_v49 = vmul.f32 0.015625, %v3331_v1 }
 0x9e5   :  { %v3334_v56 = vpop.xlane.xlu0 %3333 }
 0x9e6   :  { %v10224_v36 = vsub.f32 %v10132_v31, %v3375_v49  ;;  %v3376_v29 = vmul.f32 0.015625, %v3334_v56  ;;  %v3406_v35 = vmul.f32 %v10221_v38, %v10221_v38 }
 0x9e7   :  { %v3337_v33 = vpop.xlane.xlu1 %3336 }
 0x9e8   :  { %v10229_v40 = vsub.f32 %v10129_v2, %v3376_v29  ;;  %v3377_v28 = vmul.f32 0.015625, %v3337_v33  ;;  %v3422_v53 = vsel %vm66_vm0, %v3406_v35, 0.0  ;;  %v3407_v41 = vmul.f32 %v10224_v36, %v10224_v36 }
 0x9e9   :  { %3423 = vadd.xlane.f32.xlu0 %v3422_v53 }
 0x9ea   :  { %v10235_v32 = vsub.f32 %v10137_v4, %v3377_v28  ;;  %v3425_v37 = vsel %vm66_vm0, %v3407_v41, 0.0  ;;  %v3408_v27 = vmul.f32 %v10229_v40, %v10229_v40 }
 0x9eb   :  { %3426 = vadd.xlane.f32.xlu1 %v3425_v37 }
 0x9ec   :  { %v3340_v3 = vpop.xlane.xlu0 %3339  ;;  %v3428_v17 = vsel %vm66_vm0, %v3408_v27, 0.0  ;;  %v3409_v21 = vmul.f32 %v10235_v32, %v10235_v32 }
 0x9ed   :  { %v3378_v5 = vmul.f32 0.015625, %v3340_v3  ;;  %3429 = vadd.xlane.f32.xlu0 %v3428_v17 }
 0x9ee   :  { %v3343_v51 = vpop.xlane.xlu1 %3342  ;;  %v3431_v43 = vsel %vm66_vm0, %v3409_v21, 0.0 }
 0x9ef   :  { %v10245_v63 = vsub.f32 %v10148_v57, %v3378_v5  ;;  %v3379_v13 = vmul.f32 0.015625, %v3343_v51  ;;  %3432 = vadd.xlane.f32.xlu1 %v3431_v43 }
 0x9f0   :  { %v3346_v15 = vpop.xlane.xlu0 %3345 }
 0x9f1   :  { %v10248_v10 = vsub.f32 %v10156_v11, %v3379_v13  ;;  %v3380_v9 = vmul.f32 0.015625, %v3346_v15  ;;  %v3410_v44 = vmul.f32 %v10245_v63, %v10245_v63 }
 0x9f2   :  { %v3349_v23 = vpop.xlane.xlu1 %3348 }
 0x9f3   :  { %v10253_v25 = vsub.f32 %v10153_v58, %v3380_v9  ;;  %v3381_v30 = vmul.f32 0.015625, %v3349_v23  ;;  %v3434_v59 = vsel %vm66_vm0, %v3410_v44, 0.0  ;;  %v3411_v60 = vmul.f32 %v10248_v10, %v10248_v10  ;;  %v8115_v44 = vld [vmem:[%s11602_s3 + $0x60] sm:$0xff]  }
 0x9f4   :  { %v3352_v6 = vpop.xlane.xlu0 %3351  ;;  %3435 = vadd.xlane.f32.xlu0 %v3434_v59  ;;  %7717 = vmatprep.subr.bf16.mxu1 %v8115_v44 }
 0x9f5   :  { %v10259_v16 = vsub.f32 %v10161_v18, %v3381_v30  ;;  %v3382_v48 = vmul.f32 0.015625, %v3352_v6  ;;  %v3437_v12 = vsel %vm66_vm0, %v3411_v60, 0.0  ;;  %v3412_v62 = vmul.f32 %v10253_v25, %v10253_v25  ;;  %7718 = vmatpush3.bf16.msra.mxu1 %v8115_v44 }
 0x9f6   :  { %3438 = vadd.xlane.f32.xlu1 %v3437_v12  ;;  %v3355_v39 = vpop.xlane.xlu1 %3354 }
 0x9f7   :  { %v10265_v14 = vsub.f32 %v10170_v0, %v3382_v48  ;;  %v3383_v19 = vmul.f32 0.015625, %v3355_v39  ;;  %v3440_v45 = vsel %vm66_vm0, %v3412_v62, 0.0  ;;  %v3413_v61 = vmul.f32 %v10259_v16, %v10259_v16  ;;  %v8114_v62 = vld [vmem:[%s11602_s3 + $0x48] sm:$0xff]  }
 0x9f8   :  { %v3358_v46 = vpop.xlane.xlu0 %3357  ;;  %3441 = vadd.xlane.f32.xlu0 %v3440_v45  ;;  %v8117_v39 = vld [vmem:[%s11602_s3 + $0x68] sm:$0xff]   ;;  %7695 = vmatprep.subr.bf16.mxu0 %v8114_v62 }
 0x9f9   :  { %v10271_v50 = vsub.f32 %v10180_v20, %v3383_v19  ;;  %v3384_v24 = vmul.f32 0.015625, %v3358_v46  ;;  %v3443_v7 = vsel %vm66_vm0, %v3413_v61, 0.0  ;;  %v3414_v22 = vmul.f32 %v10265_v14, %v10265_v14  ;;  %7696 = vmatpush3.bf16.msra.mxu0 %v8114_v62  ;;  %7719 = vmatprep.subr.bf16.mxu1 %v8117_v39  ;;  %v8116_v46 = vld [vmem:[%s11602_s3 + $0x50] sm:$0xff]  }
 0x9fa   :  { %3444 = vadd.xlane.f32.xlu1 %v3443_v7  ;;  %v3361_v8 = vpop.xlane.xlu1 %3360  ;;  %7720 = vmatpush3.bf16.msra.mxu1 %v8117_v39  ;;  %v8119_v7 = vld [vmem:[%s11602_s3 + $0x58] sm:$0xff]  }
 0x9fb   :  { %v10277_v1 = vsub.f32 %v10177_v47, %v3384_v24  ;;  %v3385_v49 = vmul.f32 0.015625, %v3361_v8  ;;  %v3446_v56 = vsel %vm66_vm0, %v3414_v22, 0.0  ;;  %v3415_v29 = vmul.f32 %v10271_v50, %v10271_v50  ;;  %v8118_v24 = vld [vmem:[%s11602_s3 + $0x70] sm:$0xff]   ;;  %7697 = vmatprep.subr.bf16.mxu0 %v8116_v46  ;;  %v8120_v22 = vld [vmem:[%s11602_s3 + $0x78] sm:$0xff]   ;;  %v10340_v8 = vld [vmem:[%s11603_s4 + $0x40] sm:$0xff]  }
 0x9fc   :  { %3447 = vadd.xlane.f32.xlu0 %v3446_v56  ;;  %v3364_v33 = vpop.xlane.xlu0 %3363  ;;  %7721 = vmatprep.subr.bf16.mxu1 %v8118_v24 }
 0x9fd   :  { %v10283_v35 = vsub.f32 %v10185_v26, %v3385_v49  ;;  %v3449_v28 = vsel %vm66_vm0, %v3415_v29, 0.0  ;;  %v3416_v53 = vmul.f32 %v10277_v1, %v10277_v1  ;;  %v3386_v41 = vmul.f32 0.015625, %v3364_v33  ;;  %7698 = vmatpush3.bf16.msra.mxu0 %v8116_v46  ;;  %v10345_v49 = vld [vmem:[%s11603_s4 + $0x60] sm:$0xff]  }
 0x9fe   :  { %3450 = vadd.xlane.f32.xlu1 %v3449_v28  ;;  %v3367_v37 = vpop.xlane.xlu1 %3366  ;;  %7722 = vmatpush3.bf16.msra.mxu1 %v8118_v24 }
 0x9ff   :  { %v3452_v27 = vsel %vm66_vm0, %v3416_v53, 0.0  ;;  %v3417_v3 = vmul.f32 %v10283_v35, %v10283_v35  ;;  %v10292_v17 = vsub.f32 %v10196_v52, %v3386_v41  ;;  %v3387_v21 = vmul.f32 0.015625, %v3367_v37  ;;  %7699 = vmatprep.subr.bf16.mxu0 %v8119_v7  ;;  %7723 = vmatprep.subr.bf16.mxu1 %v8120_v22 }
 0xa00   :  { %3453 = vadd.xlane.f32.xlu0 %v3452_v27  ;;  %v3370_v5 = vpop.xlane.xlu0 %3369 }
 0xa01   :  { %v3455_v51 = vsel %vm66_vm0, %v3417_v3, 0.0  ;;  %v10296_v43 = vsub.f32 %v10204_v34, %v3387_v21  ;;  %v3388_v13 = vmul.f32 0.015625, %v3370_v5  ;;  %v3418_v15 = vmul.f32 %v10292_v17, %v10292_v17  ;;  %7700 = vmatpush3.bf16.msra.mxu0 %v8119_v7 }
 0xa02   :  { %3456 = vadd.xlane.f32.xlu1 %v3455_v51  ;;  %v3373_v9 = vpop.xlane.xlu1 %3372  ;;  %7724 = vmatpush3.bf16.msra.mxu1 %v8120_v22 }
 0xa03   :  { %v10304_v23 = vsub.f32 %v10201_v54, %v3388_v13  ;;  %v3389_v30 = vmul.f32 0.015625, %v3373_v9  ;;  %v3458_v59 = vsel %vm66_vm0, %v3418_v15, 0.0  ;;  %v3419_v60 = vmul.f32 %v10296_v43, %v10296_v43  ;;  %7741 = vmatprep.subr.bf16.mxu0 %v10340_v8  ;;  %7765 = vmatprep.subr.bf16.mxu1 %v10345_v49 }
 0xa04   :  { %3459 = vadd.xlane.f32.xlu0 %v3458_v59 }
 0xa05   :  { %v10310_v6 = vsub.f32 %v10209_v42, %v3389_v30  ;;  %v3461_v48 = vsel %vm66_vm0, %v3419_v60, 0.0  ;;  %v3420_v12 = vmul.f32 %v10304_v23, %v10304_v23 }
 0xa06   :  { %3462 = vadd.xlane.f32.xlu1 %v3461_v48  ;;  %v10352_v48 = vld [vmem:[%s11605_s1 + $0x1] ss:$0 sm:$0xff] }
 0xa07   :  { %v3464_v19 = vsel %vm66_vm0, %v3420_v12, 0.0  ;;  %v3421_v45 = vmul.f32 %v10310_v6, %v10310_v6 }
 0xa08   :  { %3465 = vadd.xlane.f32.xlu0 %v3464_v19 }
 0xa09   :  { %v3467_v61 = vsel %vm66_vm0, %v3421_v45, 0.0 }
 0xa0a   :  { %3468 = vadd.xlane.f32.xlu1 %v3467_v61 }
 0xa76   :  { %v3424_v56 = vpop.xlane.xlu0 %3423 }
 0xa77   :  { %v3470_v29 = vmul.f32 0.015625, %v3424_v56 }
 0xa78   :  { %v3427_v33 = vpop.xlane.xlu1 %3426 }
 0xa79   :  { %v3486_v28 = vadd.f32 1e-05, %v3470_v29  ;;  %v3471_v53 = vmul.f32 0.015625, %v3427_v33  ;;  %v10360_v29 = vld [vmem:[%s11606_s2 + $0x1] ss:$0 sm:$0xff] }
 0xa7a   :  { %v3430_v41 = vpop.xlane.xlu0 %3429 }
 0xa7b   :  { %8369 = vrsqrt.f32 %v3486_v28  ;;  %v3487_v37 = vadd.f32 1e-05, %v3471_v53  ;;  %v3472_v27 = vmul.f32 0.015625, %v3430_v41 }
 0xa7c   :  { %v3433_v3 = vpop.xlane.xlu1 %3432 }
 0xa7d   :  { %8371 = vrsqrt.f32 %v3487_v37  ;;  %v3488_v21 = vadd.f32 1e-05, %v3472_v27  ;;  %v3473_v5 = vmul.f32 0.015625, %v3433_v3 }
 0xa7f   :  { %8373 = vrsqrt.f32 %v3488_v21  ;;  %v3489_v51 = vadd.f32 1e-05, %v3473_v5 }
 0xa81   :  { %8375 = vrsqrt.f32 %v3489_v51  ;;  %v3436_v13 = vpop.xlane.xlu0 %3435 }
 0xa82   :  { %v3474_v15 = vmul.f32 0.015625, %v3436_v13 }
 0xa83   :  { %v3439_v9 = vpop.xlane.xlu1 %3438 }
 0xa84   :  { %v3490_v44 = vadd.f32 1e-05, %v3474_v15  ;;  %v3475_v30 = vmul.f32 0.015625, %v3439_v9 }
 0xa85   :  { %v8370_v59 = vpop.eup %8369  ;;  %v3442_v60 = vpop.xlane.xlu0 %3441 }
 0xa86   :  { %v3518_v12 = vmul.f32 %v8370_v59, %v10221_v38  ;;  %8377 = vrsqrt.f32 %v3490_v44  ;;  %v3491_v62 = vadd.f32 1e-05, %v3475_v30  ;;  %v3476_v39 = vmul.f32 0.015625, %v3442_v60 }
 0xa87   :  { %v8372_v19 = vpop.eup %8371  ;;  %v3445_v45 = vpop.xlane.xlu1 %3444 }
 0xa88   :  { %v3519_v61 = vmul.f32 %v8372_v19, %v10224_v36  ;;  %8379 = vrsqrt.f32 %v3491_v62  ;;  %v3492_v46 = vadd.f32 1e-05, %v3476_v39  ;;  %v3540_v7 = vmul.f32 %v10352_v48, %v3518_v12 }
 0xa89   :  { %v8374_v24 = vpop.eup %8373  ;;  %v3477_v22 = vmul.f32 0.015625, %v3445_v45  ;;  %v3448_v56 = vpop.xlane.xlu0 %3447 }
 0xa8a   :  { %v3541_v38 = vmul.f32 %v10352_v48, %v3519_v61  ;;  %v3520_v33 = vmul.f32 %v8374_v24, %v10229_v40  ;;  %8381 = vrsqrt.f32 %v3492_v46  ;;  %v3478_v36 = vmul.f32 0.015625, %v3448_v56  ;;  %v8122_v24 = vld [vmem:[%s11603_s4 + $0x48] sm:$0xff]  }
 0xa8b   :  { %v8376_v28 = vpop.eup %8375  ;;  %v3493_v53 = vadd.f32 1e-05, %v3477_v22  ;;  %v3451_v41 = vpop.xlane.xlu1 %3450  ;;  %v3562_v5 = vadd.f32 %v10360_v29, %v3540_v7 }
 0xa8c   :  { %v3563_v37 = vadd.f32 %v10360_v29, %v3541_v38  ;;  %v3542_v27 = vmul.f32 %v10352_v48, %v3520_v33  ;;  %v3521_v3 = vmul.f32 %v8376_v28, %v10235_v32  ;;  %v3479_v21 = vmul.f32 0.015625, %v3451_v41 }
 0xa8d   :  { %8383 = vrsqrt.f32 %v3493_v53  ;;  %v3494_v51 = vadd.f32 1e-05, %v3478_v36  ;;  %v3454_v13 = vpop.xlane.xlu0 %3453 }
 0xa8e   :  { %v3543_v15 = vmul.f32 %v10352_v48, %v3521_v3  ;;  %v3495_v40 = vadd.f32 1e-05, %v3479_v21  ;;  %v3480_v9 = vmul.f32 0.015625, %v3454_v13  ;;  %v3564_v44 = vadd.f32 %v10360_v29, %v3542_v27  ;;  %v8127_v27 = vld [vmem:[%s11603_s4 + $0x70] sm:$0xff]  }
 0xa8f   :  { %8385 = vrsqrt.f32 %v3494_v51  ;;  %v3457_v30 = vpop.xlane.xlu1 %3456  ;;  %v10370_v59 = vpack.c.bf16 %v3563_v37, %v3562_v5  ;;  %v8123_v37 = vld [vmem:[%s11603_s4 + $0x50] sm:$0xff]  }
 0xa90   :  { %v8378_v60 = vpop.eup %8377  ;;  %v3565_v12 = vadd.f32 %v10360_v29, %v3543_v15  ;;  %8387 = vrsqrt.f32 %v3495_v40  ;;  %v3496_v32 = vadd.f32 1e-05, %v3480_v9  ;;  %v3481_v62 = vmul.f32 0.015625, %v3457_v30 }
 0xa91   :  { %v3522_v39 = vmul.f32 %v8378_v60, %v10245_v63  ;;  %7701 = vmatprep.mubr.msk.bf16.mxu0 %vm66_vm0, %v10370_v59  ;;  %7725 = vmatprep.mubr.msk.bf16.mxu1 %vm66_vm0, %v10370_v59  ;;  %v3460_v61 = vpop.xlane.xlu0 %3459  ;;  %v8125_v63 = vld [vmem:[%s11603_s4 + $0x68] sm:$0xff]  }
 0xa92   :  { %v8380_v19 = vpop.eup %8379  ;;  %8389 = vrsqrt.f32 %v3496_v32  ;;  %v3497_v45 = vadd.f32 1e-05, %v3481_v62  ;;  %v10378_v46 = vpack.c.bf16 %v3565_v12, %v3564_v44  ;;  %v3482_v56 = vmul.f32 0.015625, %v3460_v61  ;;  %v8128_v32 = vld [vmem:[%s11603_s4 + $0x78] sm:$0xff]  }
 0xa93   :  { %v3544_v7 = vmul.f32 %v10352_v48, %v3522_v39  ;;  %v3523_v22 = vmul.f32 %v8380_v19, %v10248_v10  ;;  %v3463_v33 = vpop.xlane.xlu1 %3462 }
 0xa94   :  { %v8382_v38 = vpop.eup %8381  ;;  %8391 = vrsqrt.f32 %v3497_v45  ;;  %7702 = vmatmul.mubr.msk.bf16.vlgmr.msra.gmra.mrb[112].mxu0 %vm66_vm0, %v10378_v46  ;;  %7726 = vmatmul.mubr.msk.bf16.vlgmr.msra.gmra.mrb[112].mxu1 %vm66_vm0, %v10378_v46  ;;  %v3498_v36 = vadd.f32 1e-05, %v3482_v56  ;;  %v3483_v10 = vmul.f32 0.015625, %v3463_v33  ;;  %v8130_v56 = vld [vmem:[%s11604_s5 + $0x60] sm:$0xff]  }
 0xa95   :  { %v3545_v28 = vmul.f32 %v10352_v48, %v3523_v22  ;;  %v3524_v53 = vmul.f32 %v8382_v38, %v10253_v25  ;;  %7742 = vmatpush3.bf16.msra.mxu0 %v10340_v8  ;;  %7766 = vmatpush3.bf16.msra.mxu1 %v10345_v49  ;;  %v3466_v41 = vpop.xlane.xlu0 %3465  ;;  %v3566_v25 = vadd.f32 %v10360_v29, %v3544_v7  ;;  %v8129_v22 = vld [vmem:[%s11604_s5 + $0x40] sm:$0xff]  }
 0xa96   :  { %7743 = vmatprep.subr.bf16.mxu0 %v8122_v24  ;;  %7767 = vmatprep.subr.bf16.mxu1 %v8125_v63  ;;  %8393 = vrsqrt.f32 %v3498_v36  ;;  %v3484_v8 = vmul.f32 0.015625, %v3466_v41  ;;  %v3499_v51 = vadd.f32 1e-05, %v3483_v10 }
 0xa97   :  { %v8384_v3 = vpop.eup %8383  ;;  %v3567_v21 = vadd.f32 %v10360_v29, %v3545_v28  ;;  %v3546_v49 = vmul.f32 %v10352_v48, %v3524_v53  ;;  %v3469_v13 = vpop.xlane.xlu1 %3468 }
 0xa98   :  { %v3525_v5 = vmul.f32 %v8384_v3, %v10259_v16  ;;  %v3500_v40 = vadd.f32 1e-05, %v3484_v8  ;;  %v3485_v9 = vmul.f32 0.015625, %v3469_v13  ;;  %8395 = vrsqrt.f32 %v3499_v51  ;;  %v8126_v16 = vld [vmem:[%s11603_s4 + $0x58] sm:$0xff]  }
 0xa99   :  { %v8386_v15 = vpop.eup %8385  ;;  %v10406_v44 = vpack.c.bf16 %v3567_v21, %v3566_v25  ;;  %7744 = vmatpush3.bf16.msra.mxu0 %v8122_v24  ;;  %7768 = vmatpush3.bf16.msra.mxu1 %v8125_v63  ;;  %v3568_v19 = vadd.f32 %v10360_v29, %v3546_v49 }
 0xa9a   :  { %v8388_v30 = vpop.eup %8387  ;;  %v3547_v60 = vmul.f32 %v10352_v48, %v3525_v5  ;;  %v3526_v12 = vmul.f32 %v8386_v15, %v10265_v14  ;;  %7745 = vmatprep.subr.bf16.mxu0 %v8123_v37  ;;  %7769 = vmatprep.subr.bf16.mxu1 %v8127_v27  ;;  %8397 = vrsqrt.f32 %v3500_v40  ;;  %v3501_v39 = vadd.f32 1e-05, %v3485_v9 }
 0xa9b   :  { %v3527_v62 = vmul.f32 %v8388_v30, %v10271_v50  ;;  %7705 = vmatprep.mubr.msk.bf16.mxu0 %vm66_vm0, %v10406_v44  ;;  %7729 = vmatprep.mubr.msk.bf16.mxu1 %vm66_vm0, %v10406_v44 }
 0xa9c   :  { %v8390_v14 = vpop.eup %8389  ;;  %v3569_v45 = vadd.f32 %v10360_v29, %v3547_v60  ;;  %v3548_v61 = vmul.f32 %v10352_v48, %v3526_v12  ;;  %8399 = vrsqrt.f32 %v3501_v39  ;;  %v8133_v60 = vld [vmem:[%s11604_s5 + $0x50] sm:$0xff]  }
 0xa9d   :  { %v3549_v24 = vmul.f32 %v10352_v48, %v3527_v62  ;;  %v3528_v63 = vmul.f32 %v8390_v14, %v10277_v1  ;;  %7746 = vmatpush3.bf16.msra.mxu0 %v8123_v37  ;;  %7770 = vmatpush3.bf16.msra.mxu1 %v8127_v27  ;;  %v8134_v12 = vld [vmem:[%s11604_s5 + $0x70] sm:$0xff]  }
 0xa9e   :  { %v8392_v50 = vpop.eup %8391  ;;  %v10426_v7 = vpack.c.bf16 %v3569_v45, %v3568_v19  ;;  %7747 = vmatprep.subr.bf16.mxu0 %v8126_v16  ;;  %7771 = vmatprep.subr.bf16.mxu1 %v8128_v32  ;;  %v3570_v38 = vadd.f32 %v10360_v29, %v3548_v61 }
 0xa9f   :  { %v3571_v1 = vadd.f32 %v10360_v29, %v3549_v24  ;;  %v3550_v33 = vmul.f32 %v10352_v48, %v3528_v63  ;;  %v3529_v28 = vmul.f32 %v8392_v50, %v10283_v35 }
 0xaa0   :  { %7706 = vmatmul.mubr.msk.bf16.gmra.mrb[116].mxu0 %vm66_vm0, %v10426_v7  ;;  %7730 = vmatmul.mubr.msk.bf16.gmra.mrb[116].mxu1 %vm66_vm0, %v10426_v7  ;;  %v8394_v53 = vpop.eup %8393 }
 0xaa1   :  { %v3551_v36 = vmul.f32 %v10352_v48, %v3529_v28  ;;  %v10443_v10 = vpack.c.bf16 %v3571_v1, %v3570_v38  ;;  %7748 = vmatpush3.bf16.msra.mxu0 %v8126_v16  ;;  %7772 = vmatpush3.bf16.msra.mxu1 %v8128_v32  ;;  %v3530_v41 = vmul.f32 %v8394_v53, %v10292_v17  ;;  %v8135_v16 = vld [vmem:[%s11604_s5 + $0x58] sm:$0xff]  }
 0xaa2   :  { %7789 = vmatprep.subr.bf16.mxu0 %v8129_v22  ;;  %7813 = vmatprep.subr.bf16.mxu1 %v8130_v56  ;;  %v3572_v37 = vadd.f32 %v10360_v29, %v3550_v33  ;;  %v8396_v27 = vpop.eup %8395  ;;  %v8136_v32 = vld [vmem:[%s11604_s5 + $0x78] sm:$0xff]  }
 0xaa3   :  { %v3573_v35 = vadd.f32 %v10360_v29, %v3551_v36  ;;  %7709 = vmatprep.mubr.msk.bf16.mxu0 %vm66_vm0, %v10443_v10  ;;  %7733 = vmatprep.mubr.msk.bf16.mxu1 %vm66_vm0, %v10443_v10  ;;  %v3552_v25 = vmul.f32 %v10352_v48, %v3530_v41  ;;  %v3531_v21 = vmul.f32 %v8396_v27, %v10296_v43 }
 0xaa4   :  { %v8398_v3 = vpop.eup %8397 }
 0xaa5   :  { %v10454_v8 = vpack.c.bf16 %v3573_v35, %v3572_v37  ;;  %v3532_v17 = vmul.f32 %v8398_v3, %v10304_v23  ;;  %v3553_v5 = vmul.f32 %v10352_v48, %v3531_v21  ;;  %v3574_v15 = vadd.f32 %v10360_v29, %v3552_v25 }
 0xaa6   :  { %v8400_v49 = vpop.eup %8399 }
 0xaa7   :  { %v3554_v51 = vmul.f32 %v10352_v48, %v3532_v17  ;;  %v3533_v13 = vmul.f32 %v8400_v49, %v10310_v6  ;;  %v3575_v43 = vadd.f32 %v10360_v29, %v3553_v5 }
 0xaa8   :  { %7710 = vmatmul.mubr.msk.bf16.gmra.mrb[120].mxu0 %vm66_vm0, %v10454_v8  ;;  %7734 = vmatmul.mubr.msk.bf16.gmra.mrb[120].mxu1 %vm66_vm0, %v10454_v8 }
 0xaa9   :  { %v3555_v40 = vmul.f32 %v10352_v48, %v3533_v13  ;;  %v3584_v23 = vpack.c.bf16 %v3575_v43, %v3574_v15  ;;  %v3576_v9 = vadd.f32 %v10360_v29, %v3554_v51  ;;  %v8131_v48 = vld [vmem:[%s11604_s5 + $0x48] sm:$0xff]  }
 0xaab   :  { %v3577_v30 = vadd.f32 %v10360_v29, %v3555_v40  ;;  %7713 = vmatprep.mubr.msk.bf16.mxu0 %vm66_vm0, %v3584_v23  ;;  %7737 = vmatprep.mubr.msk.bf16.mxu1 %vm66_vm0, %v3584_v23  ;;  %v8132_v29 = vld [vmem:[%s11604_s5 + $0x68] sm:$0xff]  }
 0xaad   :  { %v3585_v6 = vpack.c.bf16 %v3577_v30, %v3576_v9 }
 0xab0   :  { %7714 = vmatmul.mubr.msk.bf16.gmra.mrb[124].mxu0 %vm66_vm0, %v3585_v6  ;;  %7738 = vmatmul.mubr.msk.bf16.gmra.mrb[124].mxu1 %vm66_vm0, %v3585_v6 }
 0xab1   :  { %7749 = vmatprep.mubr.msk.bf16.mxu0 %vm66_vm0, %v10370_v59  ;;  %7773 = vmatprep.mubr.msk.bf16.mxu1 %vm66_vm0, %v10370_v59 }
 0xab8   :  { %7750 = vmatmul.mubr.msk.bf16.vlgmr.msra.gmra.mrb[128].mxu0 %vm66_vm0, %v10378_v46  ;;  %7774 = vmatmul.mubr.msk.bf16.vlgmr.msra.gmra.mrb[128].mxu1 %vm66_vm0, %v10378_v46 }
 0xab9   :  { %7753 = vmatprep.mubr.msk.bf16.mxu0 %vm66_vm0, %v10406_v44  ;;  %7777 = vmatprep.mubr.msk.bf16.mxu1 %vm66_vm0, %v10406_v44 }
 0xaba   :  { %7790 = vmatpush3.bf16.msra.mxu0 %v8129_v22  ;;  %7814 = vmatpush3.bf16.msra.mxu1 %v8130_v56 }
 0xabb   :  { %7791 = vmatprep.subr.bf16.mxu0 %v8131_v48  ;;  %7815 = vmatprep.subr.bf16.mxu1 %v8132_v29 }
 0xabe   :  { %7792 = vmatpush3.bf16.msra.mxu0 %v8131_v48  ;;  %7816 = vmatpush3.bf16.msra.mxu1 %v8132_v29 }
 0xabf   :  { %7793 = vmatprep.subr.bf16.mxu0 %v8133_v60  ;;  %7817 = vmatprep.subr.bf16.mxu1 %v8134_v12 }
 0xac0   :  { %7754 = vmatmul.mubr.msk.bf16.gmra.mrb[132].mxu0 %vm66_vm0, %v10426_v7  ;;  %7778 = vmatmul.mubr.msk.bf16.gmra.mrb[132].mxu1 %vm66_vm0, %v10426_v7 }
 0xac1   :  { %7757 = vmatprep.mubr.msk.bf16.mxu0 %vm66_vm0, %v10443_v10  ;;  %7781 = vmatprep.mubr.msk.bf16.mxu1 %vm66_vm0, %v10443_v10 }
 0xac2   :  { %7794 = vmatpush3.bf16.msra.mxu0 %v8133_v60  ;;  %7818 = vmatpush3.bf16.msra.mxu1 %v8134_v12 }
 0xac3   :  { %7795 = vmatprep.subr.bf16.mxu0 %v8135_v16  ;;  %7819 = vmatprep.subr.bf16.mxu1 %v8136_v32 }
 0xac6   :  { %7796 = vmatpush3.bf16.msra.mxu0 %v8135_v16  ;;  %7820 = vmatpush3.bf16.msra.mxu1 %v8136_v32 }
 0xac8   :  { %7758 = vmatmul.mubr.msk.bf16.gmra.mrb[136].mxu0 %vm66_vm0, %v10454_v8  ;;  %7782 = vmatmul.mubr.msk.bf16.gmra.mrb[136].mxu1 %vm66_vm0, %v10454_v8 }
 0xac9   :  { %7761 = vmatprep.mubr.msk.bf16.mxu0 %vm66_vm0, %v3584_v23  ;;  %7785 = vmatprep.mubr.msk.bf16.mxu1 %vm66_vm0, %v3584_v23 }
 0xad0   :  { %7762 = vmatmul.mubr.msk.bf16.gmra.mrb[140].mxu0 %vm66_vm0, %v3585_v6  ;;  %7786 = vmatmul.mubr.msk.bf16.gmra.mrb[140].mxu1 %vm66_vm0, %v3585_v6 }
 0xad1   :  { %7797 = vmatprep.mubr.msk.bf16.mxu0 %vm66_vm0, %v10370_v59  ;;  %7821 = vmatprep.mubr.msk.bf16.mxu1 %vm66_vm0, %v10370_v59 }
 0xad8   :  { %7798 = vmatmul.mubr.msk.bf16.vlgmr.msra.gmra.mrb[144].mxu0 %vm66_vm0, %v10378_v46  ;;  %7822 = vmatmul.mubr.msk.bf16.vlgmr.msra.gmra.mrb[144].mxu1 %vm66_vm0, %v10378_v46 }
 0xad9   :  { %7801 = vmatprep.mubr.msk.bf16.mxu0 %vm66_vm0, %v10406_v44  ;;  %7825 = vmatprep.mubr.msk.bf16.mxu1 %vm66_vm0, %v10406_v44 }
 0xae0   :  { %7802 = vmatmul.mubr.msk.bf16.gmra.mrb[148].mxu0 %vm66_vm0, %v10426_v7  ;;  %7826 = vmatmul.mubr.msk.bf16.gmra.mrb[148].mxu1 %vm66_vm0, %v10426_v7 }
 0xae1   :  { %7805 = vmatprep.mubr.msk.bf16.mxu0 %vm66_vm0, %v10443_v10  ;;  %7829 = vmatprep.mubr.msk.bf16.mxu1 %vm66_vm0, %v10443_v10 }
 0xae8   :  { %7806 = vmatmul.mubr.msk.bf16.gmra.mrb[152].mxu0 %vm66_vm0, %v10454_v8  ;;  %7830 = vmatmul.mubr.msk.bf16.gmra.mrb[152].mxu1 %vm66_vm0, %v10454_v8 }
 0xae9   :  { %7809 = vmatprep.mubr.msk.bf16.mxu0 %vm66_vm0, %v3584_v23  ;;  %7833 = vmatprep.mubr.msk.bf16.mxu1 %vm66_vm0, %v3584_v23 }
 0xaf0   :  { %7810 = vmatmul.mubr.msk.bf16.gmra.mrb[156].mxu0 %vm66_vm0, %v3585_v6  ;;  %7834 = vmatmul.mubr.msk.bf16.gmra.mrb[156].mxu1 %vm66_vm0, %v3585_v6 }
 0xb67   :  { %v10547_v59 = vpop.f32.mrb[112].mxu0  ;;  %v10549_v46 = vpop.f32.mrb[112].mxu1 }
 0xb68   :  { %v3685_v44 = vpop.f32.mrb[113].mxu0  ;;  %v10551_v62 = vpop.f32.mrb[113].mxu1 }
 0xb69   :  { %v10553_v39 = vpop.f32.mrb[114].mxu0  ;;  %v10555_v14 = vpop.f32.mrb[114].mxu1 }
 0xb6a   :  { %v3688_v61 = vpop.f32.mrb[115].mxu0  ;;  %v10561_v24 = vpop.f32.mrb[115].mxu1 }
 0xb6b   :  { %v4387_v63 = vpack.c.bf16 %v3688_v61, %v3685_v44 }
 0xb6d   :  { %7845 = vmatprep.mubr.msk.bf16.mxu0 %vm1174_vm1, %v4387_v63 }
 0xb73   :  { %v10566_v7 = vpop.f32.mrb[116].mxu0  ;;  %v10568_v22 = vpop.f32.mrb[116].mxu1 }
 0xb74   :  { %v10570_v56 = vpop.f32.mrb[117].mxu0  ;;  %v10572_v38 = vpop.f32.mrb[117].mxu1 }
 0xb75   :  { %v10574_v1 = vpop.f32.mrb[118].mxu0  ;;  %v10576_v33 = vpop.f32.mrb[118].mxu1 }
 0xb76   :  { %v10582_v36 = vpop.f32.mrb[119].mxu0  ;;  %v10584_v10 = vpop.f32.mrb[119].mxu1 }
 0xb7b   :  { %v10590_v35 = vpop.f32.mrb[120].mxu0  ;;  %v10592_v27 = vpop.f32.mrb[120].mxu1 }
 0xb7c   :  { %v3717_v3 = vpop.f32.mrb[121].mxu0  ;;  %v10594_v25 = vpop.f32.mrb[121].mxu1 }
 0xb7d   :  { %v10596_v21 = vpop.f32.mrb[122].mxu0  ;;  %v10598_v8 = vpop.f32.mrb[122].mxu1 }
 0xb7e   :  { %v3720_v5 = vpop.f32.mrb[123].mxu0  ;;  %v10604_v51 = vpop.f32.mrb[123].mxu1 }
 0xb7f   :  { %v4391_v13 = vpack.c.bf16 %v3720_v5, %v3717_v3 }
 0xb81   :  { %7861 = vmatprep.mubr.msk.bf16.mxu1 %vm1174_vm1, %v4391_v13 }
 0xb83   :  { %v10609_v43 = vpop.f32.mrb[124].mxu0  ;;  %v10611_v40 = vpop.f32.mrb[124].mxu1 }
 0xb84   :  { %v10613_v23 = vpop.f32.mrb[125].mxu0  ;;  %v10615_v9 = vpop.f32.mrb[125].mxu1 }
 0xb85   :  { %v10617_v30 = vpop.f32.mrb[126].mxu0  ;;  %v10619_v6 = vpop.f32.mrb[126].mxu1 }
 0xb86   :  { %v10625_v60 = vpop.f32.mrb[127].mxu0  ;;  %v10627_v12 = vpop.f32.mrb[127].mxu1 }
 0xb8b   :  { %v7751_v44 = vpop.f32.mrb[128].mxu0  ;;  %v7775_v61 = vpop.f32.mrb[128].mxu1 }
 0xb8c   :  { %v3944_v63 = vpop.f32.mrb[129].mxu0  ;;  %v4065_v3 = vpop.f32.mrb[129].mxu1 }
 0xb8d   :  { %v7752_v5 = vpop.f32.mrb[130].mxu0  ;;  %v7776_v13 = vpop.f32.mrb[130].mxu1 }
 0xb8e   :  { %v4404_v49 = vpack.c.bf16 %v7752_v5, %v7751_v44  ;;  %v10633_v53 = vpack.c.bf16 %v7776_v13, %v7775_v61  ;;  %v3947_v29 = vpop.f32.mrb[131].mxu0  ;;  %v4068_v37 = vpop.f32.mrb[131].mxu1 }
 0xb8f   :  { %v4403_v45 = vpack.c.bf16 %v3947_v29, %v3944_v63  ;;  %v10635_v15 = vpack.c.bf16 %v4068_v37, %v4065_v3 }
 0xb90   :  { %v4451_v3 = vsel %vm1174_vm1, %v4404_v49, 0 }
 0xb91   :  { %v4448_v48 = vsel %vm1174_vm1, %v4403_v45, 0  ;;  %8065 = vmatprep.subr.msk.bf16.mxu0 %vm1174_vm1, %v4403_v45  ;;  %v4626_v20 = vsel %vm1174_vm1, %v10635_v15, 0 }
 0xb92   :  { %7838 = vmatpush3.bf16.xpose.msra.mxu0 %v4448_v48 }
 0xb93   :  { %v7755_v32 = vpop.f32.mrb[132].mxu0  ;;  %v7779_v16 = vpop.f32.mrb[132].mxu1  ;;  %8066 = vmatprep.subr.msk.bf16.mxu0 %vm1174_vm1, %v4404_v49 }
 0xb94   :  { %v3960_v17 = vpop.f32.mrb[133].mxu0  ;;  %v4081_v50 = vpop.f32.mrb[133].mxu1 }
 0xb95   :  { %v7756_v28 = vpop.f32.mrb[134].mxu0  ;;  %v7780_v44 = vpop.f32.mrb[134].mxu1 }
 0xb96   :  { %v4406_v61 = vpack.c.bf16 %v7756_v28, %v7755_v32  ;;  %v10640_v5 = vpack.c.bf16 %v7780_v44, %v7779_v16  ;;  %v3963_v13 = vpop.f32.mrb[135].mxu0  ;;  %v4084_v29 = vpop.f32.mrb[135].mxu1 }
 0xb97   :  { %v4405_v37 = vpack.c.bf16 %v3963_v13, %v3960_v17  ;;  %v10642_v63 = vpack.c.bf16 %v4084_v29, %v4081_v50 }
 0xb99   :  { %v4454_v50 = vsel %vm1174_vm1, %v4405_v37, 0 }
 0xb9a   :  { %7840 = vmatpush3.bf16.xpose.msra.mxu0 %v4451_v3 }
 0xb9b   :  { %v7759_v45 = vpop.f32.mrb[136].mxu0  ;;  %v7783_v48 = vpop.f32.mrb[136].mxu1  ;;  %8067 = vmatprep.subr.msk.bf16.mxu0 %vm1174_vm1, %v4405_v37 }
 0xb9c   :  { %v3976_v41 = vpop.f32.mrb[137].mxu0  ;;  %v4097_v19 = vpop.f32.mrb[137].mxu1 }
 0xb9d   :  { %v7760_v34 = vpop.f32.mrb[138].mxu0  ;;  %v7784_v42 = vpop.f32.mrb[138].mxu1 }
 0xb9e   :  { %v4408_v52 = vpack.c.bf16 %v7760_v34, %v7759_v45  ;;  %v10646_v28 = vpack.c.bf16 %v7784_v42, %v7783_v48  ;;  %v3979_v16 = vpop.f32.mrb[139].mxu0  ;;  %v4100_v32 = vpop.f32.mrb[139].mxu1 }
 0xb9f   :  { %v4407_v44 = vpack.c.bf16 %v3979_v16, %v3976_v41  ;;  %v10648_v17 = vpack.c.bf16 %v4100_v32, %v4097_v19 }
 0xba1   :  { %v4537_v49 = vsel %vm1174_vm1, %v4407_v44, 0  ;;  %8069 = vmatprep.subr.msk.bf16.mxu1 %vm1174_vm1, %v4407_v44  ;;  %v4457_v44 = vsel %vm1174_vm1, %v4406_v61, 0 }
 0xba2   :  { %7842 = vmatpush3.bf16.xpose.msra.mxu0 %v4454_v50  ;;  %7854 = vmatpush3.bf16.xpose.msra.mxu1 %v4537_v49  ;;  %v4540_v50 = vsel %vm1174_vm1, %v4408_v52, 0 }
 0xba3   :  { %v7763_v13 = vpop.f32.mrb[140].mxu0  ;;  %v7787_v29 = vpop.f32.mrb[140].mxu1  ;;  %8068 = vmatprep.subr.msk.bf16.mxu0 %vm1174_vm1, %v4406_v61  ;;  %8070 = vmatprep.subr.msk.bf16.mxu1 %vm1174_vm1, %v4408_v52 }
 0xba4   :  { %v3992_v34 = vpop.f32.mrb[141].mxu0  ;;  %v4113_v42 = vpop.f32.mrb[141].mxu1 }
 0xba5   :  { %v7764_v3 = vpop.f32.mrb[142].mxu0  ;;  %v7788_v41 = vpop.f32.mrb[142].mxu1 }
 0xba6   :  { %v4410_v19 = vpack.c.bf16 %v7764_v3, %v7763_v13  ;;  %v10655_v45 = vpack.c.bf16 %v7788_v41, %v7787_v29  ;;  %v3995_v37 = vpop.f32.mrb[143].mxu0  ;;  %v4116_v48 = vpop.f32.mrb[143].mxu1 }
 0xba7   :  { %v4409_v16 = vpack.c.bf16 %v3995_v37, %v3992_v34  ;;  %v10657_v32 = vpack.c.bf16 %v4116_v48, %v4113_v42 }
 0xbaa   :  { %7844 = vmatpush3.bf16.xpose.msra.mxu0 %v4457_v44  ;;  %7856 = vmatpush3.bf16.xpose.msra.mxu1 %v4540_v50  ;;  %v4543_v44 = vsel %vm1174_vm1, %v4409_v16, 0  ;;  %v11634_v50 = vpack.c.bf16 %v10553_v39, %v10547_v59 }
 0xbab   :  { %v7799_v49 = vpop.f32.mrb[144].mxu0  ;;  %v7823_v54 = vpop.f32.mrb[144].mxu1  ;;  %8071 = vmatprep.subr.msk.bf16.mxu1 %vm1174_vm1, %v4409_v16  ;;  %8073 = vmatprep.subr.msk.bf16.mxu0 %vm1174_vm1, %v10635_v15 }
 0xbac   :  { %v4203_v13 = vpop.f32.mrb[145].mxu0  ;;  %v4324_v29 = vpop.f32.mrb[145].mxu1 }
 0xbad   :  { %v7800_v3 = vpop.f32.mrb[146].mxu0  ;;  %v7824_v41 = vpop.f32.mrb[146].mxu1 }
 0xbae   :  { %v10664_v34 = vpack.c.bf16 %v7800_v3, %v7799_v49  ;;  %v10666_v42 = vpack.c.bf16 %v7824_v41, %v7823_v54  ;;  %v4206_v61 = vpop.f32.mrb[147].mxu0  ;;  %v4327_v37 = vpop.f32.mrb[147].mxu1  ;;  %v11635_v54 = vpack.c.bf16 %v10582_v36, %v10570_v56 }
 0xbaf   :  { %v10668_v52 = vpack.c.bf16 %v4206_v61, %v4203_v13  ;;  %v10670_v48 = vpack.c.bf16 %v4327_v37, %v4324_v29  ;;  %v11636_v37 = vpack.c.bf16 %v10574_v1, %v10566_v7 }
 0xbb1   :  { %7846 = vmatmul.mubr.msk.bf16.vlgmr.msra.gmra.mrb[160].mxu0 %vm1174_vm1, %v11634_v50  ;;  %v11637_v50 = vpack.c.bf16 %v10561_v24, %v10551_v62 }
 0xbb2   :  { %7849 = vmatprep.mubr.msk.bf16.mxu0 %vm1174_vm1, %v11635_v54  ;;  %7858 = vmatpush3.bf16.xpose.msra.mxu1 %v4543_v44  ;;  %v4629_v44 = vsel %vm1174_vm1, %v10633_v53, 0 }
 0xbb3   :  { %7870 = vmatpush3.bf16.xpose.msra.mxu0 %v4626_v20  ;;  %v7803_v49 = vpop.f32.mrb[148].mxu0  ;;  %v7827_v13 = vpop.f32.mrb[148].mxu1  ;;  %8072 = vmatprep.subr.msk.bf16.mxu1 %vm1174_vm1, %v4410_v19  ;;  %v4546_v20 = vsel %vm1174_vm1, %v4410_v19, 0 }
 0xbb4   :  { %8074 = vmatprep.subr.msk.bf16.mxu0 %vm1174_vm1, %v10633_v53  ;;  %v4219_v59 = vpop.f32.mrb[149].mxu0  ;;  %v4340_v39 = vpop.f32.mrb[149].mxu1 }
 0xbb5   :  { %v7804_v16 = vpop.f32.mrb[150].mxu0  ;;  %v7828_v29 = vpop.f32.mrb[150].mxu1 }
 0xbb6   :  { %v10686_v3 = vpack.c.bf16 %v7804_v16, %v7803_v49  ;;  %v10688_v15 = vpack.c.bf16 %v7828_v29, %v7827_v13  ;;  %v4222_v56 = vpop.f32.mrb[151].mxu0  ;;  %v4343_v36 = vpop.f32.mrb[151].mxu1  ;;  %v4715_v29 = vsel %vm1174_vm1, %v10648_v17, 0 }
 0xbb7   :  { %v4421_v41 = vpack.c.bf16 %v4222_v56, %v4219_v59  ;;  %v10690_v61 = vpack.c.bf16 %v4343_v36, %v4340_v39  ;;  %v11638_v56 = vpack.c.bf16 %v10596_v21, %v10590_v35  ;;  %v4632_v36 = vsel %vm1174_vm1, %v10642_v63, 0 }
 0xbb9   :  { %7850 = vmatmul.mubr.msk.bf16.gmra.mrb[164].mxu0 %vm1174_vm1, %v11636_v37 }
 0xbba   :  { %7860 = vmatpush3.bf16.xpose.msra.mxu1 %v4546_v20  ;;  %7877 = vmatprep.mubr.msk.bf16.mxu0 %vm1174_vm1, %v11637_v50  ;;  %v11639_v20 = vpack.c.bf16 %v10625_v60, %v10613_v23 }
 0xbbb   :  { %7872 = vmatpush3.bf16.xpose.msra.mxu0 %v4629_v44  ;;  %v7807_v54 = vpop.f32.mrb[152].mxu0  ;;  %v7831_v49 = vpop.f32.mrb[152].mxu1  ;;  %8077 = vmatprep.subr.msk.bf16.mxu1 %vm1174_vm1, %v10648_v17 }
 0xbbc   :  { %8075 = vmatprep.subr.msk.bf16.mxu0 %vm1174_vm1, %v10642_v63  ;;  %v4235_v7 = vpop.f32.mrb[153].mxu0  ;;  %v4356_v1 = vpop.f32.mrb[153].mxu1 }
 0xbbd   :  { %v7808_v19 = vpop.f32.mrb[154].mxu0  ;;  %v7832_v13 = vpop.f32.mrb[154].mxu1 }
 0xbbe   :  { %v4424_v53 = vpack.c.bf16 %v7808_v19, %v7807_v54  ;;  %v10707_v59 = vpack.c.bf16 %v7832_v13, %v7831_v49  ;;  %v4238_v39 = vpop.f32.mrb[155].mxu0  ;;  %v4359_v62 = vpop.f32.mrb[155].mxu1  ;;  %v11640_v19 = vpack.c.bf16 %v10617_v30, %v10609_v43  ;;  %v4635_v13 = vsel %vm1174_vm1, %v10640_v5, 0 }
 0xbbf   :  { %v4423_v24 = vpack.c.bf16 %v4238_v39, %v4235_v7  ;;  %v10709_v16 = vpack.c.bf16 %v4359_v62, %v4356_v1  ;;  %v4718_v1 = vsel %vm1174_vm1, %v10646_v28, 0  ;;  %v11641_v39 = vpack.c.bf16 %v10604_v51, %v10594_v25 }
 0xbc0   :  { %v4721_v43 = vsel %vm1174_vm1, %v10657_v32, 0  ;;  %v11642_v30 = vpack.c.bf16 %v10555_v14, %v10549_v46  ;;  %v11643_v25 = vpack.c.bf16 %v10584_v10, %v10572_v38  ;;  %v4724_v46 = vsel %vm1174_vm1, %v10655_v45, 0 }
 0xbc1   :  { %7862 = vmatmul.mubr.msk.bf16.vlgmr.msra.gmra.mrb[160].mxu1 %vm1174_vm1, %v11638_v56  ;;  %v11644_v14 = vpack.c.bf16 %v10576_v33, %v10568_v22  ;;  %v11645_v38 = vpack.c.bf16 %v10598_v8, %v10592_v27  ;;  %v11646_v10 = vpack.c.bf16 %v10627_v12, %v10615_v9  ;;  %v11647_v22 = vpack.c.bf16 %v10619_v6, %v10611_v40 }
 0xbc2   :  { %7865 = vmatprep.mubr.msk.bf16.mxu1 %vm1174_vm1, %v11639_v20  ;;  %7886 = vmatpush3.bf16.xpose.msra.mxu1 %v4715_v29 }
 0xbc3   :  { %7874 = vmatpush3.bf16.xpose.msra.mxu0 %v4632_v36  ;;  %v7811_v37 = vpop.f32.mrb[156].mxu0  ;;  %v7835_v44 = vpop.f32.mrb[156].mxu1  ;;  %8078 = vmatprep.subr.msk.bf16.mxu1 %vm1174_vm1, %v10646_v28 }
 0xbc4   :  { %8076 = vmatprep.subr.msk.bf16.mxu0 %vm1174_vm1, %v10640_v5  ;;  %v4251_v35 = vpop.f32.mrb[157].mxu0  ;;  %v4372_v21 = vpop.f32.mrb[157].mxu1 }
 0xbc5   :  { %v7812_v17 = vpop.f32.mrb[158].mxu0  ;;  %v7836_v50 = vpop.f32.mrb[158].mxu1 }
 0xbc6   :  { %v4426_v63 = vpack.c.bf16 %v7812_v17, %v7811_v37  ;;  %v10727_v54 = vpack.c.bf16 %v7836_v50, %v7835_v44  ;;  %v4254_v23 = vpop.f32.mrb[159].mxu0  ;;  %v4375_v60 = vpop.f32.mrb[159].mxu1 }
 0xbc7   :  { %v4425_v49 = vpack.c.bf16 %v4254_v23, %v4251_v35  ;;  %v10729_v7 = vpack.c.bf16 %v4375_v60, %v4372_v21 }
 0xbc9   :  { %7866 = vmatmul.mubr.msk.bf16.gmra.mrb[164].mxu1 %vm1174_vm1, %v11640_v19 }
 0xbca   :  { %7888 = vmatpush3.bf16.xpose.msra.mxu1 %v4718_v1  ;;  %7893 = vmatprep.mubr.msk.bf16.mxu1 %vm1174_vm1, %v11641_v39 }
 0xbcb   :  { %7876 = vmatpush3.bf16.xpose.msra.mxu0 %v4635_v13  ;;  %8079 = vmatprep.subr.msk.bf16.mxu1 %vm1174_vm1, %v10657_v32 }
 0xbcc   :  { %7901 = vmatprep.subr.bf16.mxu0 %v10668_v52 }
 0xbd2   :  { %7878 = vmatmul.mubr.msk.bf16.vlgmr.msra.gmra.mrb[168].mxu0 %vm1174_vm1, %v11642_v30  ;;  %7890 = vmatpush3.bf16.xpose.msra.mxu1 %v4721_v43 }
 0xbd3   :  { %7881 = vmatprep.mubr.msk.bf16.mxu0 %vm1174_vm1, %v11643_v25  ;;  %7902 = vmatpush3.bf16.msra.mxu0 %v10668_v52 }
 0xbd4   :  { %8080 = vmatprep.subr.msk.bf16.mxu1 %vm1174_vm1, %v10655_v45  ;;  %7903 = vmatprep.subr.bf16.mxu0 %v10664_v34 }
 0xbd7   :  { %7904 = vmatpush3.bf16.msra.mxu0 %v10664_v34 }
 0xbd8   :  { %7905 = vmatprep.subr.bf16.mxu0 %v4421_v41 }
 0xbda   :  { %7882 = vmatmul.mubr.msk.bf16.gmra.mrb[172].mxu0 %vm1174_vm1, %v11644_v14  ;;  %7892 = vmatpush3.bf16.xpose.msra.mxu1 %v4724_v46 }
 0xbdb   :  { %7906 = vmatpush3.bf16.msra.mxu0 %v4421_v41  ;;  %7917 = vmatprep.subr.bf16.mxu1 %v4423_v24 }
 0xbdc   :  { %7907 = vmatprep.subr.bf16.mxu0 %v10686_v3 }
 0xbdf   :  { %7908 = vmatpush3.bf16.msra.mxu0 %v10686_v3 }
 0xbe0   :  { %7933 = vmatprep.subr.bf16.mxu0 %v10670_v48 }
 0xbe1   :  { %7894 = vmatmul.mubr.msk.bf16.vlgmr.msra.gmra.mrb[168].mxu1 %vm1174_vm1, %v11645_v38 }
 0xbe2   :  { %7897 = vmatprep.mubr.msk.bf16.mxu1 %vm1174_vm1, %v11646_v10  ;;  %7918 = vmatpush3.bf16.msra.mxu1 %v4423_v24 }
 0xbe3   :  { %7919 = vmatprep.subr.bf16.mxu1 %v4424_v53 }
 0xbe6   :  { %7920 = vmatpush3.bf16.msra.mxu1 %v4424_v53 }
 0xbe7   :  { %7921 = vmatprep.subr.bf16.mxu1 %v4425_v49 }
 0xbe9   :  { %7898 = vmatmul.mubr.msk.bf16.gmra.mrb[172].mxu1 %vm1174_vm1, %v11647_v22 }
 0xbea   :  { %7922 = vmatpush3.bf16.msra.mxu1 %v4425_v49 }
 0xbeb   :  { %7923 = vmatprep.subr.bf16.mxu1 %v4426_v63 }
 0xbee   :  { %7924 = vmatpush3.bf16.msra.mxu1 %v4426_v63 }
 0xbef   :  { %7949 = vmatprep.subr.bf16.mxu1 %v10709_v16 }
 0xc84   :  { %v10783_v33 = vpop.f32.mrb[160].mxu0 }
 0xc85   :  { %v10785_v27 = vpop.f32.mrb[161].mxu0  ;;  %v4797_v8 = vsel %vm66_vm0, %v10783_v33, -inf }
 0xc86   :  { %4798 = vmax.xlane.f32.xlu0 %v4797_v8  ;;  %v10789_v51 = vpop.f32.mrb[162].mxu0  ;;  %v4791_v6 = vsel %vm66_vm0, %v10785_v27, -inf }
 0xc87   :  { %v10791_v9 = vpop.f32.mrb[163].mxu0  ;;  %v4800_v40 = vsel %vm66_vm0, %v10789_v51, -inf }
 0xc88   :  { %4801 = vmax.xlane.f32.xlu1 %v4800_v40  ;;  %v4794_v12 = vsel %vm66_vm0, %v10791_v9, -inf }
 0xc8a   :  { %4792 = vmax.xlane.f32.xlu0 %v4791_v6 }
 0xc8c   :  { %4795 = vmax.xlane.f32.xlu1 %v4794_v12  ;;  %v10799_v5 = vpop.f32.mrb[164].mxu0 }
 0xc8d   :  { %v10801_v28 = vpop.f32.mrb[165].mxu0  ;;  %v4809_v45 = vsel %vm66_vm0, %v10799_v5, -inf }
 0xc8e   :  { %4810 = vmax.xlane.f32.xlu0 %v4809_v45  ;;  %v10805_v32 = vpop.f32.mrb[166].mxu0  ;;  %v4803_v3 = vsel %vm66_vm0, %v10801_v28, -inf }
 0xc8f   :  { %v10807_v34 = vpop.f32.mrb[167].mxu0  ;;  %v4812_v52 = vsel %vm66_vm0, %v10805_v32, -inf }
 0xc90   :  { %4813 = vmax.xlane.f32.xlu1 %v4812_v52  ;;  %v4806_v41 = vsel %vm66_vm0, %v10807_v34, -inf }
 0xc92   :  { %4804 = vmax.xlane.f32.xlu0 %v4803_v3 }
 0xc94   :  { %v10815_v53 = vpop.f32.mrb[160].mxu1  ;;  %4807 = vmax.xlane.f32.xlu1 %v4806_v41 }
 0xc95   :  { %v10817_v62 = vpop.f32.mrb[161].mxu1  ;;  %v4821_v24 = vsel %vm66_vm0, %v10815_v53, -inf }
 0xc96   :  { %v10821_v29 = vpop.f32.mrb[162].mxu1  ;;  %4822 = vmax.xlane.f32.xlu0 %v4821_v24  ;;  %v4815_v20 = vsel %vm66_vm0, %v10817_v62, -inf }
 0xc97   :  { %v10823_v56 = vpop.f32.mrb[163].mxu1  ;;  %v4824_v36 = vsel %vm66_vm0, %v10821_v29, -inf }
 0xc98   :  { %4825 = vmax.xlane.f32.xlu1 %v4824_v36  ;;  %v4818_v37 = vsel %vm66_vm0, %v10823_v56, -inf }
 0xc9a   :  { %4816 = vmax.xlane.f32.xlu0 %v4815_v20 }
 0xc9c   :  { %v10831_v44 = vpop.f32.mrb[164].mxu1  ;;  %4819 = vmax.xlane.f32.xlu1 %v4818_v37 }
 0xc9d   :  { %v10833_v35 = vpop.f32.mrb[165].mxu1  ;;  %v4833_v46 = vsel %vm66_vm0, %v10831_v44, -inf }
 0xc9e   :  { %v10835_v21 = vpop.f32.mrb[166].mxu1  ;;  %v4827_v17 = vsel %vm66_vm0, %v10833_v35, -inf }
 0xc9f   :  { %v10839_v50 = vpop.f32.mrb[167].mxu1  ;;  %4828 = vmax.xlane.f32.xlu0 %v4827_v17  ;;  %v4836_v10 = vsel %vm66_vm0, %v10835_v21, -inf }
 0xca0   :  { %v4830_v63 = vsel %vm66_vm0, %v10839_v50, -inf }
 0xca1   :  { %4831 = vmax.xlane.f32.xlu1 %v4830_v63 }
 0xca5   :  { %v10843_v23 = vpop.f32.mrb[168].mxu0 }
 0xca6   :  { %v10845_v60 = vpop.f32.mrb[169].mxu0  ;;  %v4845_v49 = vsel %vm66_vm0, %v10843_v23, -inf }
 0xca7   :  { %4846 = vmax.xlane.f32.xlu0 %v4845_v49  ;;  %v10849_v1 = vpop.f32.mrb[170].mxu0  ;;  %v4839_v39 = vsel %vm66_vm0, %v10845_v60, -inf }
 0xca8   :  { %v10851_v19 = vpop.f32.mrb[171].mxu0  ;;  %v4848_v13 = vsel %vm66_vm0, %v10849_v1, -inf }
 0xca9   :  { %4849 = vmax.xlane.f32.xlu1 %v4848_v13  ;;  %v4842_v43 = vsel %vm66_vm0, %v10851_v19, -inf }
 0xcab   :  { %4840 = vmax.xlane.f32.xlu0 %v4839_v39 }
 0xcad   :  { %4843 = vmax.xlane.f32.xlu1 %v4842_v43  ;;  %v10859_v30 = vpop.f32.mrb[172].mxu0 }
 0xcae   :  { %v10861_v25 = vpop.f32.mrb[173].mxu0  ;;  %v4857_v45 = vsel %vm66_vm0, %v10859_v30, -inf }
 0xcaf   :  { %4834 = vmax.xlane.f32.xlu0 %v4833_v46  ;;  %v10865_v14 = vpop.f32.mrb[174].mxu0  ;;  %v4851_v22 = vsel %vm66_vm0, %v10861_v25, -inf }
 0xcb0   :  { %v10867_v38 = vpop.f32.mrb[175].mxu0  ;;  %v4860_v3 = vsel %vm66_vm0, %v10865_v14, -inf }
 0xcb1   :  { %4837 = vmax.xlane.f32.xlu1 %v4836_v10  ;;  %v4854_v40 = vsel %vm66_vm0, %v10867_v38, -inf }
 0xcb3   :  { %4852 = vmax.xlane.f32.xlu0 %v4851_v22 }
 0xcb4   :  { %v10873_v8 = vpop.f32.mrb[168].mxu1 }
 0xcb5   :  { %4855 = vmax.xlane.f32.xlu1 %v4854_v40  ;;  %v10877_v6 = vpop.f32.mrb[169].mxu1  ;;  %v4869_v17 = vsel %vm66_vm0, %v10873_v8, -inf }
 0xcb6   :  { %v10879_v12 = vpop.f32.mrb[170].mxu1  ;;  %v4863_v41 = vsel %vm66_vm0, %v10877_v6, -inf }
 0xcb7   :  { %4858 = vmax.xlane.f32.xlu0 %v4857_v45  ;;  %v10883_v52 = vpop.f32.mrb[171].mxu1  ;;  %v4872_v49 = vsel %vm66_vm0, %v10879_v12, -inf }
 0xcb8   :  { %v4866_v36 = vsel %vm66_vm0, %v10883_v52, -inf }
 0xcb9   :  { %4861 = vmax.xlane.f32.xlu1 %v4860_v3 }
 0xcbb   :  { %4864 = vmax.xlane.f32.xlu0 %v4863_v41 }
 0xcbc   :  { %v10889_v24 = vpop.f32.mrb[172].mxu1 }
 0xcbd   :  { %4867 = vmax.xlane.f32.xlu1 %v4866_v36  ;;  %v10893_v20 = vpop.f32.mrb[173].mxu1  ;;  %v4881_v43 = vsel %vm66_vm0, %v10889_v24, -inf }
 0xcbe   :  { %v10895_v37 = vpop.f32.mrb[174].mxu1  ;;  %v4875_v13 = vsel %vm66_vm0, %v10893_v20, -inf }
 0xcbf   :  { %4870 = vmax.xlane.f32.xlu0 %v4869_v17  ;;  %v10899_v63 = vpop.f32.mrb[175].mxu1  ;;  %v4884_v46 = vsel %vm66_vm0, %v10895_v37, -inf }
 0xcc0   :  { %v4878_v39 = vsel %vm66_vm0, %v10899_v63, -inf }
 0xcc1   :  { %4873 = vmax.xlane.f32.xlu1 %v4872_v49 }
 0xcc3   :  { %4876 = vmax.xlane.f32.xlu0 %v4875_v13 }
 0xcc5   :  { %4879 = vmax.xlane.f32.xlu1 %v4878_v39 }
 0xcc7   :  { %4882 = vmax.xlane.f32.xlu0 %v4881_v43 }
 0xcc9   :  { %4885 = vmax.xlane.f32.xlu1 %v4884_v46 }
 0xd13   :  { %v4799_v10 = vpop.xlane.xlu0 %4798 }
 0xd14   :  { %v4889_v22 = vsub.f32 %v10783_v33, %v4799_v10 }
 0xd15   :  { %v4802_v40 = vpop.xlane.xlu1 %4801 }
 0xd16   :  { %v4923_v45 = vmul.f32 1.442695, %v4889_v22  ;;  %v4890_v3 = vsub.f32 %v10789_v51, %v4802_v40 }
 0xd17   :  { %v4793_v41 = vpop.xlane.xlu0 %4792 }
 0xd18   :  { %8401 = vpow2.f32 %v4923_v45  ;;  %v4925_v36 = vmul.f32 1.442695, %v4890_v3  ;;  %v4887_v17 = vsub.f32 %v10785_v27, %v4793_v41 }
 0xd19   :  { %v4796_v49 = vpop.xlane.xlu1 %4795 }
 0xd1a   :  { %8403 = vpow2.f32 %v4925_v36  ;;  %v4919_v13 = vmul.f32 1.442695, %v4887_v17  ;;  %v4888_v39 = vsub.f32 %v10791_v9, %v4796_v49 }
 0xd1b   :  { %v4811_v43 = vpop.xlane.xlu0 %4810 }
 0xd1c   :  { %8405 = vpow2.f32 %v4919_v13  ;;  %v4921_v46 = vmul.f32 1.442695, %v4888_v39  ;;  %v4893_v26 = vsub.f32 %v10799_v5, %v4811_v43 }
 0xd1d   :  { %v4814_v33 = vpop.xlane.xlu1 %4813 }
 0xd1e   :  { %8407 = vpow2.f32 %v4921_v46  ;;  %v4931_v10 = vmul.f32 1.442695, %v4893_v26  ;;  %v4894_v51 = vsub.f32 %v10805_v32, %v4814_v33 }
 0xd1f   :  { %v4805_v22 = vpop.xlane.xlu0 %4804 }
 0xd20   :  { %8409 = vpow2.f32 %v4931_v10  ;;  %v4933_v40 = vmul.f32 1.442695, %v4894_v51  ;;  %v4891_v27 = vsub.f32 %v10801_v28, %v4805_v22 }
 0xd21   :  { %v4808_v45 = vpop.xlane.xlu1 %4807 }
 0xd22   :  { %v10918_v3 = vpop.eup %8401  ;;  %8411 = vpow2.f32 %v4933_v40  ;;  %v4927_v9 = vmul.f32 1.442695, %v4891_v27  ;;  %v4892_v41 = vsub.f32 %v10807_v34, %v4808_v45 }
 0xd23   :  { %v4823_v36 = vpop.xlane.xlu0 %4822  ;;  %v4989_v5 = vsel %vm66_vm0, %v10918_v3, 0.0 }
 0xd24   :  { %v10923_v17 = vpop.eup %8403  ;;  %8413 = vpow2.f32 %v4927_v9  ;;  %v4929_v26 = vmul.f32 1.442695, %v4892_v41  ;;  %v4897_v32 = vsub.f32 %v10815_v53, %v4823_v36  ;;  %4990 = vadd.xlane.f32.xlu0 %v4989_v5 }
 0xd25   :  { %v4826_v49 = vpop.xlane.xlu1 %4825  ;;  %v4992_v28 = vsel %vm66_vm0, %v10923_v17, 0.0 }
 0xd26   :  { %v10928_v13 = vpop.eup %8405  ;;  %8415 = vpow2.f32 %v4929_v26  ;;  %v4939_v39 = vmul.f32 1.442695, %v4897_v32  ;;  %v4898_v34 = vsub.f32 %v10821_v29, %v4826_v49  ;;  %4993 = vadd.xlane.f32.xlu1 %v4992_v28 }
 0xd27   :  { %v4817_v43 = vpop.xlane.xlu0 %4816  ;;  %v4983_v46 = vsel %vm66_vm0, %v10928_v13, 0.0 }
 0xd28   :  { %v10933_v33 = vpop.eup %8407  ;;  %8417 = vpow2.f32 %v4939_v39  ;;  %v4941_v53 = vmul.f32 1.442695, %v4898_v34  ;;  %v4895_v10 = vsub.f32 %v10817_v62, %v4817_v43  ;;  %4984 = vadd.xlane.f32.xlu0 %v4983_v46 }
 0xd29   :  { %v4820_v51 = vpop.xlane.xlu1 %4819  ;;  %v4986_v22 = vsel %vm66_vm0, %v10933_v33, 0.0 }
 0xd2a   :  { %v10938_v40 = vpop.eup %8409  ;;  %8419 = vpow2.f32 %v4941_v53  ;;  %v4935_v29 = vmul.f32 1.442695, %v4895_v10  ;;  %v4896_v27 = vsub.f32 %v10823_v56, %v4820_v51  ;;  %4987 = vadd.xlane.f32.xlu1 %v4986_v22 }
 0xd2b   :  { %v5001_v45 = vsel %vm66_vm0, %v10938_v40, 0.0 }
 0xd2c   :  { %v10943_v9 = vpop.eup %8411  ;;  %8421 = vpow2.f32 %v4935_v29  ;;  %v4937_v41 = vmul.f32 1.442695, %v4896_v27  ;;  %v4829_v62 = vpop.xlane.xlu0 %4828  ;;  %5002 = vadd.xlane.f32.xlu0 %v5001_v45 }
 0xd2d   :  { %v4899_v36 = vsub.f32 %v10833_v35, %v4829_v62  ;;  %v5004_v5 = vsel %vm66_vm0, %v10943_v9, 0.0 }
 0xd2e   :  { %v10948_v26 = vpop.eup %8413  ;;  %8423 = vpow2.f32 %v4937_v41  ;;  %v4832_v32 = vpop.xlane.xlu1 %4831  ;;  %5005 = vadd.xlane.f32.xlu1 %v5004_v5 }
 0xd2f   :  { %v4943_v56 = vmul.f32 1.442695, %v4899_v36  ;;  %v4900_v49 = vsub.f32 %v10839_v50, %v4832_v32  ;;  %v4995_v28 = vsel %vm66_vm0, %v10948_v26, 0.0 }
 0xd30   :  { %v10953_v39 = vpop.eup %8415  ;;  %4996 = vadd.xlane.f32.xlu0 %v4995_v28 }
 0xd31   :  { %8425 = vpow2.f32 %v4943_v56  ;;  %v4945_v34 = vmul.f32 1.442695, %v4900_v49  ;;  %v4998_v35 = vsel %vm66_vm0, %v10953_v39, 0.0 }
 0xd32   :  { %v10957_v43 = vpop.eup %8417  ;;  %4999 = vadd.xlane.f32.xlu1 %v4998_v35 }
 0xd33   :  { %8427 = vpow2.f32 %v4945_v34  ;;  %v5013_v46 = vsel %vm66_vm0, %v10957_v43, 0.0 }
 0xd34   :  { %v10961_v53 = vpop.eup %8419  ;;  %v4847_v50 = vpop.xlane.xlu0 %4846  ;;  %5014 = vadd.xlane.f32.xlu0 %v5013_v46 }
 0xd35   :  { %v4905_v10 = vsub.f32 %v10843_v23, %v4847_v50  ;;  %v5016_v51 = vsel %vm66_vm0, %v10961_v53, 0.0 }
 0xd36   :  { %v10966_v22 = vpop.eup %8421  ;;  %v4850_v29 = vpop.xlane.xlu1 %4849  ;;  %5017 = vadd.xlane.f32.xlu1 %v5016_v51 }
 0xd37   :  { %v4955_v27 = vmul.f32 1.442695, %v4905_v10  ;;  %v4906_v45 = vsub.f32 %v10849_v1, %v4850_v29  ;;  %v5007_v41 = vsel %vm66_vm0, %v10966_v22, 0.0 }
 0xd38   :  { %v10971_v62 = vpop.eup %8423  ;;  %v4841_v36 = vpop.xlane.xlu0 %4840  ;;  %5008 = vadd.xlane.f32.xlu0 %v5007_v41 }
 0xd39   :  { %8429 = vpow2.f32 %v4955_v27  ;;  %v4957_v5 = vmul.f32 1.442695, %v4906_v45  ;;  %v4903_v23 = vsub.f32 %v10845_v60, %v4841_v36  ;;  %v5010_v32 = vsel %vm66_vm0, %v10971_v62, 0.0 }
 0xd3a   :  { %v4844_v56 = vpop.xlane.xlu1 %4843  ;;  %5011 = vadd.xlane.f32.xlu1 %v5010_v32 }
 0xd3b   :  { %v10976_v49 = vpop.eup %8425  ;;  %8431 = vpow2.f32 %v4957_v5  ;;  %v4951_v1 = vmul.f32 1.442695, %v4903_v23  ;;  %v4904_v28 = vsub.f32 %v10851_v19, %v4844_v56 }
 0xd3c   :  { %v4835_v34 = vpop.xlane.xlu0 %4834  ;;  %v5019_v35 = vsel %vm66_vm0, %v10976_v49, 0.0 }
 0xd3d   :  { %v10981_v46 = vpop.eup %8427  ;;  %8433 = vpow2.f32 %v4951_v1  ;;  %v4953_v50 = vmul.f32 1.442695, %v4904_v28  ;;  %v4901_v60 = vsub.f32 %v10831_v44, %v4835_v34  ;;  %5020 = vadd.xlane.f32.xlu0 %v5019_v35 }
 0xd3e   :  { %v4838_v10 = vpop.xlane.xlu1 %4837  ;;  %v5022_v51 = vsel %vm66_vm0, %v10981_v46, 0.0 }
 0xd3f   :  { %8435 = vpow2.f32 %v4953_v50  ;;  %v4947_v29 = vmul.f32 1.442695, %v4901_v60  ;;  %v4902_v27 = vsub.f32 %v10835_v21, %v4838_v10  ;;  %5023 = vadd.xlane.f32.xlu1 %v5022_v51 }
 0xd40   :  { %v4853_v19 = vpop.xlane.xlu0 %4852 }
 0xd41   :  { %8437 = vpow2.f32 %v4947_v29  ;;  %v4949_v45 = vmul.f32 1.442695, %v4902_v27  ;;  %v4907_v41 = vsub.f32 %v10861_v25, %v4853_v19 }
 0xd42   :  { %v4856_v36 = vpop.xlane.xlu1 %4855 }
 0xd43   :  { %v10988_v5 = vpop.eup %8429  ;;  %8439 = vpow2.f32 %v4949_v45  ;;  %v4959_v44 = vmul.f32 1.442695, %v4907_v41  ;;  %v4908_v23 = vsub.f32 %v10867_v38, %v4856_v36 }
 0xd44   :  { %v4859_v32 = vpop.xlane.xlu0 %4858  ;;  %v5037_v56 = vsel %vm66_vm0, %v10988_v5, 0.0 }
 0xd45   :  { %v10993_v1 = vpop.eup %8431  ;;  %8441 = vpow2.f32 %v4959_v44  ;;  %v4961_v21 = vmul.f32 1.442695, %v4908_v23  ;;  %v4909_v28 = vsub.f32 %v10859_v30, %v4859_v32  ;;  %5038 = vadd.xlane.f32.xlu0 %v5037_v56 }
 0xd46   :  { %v4862_v34 = vpop.xlane.xlu1 %4861  ;;  %v5040_v25 = vsel %vm66_vm0, %v10993_v1, 0.0 }
 0xd47   :  { %v10998_v35 = vpop.eup %8433  ;;  %8443 = vpow2.f32 %v4961_v21  ;;  %v4963_v50 = vmul.f32 1.442695, %v4909_v28  ;;  %v4910_v38 = vsub.f32 %v10865_v14, %v4862_v34  ;;  %5041 = vadd.xlane.f32.xlu1 %v5040_v25 }
 0xd48   :  { %v4865_v60 = vpop.xlane.xlu0 %4864  ;;  %v5031_v10 = vsel %vm66_vm0, %v10998_v35, 0.0 }
 0xd49   :  { %v11003_v51 = vpop.eup %8435  ;;  %8445 = vpow2.f32 %v4963_v50  ;;  %v4965_v30 = vmul.f32 1.442695, %v4910_v38  ;;  %v4911_v29 = vsub.f32 %v10877_v6, %v4865_v60  ;;  %5032 = vadd.xlane.f32.xlu0 %v5031_v10 }
 0xd4a   :  { %v4868_v27 = vpop.xlane.xlu1 %4867  ;;  %v5034_v19 = vsel %vm66_vm0, %v11003_v51, 0.0 }
 0xd4b   :  { %v11008_v45 = vpop.eup %8437  ;;  %8447 = vpow2.f32 %v4965_v30  ;;  %v4967_v14 = vmul.f32 1.442695, %v4911_v29  ;;  %v4912_v41 = vsub.f32 %v10883_v52, %v4868_v27  ;;  %5035 = vadd.xlane.f32.xlu1 %v5034_v19 }
 0xd4c   :  { %v4871_v36 = vpop.xlane.xlu0 %4870  ;;  %v5025_v44 = vsel %vm66_vm0, %v11008_v45, 0.0 }
 0xd4d   :  { %v11013_v23 = vpop.eup %8439  ;;  %8449 = vpow2.f32 %v4967_v14  ;;  %v4969_v6 = vmul.f32 1.442695, %v4912_v41  ;;  %v4913_v32 = vsub.f32 %v10873_v8, %v4871_v36  ;;  %5026 = vadd.xlane.f32.xlu0 %v5025_v44 }
 0xd4e   :  { %v4874_v56 = vpop.xlane.xlu1 %4873  ;;  %v5028_v21 = vsel %vm66_vm0, %v11013_v23, 0.0 }
 0xd4f   :  { %v11018_v28 = vpop.eup %8441  ;;  %8451 = vpow2.f32 %v4969_v6  ;;  %v4971_v52 = vmul.f32 1.442695, %v4913_v32  ;;  %v4914_v34 = vsub.f32 %v10879_v12, %v4874_v56  ;;  %5029 = vadd.xlane.f32.xlu1 %v5028_v21 }
 0xd50   :  { %v4877_v25 = vpop.xlane.xlu0 %4876  ;;  %v5043_v50 = vsel %vm66_vm0, %v11018_v28, 0.0 }
 0xd51   :  { %v11023_v38 = vpop.eup %8443  ;;  %8453 = vpow2.f32 %v4971_v52  ;;  %v4973_v8 = vmul.f32 1.442695, %v4914_v34  ;;  %v4915_v60 = vsub.f32 %v10893_v20, %v4877_v25  ;;  %5044 = vadd.xlane.f32.xlu0 %v5043_v50 }
 0xd52   :  { %v4880_v10 = vpop.xlane.xlu1 %4879  ;;  %v5046_v30 = vsel %vm66_vm0, %v11023_v38, 0.0 }
 0xd53   :  { %v11028_v29 = vpop.eup %8445  ;;  %8455 = vpow2.f32 %v4973_v8  ;;  %v4975_v12 = vmul.f32 1.442695, %v4915_v60  ;;  %v4916_v27 = vsub.f32 %v10899_v63, %v4880_v10  ;;  %5047 = vadd.xlane.f32.xlu1 %v5046_v30 }
 0xd54   :  { %v4883_v19 = vpop.xlane.xlu0 %4882  ;;  %v5049_v14 = vsel %vm66_vm0, %v11028_v29, 0.0 }
 0xd55   :  { %v11033_v41 = vpop.eup %8447  ;;  %8457 = vpow2.f32 %v4975_v12  ;;  %v4977_v20 = vmul.f32 1.442695, %v4916_v27  ;;  %v4917_v36 = vsub.f32 %v10889_v24, %v4883_v19  ;;  %5050 = vadd.xlane.f32.xlu0 %v5049_v14 }
 0xd56   :  { %v4886_v44 = vpop.xlane.xlu1 %4885  ;;  %v5052_v6 = vsel %vm66_vm0, %v11033_v41, 0.0 }
 0xd57   :  { %v11038_v32 = vpop.eup %8449  ;;  %8459 = vpow2.f32 %v4977_v20  ;;  %v4979_v63 = vmul.f32 1.442695, %v4917_v36  ;;  %v4918_v56 = vsub.f32 %v10895_v37, %v4886_v44  ;;  %5053 = vadd.xlane.f32.xlu1 %v5052_v6 }
 0xd58   :  { %v5055_v21 = vsel %vm66_vm0, %v11038_v32, 0.0 }
 0xd59   :  { %v11043_v52 = vpop.eup %8451  ;;  %8461 = vpow2.f32 %v4979_v63  ;;  %v4981_v34 = vmul.f32 1.442695, %v4918_v56  ;;  %5056 = vadd.xlane.f32.xlu0 %v5055_v21 }
 0xd5a   :  { %v5058_v24 = vsel %vm66_vm0, %v11043_v52, 0.0 }
 0xd5b   :  { %v11047_v25 = vpop.eup %8453  ;;  %8463 = vpow2.f32 %v4981_v34  ;;  %5059 = vadd.xlane.f32.xlu1 %v5058_v24 }
 0xd5c   :  { %v5061_v50 = vsel %vm66_vm0, %v11047_v25, 0.0 }
 0xd5d   :  { %v11051_v37 = vpop.eup %8455  ;;  %5062 = vadd.xlane.f32.xlu0 %v5061_v50 }
 0xd5e   :  { %v5064_v8 = vsel %vm66_vm0, %v11051_v37, 0.0 }
 0xd5f   :  { %v11055_v60 = vpop.eup %8457  ;;  %5065 = vadd.xlane.f32.xlu1 %v5064_v8 }
 0xd60   :  { %v5067_v10 = vsel %vm66_vm0, %v11055_v60, 0.0 }
 0xd61   :  { %v11059_v30 = vpop.eup %8459  ;;  %5068 = vadd.xlane.f32.xlu0 %v5067_v10 }
 0xd62   :  { %v5070_v12 = vsel %vm66_vm0, %v11059_v30, 0.0 }
 0xd63   :  { %v11063_v27 = vpop.eup %8461  ;;  %5071 = vadd.xlane.f32.xlu1 %v5070_v12 }
 0xd64   :  { %v5073_v19 = vsel %vm66_vm0, %v11063_v27, 0.0 }
 0xd65   :  { %v11067_v14 = vpop.eup %8463  ;;  %5074 = vadd.xlane.f32.xlu0 %v5073_v19 }
 0xd66   :  { %v5076_v20 = vsel %vm66_vm0, %v11067_v14, 0.0 }
 0xd67   :  { %5077 = vadd.xlane.f32.xlu1 %v5076_v20 }
 0xdb1   :  { %v4991_v36 = vpop.xlane.xlu0 %4990 }
 0xdb3   :  { %v4994_v44 = vpop.xlane.xlu1 %4993 }
 0xdb4   :  { %8465 = vrcp.f32 %v4994_v44 }
 0xdb5   :  { %v4985_v6 = vpop.xlane.xlu0 %4984 }
 0xdb6   :  { %8467 = vrcp.f32 %v4985_v6 }
 0xdb7   :  { %8469 = vrcp.f32 %v4991_v36  ;;  %v4988_v63 = vpop.xlane.xlu1 %4987 }
 0xdb8   :  { %8471 = vrcp.f32 %v4988_v63 }
 0xdb9   :  { %v5003_v56 = vpop.xlane.xlu0 %5002 }
 0xdbb   :  { %v5006_v21 = vpop.xlane.xlu1 %5005 }
 0xdbc   :  { %8473 = vrcp.f32 %v5006_v21 }
 0xdbd   :  { %v4997_v34 = vpop.xlane.xlu0 %4996 }
 0xdbe   :  { %8475 = vrcp.f32 %v4997_v34  ;;  %v8466_v24 = vpop.eup %8465 }
 0xdbf   :  { %8477 = vrcp.f32 %v5003_v56  ;;  %v5000_v50 = vpop.xlane.xlu1 %4999  ;;  %v5114_v20 = vmul.f32 %v8466_v24, %v10923_v17 }
 0xdc0   :  { %v8468_v8 = vpop.eup %8467  ;;  %8479 = vrcp.f32 %v5000_v50 }
 0xdc1   :  { %v8470_v10 = vpop.eup %8469  ;;  %v5015_v12 = vpop.xlane.xlu0 %5014  ;;  %v5111_v36 = vmul.f32 %v8468_v8, %v10928_v13 }
 0xdc2   :  { %v8472_v19 = vpop.eup %8471  ;;  %v5113_v63 = vmul.f32 %v8470_v10, %v10918_v3 }
 0xdc3   :  { %v5018_v44 = vpop.xlane.xlu1 %5017  ;;  %v5112_v6 = vmul.f32 %v8472_v19, %v10933_v33 }
 0xdc4   :  { %8481 = vrcp.f32 %v5018_v44  ;;  %v5144_v0 = vpack.c.bf16 %v5114_v20, %v5113_v63 }
 0xdc5   :  { %v5009_v21 = vpop.xlane.xlu0 %5008  ;;  %v5143_v34 = vpack.c.bf16 %v5112_v6, %v5111_v36 }
 0xdc6   :  { %8483 = vrcp.f32 %v5009_v21  ;;  %v8474_v56 = vpop.eup %8473 }
 0xdc7   :  { %8485 = vrcp.f32 %v5015_v12  ;;  %7909 = vmatprep.mubr.msk.bf16.mxu0 %vm66_vm0, %v5143_v34  ;;  %v5012_v50 = vpop.xlane.xlu1 %5011  ;;  %v5118_v33 = vmul.f32 %v8474_v56, %v10943_v9 }
 0xdc8   :  { %v8476_v47 = vpop.eup %8475  ;;  %8487 = vrcp.f32 %v5012_v50  ;;  %7910 = vmatmul.mubr.msk.bf16.vlgmr.msra.gmra.mrb[176].mxu0 %vm66_vm0, %v5144_v0 }
 0xdc9   :  { %v8478_v17 = vpop.eup %8477  ;;  %7934 = vmatpush3.bf16.msra.mxu0 %v10670_v48  ;;  %v5115_v24 = vmul.f32 %v8476_v47, %v10948_v26 }
 0xdca   :  { %v8480_v13 = vpop.eup %8479  ;;  %7935 = vmatprep.subr.bf16.mxu0 %v10666_v42  ;;  %v5021_v3 = vpop.xlane.xlu0 %5020  ;;  %v5117_v12 = vmul.f32 %v8478_v17, %v10938_v40 }
 0xdcb   :  { %8489 = vrcp.f32 %v5021_v3  ;;  %v5116_v8 = vmul.f32 %v8480_v13, %v10953_v39 }
 0xdcc   :  { %v5024_v10 = vpop.xlane.xlu1 %5023  ;;  %v5146_v48 = vpack.c.bf16 %v5118_v33, %v5117_v12 }
 0xdcd   :  { %7936 = vmatpush3.bf16.msra.mxu0 %v10666_v42  ;;  %8491 = vrcp.f32 %v5024_v10  ;;  %v5145_v0 = vpack.c.bf16 %v5116_v8, %v5115_v24 }
 0xdce   :  { %7937 = vmatprep.subr.bf16.mxu0 %v10690_v61  ;;  %v8482_v19 = vpop.eup %8481 }
 0xdcf   :  { %7913 = vmatprep.mubr.msk.bf16.mxu0 %vm66_vm0, %v5145_v0  ;;  %v5122_v26 = vmul.f32 %v8482_v19, %v10961_v53 }
 0xdd0   :  { %v8484_v20 = vpop.eup %8483  ;;  %7914 = vmatmul.mubr.msk.bf16.gmra.mrb[180].mxu0 %vm66_vm0, %v5146_v48 }
 0xdd1   :  { %v8486_v9 = vpop.eup %8485  ;;  %7938 = vmatpush3.bf16.msra.mxu0 %v10690_v61  ;;  %v5119_v42 = vmul.f32 %v8484_v20, %v10966_v22 }
 0xdd2   :  { %v8488_v47 = vpop.eup %8487  ;;  %v5039_v40 = vpop.xlane.xlu0 %5038  ;;  %7939 = vmatprep.subr.bf16.mxu0 %v10688_v15  ;;  %v5121_v44 = vmul.f32 %v8486_v9, %v10957_v43 }
 0xdd3   :  { %v5120_v39 = vmul.f32 %v8488_v47, %v10971_v62 }
 0xdd4   :  { %v5042_v36 = vpop.xlane.xlu1 %5041  ;;  %v5148_v21 = vpack.c.bf16 %v5122_v26, %v5121_v44 }
 0xdd5   :  { %v8490_v6 = vpop.eup %8489  ;;  %7940 = vmatpush3.bf16.msra.mxu0 %v10688_v15  ;;  %v5147_v63 = vpack.c.bf16 %v5120_v39, %v5119_v42  ;;  %8493 = vrcp.f32 %v5042_v36 }
 0xdd6   :  { %v5033_v61 = vpop.xlane.xlu0 %5032  ;;  %v5123_v22 = vmul.f32 %v8490_v6, %v10976_v49 }
 0xdd7   :  { %v8492_v34 = vpop.eup %8491  ;;  %8495 = vrcp.f32 %v5033_v61  ;;  %7925 = vmatprep.mubr.msk.bf16.mxu1 %vm66_vm0, %v5147_v63 }
 0xdd8   :  { %8497 = vrcp.f32 %v5039_v40  ;;  %v5036_v53 = vpop.xlane.xlu1 %5035  ;;  %7926 = vmatmul.mubr.msk.bf16.vlgmr.msra.gmra.mrb[176].mxu1 %vm66_vm0, %v5148_v21  ;;  %v5124_v43 = vmul.f32 %v8492_v34, %v10981_v46 }
 0xdd9   :  { %8499 = vrcp.f32 %v5036_v53  ;;  %7950 = vmatpush3.bf16.msra.mxu1 %v10709_v16 }
 0xdda   :  { %v5027_v15 = vpop.xlane.xlu0 %5026  ;;  %7951 = vmatprep.subr.bf16.mxu1 %v10707_v59  ;;  %v5149_v62 = vpack.c.bf16 %v5124_v43, %v5123_v22 }
 0xddb   :  { %8501 = vrcp.f32 %v5027_v15 }
 0xddc   :  { %v5030_v56 = vpop.xlane.xlu1 %5029  ;;  %7929 = vmatprep.mubr.msk.bf16.mxu1 %vm66_vm0, %v5149_v62 }
 0xddd   :  { %8503 = vrcp.f32 %v5030_v56  ;;  %7952 = vmatpush3.bf16.msra.mxu1 %v10707_v59 }
 0xdde   :  { %v5045_v50 = vpop.xlane.xlu0 %5044  ;;  %7953 = vmatprep.subr.bf16.mxu1 %v10729_v7 }
 0xddf   :  { %8505 = vrcp.f32 %v5045_v50  ;;  %v8494_v49 = vpop.eup %8493 }
 0xde0   :  { %v5048_v46 = vpop.xlane.xlu1 %5047  ;;  %v5130_v33 = vmul.f32 %v8494_v49, %v10993_v1 }
 0xde1   :  { %v8496_v17 = vpop.eup %8495  ;;  %8507 = vrcp.f32 %v5048_v46  ;;  %7954 = vmatpush3.bf16.msra.mxu1 %v10729_v7 }
 0xde2   :  { %v8498_v16 = vpop.eup %8497  ;;  %v5051_v13 = vpop.xlane.xlu0 %5050  ;;  %7955 = vmatprep.subr.bf16.mxu1 %v10727_v54  ;;  %v5127_v59 = vmul.f32 %v8496_v17, %v10998_v35 }
 0xde3   :  { %v8500_v3 = vpop.eup %8499  ;;  %8509 = vrcp.f32 %v5051_v13  ;;  %v5129_v12 = vmul.f32 %v8498_v16, %v10988_v5  ;;  %v8137_v13 = vld [vmem:[%s11607_s6 + $0x10] sm:$0xff]  }
 0xde4   :  { %v5054_v24 = vpop.xlane.xlu1 %5053  ;;  %v5128_v8 = vmul.f32 %v8500_v3, %v11003_v51  ;;  %7965 = vmatprep.subr.bf16.mxu0 %v8137_v13 }
 0xde5   :  { %v8502_v10 = vpop.eup %8501  ;;  %8511 = vrcp.f32 %v5054_v24  ;;  %7956 = vmatpush3.bf16.msra.mxu1 %v10727_v54  ;;  %v5152_v19 = vpack.c.bf16 %v5130_v33, %v5129_v12 }
 0xde6   :  { %v5057_v7 = vpop.xlane.xlu0 %5056  ;;  %v5151_v0 = vpack.c.bf16 %v5128_v8, %v5127_v59  ;;  %v5125_v20 = vmul.f32 %v8502_v10, %v11008_v45  ;;  %7975 = vmatprep.subr.bf16.mxu1 %v8137_v13 }
 0xde7   :  { %v8504_v48 = vpop.eup %8503  ;;  %8513 = vrcp.f32 %v5057_v7 }
 0xde8   :  { %7941 = vmatprep.mubr.msk.bf16.mxu0 %vm66_vm0, %v5151_v0  ;;  %v5060_v1 = vpop.xlane.xlu1 %5059  ;;  %v5126_v35 = vmul.f32 %v8504_v48, %v11013_v23 }
 0xde9   :  { %v8506_v9 = vpop.eup %8505  ;;  %8515 = vrcp.f32 %v5060_v1  ;;  %7942 = vmatmul.mubr.msk.bf16.vlgmr.msra.gmra.mrb[184].mxu0 %vm66_vm0, %v5152_v19 }
 0xdea   :  { %v5063_v5 = vpop.xlane.xlu0 %5062  ;;  %v5150_v51 = vpack.c.bf16 %v5126_v35, %v5125_v20  ;;  %v5131_v26 = vmul.f32 %v8506_v9, %v11018_v28  ;;  %7966 = vmatpush3.bf16.msra.mxu0 %v8137_v13 }
 0xdeb   :  { %v8508_v47 = vpop.eup %8507  ;;  %8517 = vrcp.f32 %v5063_v5 }
 0xdec   :  { %v5066_v54 = vpop.xlane.xlu1 %5065  ;;  %7930 = vmatmul.mubr.msk.bf16.gmra.mrb[180].mxu1 %vm66_vm0, %v5150_v51  ;;  %v5132_v40 = vmul.f32 %v8508_v47, %v11023_v38 }
 0xded   :  { %v8510_v42 = vpop.eup %8509  ;;  %8519 = vrcp.f32 %v5066_v54 }
 0xdee   :  { %v5069_v45 = vpop.xlane.xlu0 %5068  ;;  %v5153_v39 = vpack.c.bf16 %v5132_v40, %v5131_v26  ;;  %v5133_v36 = vmul.f32 %v8510_v42, %v11028_v29 }
 0xdef   :  { %v8512_v23 = vpop.eup %8511  ;;  %8521 = vrcp.f32 %v5069_v45 }
 0xdf0   :  { %7945 = vmatprep.mubr.msk.bf16.mxu0 %vm66_vm0, %v5153_v39  ;;  %v5072_v44 = vpop.xlane.xlu1 %5071  ;;  %v5134_v6 = vmul.f32 %v8512_v23, %v11033_v41 }
 0xdf1   :  { %v8514_v63 = vpop.eup %8513  ;;  %8523 = vrcp.f32 %v5072_v44 }
 0xdf2   :  { %v5075_v21 = vpop.xlane.xlu0 %5074  ;;  %v5154_v61 = vpack.c.bf16 %v5134_v6, %v5133_v36  ;;  %v5135_v34 = vmul.f32 %v8514_v63, %v11038_v32 }
 0xdf3   :  { %v8516_v28 = vpop.eup %8515  ;;  %8525 = vrcp.f32 %v5075_v21 }
 0xdf4   :  { %7946 = vmatmul.mubr.msk.bf16.gmra.mrb[188].mxu0 %vm66_vm0, %v5154_v61  ;;  %v5078_v38 = vpop.xlane.xlu1 %5077  ;;  %v5136_v53 = vmul.f32 %v8516_v28, %v11043_v52 }
 0xdf5   :  { %v8518_v22 = vpop.eup %8517  ;;  %8527 = vrcp.f32 %v5078_v38 }
 0xdf6   :  { %v5155_v43 = vpack.c.bf16 %v5136_v53, %v5135_v34  ;;  %v5137_v29 = vmul.f32 %v8518_v22, %v11047_v25 }
 0xdf7   :  { %v8520_v15 = vpop.eup %8519 }
 0xdf8   :  { %v5138_v41 = vmul.f32 %v8520_v15, %v11051_v37  ;;  %7957 = vmatprep.mubr.msk.bf16.mxu1 %vm66_vm0, %v5155_v43 }
 0xdf9   :  { %v8522_v62 = vpop.eup %8521 }
 0xdfa   :  { %v5156_v56 = vpack.c.bf16 %v5138_v41, %v5137_v29  ;;  %v5139_v49 = vmul.f32 %v8522_v62, %v11055_v60  ;;  %v8138_v60 = vld [vmem:[%s11607_s6 + $0x18] sm:$0xff]  }
 0xdfb   :  { %v8524_v50 = vpop.eup %8523  ;;  %7985 = vmatprep.subr.bf16.mxu0 %v8138_v60 }
 0xdfc   :  { %7958 = vmatmul.mubr.msk.bf16.vlgmr.msra.gmra.mrb[184].mxu1 %vm66_vm0, %v5156_v56  ;;  %v5140_v32 = vmul.f32 %v8524_v50, %v11059_v30 }
 0xdfd   :  { %v8526_v52 = vpop.eup %8525  ;;  %7976 = vmatpush3.bf16.msra.mxu1 %v8137_v13 }
 0xdfe   :  { %v5157_v46 = vpack.c.bf16 %v5140_v32, %v5139_v49  ;;  %v5141_v25 = vmul.f32 %v8526_v52, %v11063_v27  ;;  %7995 = vmatprep.subr.bf16.mxu1 %v8138_v60 }
 0xdff   :  { %v8528_v17 = vpop.eup %8527 }
 0xe00   :  { %7961 = vmatprep.mubr.msk.bf16.mxu1 %vm66_vm0, %v5157_v46  ;;  %v5142_v37 = vmul.f32 %v8528_v17, %v11067_v14 }
 0xe02   :  { %v5158_v16 = vpack.c.bf16 %v5142_v37, %v5141_v25 }
 0xe04   :  { %7962 = vmatmul.mubr.msk.bf16.gmra.mrb[188].mxu1 %vm66_vm0, %v5158_v16 }
 0xe9b   :  { %v7911_v30 = vpop.f32.mrb[176].mxu0 }
 0xe9c   :  { %v5205_v27 = vpop.f32.mrb[177].mxu0 }
 0xe9d   :  { %v7912_v14 = vpop.f32.mrb[178].mxu0 }
 0xe9e   :  { %v5473_v3 = vpack.c.bf16 %v7912_v14, %v7911_v30  ;;  %v5208_v33 = vpop.f32.mrb[179].mxu0 }
 0xe9f   :  { %v5472_v24 = vpack.c.bf16 %v5208_v33, %v5205_v27 }
 0xea1   :  { %7967 = vmatprep.mubr.msk.bf16.mxu0 %vm1174_vm1, %v5472_v24 }
 0xea2   :  { %7968 = vmatmul.mubr.msk.bf16.vlgmr.msra.gmra.mrb[192].mxu0 %vm1174_vm1, %v5473_v3 }
 0xea3   :  { %v7915_v59 = vpop.f32.mrb[180].mxu0  ;;  %7986 = vmatpush3.bf16.msra.mxu0 %v8138_v60 }
 0xea4   :  { %v5221_v8 = vpop.f32.mrb[181].mxu0 }
 0xea5   :  { %v7916_v10 = vpop.f32.mrb[182].mxu0 }
 0xea6   :  { %v5475_v12 = vpack.c.bf16 %v7916_v10, %v7915_v59  ;;  %v5224_v7 = vpop.f32.mrb[183].mxu0 }
 0xea7   :  { %v5474_v0 = vpack.c.bf16 %v5224_v7, %v5221_v8 }
 0xea9   :  { %7971 = vmatprep.mubr.msk.bf16.mxu0 %vm1174_vm1, %v5474_v0 }
 0xeaa   :  { %7972 = vmatmul.mubr.msk.bf16.gmra.mrb[196].mxu0 %vm1174_vm1, %v5475_v12 }
 0xeab   :  { %v7927_v48 = vpop.f32.mrb[176].mxu1 }
 0xeac   :  { %v5282_v19 = vpop.f32.mrb[177].mxu1 }
 0xead   :  { %v7928_v1 = vpop.f32.mrb[178].mxu1 }
 0xeae   :  { %v5477_v20 = vpack.c.bf16 %v7928_v1, %v7927_v48  ;;  %v5285_v35 = vpop.f32.mrb[179].mxu1 }
 0xeaf   :  { %v5476_v9 = vpack.c.bf16 %v5285_v35, %v5282_v19 }
 0xeb1   :  { %7977 = vmatprep.mubr.msk.bf16.mxu1 %vm1174_vm1, %v5476_v9 }
 0xeb2   :  { %7978 = vmatmul.mubr.msk.bf16.vlgmr.msra.gmra.mrb[192].mxu1 %vm1174_vm1, %v5477_v20 }
 0xeb3   :  { %7996 = vmatpush3.bf16.msra.mxu1 %v8138_v60 }
 0xebc   :  { %v7943_v5 = vpop.f32.mrb[184].mxu0 }
 0xebd   :  { %v5359_v51 = vpop.f32.mrb[185].mxu0 }
 0xebe   :  { %v7944_v47 = vpop.f32.mrb[186].mxu0 }
 0xebf   :  { %v5481_v54 = vpack.c.bf16 %v7944_v47, %v7943_v5  ;;  %v7931_v26 = vpop.f32.mrb[180].mxu1  ;;  %v5362_v40 = vpop.f32.mrb[187].mxu0  ;;  %v11173_v5 = vld [vmem:[%s11608_s7 + $0x1] ss:$0 sm:$0xff] }
 0xec0   :  { %v5480_v42 = vpack.c.bf16 %v5362_v40, %v5359_v51  ;;  %v5298_v45 = vpop.f32.mrb[181].mxu1 }
 0xec1   :  { %v7932_v39 = vpop.f32.mrb[182].mxu1 }
 0xec2   :  { %v5479_v23 = vpack.c.bf16 %v7932_v39, %v7931_v26  ;;  %v5301_v44 = vpop.f32.mrb[183].mxu1  ;;  %7987 = vmatprep.mubr.msk.bf16.mxu0 %vm1174_vm1, %v5480_v42 }
 0xec3   :  { %v5478_v36 = vpack.c.bf16 %v5301_v44, %v5298_v45  ;;  %7988 = vmatmul.mubr.msk.bf16.vlgmr.msra.gmra.mrb[200].mxu0 %vm1174_vm1, %v5481_v54 }
 0xec5   :  { %7981 = vmatprep.mubr.msk.bf16.mxu1 %vm1174_vm1, %v5478_v36 }
 0xec6   :  { %7982 = vmatmul.mubr.msk.bf16.gmra.mrb[196].mxu1 %vm1174_vm1, %v5479_v23 }
 0xec7   :  { %v7947_v6 = vpop.f32.mrb[188].mxu0 }
 0xec8   :  { %v5375_v63 = vpop.f32.mrb[189].mxu0 }
 0xec9   :  { %v7948_v21 = vpop.f32.mrb[190].mxu0 }
 0xeca   :  { %v5483_v61 = vpack.c.bf16 %v7948_v21, %v7947_v6  ;;  %v5378_v28 = vpop.f32.mrb[191].mxu0 }
 0xecb   :  { %v5482_v38 = vpack.c.bf16 %v5378_v28, %v5375_v63 }
 0xecd   :  { %7991 = vmatprep.mubr.msk.bf16.mxu0 %vm1174_vm1, %v5482_v38 }
 0xece   :  { %7992 = vmatmul.mubr.msk.bf16.gmra.mrb[204].mxu0 %vm1174_vm1, %v5483_v61 }
 0xecf   :  { %v7959_v34 = vpop.f32.mrb[184].mxu1 }
 0xed0   :  { %v5436_v53 = vpop.f32.mrb[185].mxu1 }
 0xed1   :  { %v7960_v22 = vpop.f32.mrb[186].mxu1 }
 0xed2   :  { %v5485_v43 = vpack.c.bf16 %v7960_v22, %v7959_v34  ;;  %v5439_v15 = vpop.f32.mrb[187].mxu1 }
 0xed3   :  { %v5484_v29 = vpack.c.bf16 %v5439_v15, %v5436_v53 }
 0xed5   :  { %7997 = vmatprep.mubr.msk.bf16.mxu1 %vm1174_vm1, %v5484_v29 }
 0xed6   :  { %7998 = vmatmul.mubr.msk.bf16.vlgmr.msra.gmra.mrb[200].mxu1 %vm1174_vm1, %v5485_v43 }
 0xed7   :  { %v7963_v41 = vpop.f32.mrb[188].mxu1 }
 0xed8   :  { %v5452_v62 = vpop.f32.mrb[189].mxu1 }
 0xed9   :  { %v7964_v56 = vpop.f32.mrb[190].mxu1 }
 0xeda   :  { %v5487_v50 = vpack.c.bf16 %v7964_v56, %v7963_v41  ;;  %v5455_v49 = vpop.f32.mrb[191].mxu1 }
 0xedb   :  { %v5486_v32 = vpack.c.bf16 %v5455_v49, %v5452_v62 }
 0xedd   :  { %8001 = vmatprep.mubr.msk.bf16.mxu1 %vm1174_vm1, %v5486_v32 }
 0xede   :  { %8002 = vmatmul.mubr.msk.bf16.gmra.mrb[204].mxu1 %vm1174_vm1, %v5487_v50 }
 0xf75   :  { %v7969_v52 = vpop.f32.mrb[192].mxu0 }
 0xf76   :  { %v5540_v46 = vpop.f32.mrb[193].mxu0  ;;  %v5814_v24 = vsel %vm66_vm0, %v7969_v52, 0.0 }
 0xf77   :  { %v7970_v17 = vpop.f32.mrb[194].mxu0  ;;  %v5808_v10 = vsel %vm66_vm0, %v5540_v46, 0.0 }
 0xf78   :  { %v5543_v25 = vpop.f32.mrb[195].mxu0  ;;  %v5817_v48 = vsel %vm66_vm0, %v7970_v17, 0.0 }
 0xf79   :  { %v5811_v9 = vsel %vm66_vm0, %v5543_v25, 0.0 }
 0xf7d   :  { %v7973_v37 = vpop.f32.mrb[196].mxu0 }
 0xf7e   :  { %v5556_v16 = vpop.f32.mrb[197].mxu0 }
 0xf7f   :  { %v7974_v13 = vpop.f32.mrb[198].mxu0  ;;  %v5820_v38 = vsel %vm66_vm0, %v5556_v16, 0.0 }
 0xf80   :  { %v5559_v60 = vpop.f32.mrb[199].mxu0  ;;  %v5829_v15 = vsel %vm66_vm0, %v7974_v13, 0.0 }
 0xf81   :  { %v5823_v56 = vsel %vm66_vm0, %v5559_v60, 0.0 }
 0xf85   :  { %v7979_v30 = vpop.f32.mrb[192].mxu1 }
 0xf86   :  { %v11155_v27 = vpop.f32.mrb[193].mxu1  ;;  %v5838_v13 = vsel %vm66_vm0, %v7979_v30, 0.0 }
 0xf87   :  { %v11157_v14 = vpop.f32.mrb[194].mxu1 }
 0xf88   :  { %v11159_v3 = vpop.f32.mrb[195].mxu1 }
 0xf96   :  { %v7989_v33 = vpop.f32.mrb[200].mxu0 }
 0xf97   :  { %v5815_v59 = vsel %vm66_vm0, %v7989_v33, 0.0  ;;  %v5700_v8 = vpop.f32.mrb[201].mxu0 }
 0xf98   :  { %v5816_v12 = vadd.f32 %v5815_v59, %v5814_v24  ;;  %v5809_v7 = vsel %vm66_vm0, %v5700_v8, 0.0  ;;  %v7990_v0 = vpop.f32.mrb[202].mxu0 }
 0xf99   :  { %v5810_v19 = vadd.f32 %v5809_v7, %v5808_v10  ;;  %v5818_v1 = vsel %vm66_vm0, %v7990_v0, 0.0  ;;  %v11167_v20 = vpop.f32.mrb[196].mxu1  ;;  %v5703_v35 = vpop.f32.mrb[203].mxu0 }
 0xf9a   :  { %v5819_v51 = vadd.f32 %v5818_v1, %v5817_v48  ;;  %v5812_v47 = vsel %vm66_vm0, %v5703_v35, 0.0  ;;  %v11176_v54 = vpop.f32.mrb[197].mxu1  ;;  %v5858_v26 = vadd.f32 %v5816_v12, %v10129_v2  ;;  %v11648_v35 = vld [vmem:[#allocation3_spill] sm:$0xff] }
 0xf9b   :  { %v5856_v40 = vadd.f32 %v5810_v19, %v10124_v55  ;;  %v5813_v42 = vadd.f32 %v5812_v47, %v5811_v9  ;;  %v11180_v45 = vpop.f32.mrb[198].mxu1 }
 0xf9c   :  { %v11182_v39 = vpop.f32.mrb[199].mxu1  ;;  %v5859_v44 = vadd.f32 %v5819_v51, %v10137_v4  ;;  %v11190_v6 = vadd.f32 %v11173_v5, %v5858_v26  ;;  %v5826_v4 = vsel %vm66_vm0, %v7973_v37, 0.0  ;;  %v11649_v51 = vld [vmem:[#allocation2_spill] sm:$0xff] }
 0xf9d   :  { %v11185_v23 = vadd.f32 %v11173_v5, %v5856_v40  ;;  %v5857_v36 = vadd.f32 %v5813_v42, %v10132_v31 }
 0xf9e   :  { %v11198_v2 = vadd.f32 %v11173_v5, %v5859_v44  ;;  %v5906_v43 = vsel %vm66_vm0, %v11190_v6, 0.0  ;;  %v11650_v44 = vld [vmem:[#allocation5_spill] sm:$0xff] }
 0xf9f   :  { %v11193_v63 = vadd.f32 %v11173_v5, %v5857_v36  ;;  %v5900_v55 = vsel %vm66_vm0, %v11185_v23, 0.0 }
 0xfa0   :  { %5901 = vadd.xlane.f32.xlu0 %v5900_v55  ;;  %v5909_v32 = vsel %vm66_vm0, %v11198_v2, 0.0  ;;  %v11651_v55 = vld [vmem:[#allocation4_spill] sm:$0xff] }
 0xfa1   :  { %v7993_v21 = vpop.f32.mrb[204].mxu0  ;;  %v5903_v61 = vsel %vm66_vm0, %v11193_v63, 0.0 }
 0xfa2   :  { %v5827_v31 = vsel %vm66_vm0, %v7993_v21, 0.0  ;;  %5904 = vadd.xlane.f32.xlu1 %v5903_v61  ;;  %v5716_v28 = vpop.f32.mrb[205].mxu0  ;;  %v5850_v61 = vsel %vm66_vm0, %v11167_v20, 0.0  ;;  %v5853_v20 = vsel %vm66_vm0, %v11180_v45, 0.0 }
 0xfa3   :  { %v5828_v34 = vadd.f32 %v5827_v31, %v5826_v4  ;;  %v5821_v53 = vsel %vm66_vm0, %v5716_v28, 0.0  ;;  %v7994_v22 = vpop.f32.mrb[206].mxu0 }
 0xfa4   :  { %v5822_v29 = vadd.f32 %v5821_v53, %v5820_v38  ;;  %v5830_v41 = vsel %vm66_vm0, %v7994_v22, 0.0  ;;  %5907 = vadd.xlane.f32.xlu0 %v5906_v43  ;;  %v5719_v62 = vpop.f32.mrb[207].mxu0  ;;  %v5844_v22 = vsel %vm66_vm0, %v11176_v54, 0.0  ;;  %v5847_v54 = vsel %vm66_vm0, %v11182_v39, 0.0 }
 0xfa5   :  { %v5831_v50 = vadd.f32 %v5830_v41, %v5829_v15  ;;  %v5824_v49 = vsel %vm66_vm0, %v5719_v62, 0.0  ;;  %v5862_v52 = vadd.f32 %v5828_v34, %v10153_v58 }
 0xfa6   :  { %v5860_v46 = vadd.f32 %v5822_v29, %v10148_v57  ;;  %v5825_v17 = vadd.f32 %v5824_v49, %v5823_v56  ;;  %5910 = vadd.xlane.f32.xlu1 %v5909_v32 }
 0xfa7   :  { %v5863_v37 = vadd.f32 %v5831_v50, %v10161_v18  ;;  %v11223_v33 = vadd.f32 %v11173_v5, %v5862_v52  ;;  %v5832_v18 = vsel %vm66_vm0, %v11155_v27, 0.0  ;;  %v5835_v27 = vsel %vm66_vm0, %v11159_v3, 0.0  ;;  %v11652_v52 = vld [vmem:[#allocation7_spill] sm:$0xff] }
 0xfa8   :  { %v11217_v25 = vadd.f32 %v11173_v5, %v5860_v46  ;;  %v5861_v16 = vadd.f32 %v5825_v17, %v10156_v11  ;;  %v5841_v11 = vsel %vm66_vm0, %v11157_v14, 0.0  ;;  %v11653_v17 = vld [vmem:[#allocation6_spill] sm:$0xff] }
 0xfa9   :  { %v7999_v60 = vpop.f32.mrb[200].mxu1  ;;  %v11237_v12 = vadd.f32 %v11173_v5, %v5863_v37  ;;  %v5918_v40 = vsel %vm66_vm0, %v11223_v33, 0.0 }
 0xfaa   :  { %v11226_v24 = vadd.f32 %v11173_v5, %v5861_v16  ;;  %v5839_v57 = vsel %vm66_vm0, %v7999_v60, 0.0  ;;  %v5777_v58 = vpop.f32.mrb[201].mxu1  ;;  %v5912_v59 = vsel %vm66_vm0, %v11217_v25, 0.0 }
 0xfab   :  { %v5840_v30 = vadd.f32 %v5839_v57, %v5838_v13  ;;  %v5833_v8 = vsel %vm66_vm0, %v5777_v58, 0.0  ;;  %5913 = vadd.xlane.f32.xlu0 %v5912_v59  ;;  %v8000_v10 = vpop.f32.mrb[202].mxu1  ;;  %v5921_v21 = vsel %vm66_vm0, %v11237_v12, 0.0  ;;  %v11654_v57 = vld [vmem:[#allocation9_spill] sm:$0xff]  ;;  %v11655_v59 = vld [vmem:[#allocation8_spill] sm:$0xff] }
 0xfac   :  { %v5834_v7 = vadd.f32 %v5833_v8, %v5832_v18  ;;  %v5842_v0 = vsel %vm66_vm0, %v8000_v10, 0.0  ;;  %v5780_v48 = vpop.f32.mrb[203].mxu1  ;;  %v5915_v19 = vsel %vm66_vm0, %v11226_v24, 0.0 }
 0xfad   :  { %v5843_v1 = vadd.f32 %v5842_v0, %v5841_v11  ;;  %v5836_v14 = vsel %vm66_vm0, %v5780_v48, 0.0  ;;  %5916 = vadd.xlane.f32.xlu1 %v5915_v19  ;;  %v5866_v9 = vadd.f32 %v5840_v30, %v11648_v35 }
 0xfae   :  { %v5864_v47 = vadd.f32 %v5834_v7, %v11649_v51  ;;  %v5837_v26 = vadd.f32 %v5836_v14, %v5835_v27 }
 0xfaf   :  { %5919 = vadd.xlane.f32.xlu0 %v5918_v40  ;;  %v5867_v36 = vadd.f32 %v5843_v1, %v11650_v44  ;;  %v11259_v31 = vadd.f32 %v11173_v5, %v5866_v9 }
 0xfb0   :  { %v11250_v42 = vadd.f32 %v11173_v5, %v5864_v47  ;;  %v5865_v3 = vadd.f32 %v5837_v26, %v11651_v55 }
 0xfb1   :  { %5922 = vadd.xlane.f32.xlu1 %v5921_v21  ;;  %v8003_v4 = vpop.f32.mrb[204].mxu1  ;;  %v11273_v41 = vadd.f32 %v11173_v5, %v5867_v36  ;;  %v5930_v13 = vsel %vm66_vm0, %v11259_v31, 0.0 }
 0xfb2   :  { %v11262_v28 = vadd.f32 %v11173_v5, %v5865_v3  ;;  %v5851_v38 = vsel %vm66_vm0, %v8003_v4, 0.0  ;;  %v5793_v34 = vpop.f32.mrb[205].mxu1  ;;  %v5924_v53 = vsel %vm66_vm0, %v11250_v42, 0.0 }
 0xfb3   :  { %v5852_v43 = vadd.f32 %v5851_v38, %v5850_v61  ;;  %v5845_v15 = vsel %vm66_vm0, %v5793_v34, 0.0  ;;  %5925 = vadd.xlane.f32.xlu0 %v5924_v53  ;;  %v8004_v29 = vpop.f32.mrb[206].mxu1  ;;  %v5933_v18 = vsel %vm66_vm0, %v11273_v41, 0.0 }
 0xfb4   :  { %v5846_v62 = vadd.f32 %v5845_v15, %v5844_v22  ;;  %v5854_v56 = vsel %vm66_vm0, %v8004_v29, 0.0  ;;  %v5796_v50 = vpop.f32.mrb[207].mxu1  ;;  %v5927_v49 = vsel %vm66_vm0, %v11262_v28, 0.0 }
 0xfb5   :  { %v5855_v32 = vadd.f32 %v5854_v56, %v5853_v20  ;;  %v5848_v45 = vsel %vm66_vm0, %v5796_v50, 0.0  ;;  %5928 = vadd.xlane.f32.xlu1 %v5927_v49  ;;  %v5870_v46 = vadd.f32 %v5852_v43, %v11652_v52 }
 0xfb6   :  { %v5868_v37 = vadd.f32 %v5846_v62, %v11653_v17  ;;  %v5849_v16 = vadd.f32 %v5848_v45, %v5847_v54 }
 0xfb7   :  { %5931 = vadd.xlane.f32.xlu0 %v5930_v13  ;;  %v5871_v58 = vadd.f32 %v5855_v32, %v11654_v57  ;;  %v11293_v11 = vadd.f32 %v11173_v5, %v5870_v46 }
 0xfb8   :  { %v11286_v60 = vadd.f32 %v11173_v5, %v5868_v37  ;;  %v5869_v39 = vadd.f32 %v5849_v16, %v11655_v59 }
 0xfb9   :  { %5934 = vadd.xlane.f32.xlu1 %v5933_v18  ;;  %v11301_v10 = vadd.f32 %v11173_v5, %v5871_v58  ;;  %v5942_v0 = vsel %vm66_vm0, %v11293_v11, 0.0 }
 0xfba   :  { %v11296_v30 = vadd.f32 %v11173_v5, %v5869_v39  ;;  %v5936_v8 = vsel %vm66_vm0, %v11286_v60, 0.0 }
 0xfbb   :  { %5937 = vadd.xlane.f32.xlu0 %v5936_v8  ;;  %v5945_v48 = vsel %vm66_vm0, %v11301_v10, 0.0 }
 0xfbc   :  { %v5939_v7 = vsel %vm66_vm0, %v11296_v30, 0.0 }
 0xfbd   :  { %5940 = vadd.xlane.f32.xlu1 %v5939_v7 }
 0xfbf   :  { %5943 = vadd.xlane.f32.xlu0 %v5942_v0 }
 0xfc1   :  { %5946 = vadd.xlane.f32.xlu1 %v5945_v48 }
0x102d   :  { %v5902_v19 = vpop.xlane.xlu0 %5901 }
0x102e   :  { %v5948_v27 = vmul.f32 0.015625, %v5902_v19 }
0x102f   :  { %v5905_v1 = vpop.xlane.xlu1 %5904 }
0x1030   :  { %v11310_v14 = vsub.f32 %v11185_v23, %v5948_v27  ;;  %v5949_v5 = vmul.f32 0.015625, %v5905_v1 }
0x1031   :  { %v5908_v35 = vpop.xlane.xlu0 %5907 }
0x1032   :  { %v11313_v9 = vsub.f32 %v11193_v63, %v5949_v5  ;;  %v5950_v51 = vmul.f32 0.015625, %v5908_v35  ;;  %v5980_v47 = vmul.f32 %v11310_v14, %v11310_v14 }
0x1033   :  { %v5911_v26 = vpop.xlane.xlu1 %5910 }
0x1034   :  { %v11318_v40 = vsub.f32 %v11190_v6, %v5950_v51  ;;  %v5951_v44 = vmul.f32 0.015625, %v5911_v26  ;;  %v5996_v36 = vsel %vm66_vm0, %v5980_v47, 0.0  ;;  %v5981_v55 = vmul.f32 %v11313_v9, %v11313_v9 }
0x1035   :  { %5997 = vadd.xlane.f32.xlu0 %v5996_v36 }
0x1036   :  { %v11324_v3 = vsub.f32 %v11198_v2, %v5951_v44  ;;  %v5999_v21 = vsel %vm66_vm0, %v5981_v55, 0.0  ;;  %v5982_v61 = vmul.f32 %v11318_v40, %v11318_v40 }
0x1037   :  { %6000 = vadd.xlane.f32.xlu1 %v5999_v21 }
0x1038   :  { %v5914_v4 = vpop.xlane.xlu0 %5913  ;;  %v6002_v38 = vsel %vm66_vm0, %v5982_v61, 0.0  ;;  %v5983_v34 = vmul.f32 %v11324_v3, %v11324_v3 }
0x1039   :  { %v5952_v53 = vmul.f32 0.015625, %v5914_v4  ;;  %6003 = vadd.xlane.f32.xlu0 %v6002_v38 }
0x103a   :  { %v5917_v22 = vpop.xlane.xlu1 %5916  ;;  %v6005_v20 = vsel %vm66_vm0, %v5983_v34, 0.0 }
0x103b   :  { %v11334_v43 = vsub.f32 %v11217_v25, %v5952_v53  ;;  %v5953_v15 = vmul.f32 0.015625, %v5917_v22  ;;  %6006 = vadd.xlane.f32.xlu1 %v6005_v20 }
0x103c   :  { %v5920_v29 = vpop.xlane.xlu0 %5919 }
0x103d   :  { %v11337_v62 = vsub.f32 %v11226_v24, %v5953_v15  ;;  %v5954_v56 = vmul.f32 0.015625, %v5920_v29  ;;  %v5984_v50 = vmul.f32 %v11334_v43, %v11334_v43 }
0x103e   :  { %v5923_v49 = vpop.xlane.xlu1 %5922 }
0x103f   :  { %v11342_v54 = vsub.f32 %v11223_v33, %v5954_v56  ;;  %v5955_v32 = vmul.f32 0.015625, %v5923_v49  ;;  %v6008_v45 = vsel %vm66_vm0, %v5984_v50, 0.0  ;;  %v5985_v52 = vmul.f32 %v11337_v62, %v11337_v62  ;;  %v8139_v50 = vld [vmem:[%s11609_s10 + $0x20] sm:$0xff]  }
0x1040   :  { %v5926_v46 = vpop.xlane.xlu0 %5925  ;;  %6009 = vadd.xlane.f32.xlu0 %v6008_v45  ;;  %8005 = vmatprep.subr.bf16.mxu0 %v8139_v50 }
0x1041   :  { %v11348_v17 = vsub.f32 %v11237_v12, %v5955_v32  ;;  %v5956_v37 = vmul.f32 0.015625, %v5926_v46  ;;  %v6011_v16 = vsel %vm66_vm0, %v5985_v52, 0.0  ;;  %v5986_v13 = vmul.f32 %v11342_v54, %v11342_v54  ;;  %8006 = vmatpush3.bf16.msra.mxu0 %v8139_v50  ;;  %v11421_v50 = vld [vmem:[%s11610_s8 + $0x1] ss:$0 sm:$0xff] }
0x1042   :  { %v5929_v57 = vpop.xlane.xlu1 %5928  ;;  %6012 = vadd.xlane.f32.xlu1 %v6011_v16 }
0x1043   :  { %v11354_v58 = vsub.f32 %v11250_v42, %v5956_v37  ;;  %v5957_v59 = vmul.f32 0.015625, %v5929_v57  ;;  %v6014_v39 = vsel %vm66_vm0, %v5986_v13, 0.0  ;;  %v5987_v18 = vmul.f32 %v11348_v17, %v11348_v17  ;;  %v8140_v13 = vld [vmem:[%s11609_s10 + $0x28] sm:$0xff]  }
0x1044   :  { %v5932_v8 = vpop.xlane.xlu0 %5931  ;;  %6015 = vadd.xlane.f32.xlu0 %v6014_v39  ;;  %8007 = vmatprep.subr.bf16.mxu0 %v8140_v13 }
0x1045   :  { %v11360_v7 = vsub.f32 %v11262_v28, %v5957_v59  ;;  %v5958_v0 = vmul.f32 0.015625, %v5932_v8  ;;  %v6017_v48 = vsel %vm66_vm0, %v5987_v18, 0.0  ;;  %v5988_v19 = vmul.f32 %v11354_v58, %v11354_v58  ;;  %8008 = vmatpush3.bf16.msra.mxu0 %v8140_v13  ;;  %v8141_v18 = vld [vmem:[%s11609_s10 + $0x30] sm:$0xff]   ;;  %v8142_v8 = vld [vmem:[%s11609_s10 + $0x38] sm:$0xff]  }
0x1046   :  { %v5935_v27 = vpop.xlane.xlu1 %5934  ;;  %6018 = vadd.xlane.f32.xlu1 %v6017_v48  ;;  %8009 = vmatprep.subr.bf16.mxu0 %v8141_v18 }
0x1047   :  { %v11366_v1 = vsub.f32 %v11259_v31, %v5958_v0  ;;  %v5959_v5 = vmul.f32 0.015625, %v5935_v27  ;;  %v6020_v35 = vsel %vm66_vm0, %v5988_v19, 0.0  ;;  %v5989_v51 = vmul.f32 %v11360_v7, %v11360_v7 }
0x1048   :  { %6021 = vadd.xlane.f32.xlu0 %v6020_v35  ;;  %v5938_v47 = vpop.xlane.xlu0 %5937 }
0x1049   :  { %v11372_v26 = vsub.f32 %v11273_v41, %v5959_v5  ;;  %v5960_v44 = vmul.f32 0.015625, %v5938_v47  ;;  %v6023_v36 = vsel %vm66_vm0, %v5989_v51, 0.0  ;;  %v5990_v55 = vmul.f32 %v11366_v1, %v11366_v1  ;;  %8010 = vmatpush3.bf16.msra.mxu0 %v8141_v18 }
0x104a   :  { %6024 = vadd.xlane.f32.xlu1 %v6023_v36  ;;  %v5941_v21 = vpop.xlane.xlu1 %5940  ;;  %8011 = vmatprep.subr.bf16.mxu0 %v8142_v8 }
0x104b   :  { %v11378_v61 = vsub.f32 %v11286_v60, %v5960_v44  ;;  %v5961_v4 = vmul.f32 0.015625, %v5941_v21  ;;  %v6026_v38 = vsel %vm66_vm0, %v5990_v55, 0.0  ;;  %v5991_v34 = vmul.f32 %v11372_v26, %v11372_v26 }
0x104c   :  { %6027 = vadd.xlane.f32.xlu0 %v6026_v38  ;;  %v5944_v53 = vpop.xlane.xlu0 %5943 }
0x104d   :  { %v11384_v22 = vsub.f32 %v11296_v30, %v5961_v4  ;;  %v5962_v20 = vmul.f32 0.015625, %v5944_v53  ;;  %v6029_v15 = vsel %vm66_vm0, %v5991_v34, 0.0  ;;  %v5992_v29 = vmul.f32 %v11378_v61, %v11378_v61  ;;  %8012 = vmatpush3.bf16.msra.mxu0 %v8142_v8 }
0x104e   :  { %6030 = vadd.xlane.f32.xlu1 %v6029_v15  ;;  %v5947_v56 = vpop.xlane.xlu1 %5946 }
0x104f   :  { %v11393_v49 = vsub.f32 %v11293_v11, %v5962_v20  ;;  %v5963_v32 = vmul.f32 0.015625, %v5947_v56  ;;  %v6032_v45 = vsel %vm66_vm0, %v5992_v29, 0.0  ;;  %v5993_v52 = vmul.f32 %v11384_v22, %v11384_v22 }
0x1050   :  { %6033 = vadd.xlane.f32.xlu0 %v6032_v45 }
0x1051   :  { %v11399_v46 = vsub.f32 %v11301_v10, %v5963_v32  ;;  %v6035_v37 = vsel %vm66_vm0, %v5993_v52, 0.0  ;;  %v5994_v16 = vmul.f32 %v11393_v49, %v11393_v49 }
0x1052   :  { %6036 = vadd.xlane.f32.xlu1 %v6035_v37 }
0x1053   :  { %v6038_v57 = vsel %vm66_vm0, %v5994_v16, 0.0  ;;  %v5995_v59 = vmul.f32 %v11399_v46, %v11399_v46 }
0x1054   :  { %6039 = vadd.xlane.f32.xlu0 %v6038_v57 }
0x1055   :  { %v6041_v39 = vsel %vm66_vm0, %v5995_v59, 0.0 }
0x1056   :  { %6042 = vadd.xlane.f32.xlu1 %v6041_v39 }
0x10c2   :  { %v5998_v0 = vpop.xlane.xlu0 %5997 }
0x10c3   :  { %v6044_v48 = vmul.f32 0.015625, %v5998_v0 }
0x10c4   :  { %v6001_v19 = vpop.xlane.xlu1 %6000 }
0x10c5   :  { %v6060_v27 = vadd.f32 1e-05, %v6044_v48  ;;  %v6045_v5 = vmul.f32 0.015625, %v6001_v19 }
0x10c6   :  { %v6004_v35 = vpop.xlane.xlu0 %6003 }
0x10c7   :  { %8529 = vrsqrt.f32 %v6060_v27  ;;  %v6061_v51 = vadd.f32 1e-05, %v6045_v5  ;;  %v6046_v47 = vmul.f32 0.015625, %v6004_v35 }
0x10c8   :  { %v6007_v44 = vpop.xlane.xlu1 %6006 }
0x10c9   :  { %8531 = vrsqrt.f32 %v6061_v51  ;;  %v6062_v36 = vadd.f32 1e-05, %v6046_v47  ;;  %v6047_v55 = vmul.f32 0.015625, %v6007_v44 }
0x10cb   :  { %8533 = vrsqrt.f32 %v6062_v36  ;;  %v6063_v21 = vadd.f32 1e-05, %v6047_v55 }
0x10cd   :  { %8535 = vrsqrt.f32 %v6063_v21  ;;  %v6010_v4 = vpop.xlane.xlu0 %6009 }
0x10ce   :  { %v6048_v38 = vmul.f32 0.015625, %v6010_v4 }
0x10cf   :  { %v6013_v34 = vpop.xlane.xlu1 %6012 }
0x10d0   :  { %v6064_v53 = vadd.f32 1e-05, %v6048_v38  ;;  %v6049_v20 = vmul.f32 0.015625, %v6013_v34 }
0x10d1   :  { %v8530_v15 = vpop.eup %8529  ;;  %v6016_v29 = vpop.xlane.xlu0 %6015 }
0x10d2   :  { %v6092_v56 = vmul.f32 %v8530_v15, %v11310_v14  ;;  %8537 = vrsqrt.f32 %v6064_v53  ;;  %v6065_v32 = vadd.f32 1e-05, %v6049_v20  ;;  %v6050_v45 = vmul.f32 0.015625, %v6016_v29  ;;  %v11428_v14 = vld [vmem:[%s11611_s9 + $0x1] ss:$0 sm:$0xff] }
0x10d3   :  { %v8532_v52 = vpop.eup %8531  ;;  %v6019_v37 = vpop.xlane.xlu1 %6018 }
0x10d4   :  { %v6093_v16 = vmul.f32 %v8532_v52, %v11313_v9  ;;  %8539 = vrsqrt.f32 %v6065_v32  ;;  %v6066_v13 = vadd.f32 1e-05, %v6050_v45  ;;  %v6051_v57 = vmul.f32 0.015625, %v6019_v37 }
0x10d5   :  { %v8534_v59 = vpop.eup %8533  ;;  %v6022_v39 = vpop.xlane.xlu0 %6021  ;;  %v6114_v18 = vmul.f32 %v11421_v50, %v6092_v56 }
0x10d6   :  { %v6094_v8 = vmul.f32 %v8534_v59, %v11318_v40  ;;  %8541 = vrsqrt.f32 %v6066_v13  ;;  %v6067_v0 = vadd.f32 1e-05, %v6051_v57  ;;  %v6052_v48 = vmul.f32 0.015625, %v6022_v39 }
0x10d7   :  { %v8536_v19 = vpop.eup %8535  ;;  %v6025_v27 = vpop.xlane.xlu1 %6024  ;;  %v6115_v9 = vmul.f32 %v11421_v50, %v6093_v16  ;;  %v6136_v36 = vadd.f32 %v11428_v14, %v6114_v18 }
0x10d8   :  { %v6116_v5 = vmul.f32 %v11421_v50, %v6094_v8  ;;  %v6095_v35 = vmul.f32 %v8536_v19, %v11324_v3  ;;  %8543 = vrsqrt.f32 %v6067_v0  ;;  %v6068_v51 = vadd.f32 1e-05, %v6052_v48 }
0x10d9   :  { %v6053_v47 = vmul.f32 0.015625, %v6025_v27  ;;  %v6028_v44 = vpop.xlane.xlu0 %6027  ;;  %v6137_v55 = vadd.f32 %v11428_v14, %v6115_v9 }
0x10da   :  { %v6117_v40 = vmul.f32 %v11421_v50, %v6095_v35  ;;  %8545 = vrsqrt.f32 %v6068_v51  ;;  %v6054_v21 = vmul.f32 0.015625, %v6028_v44  ;;  %v6138_v20 = vadd.f32 %v11428_v14, %v6116_v5 }
0x10db   :  { %v6069_v4 = vadd.f32 1e-05, %v6053_v47  ;;  %v6031_v38 = vpop.xlane.xlu1 %6030  ;;  %v6152_v34 = vpack.c.bf16 %v6137_v55, %v6136_v36 }
0x10dc   :  { %v8538_v53 = vpop.eup %8537  ;;  %v6139_v3 = vadd.f32 %v11428_v14, %v6117_v40  ;;  %v6070_v15 = vadd.f32 1e-05, %v6054_v21  ;;  %v6055_v29 = vmul.f32 0.015625, %v6031_v38 }
0x10dd   :  { %v6096_v56 = vmul.f32 %v8538_v53, %v11334_v43  ;;  %8547 = vrsqrt.f32 %v6069_v4  ;;  %8013 = vmatprep.mubr.msk.bf16.mxu0 %vm66_vm0, %v6152_v34  ;;  %v6034_v32 = vpop.xlane.xlu0 %6033 }
0x10de   :  { %v8540_v45 = vpop.eup %8539  ;;  %8549 = vrsqrt.f32 %v6070_v15  ;;  %v6071_v52 = vadd.f32 1e-05, %v6055_v29  ;;  %v6056_v37 = vmul.f32 0.015625, %v6034_v32  ;;  %v6153_v16 = vpack.c.bf16 %v6139_v3, %v6138_v20 }
0x10df   :  { %v6097_v13 = vmul.f32 %v8540_v45, %v11337_v62  ;;  %v6037_v57 = vpop.xlane.xlu1 %6036  ;;  %v6118_v59 = vmul.f32 %v11421_v50, %v6096_v56 }
0x10e0   :  { %v8542_v39 = vpop.eup %8541  ;;  %8551 = vrsqrt.f32 %v6071_v52  ;;  %v6072_v18 = vadd.f32 1e-05, %v6056_v37  ;;  %v6057_v8 = vmul.f32 0.015625, %v6037_v57  ;;  %8014 = vmatmul.mubr.msk.bf16.vlgmr.msra.gmra.mrb[208].mxu0 %vm66_vm0, %v6153_v16 }
0x10e1   :  { %v6098_v43 = vmul.f32 %v8542_v39, %v11342_v54  ;;  %v6040_v0 = vpop.xlane.xlu0 %6039  ;;  %v6119_v48 = vmul.f32 %v11421_v50, %v6097_v13  ;;  %v6140_v35 = vadd.f32 %v11428_v14, %v6118_v59 }
0x10e2   :  { %v8544_v19 = vpop.eup %8543  ;;  %8553 = vrsqrt.f32 %v6072_v18  ;;  %v6073_v27 = vadd.f32 1e-05, %v6057_v8  ;;  %v6058_v9 = vmul.f32 0.015625, %v6040_v0 }
0x10e3   :  { %v6099_v62 = vmul.f32 %v8544_v19, %v11348_v17  ;;  %v6043_v5 = vpop.xlane.xlu1 %6042  ;;  %v6141_v51 = vadd.f32 %v11428_v14, %v6119_v48  ;;  %v6120_v47 = vmul.f32 %v11421_v50, %v6098_v43 }
0x10e4   :  { %v8546_v44 = vpop.eup %8545  ;;  %8555 = vrsqrt.f32 %v6073_v27  ;;  %v6074_v36 = vadd.f32 1e-05, %v6058_v9  ;;  %v6059_v54 = vmul.f32 0.015625, %v6043_v5 }
0x10e5   :  { %v6100_v55 = vmul.f32 %v8546_v44, %v11354_v58  ;;  %v6154_v40 = vpack.c.bf16 %v6141_v51, %v6140_v35  ;;  %v6121_v21 = vmul.f32 %v11421_v50, %v6099_v62  ;;  %v6142_v17 = vadd.f32 %v11428_v14, %v6120_v47  ;;  %v8144_v47 = vld [vmem:[%s11612_s12 + $0x18] sm:$0xff]  }
0x10e6   :  { %8557 = vrsqrt.f32 %v6074_v36  ;;  %v6075_v4 = vadd.f32 1e-05, %v6059_v54 }
0x10e7   :  { %v8548_v38 = vpop.eup %8547  ;;  %8017 = vmatprep.mubr.msk.bf16.mxu0 %vm66_vm0, %v6154_v40  ;;  %v6143_v34 = vadd.f32 %v11428_v14, %v6121_v21  ;;  %v6122_v3 = vmul.f32 %v11421_v50, %v6100_v55 }
0x10e8   :  { %v8550_v53 = vpop.eup %8549  ;;  %v6101_v20 = vmul.f32 %v8548_v38, %v11360_v7  ;;  %8559 = vrsqrt.f32 %v6075_v4 }
0x10e9   :  { %v6102_v58 = vmul.f32 %v8550_v53, %v11366_v1  ;;  %v6155_v15 = vpack.c.bf16 %v6143_v34, %v6142_v17  ;;  %v6144_v37 = vadd.f32 %v11428_v14, %v6122_v3 }
0x10ea   :  { %v8552_v29 = vpop.eup %8551  ;;  %v6123_v56 = vmul.f32 %v11421_v50, %v6101_v20 }
0x10eb   :  { %v6103_v32 = vmul.f32 %v8552_v29, %v11372_v26  ;;  %8018 = vmatmul.mubr.msk.bf16.gmra.mrb[212].mxu0 %vm66_vm0, %v6155_v15  ;;  %v6124_v45 = vmul.f32 %v11421_v50, %v6102_v58 }
0x10ec   :  { %v8554_v52 = vpop.eup %8553  ;;  %v6145_v7 = vadd.f32 %v11428_v14, %v6123_v56 }
0x10ed   :  { %v6104_v16 = vmul.f32 %v8554_v52, %v11378_v61  ;;  %v6125_v13 = vmul.f32 %v11421_v50, %v6103_v32  ;;  %v6146_v39 = vadd.f32 %v11428_v14, %v6124_v45 }
0x10ee   :  { %v8556_v1 = vpop.eup %8555  ;;  %v6156_v57 = vpack.c.bf16 %v6145_v7, %v6144_v37 }
0x10ef   :  { %v6105_v59 = vmul.f32 %v8556_v1, %v11384_v22  ;;  %v6147_v26 = vadd.f32 %v11428_v14, %v6125_v13  ;;  %v6126_v18 = vmul.f32 %v11421_v50, %v6104_v16 }
0x10f0   :  { %v8558_v8 = vpop.eup %8557  ;;  %8021 = vmatprep.mubr.msk.bf16.mxu0 %vm66_vm0, %v6156_v57 }
0x10f1   :  { %v6106_v43 = vmul.f32 %v8558_v8, %v11393_v49  ;;  %v6157_v0 = vpack.c.bf16 %v6147_v26, %v6146_v39  ;;  %v6127_v61 = vmul.f32 %v11421_v50, %v6105_v59  ;;  %v6148_v22 = vadd.f32 %v11428_v14, %v6126_v18 }
0x10f2   :  { %v8560_v48 = vpop.eup %8559 }
0x10f3   :  { %v6107_v19 = vmul.f32 %v8560_v48, %v11399_v46  ;;  %8022 = vmatmul.mubr.msk.bf16.gmra.mrb[216].mxu0 %vm66_vm0, %v6157_v0  ;;  %v6149_v27 = vadd.f32 %v11428_v14, %v6127_v61  ;;  %v6128_v9 = vmul.f32 %v11421_v50, %v6106_v43  ;;  %v8143_v46 = vld [vmem:[%s11612_s12 + $0x10] sm:$0xff]  }
0x10f4   :  { %8029 = vmatprep.subr.bf16.mxu1 %v8143_v46 }
0x10f5   :  { %v6158_v62 = vpack.c.bf16 %v6149_v27, %v6148_v22  ;;  %v6129_v5 = vmul.f32 %v11421_v50, %v6107_v19  ;;  %v6150_v49 = vadd.f32 %v11428_v14, %v6128_v9  ;;  %8030 = vmatpush3.bf16.msra.mxu1 %v8143_v46  ;;  %v11492_v50 = vld [vmem:[%s11613_s11 + $0x1] ss:$0 sm:$0xff] }
0x10f6   :  { %8031 = vmatprep.subr.bf16.mxu1 %v8144_v47 }
0x10f7   :  { %8025 = vmatprep.mubr.msk.bf16.mxu0 %vm66_vm0, %v6158_v62  ;;  %v6151_v35 = vadd.f32 %v11428_v14, %v6129_v5 }
0x10f9   :  { %v6159_v51 = vpack.c.bf16 %v6151_v35, %v6150_v49  ;;  %8032 = vmatpush3.bf16.msra.mxu1 %v8144_v47 }
0x10fb   :  { %8026 = vmatmul.mubr.msk.bf16.gmra.mrb[220].mxu0 %vm66_vm0, %v6159_v51 }
0x11b3   :  { %v8015_v14 = vpop.f32.mrb[208].mxu0 }
0x11b4   :  { %v6268_v44 = vadd.f32 %v8015_v14, %v11492_v50  ;;  %v6259_v36 = vpop.f32.mrb[209].mxu0 }
0x11b5   :  { %v6260_v54 = vadd.f32 %v11492_v50, %v6259_v36  ;;  %v8016_v55 = vpop.f32.mrb[210].mxu0 }
0x11b6   :  { %v6340_v40 = vmul.f32 0.70710677, %v6268_v44  ;;  %v6271_v21 = vadd.f32 %v8016_v55, %v11492_v50  ;;  %v6262_v4 = vpop.f32.mrb[211].mxu0  ;;  %v6324_v18 = vmul.f32 0.5, %v6268_v44 }
0x11b7   :  { %v6338_v38 = vmul.f32 0.70710677, %v6260_v54  ;;  %v6263_v17 = vadd.f32 %v11492_v50, %v6262_v4  ;;  %v6322_v0 = vmul.f32 0.5, %v6260_v54 }
0x11b8   :  { %8561 = verf.f32 %v6340_v40  ;;  %v6341_v34 = vmul.f32 0.70710677, %v6271_v21  ;;  %v6325_v8 = vmul.f32 0.5, %v6271_v21 }
0x11b9   :  { %8563 = verf.f32 %v6338_v38  ;;  %v6339_v53 = vmul.f32 0.70710677, %v6263_v17  ;;  %v6323_v61 = vmul.f32 0.5, %v6263_v17 }
0x11ba   :  { %8565 = verf.f32 %v6341_v34 }
0x11bb   :  { %8567 = verf.f32 %v6339_v53 }
0x11be   :  { %v8019_v20 = vpop.f32.mrb[212].mxu0 }
0x11bf   :  { %v6284_v3 = vadd.f32 %v8019_v20, %v11492_v50  ;;  %v6275_v58 = vpop.f32.mrb[213].mxu0 }
0x11c0   :  { %v6276_v15 = vadd.f32 %v11492_v50, %v6275_v58  ;;  %v8020_v29 = vpop.f32.mrb[214].mxu0 }
0x11c1   :  { %v6344_v56 = vmul.f32 0.70710677, %v6284_v3  ;;  %v6287_v32 = vadd.f32 %v8020_v29, %v11492_v50  ;;  %v6278_v45 = vpop.f32.mrb[215].mxu0 }
0x11c2   :  { %v8562_v52 = vpop.eup %8561  ;;  %v6342_v37 = vmul.f32 0.70710677, %v6276_v15  ;;  %v6279_v7 = vadd.f32 %v11492_v50, %v6278_v45  ;;  %v6328_v45 = vmul.f32 0.5, %v6284_v3 }
0x11c3   :  { %v8564_v16 = vpop.eup %8563  ;;  %v6372_v13 = vadd.f32 1.0, %v8562_v52  ;;  %8569 = verf.f32 %v6344_v56  ;;  %v6345_v1 = vmul.f32 0.70710677, %v6287_v32  ;;  %v6329_v52 = vmul.f32 0.5, %v6287_v32 }
0x11c4   :  { %v8566_v57 = vpop.eup %8565  ;;  %v6370_v59 = vadd.f32 1.0, %v8564_v16  ;;  %8571 = verf.f32 %v6342_v37  ;;  %v6343_v39 = vmul.f32 0.70710677, %v6279_v7 }
0x11c5   :  { %v8568_v26 = vpop.eup %8567  ;;  %v6373_v43 = vadd.f32 1.0, %v8566_v57  ;;  %8573 = verf.f32 %v6345_v1  ;;  %v6388_v22 = vmul.f32 %v6372_v13, %v6324_v18  ;;  %v6326_v1 = vmul.f32 0.5, %v6276_v15 }
0x11c6   :  { %v6371_v48 = vadd.f32 1.0, %v8568_v26  ;;  %8575 = verf.f32 %v6343_v39  ;;  %v8023_v19 = vpop.f32.mrb[216].mxu0  ;;  %v6386_v5 = vmul.f32 %v6370_v59, %v6322_v0  ;;  %v6327_v57 = vmul.f32 0.5, %v6279_v7 }
0x11c7   :  { %v6389_v27 = vmul.f32 %v6373_v43, %v6325_v8  ;;  %v6300_v9 = vadd.f32 %v8023_v19, %v11492_v50  ;;  %v6291_v62 = vpop.f32.mrb[217].mxu0 }
0x11c8   :  { %v6387_v49 = vmul.f32 %v6371_v48, %v6323_v61  ;;  %v6292_v35 = vadd.f32 %v11492_v50, %v6291_v62  ;;  %v8024_v51 = vpop.f32.mrb[218].mxu0 }
0x11c9   :  { %v6403_v46 = vpack.c.bf16 %v6389_v27, %v6388_v22  ;;  %v6348_v47 = vmul.f32 0.70710677, %v6300_v9  ;;  %v6303_v14 = vadd.f32 %v8024_v51, %v11492_v50  ;;  %v6294_v44 = vpop.f32.mrb[219].mxu0 }
0x11ca   :  { %v6402_v36 = vpack.c.bf16 %v6387_v49, %v6386_v5  ;;  %v6346_v54 = vmul.f32 0.70710677, %v6292_v35  ;;  %v6295_v55 = vadd.f32 %v11492_v50, %v6294_v44 }
0x11cb   :  { %8577 = verf.f32 %v6348_v47  ;;  %v6349_v40 = vmul.f32 0.70710677, %v6303_v14  ;;  %v6333_v47 = vmul.f32 0.5, %v6303_v14 }
0x11cc   :  { %8579 = verf.f32 %v6346_v54  ;;  %v6347_v21 = vmul.f32 0.70710677, %v6295_v55  ;;  %8033 = vmatprep.mubr.msk.bf16.mxu1 %vm3161_vm2, %v6402_v36  ;;  %v6331_v36 = vmul.f32 0.5, %v6295_v55 }
0x11cd   :  { %v8570_v4 = vpop.eup %8569  ;;  %8581 = verf.f32 %v6349_v40  ;;  %8034 = vmatmul.mubr.msk.bf16.vlgmr.msra.gmra.mrb[208].mxu1 %vm3161_vm2, %v6403_v46  ;;  %v6332_v46 = vmul.f32 0.5, %v6300_v9 }
0x11ce   :  { %v8572_v38 = vpop.eup %8571  ;;  %v6376_v17 = vadd.f32 1.0, %v8570_v4  ;;  %8583 = verf.f32 %v6347_v21  ;;  %v8027_v34 = vpop.f32.mrb[220].mxu0 }
0x11cf   :  { %v8574_v53 = vpop.eup %8573  ;;  %v6374_v20 = vadd.f32 1.0, %v8572_v38  ;;  %v6316_v58 = vadd.f32 %v8027_v34, %v11492_v50  ;;  %v6307_v29 = vpop.f32.mrb[221].mxu0 }
0x11d0   :  { %v8576_v56 = vpop.eup %8575  ;;  %v6377_v37 = vadd.f32 1.0, %v8574_v53  ;;  %v6308_v16 = vadd.f32 %v11492_v50, %v6307_v29  ;;  %v8028_v13 = vpop.f32.mrb[222].mxu0  ;;  %v6392_v18 = vmul.f32 %v6376_v17, %v6328_v45 }
0x11d1   :  { %v6375_v59 = vadd.f32 1.0, %v8576_v56  ;;  %v6352_v39 = vmul.f32 0.70710677, %v6316_v58  ;;  %v6310_v26 = vpop.f32.mrb[223].mxu0  ;;  %v6319_v0 = vadd.f32 %v8028_v13, %v11492_v50  ;;  %v6390_v61 = vmul.f32 %v6374_v20, %v6326_v1 }
0x11d2   :  { %v6393_v8 = vmul.f32 %v6377_v37, %v6329_v52  ;;  %v6350_v43 = vmul.f32 0.70710677, %v6308_v16  ;;  %v6311_v3 = vadd.f32 %v11492_v50, %v6310_v26  ;;  %v6330_v50 = vmul.f32 0.5, %v6292_v35 }
0x11d3   :  { %v6391_v48 = vmul.f32 %v6375_v59, %v6327_v57  ;;  %8585 = verf.f32 %v6352_v39  ;;  %v6353_v19 = vmul.f32 0.70710677, %v6319_v0  ;;  %v6336_v45 = vmul.f32 0.5, %v6316_v58  ;;  %v6980_v58 = vld [vmem:[%s11614_s13 + $0x1] ss:$0 sm:$0xff] }
0x11d4   :  { %v6405_v32 = vpack.c.bf16 %v6393_v8, %v6392_v18  ;;  %8587 = verf.f32 %v6350_v43  ;;  %v6351_v15 = vmul.f32 0.70710677, %v6311_v3  ;;  %v6337_v35 = vmul.f32 0.5, %v6319_v0 }
0x11d5   :  { %v8578_v22 = vpop.eup %8577  ;;  %v6404_v27 = vpack.c.bf16 %v6391_v48, %v6390_v61  ;;  %8589 = verf.f32 %v6353_v19  ;;  %v6334_v52 = vmul.f32 0.5, %v6308_v16  ;;  %v6335_v37 = vmul.f32 0.5, %v6311_v3 }
0x11d6   :  { %v8580_v7 = vpop.eup %8579  ;;  %v6380_v62 = vadd.f32 1.0, %v8578_v22  ;;  %8591 = verf.f32 %v6351_v15 }
0x11d7   :  { %v8582_v5 = vpop.eup %8581  ;;  %v6378_v49 = vadd.f32 1.0, %v8580_v7  ;;  %8037 = vmatprep.mubr.msk.bf16.mxu1 %vm3161_vm2, %v6404_v27 }
0x11d8   :  { %v8584_v51 = vpop.eup %8583  ;;  %v6381_v44 = vadd.f32 1.0, %v8582_v5  ;;  %8038 = vmatmul.mubr.msk.bf16.gmra.mrb[212].mxu1 %vm3161_vm2, %v6405_v32  ;;  %v6396_v40 = vmul.f32 %v6380_v62, %v6332_v46 }
0x11d9   :  { %v6379_v54 = vadd.f32 1.0, %v8584_v51  ;;  %v6394_v4 = vmul.f32 %v6378_v49, %v6330_v50 }
0x11da   :  { %v6397_v21 = vmul.f32 %v6381_v44, %v6333_v47 }
0x11db   :  { %v6395_v38 = vmul.f32 %v6379_v54, %v6331_v36 }
0x11dc   :  { %v6407_v17 = vpack.c.bf16 %v6397_v21, %v6396_v40 }
0x11dd   :  { %v8586_v34 = vpop.eup %8585  ;;  %v6406_v53 = vpack.c.bf16 %v6395_v38, %v6394_v4 }
0x11de   :  { %v8588_v20 = vpop.eup %8587  ;;  %v6384_v29 = vadd.f32 1.0, %v8586_v34 }
0x11df   :  { %8041 = vmatprep.mubr.msk.bf16.mxu1 %vm3161_vm2, %v6406_v53  ;;  %v8590_v56 = vpop.eup %8589  ;;  %v6382_v9 = vadd.f32 1.0, %v8588_v20 }
0x11e0   :  { %8042 = vmatmul.mubr.msk.bf16.gmra.mrb[216].mxu1 %vm3161_vm2, %v6407_v17  ;;  %v8592_v14 = vpop.eup %8591  ;;  %v6385_v55 = vadd.f32 1.0, %v8590_v56  ;;  %v6400_v1 = vmul.f32 %v6384_v29, %v6336_v45 }
0x11e1   :  { %v6383_v13 = vadd.f32 1.0, %v8592_v14  ;;  %v6398_v59 = vmul.f32 %v6382_v9, %v6334_v52 }
0x11e2   :  { %v6401_v57 = vmul.f32 %v6385_v55, %v6337_v35 }
0x11e3   :  { %v6399_v39 = vmul.f32 %v6383_v13, %v6335_v37 }
0x11e4   :  { %v6409_v26 = vpack.c.bf16 %v6401_v57, %v6400_v1 }
0x11e5   :  { %v6408_v18 = vpack.c.bf16 %v6399_v39, %v6398_v59 }
0x11e7   :  { %8045 = vmatprep.mubr.msk.bf16.mxu1 %vm3161_vm2, %v6408_v18 }
0x11e8   :  { %8046 = vmatmul.mubr.msk.bf16.gmra.mrb[220].mxu1 %vm3161_vm2, %v6409_v26 }
0x12a0   :  { %v8035_v8 = vpop.f32.mrb[208].mxu1 }
0x12a1   :  { %v6550_v43 = vadd.f32 %v8035_v8, %v11190_v6  ;;  %v6485_v16 = vpop.f32.mrb[209].mxu1 }
0x12a2   :  { %v6548_v0 = vadd.f32 %v6485_v16, %v11185_v23  ;;  %v8036_v61 = vpop.f32.mrb[210].mxu1 }
0x12a3   :  { %v6574_v48 = vadd.f32 %v6980_v58, %v6550_v43  ;;  %v6551_v3 = vadd.f32 %v8036_v61, %v11198_v2  ;;  %v6488_v32 = vpop.f32.mrb[211].mxu1 }
0x12a4   :  { %v6572_v19 = vadd.f32 %v6980_v58, %v6548_v0  ;;  %v6549_v22 = vadd.f32 %v6488_v32, %v11193_v63 }
0x12a5   :  { %6590 = vst.msk [vmem:[%s11615_s14 + $0x10] sm:$0xff] %vm66_vm0, %v6574_v48  ;;  %v6575_v27 = vadd.f32 %v6980_v58, %v6551_v3 }
0x12a6   :  { %6588 = vst.msk [vmem:[%s11615_s14] sm:$0xff] %vm66_vm0, %v6572_v19  ;;  %v6573_v23 = vadd.f32 %v6980_v58, %v6549_v22 }
0x12a7   :  { %6591 = vst.msk [vmem:[%s11615_s14 + $0x18] sm:$0xff] %vm66_vm0, %v6575_v27 }
0x12a8   :  { %6589 = vst.msk [vmem:[%s11615_s14 + $0x8] sm:$0xff] %vm66_vm0, %v6573_v23 }
0x12ab   :  { %v8039_v6 = vpop.f32.mrb[212].mxu1 }
0x12ac   :  { %v6554_v63 = vadd.f32 %v8039_v6, %v11223_v33  ;;  %v6501_v2 = vpop.f32.mrb[213].mxu1 }
0x12ad   :  { %v6552_v15 = vadd.f32 %v6501_v2, %v11217_v25  ;;  %v8040_v7 = vpop.f32.mrb[214].mxu1 }
0x12ae   :  { %v6578_v62 = vadd.f32 %v6980_v58, %v6554_v63  ;;  %v6555_v5 = vadd.f32 %v8040_v7, %v11237_v12  ;;  %v6504_v49 = vpop.f32.mrb[215].mxu1 }
0x12af   :  { %v6576_v51 = vadd.f32 %v6980_v58, %v6552_v15  ;;  %v6553_v46 = vadd.f32 %v6504_v49, %v11226_v24 }
0x12b0   :  { %6594 = vst.msk [vmem:[%s11615_s14 + $0x30] sm:$0xff] %vm66_vm0, %v6578_v62  ;;  %v6579_v47 = vadd.f32 %v6980_v58, %v6555_v5 }
0x12b1   :  { %6592 = vst.msk [vmem:[%s11615_s14 + $0x20] sm:$0xff] %vm66_vm0, %v6576_v51  ;;  %v6577_v25 = vadd.f32 %v6980_v58, %v6553_v46 }
0x12b2   :  { %6595 = vst.msk [vmem:[%s11615_s14 + $0x38] sm:$0xff] %vm66_vm0, %v6579_v47 }
0x12b3   :  { %6593 = vst.msk [vmem:[%s11615_s14 + $0x28] sm:$0xff] %vm66_vm0, %v6577_v25  ;;  %v8043_v33 = vpop.f32.mrb[216].mxu1 }
0x12b4   :  { %v6558_v24 = vadd.f32 %v8043_v33, %v11259_v31  ;;  %v6517_v12 = vpop.f32.mrb[217].mxu1 }
0x12b5   :  { %v6556_v44 = vadd.f32 %v6517_v12, %v11250_v42  ;;  %v8044_v50 = vpop.f32.mrb[218].mxu1 }
0x12b6   :  { %v6582_v36 = vadd.f32 %v6980_v58, %v6558_v24  ;;  %v6559_v54 = vadd.f32 %v8044_v50, %v11273_v41  ;;  %v6520_v40 = vpop.f32.mrb[219].mxu1 }
0x12b7   :  { %v6580_v21 = vadd.f32 %v6980_v58, %v6556_v44  ;;  %v6557_v4 = vadd.f32 %v6520_v40, %v11262_v28 }
0x12b8   :  { %6598 = vst.msk [vmem:[%s11615_s14 + $0x50] sm:$0xff] %vm66_vm0, %v6582_v36  ;;  %v6583_v38 = vadd.f32 %v6980_v58, %v6559_v54 }
0x12b9   :  { %6596 = vst.msk [vmem:[%s11615_s14 + $0x40] sm:$0xff] %vm66_vm0, %v6580_v21  ;;  %v6581_v42 = vadd.f32 %v6980_v58, %v6557_v4 }
0x12ba   :  { %6599 = vst.msk [vmem:[%s11615_s14 + $0x58] sm:$0xff] %vm66_vm0, %v6583_v38 }
0x12bb   :  { %6597 = vst.msk [vmem:[%s11615_s14 + $0x48] sm:$0xff] %vm66_vm0, %v6581_v42  ;;  %v8047_v31 = vpop.f32.mrb[220].mxu1 }
0x12bc   :  { %v6562_v28 = vadd.f32 %v8047_v31, %v11293_v11  ;;  %v6533_v41 = vpop.f32.mrb[221].mxu1 }
0x12bd   :  { %v6560_v17 = vadd.f32 %v6533_v41, %v11286_v60  ;;  %v8048_v34 = vpop.f32.mrb[222].mxu1 }
0x12be   :  { %v6586_v53 = vadd.f32 %v6980_v58, %v6562_v28  ;;  %v6563_v20 = vadd.f32 %v8048_v34, %v11301_v10  ;;  %v6536_v29 = vpop.f32.mrb[223].mxu1 }
0x12bf   :  { %v6584_v56 = vadd.f32 %v6980_v58, %v6560_v17  ;;  %v6561_v9 = vadd.f32 %v6536_v29, %v11296_v30 }
0x12c0   :  { %6602 = vst.msk [vmem:[%s11615_s14 + $0x70] sm:$0xff] %vm66_vm0, %v6586_v53  ;;  %v6587_v14 = vadd.f32 %v6980_v58, %v6563_v20 }
0x12c1   :  { %6600 = vst.msk [vmem:[%s11615_s14 + $0x60] sm:$0xff] %vm66_vm0, %v6584_v56  ;;  %v6585_v60 = vadd.f32 %v6980_v58, %v6561_v9 }
0x12c2   :  { %6603 = vst.msk [vmem:[%s11615_s14 + $0x78] sm:$0xff] %vm66_vm0, %v6587_v14 }
0x12c3   :  { %6601 = vst.msk [vmem:[%s11615_s14 + $0x68] sm:$0xff] %vm66_vm0, %v6585_v60 }

</bundles_post_ra>
